<compile_context>
chip_gen: v7x
topology: tpu7x:2x2x1
jax: 0.10.0
libtpu: 0.0.40
codegen_flags: <defaults>
</compile_context>

<pallas_src>
import functools

import jax
import jax.numpy as jnp
from jax.experimental import pallas as pl
from jax.experimental.pallas import tpu as pltpu


def _round_up(v, m):
    return (v + m - 1) // m * m


def _pad_axis(v, before, after, axis):
    """Zero-pad a value along one axis via concatenation (static sizes)."""
    parts = []
    if before:
        shp = list(v.shape)
        shp[axis] = before
        parts.append(jnp.zeros(shp, v.dtype))
    parts.append(v)
    if after:
        shp = list(v.shape)
        shp[axis] = after
        parts.append(jnp.zeros(shp, v.dtype))
    if len(parts) == 1:
        return v
    return jnp.concatenate(parts, axis=axis)


# ----------------------------- Pallas kernel -------------------------------

def _up_doubleconv_kernel(x2_ref, x1_ref, w1a_ref, w1b_ref, s1_ref, b1_ref,
                          w2_ref, s2_ref, b2_ref, o_ref,
                          bufa_ref, bufb_ref, mid_ref,
                          *, H, W, WB, Hu, Wu, dy0, dx0):
    """Fused Upsample-pad-concat + DoubleConv for one batch element.

    Flat-row layout: spatial buffers are stored as (rows * WB, C) with row
    stride WB, so every 3x3 tap is a constant flat sublane offset.

    x2_ref:   (1, H, W, C2)   bf16 skip connection
    x1_ref:   (1, Hu, Wu, C1) bf16 already-upsampled low-res features
    w1a/w1b:  (9, C2, Cmid) / (9, C1, Cmid) bf16 conv1 weights split over the
              two channel groups of the concat (realizes the channel concat)
    s1/b1:    (1, Cmid) f32 folded BN1 scale / bias
    w2_ref:   (9, Cmid, Cout) bf16 conv2 weights
    s2/b2:    (1, Cout) f32 folded BN2 scale / bias
    o_ref:    (1, H, W, Cout) bf16 output
    bufa/bufb: ((H+4)*WB, C2/C1) bf16 conv1 input (real data at rows 2..H+2,
              cols 2..W+2 / x1 offset by (dy0, dx0); zeros elsewhere)
    mid_ref:  ((H+3)*WB, Cmid) bf16 conv1 output incl. conv2's zero ring
    """
    C2 = x2_ref.shape[-1]
    C1 = x1_ref.shape[-1]
    Cmid = w2_ref.shape[1]
    Cout = w2_ref.shape[2]
    M = H * WB                       # matmul M dim for both convs
    bf16 = jnp.bfloat16

    # --- assemble conv1 input (spatial placement + zero halo) in VMEM -------
    zrows_a = jnp.zeros((2 * WB, C2), bf16)
    bufa_ref[0:2 * WB, :] = zrows_a
    bufa_ref[(2 + H) * WB:(4 + H) * WB, :] = zrows_a
    x2v = _pad_axis(x2_ref[0], 2, WB - 2 - W, axis=1)            # (H, WB, C2)
    bufa_ref[2 * WB:(2 + H) * WB, :] = x2v.reshape(M, C2)

    zrows_b = jnp.zeros((2 * WB, C1), bf16)
    bufb_ref[0:2 * WB, :] = zrows_b
    bufb_ref[(2 + H) * WB:(4 + H) * WB, :] = zrows_b
    x1v = _pad_axis(x1_ref[0], 2 + dx0, WB - 2 - dx0 - Wu, axis=1)  # (Hu, WB, C1)
    x1v = _pad_axis(x1v, dy0, H - dy0 - Hu, axis=0)                 # (H, WB, C1)
    bufb_ref[2 * WB:(2 + H) * WB, :] = x1v.reshape(M, C1)

    # --- conv1: 9 accumulated matmuls (K split over the two channel groups) -
    acc1 = jnp.zeros((M, Cmid), jnp.float32)
    for t in range(9):
        ky, kx = t // 3, t % 3
        s = (ky + 1) * WB + kx
        acc1 = acc1 + jnp.dot(bufa_ref[s:s + M, :], w1a_ref[t],
                              preferred_element_type=jnp.float32)
        acc1 = acc1 + jnp.dot(bufb_ref[s:s + M, :], w1b_ref[t],
                              preferred_element_type=jnp.float32)
    y1 = jnp.maximum(acc1 * s1_ref[...] + b1_ref[...], 0.0)        # f32 epilogue

    # keep only the real image columns of each WB-wide row band; this zeroes
    # exactly conv2's left/right 'same' padding (plus the don't-care seams).
    col = jax.lax.broadcasted_iota(jnp.int32, (H, WB, 1), 1).reshape(M, 1)
    keep = jnp.logical_and(col >= 1, col <= W)
    y1 = jnp.where(keep, y1, 0.0).astype(bf16)

    mid_ref[0:WB, :] = jnp.zeros((WB, Cmid), bf16)                 # top zero ring
    mid_ref[WB:(H + 1) * WB, :] = y1
    mid_ref[(H + 1) * WB:(H + 3) * WB, :] = jnp.zeros((2 * WB, Cmid), bf16)

    # --- conv2: 9 accumulated matmuls over the VMEM intermediate ------------
    acc2 = jnp.zeros((M, Cout), jnp.float32)
    for t in range(9):
        ky, kx = t // 3, t % 3
        s = ky * WB + kx
        acc2 = acc2 + jnp.dot(mid_ref[s:s + M, :], w2_ref[t],
                              preferred_element_type=jnp.float32)
    y2 = jnp.maximum(acc2 * s2_ref[...] + b2_ref[...], 0.0)        # f32 epilogue
    y2 = y2.reshape(H, WB, Cout)[:, :W, :].astype(o_ref.dtype)
    o_ref[...] = y2.reshape(1, H, W, Cout)


def _fused_double_conv(x2_nhwc, x1u_nhwc, params, dy0, dx0):
    """DoubleConv on concat([x2, pad(x1_up)], channels) as one Pallas call.

    x2_nhwc:  (N, H, W, C2)   bf16
    x1u_nhwc: (N, Hu, Wu, C1) bf16 (already bilinearly upsampled)
    Returns unpadded NHWC bf16 (N, H, W, Cout) -- the chainable form.
    """
    N, H, W, C2 = x2_nhwc.shape
    _, Hu, Wu, C1 = x1u_nhwc.shape
    Cin = C2 + C1
    w1, w2 = params["w1"], params["w2"]                 # HWIO
    mid, cout = w1.shape[-1], w2.shape[-1]
    assert w1.shape == (3, 3, Cin, mid) and w2.shape == (3, 3, mid, cout)

    # Row stride; multiple of 16 so bf16 (16,128)-tiled reshapes stay free.
    WB = _round_up(W + 4, 16)
    M = H * WB

    w1a = w1[:, :, :C2, :].reshape(9, C2, mid).astype(jnp.bfloat16)
    w1b = w1[:, :, C2:, :].reshape(9, C1, mid).astype(jnp.bfloat16)
    w2m = w2.reshape(9, mid, cout).astype(jnp.bfloat16)
    s1 = params["scale1"].reshape(1, mid).astype(jnp.float32)
    b1 = params["bias1"].reshape(1, mid).astype(jnp.float32)
    s2 = params["scale2"].reshape(1, cout).astype(jnp.float32)
    b2 = params["bias2"].reshape(1, cout).astype(jnp.float32)

    kernel = functools.partial(_up_doubleconv_kernel, H=H, W=W, WB=WB,
                               Hu=Hu, Wu=Wu, dy0=dy0, dx0=dx0)

    flops = 2 * N * 9 * M * (Cin * mid + mid * cout)
    bytes_accessed = (N * (H * W * C2 + Hu * Wu * C1) * 2
                      + 9 * (Cin * mid + mid * cout) * 2
                      + 2 * (mid + cout) * 4
                      + N * H * W * cout * 2)

    # Explicit VMEM budget (scratch + double-buffered blocks + temporaries).
    scratch_bytes = ((H + 4) * WB * (C2 + C1) + (H + 3) * WB * mid) * 2
    block_bytes = 2 * (H * W * C2 * 2 + Hu * Wu * C1 * 2
                       + 9 * (C2 + C1) * mid * 2 + 9 * mid * cout * 2
                       + 2 * (mid + cout) * 4 + H * W * cout * 2)
    temp_bytes = M * (mid + cout) * 4 + 3 * M * max(C2, C1, mid, cout) * 2
    vmem_limit = int(min(64 * 1024 * 1024,
                         max(32 * 1024 * 1024,
                             2 * (scratch_bytes + block_bytes + temp_bytes))))

    out = pl.pallas_call(
        kernel,
        out_shape=jax.ShapeDtypeStruct((N, H, W, cout), jnp.bfloat16),
        grid=(N,),
        in_specs=[
            pl.BlockSpec((1, H, W, C2), lambda n: (n, 0, 0, 0)),
            pl.BlockSpec((1, Hu, Wu, C1), lambda n: (n, 0, 0, 0)),
            pl.BlockSpec((9, C2, mid), lambda n: (0, 0, 0)),
            pl.BlockSpec((9, C1, mid), lambda n: (0, 0, 0)),
            pl.BlockSpec((1, mid), lambda n: (0, 0)),
            pl.BlockSpec((1, mid), lambda n: (0, 0)),
            pl.BlockSpec((9, mid, cout), lambda n: (0, 0, 0)),
            pl.BlockSpec((1, cout), lambda n: (0, 0)),
            pl.BlockSpec((1, cout), lambda n: (0, 0)),
        ],
        out_specs=pl.BlockSpec((1, H, W, cout), lambda n: (n, 0, 0, 0)),
        scratch_shapes=[
            pltpu.VMEM(((H + 4) * WB, C2), jnp.bfloat16),
            pltpu.VMEM(((H + 4) * WB, C1), jnp.bfloat16),
            pltpu.VMEM(((H + 3) * WB, mid), jnp.bfloat16),
        ],
        compiler_params=pltpu.CompilerParams(
            dimension_semantics=("parallel",),
            vmem_limit_bytes=vmem_limit),
        cost_estimate=pl.CostEstimate(flops=flops, transcendentals=0,
                                      bytes_accessed=bytes_accessed),
    )(x2_nhwc, x1u_nhwc, w1a, w1b, s1, b1, w2m, s2, b2)
    return out


# ------------------------------- JAX glue ----------------------------------

def _interp_matrix_align_corners(out_size, in_size):
    """(out, in) linear interpolation matrix, align_corners=True."""
    if out_size == 1:
        return jnp.zeros((1, in_size), jnp.float32).at[0, 0].set(1.0)
    pos = jnp.arange(out_size, dtype=jnp.float32) * ((in_size - 1) / (out_size - 1))
    idx = jnp.arange(in_size, dtype=jnp.float32)
    return jnp.maximum(0.0, 1.0 - jnp.abs(pos[:, None] - idx[None, :]))


def bilinear_upsample_x2_align_corners(x_nhwc):
    """nn.Upsample(scale_factor=2, mode='bilinear', align_corners=True),
    gather-free via two interpolation-matrix contractions (default precision)."""
    N, H, W, C = x_nhwc.shape
    mh = _interp_matrix_align_corners(2 * H, H)
    mw = _interp_matrix_align_corners(2 * W, W)
    y = jnp.einsum("oh,nhwc->nowc", mh, x_nhwc)
    return jnp.einsum("pw,nowc->nopc", mw, y)


def up_forward(params, x1_nchw, x2_nchw):
    """Equivalent of Up.forward(x1, x2) (bilinear=True). NCHW in / NCHW out."""
    x1 = jnp.transpose(x1_nchw, (0, 2, 3, 1)).astype(jnp.float32)   # -> NHWC
    x2 = jnp.transpose(x2_nchw, (0, 2, 3, 1)).astype(jnp.bfloat16)  # -> NHWC bf16
    x1u = bilinear_upsample_x2_align_corners(x1).astype(jnp.bfloat16)
    diff_y = x2.shape[1] - x1u.shape[1]
    diff_x = x2.shape[2] - x1u.shape[2]
    y = _fused_double_conv(x2, x1u, params, diff_y // 2, diff_x // 2)
    # NCHW boundary for the PyTorch-facing interface; a chained Pallas layer
    # would consume the NHWC bf16 result of _fused_double_conv directly.
    return jnp.transpose(y, (0, 3, 1, 2)).astype(jnp.float32)


def init_up_params(key, in_channels, out_channels):
    """Deterministic synthetic parameters for Up(in_channels, out_channels, bilinear=True)."""
    mid = in_channels // 2
    eps = 1e-5
    k1, k2, k3, k4, k5, k6 = jax.random.split(key, 6)
    # Conv weights stored HWIO (PyTorch OIHW (out,in,3,3) transposed to (3,3,in,out)).
    w1 = 0.1 * jax.random.normal(k1, (3, 3, in_channels, mid), jnp.float32)
    w2 = 0.1 * jax.random.normal(k2, (3, 3, mid, out_channels), jnp.float32)
    # BatchNorm (eval mode); running_mean=0, running_var=1 (PyTorch defaults).
    g1 = 1.0 + 0.1 * jax.random.normal(k3, (mid,), jnp.float32)
    b1 = 0.1 * jax.random.normal(k4, (mid,), jnp.float32)
    g2 = 1.0 + 0.1 * jax.random.normal(k5, (out_channels,), jnp.float32)
    b2 = 0.1 * jax.random.normal(k6, (out_channels,), jnp.float32)
    m1 = jnp.zeros((mid,), jnp.float32)
    v1 = jnp.ones((mid,), jnp.float32)
    m2 = jnp.zeros((out_channels,), jnp.float32)
    v2 = jnp.ones((out_channels,), jnp.float32)
    scale1 = g1 / jnp.sqrt(v1 + eps)
    bias1 = b1 - m1 * scale1
    scale2 = g2 / jnp.sqrt(v2 + eps)
    bias2 = b2 - m2 * scale2
    return {"w1": w1, "scale1": scale1, "bias1": bias1,
            "w2": w2, "scale2": scale2, "bias2": bias2}


# ------------------------------ reference ----------------------------------

def _upsample_ref(x_nhwc):
    """Gather-based bilinear x2 upsample (align_corners=True), for checking."""
    N, H, W, C = x_nhwc.shape
    Ho, Wo = 2 * H, 2 * W

    def axis_coords(out_size, in_size):
        if in_size == 1 or out_size == 1:
            lo = jnp.zeros((out_size,), jnp.int32)
            return lo, lo, jnp.zeros((out_size,), jnp.float32)
        pos = (jnp.arange(out_size, dtype=jnp.float32)
               * (in_size - 1) / (out_size - 1))
        lo = jnp.floor(pos).astype(jnp.int32)
        hi = jnp.minimum(lo + 1, in_size - 1)
        return lo, hi, pos - lo.astype(jnp.float32)

    y0, y1, fy = axis_coords(Ho, H)
    x0, x1, fx = axis_coords(Wo, W)

    def lerp_w(rows):
        a = rows[:, :, x0]
        b = rows[:, :, x1]
        return a + (b - a) * fx[None, None, :, None]

    top = lerp_w(x_nhwc[:, y0])
    bot = lerp_w(x_nhwc[:, y1])
    return top + (bot - top) * fy[None, :, None, None]


def _ref_conv_bn_relu(x_nhwc, w_hwio, scale, bias):
    y = jax.lax.conv_general_dilated(
        x_nhwc, w_hwio, window_strides=(1, 1), padding="SAME",
        dimension_numbers=("NHWC", "HWIO", "NHWC"))
    return jnp.maximum(y * scale[None, None, None, :] + bias[None, None, None, :], 0.0)


def up_forward_ref(params, x1_nchw, x2_nchw):
    x1 = jnp.transpose(x1_nchw, (0, 2, 3, 1))
    x2 = jnp.transpose(x2_nchw, (0, 2, 3, 1))
    x1 = _upsample_ref(x1)
    diff_y = x2.shape[1] - x1.shape[1]
    diff_x = x2.shape[2] - x1.shape[2]
    x1 = jnp.pad(x1, ((0, 0),
                      (diff_y // 2, diff_y - diff_y // 2),
                      (diff_x // 2, diff_x - diff_x // 2),
                      (0, 0)))
    x = jnp.concatenate([x2, x1], axis=-1)
    x = _ref_conv_bn_relu(x, params["w1"], params["scale1"], params["bias1"])
    x = _ref_conv_bn_relu(x, params["w2"], params["scale2"], params["bias2"])
    return jnp.transpose(x, (0, 3, 1, 2))


# --------------------------------- main -------------------------------------

if __name__ == "__main__":
    key = jax.random.PRNGKey(0)
    kx1, kx2, kp = jax.random.split(key, 3)

    in_channels, out_channels = 8, 4
    # x1: low-res feature map (N, in_channels//2, 8, 8)
    # x2: skip connection     (N, in_channels//2, 16, 16)
    x1 = jax.random.normal(kx1, (2, in_channels // 2, 8, 8), jnp.float32)
    x2 = jax.random.normal(kx2, (2, in_channels // 2, 16, 16), jnp.float32)

    params = init_up_params(kp, in_channels, out_channels)

    up_jit = jax.jit(up_forward)
    out = jax.block_until_ready(up_jit(params, x1, x2))
    assert out.shape == (2, out_channels, 16, 16), out.shape

    ref = jax.block_until_ready(up_forward_ref(params, x1, x2))
    # bf16 matmul operands / bf16 output (f32 accumulation + f32 BN/ReLU
    # epilogue) => relaxed tolerance against the all-f32 reference.
    assert jnp.allclose(out, ref, atol=5e-2, rtol=5e-2), \
        float(jnp.max(jnp.abs(out - ref)))

    print("KERNEL_OK")
</pallas_src>

<mosaic_0001>
module attributes {stable_mosaic.version = 11 : i64} {
  func.func @_up_doubleconv_kernel(%arg0: i32, %arg1: memref<1x16x16x4xbf16, #tpu.memory_space<vmem>>, %arg2: memref<1x16x16x4xbf16, #tpu.memory_space<vmem>>, %arg3: memref<9x4x4xbf16, #tpu.memory_space<vmem>>, %arg4: memref<9x4x4xbf16, #tpu.memory_space<vmem>>, %arg5: memref<1x4xf32, #tpu.memory_space<vmem>>, %arg6: memref<1x4xf32, #tpu.memory_space<vmem>>, %arg7: memref<9x4x4xbf16, #tpu.memory_space<vmem>>, %arg8: memref<1x4xf32, #tpu.memory_space<vmem>>, %arg9: memref<1x4xf32, #tpu.memory_space<vmem>>, %arg10: memref<1x16x16x4xbf16, #tpu.memory_space<vmem>>, %arg11: memref<640x4xbf16, #tpu.memory_space<vmem>>, %arg12: memref<640x4xbf16, #tpu.memory_space<vmem>>, %arg13: memref<608x4xbf16, #tpu.memory_space<vmem>>) attributes {dimension_semantics = [#tpu.dimension_semantics<parallel>], iteration_bounds = array<i64: 2>, scalar_prefetch = 0 : i64, scratch_operands = 3 : i64, tpu.core_type = #tpu.core_type<tc>, window_params = [{transform_indices = @transform_0, window_bounds = array<i64: 1, 16, 16, 4>}, {transform_indices = @transform_1, window_bounds = array<i64: 1, 16, 16, 4>}, {pipeline_mode = #tpu.pipeline_mode<synchronous>, transform_indices = @transform_2, window_bounds = array<i64: 9, 4, 4>}, {pipeline_mode = #tpu.pipeline_mode<synchronous>, transform_indices = @transform_3, window_bounds = array<i64: 9, 4, 4>}, {pipeline_mode = #tpu.pipeline_mode<synchronous>, transform_indices = @transform_4, window_bounds = array<i64: 1, 4>}, {pipeline_mode = #tpu.pipeline_mode<synchronous>, transform_indices = @transform_5, window_bounds = array<i64: 1, 4>}, {pipeline_mode = #tpu.pipeline_mode<synchronous>, transform_indices = @transform_6, window_bounds = array<i64: 9, 4, 4>}, {pipeline_mode = #tpu.pipeline_mode<synchronous>, transform_indices = @transform_7, window_bounds = array<i64: 1, 4>}, {pipeline_mode = #tpu.pipeline_mode<synchronous>, transform_indices = @transform_8, window_bounds = array<i64: 1, 4>}, {transform_indices = @transform_9, window_bounds = array<i64: 1, 16, 16, 4>}]} {
    %cst = arith.constant 0.000000e+00 : bf16
    %0 = vector.broadcast %cst : bf16 to vector<64x4xbf16>
    %c0 = arith.constant 0 : index
    %c0_0 = arith.constant 0 : index
    %1 = vector.load %arg11[%c0, %c0_0] : memref<640x4xbf16, #tpu.memory_space<vmem>>, vector<64x4xbf16>
    tpu.vector_store %arg11[%c0, %c0_0], %0 {strides = array<i32>} : memref<640x4xbf16, #tpu.memory_space<vmem>>, vector<64x4xbf16>,
    %c576 = arith.constant 576 : index
    %c0_1 = arith.constant 0 : index
    %2 = vector.load %arg11[%c576, %c0_1] : memref<640x4xbf16, #tpu.memory_space<vmem>>, vector<64x4xbf16>
    tpu.vector_store %arg11[%c576, %c0_1], %0 {strides = array<i32>} : memref<640x4xbf16, #tpu.memory_space<vmem>>, vector<64x4xbf16>,
    %c0_2 = arith.constant 0 : index
    %c0_3 = arith.constant 0 : index
    %c0_4 = arith.constant 0 : index
    %c0_5 = arith.constant 0 : index
    %3 = vector.load %arg1[%c0_2, %c0_3, %c0_4, %c0_5] : memref<1x16x16x4xbf16, #tpu.memory_space<vmem>>, vector<1x16x16x4xbf16>
    %4 = vector.shape_cast %3 : vector<1x16x16x4xbf16> to vector<16x16x4xbf16>
    %cst_6 = arith.constant 0.000000e+00 : bf16
    %5 = vector.broadcast %cst_6 : bf16 to vector<16x2x4xbf16>
    %cst_7 = arith.constant 0.000000e+00 : bf16
    %6 = vector.broadcast %cst_7 : bf16 to vector<16x14x4xbf16>
    %7 = tpu.concatenate %5, %4, %6 in 1 : vector<16x2x4xbf16>, vector<16x16x4xbf16>, vector<16x14x4xbf16> -> vector<16x32x4xbf16>
    %8 = vector.shape_cast %7 : vector<16x32x4xbf16> to vector<512x4xbf16>
    %c64 = arith.constant 64 : index
    %c0_8 = arith.constant 0 : index
    %9 = vector.load %arg11[%c64, %c0_8] : memref<640x4xbf16, #tpu.memory_space<vmem>>, vector<512x4xbf16>
    tpu.vector_store %arg11[%c64, %c0_8], %8 {strides = array<i32>} : memref<640x4xbf16, #tpu.memory_space<vmem>>, vector<512x4xbf16>,
    %cst_9 = arith.constant 0.000000e+00 : bf16
    %10 = vector.broadcast %cst_9 : bf16 to vector<64x4xbf16>
    %c0_10 = arith.constant 0 : index
    %c0_11 = arith.constant 0 : index
    %11 = vector.load %arg12[%c0_10, %c0_11] : memref<640x4xbf16, #tpu.memory_space<vmem>>, vector<64x4xbf16>
    tpu.vector_store %arg12[%c0_10, %c0_11], %10 {strides = array<i32>} : memref<640x4xbf16, #tpu.memory_space<vmem>>, vector<64x4xbf16>,
    %c576_12 = arith.constant 576 : index
    %c0_13 = arith.constant 0 : index
    %12 = vector.load %arg12[%c576_12, %c0_13] : memref<640x4xbf16, #tpu.memory_space<vmem>>, vector<64x4xbf16>
    tpu.vector_store %arg12[%c576_12, %c0_13], %10 {strides = array<i32>} : memref<640x4xbf16, #tpu.memory_space<vmem>>, vector<64x4xbf16>,
    %c0_14 = arith.constant 0 : index
    %c0_15 = arith.constant 0 : index
    %c0_16 = arith.constant 0 : index
    %c0_17 = arith.constant 0 : index
    %13 = vector.load %arg2[%c0_14, %c0_15, %c0_16, %c0_17] : memref<1x16x16x4xbf16, #tpu.memory_space<vmem>>, vector<1x16x16x4xbf16>
    %14 = vector.shape_cast %13 : vector<1x16x16x4xbf16> to vector<16x16x4xbf16>
    %cst_18 = arith.constant 0.000000e+00 : bf16
    %15 = vector.broadcast %cst_18 : bf16 to vector<16x2x4xbf16>
    %cst_19 = arith.constant 0.000000e+00 : bf16
    %16 = vector.broadcast %cst_19 : bf16 to vector<16x14x4xbf16>
    %17 = tpu.concatenate %15, %14, %16 in 1 : vector<16x2x4xbf16>, vector<16x16x4xbf16>, vector<16x14x4xbf16> -> vector<16x32x4xbf16>
    %18 = vector.shape_cast %17 : vector<16x32x4xbf16> to vector<512x4xbf16>
    %c64_20 = arith.constant 64 : index
    %c0_21 = arith.constant 0 : index
    %19 = vector.load %arg12[%c64_20, %c0_21] : memref<640x4xbf16, #tpu.memory_space<vmem>>, vector<512x4xbf16>
    tpu.vector_store %arg12[%c64_20, %c0_21], %18 {strides = array<i32>} : memref<640x4xbf16, #tpu.memory_space<vmem>>, vector<512x4xbf16>,
    %cst_22 = arith.constant 0.000000e+00 : f32
    %20 = vector.broadcast %cst_22 : f32 to vector<512x4xf32>
    %c32 = arith.constant 32 : index
    %c0_23 = arith.constant 0 : index
    %21 = vector.load %arg11[%c32, %c0_23] : memref<640x4xbf16, #tpu.memory_space<vmem>>, vector<512x4xbf16>
    %c0_24 = arith.constant 0 : index
    %c0_25 = arith.constant 0 : index
    %c0_26 = arith.constant 0 : index
    %22 = vector.load %arg3[%c0_24, %c0_25, %c0_26] : memref<9x4x4xbf16, #tpu.memory_space<vmem>>, vector<1x4x4xbf16>
    %23 = vector.shape_cast %22 : vector<1x4x4xbf16> to vector<4x4xbf16>
    %cst_27 = arith.constant dense<0.000000e+00> : vector<512x4xf32>
    %24 = tpu.matmul %21, %23, %cst_27 {dimension_numbers = #tpu.dot_dimension_numbers<[1], [0], [0], [1], [0, 0, 1, 1], [], []>} : vector<512x4xbf16>, vector<4x4xbf16>, vector<512x4xf32> -> vector<512x4xf32>
    %25 = arith.addf %20, %24 : vector<512x4xf32>
    %c32_28 = arith.constant 32 : index
    %c0_29 = arith.constant 0 : index
    %26 = vector.load %arg12[%c32_28, %c0_29] : memref<640x4xbf16, #tpu.memory_space<vmem>>, vector<512x4xbf16>
    %c0_30 = arith.constant 0 : index
    %c0_31 = arith.constant 0 : index
    %c0_32 = arith.constant 0 : index
    %27 = vector.load %arg4[%c0_30, %c0_31, %c0_32] : memref<9x4x4xbf16, #tpu.memory_space<vmem>>, vector<1x4x4xbf16>
    %28 = vector.shape_cast %27 : vector<1x4x4xbf16> to vector<4x4xbf16>
    %cst_33 = arith.constant dense<0.000000e+00> : vector<512x4xf32>
    %29 = tpu.matmul %26, %28, %cst_33 {dimension_numbers = #tpu.dot_dimension_numbers<[1], [0], [0], [1], [0, 0, 1, 1], [], []>} : vector<512x4xbf16>, vector<4x4xbf16>, vector<512x4xf32> -> vector<512x4xf32>
    %30 = arith.addf %25, %29 : vector<512x4xf32>
    %c33 = arith.constant 33 : index
    %c0_34 = arith.constant 0 : index
    %31 = vector.load %arg11[%c33, %c0_34] : memref<640x4xbf16, #tpu.memory_space<vmem>>, vector<512x4xbf16>
    %c1 = arith.constant 1 : index
    %c0_35 = arith.constant 0 : index
    %c0_36 = arith.constant 0 : index
    %32 = vector.load %arg3[%c1, %c0_35, %c0_36] : memref<9x4x4xbf16, #tpu.memory_space<vmem>>, vector<1x4x4xbf16>
    %33 = vector.shape_cast %32 : vector<1x4x4xbf16> to vector<4x4xbf16>
    %cst_37 = arith.constant dense<0.000000e+00> : vector<512x4xf32>
    %34 = tpu.matmul %31, %33, %cst_37 {dimension_numbers = #tpu.dot_dimension_numbers<[1], [0], [0], [1], [0, 0, 1, 1], [], []>} : vector<512x4xbf16>, vector<4x4xbf16>, vector<512x4xf32> -> vector<512x4xf32>
    %35 = arith.addf %30, %34 : vector<512x4xf32>
    %c33_38 = arith.constant 33 : index
    %c0_39 = arith.constant 0 : index
    %36 = vector.load %arg12[%c33_38, %c0_39] : memref<640x4xbf16, #tpu.memory_space<vmem>>, vector<512x4xbf16>
    %c1_40 = arith.constant 1 : index
    %c0_41 = arith.constant 0 : index
    %c0_42 = arith.constant 0 : index
    %37 = vector.load %arg4[%c1_40, %c0_41, %c0_42] : memref<9x4x4xbf16, #tpu.memory_space<vmem>>, vector<1x4x4xbf16>
    %38 = vector.shape_cast %37 : vector<1x4x4xbf16> to vector<4x4xbf16>
    %cst_43 = arith.constant dense<0.000000e+00> : vector<512x4xf32>
    %39 = tpu.matmul %36, %38, %cst_43 {dimension_numbers = #tpu.dot_dimension_numbers<[1], [0], [0], [1], [0, 0, 1, 1], [], []>} : vector<512x4xbf16>, vector<4x4xbf16>, vector<512x4xf32> -> vector<512x4xf32>
    %40 = arith.addf %35, %39 : vector<512x4xf32>
    %c34 = arith.constant 34 : index
    %c0_44 = arith.constant 0 : index
    %41 = vector.load %arg11[%c34, %c0_44] : memref<640x4xbf16, #tpu.memory_space<vmem>>, vector<512x4xbf16>
    %c2 = arith.constant 2 : index
    %c0_45 = arith.constant 0 : index
    %c0_46 = arith.constant 0 : index
    %42 = vector.load %arg3[%c2, %c0_45, %c0_46] : memref<9x4x4xbf16, #tpu.memory_space<vmem>>, vector<1x4x4xbf16>
    %43 = vector.shape_cast %42 : vector<1x4x4xbf16> to vector<4x4xbf16>
    %cst_47 = arith.constant dense<0.000000e+00> : vector<512x4xf32>
    %44 = tpu.matmul %41, %43, %cst_47 {dimension_numbers = #tpu.dot_dimension_numbers<[1], [0], [0], [1], [0, 0, 1, 1], [], []>} : vector<512x4xbf16>, vector<4x4xbf16>, vector<512x4xf32> -> vector<512x4xf32>
    %45 = arith.addf %40, %44 : vector<512x4xf32>
    %c34_48 = arith.constant 34 : index
    %c0_49 = arith.constant 0 : index
    %46 = vector.load %arg12[%c34_48, %c0_49] : memref<640x4xbf16, #tpu.memory_space<vmem>>, vector<512x4xbf16>
    %c2_50 = arith.constant 2 : index
    %c0_51 = arith.constant 0 : index
    %c0_52 = arith.constant 0 : index
    %47 = vector.load %arg4[%c2_50, %c0_51, %c0_52] : memref<9x4x4xbf16, #tpu.memory_space<vmem>>, vector<1x4x4xbf16>
    %48 = vector.shape_cast %47 : vector<1x4x4xbf16> to vector<4x4xbf16>
    %cst_53 = arith.constant dense<0.000000e+00> : vector<512x4xf32>
    %49 = tpu.matmul %46, %48, %cst_53 {dimension_numbers = #tpu.dot_dimension_numbers<[1], [0], [0], [1], [0, 0, 1, 1], [], []>} : vector<512x4xbf16>, vector<4x4xbf16>, vector<512x4xf32> -> vector<512x4xf32>
    %50 = arith.addf %45, %49 : vector<512x4xf32>
    %c64_54 = arith.constant 64 : index
    %c0_55 = arith.constant 0 : index
    %51 = vector.load %arg11[%c64_54, %c0_55] : memref<640x4xbf16, #tpu.memory_space<vmem>>, vector<512x4xbf16>
    %c3 = arith.constant 3 : index
    %c0_56 = arith.constant 0 : index
    %c0_57 = arith.constant 0 : index
    %52 = vector.load %arg3[%c3, %c0_56, %c0_57] : memref<9x4x4xbf16, #tpu.memory_space<vmem>>, vector<1x4x4xbf16>
    %53 = vector.shape_cast %52 : vector<1x4x4xbf16> to vector<4x4xbf16>
    %cst_58 = arith.constant dense<0.000000e+00> : vector<512x4xf32>
    %54 = tpu.matmul %51, %53, %cst_58 {dimension_numbers = #tpu.dot_dimension_numbers<[1], [0], [0], [1], [0, 0, 1, 1], [], []>} : vector<512x4xbf16>, vector<4x4xbf16>, vector<512x4xf32> -> vector<512x4xf32>
    %55 = arith.addf %50, %54 : vector<512x4xf32>
    %c64_59 = arith.constant 64 : index
    %c0_60 = arith.constant 0 : index
    %56 = vector.load %arg12[%c64_59, %c0_60] : memref<640x4xbf16, #tpu.memory_space<vmem>>, vector<512x4xbf16>
    %c3_61 = arith.constant 3 : index
    %c0_62 = arith.constant 0 : index
    %c0_63 = arith.constant 0 : index
    %57 = vector.load %arg4[%c3_61, %c0_62, %c0_63] : memref<9x4x4xbf16, #tpu.memory_space<vmem>>, vector<1x4x4xbf16>
    %58 = vector.shape_cast %57 : vector<1x4x4xbf16> to vector<4x4xbf16>
    %cst_64 = arith.constant dense<0.000000e+00> : vector<512x4xf32>
    %59 = tpu.matmul %56, %58, %cst_64 {dimension_numbers = #tpu.dot_dimension_numbers<[1], [0], [0], [1], [0, 0, 1, 1], [], []>} : vector<512x4xbf16>, vector<4x4xbf16>, vector<512x4xf32> -> vector<512x4xf32>
    %60 = arith.addf %55, %59 : vector<512x4xf32>
    %c65 = arith.constant 65 : index
    %c0_65 = arith.constant 0 : index
    %61 = vector.load %arg11[%c65, %c0_65] : memref<640x4xbf16, #tpu.memory_space<vmem>>, vector<512x4xbf16>
    %c4 = arith.constant 4 : index
    %c0_66 = arith.constant 0 : index
    %c0_67 = arith.constant 0 : index
    %62 = vector.load %arg3[%c4, %c0_66, %c0_67] : memref<9x4x4xbf16, #tpu.memory_space<vmem>>, vector<1x4x4xbf16>
    %63 = vector.shape_cast %62 : vector<1x4x4xbf16> to vector<4x4xbf16>
    %cst_68 = arith.constant dense<0.000000e+00> : vector<512x4xf32>
    %64 = tpu.matmul %61, %63, %cst_68 {dimension_numbers = #tpu.dot_dimension_numbers<[1], [0], [0], [1], [0, 0, 1, 1], [], []>} : vector<512x4xbf16>, vector<4x4xbf16>, vector<512x4xf32> -> vector<512x4xf32>
    %65 = arith.addf %60, %64 : vector<512x4xf32>
    %c65_69 = arith.constant 65 : index
    %c0_70 = arith.constant 0 : index
    %66 = vector.load %arg12[%c65_69, %c0_70] : memref<640x4xbf16, #tpu.memory_space<vmem>>, vector<512x4xbf16>
    %c4_71 = arith.constant 4 : index
    %c0_72 = arith.constant 0 : index
    %c0_73 = arith.constant 0 : index
    %67 = vector.load %arg4[%c4_71, %c0_72, %c0_73] : memref<9x4x4xbf16, #tpu.memory_space<vmem>>, vector<1x4x4xbf16>
    %68 = vector.shape_cast %67 : vector<1x4x4xbf16> to vector<4x4xbf16>
    %cst_74 = arith.constant dense<0.000000e+00> : vector<512x4xf32>
    %69 = tpu.matmul %66, %68, %cst_74 {dimension_numbers = #tpu.dot_dimension_numbers<[1], [0], [0], [1], [0, 0, 1, 1], [], []>} : vector<512x4xbf16>, vector<4x4xbf16>, vector<512x4xf32> -> vector<512x4xf32>
    %70 = arith.addf %65, %69 : vector<512x4xf32>
    %c66 = arith.constant 66 : index
    %c0_75 = arith.constant 0 : index
    %71 = vector.load %arg11[%c66, %c0_75] : memref<640x4xbf16, #tpu.memory_space<vmem>>, vector<512x4xbf16>
    %c5 = arith.constant 5 : index
    %c0_76 = arith.constant 0 : index
    %c0_77 = arith.constant 0 : index
    %72 = vector.load %arg3[%c5, %c0_76, %c0_77] : memref<9x4x4xbf16, #tpu.memory_space<vmem>>, vector<1x4x4xbf16>
    %73 = vector.shape_cast %72 : vector<1x4x4xbf16> to vector<4x4xbf16>
    %cst_78 = arith.constant dense<0.000000e+00> : vector<512x4xf32>
    %74 = tpu.matmul %71, %73, %cst_78 {dimension_numbers = #tpu.dot_dimension_numbers<[1], [0], [0], [1], [0, 0, 1, 1], [], []>} : vector<512x4xbf16>, vector<4x4xbf16>, vector<512x4xf32> -> vector<512x4xf32>
    %75 = arith.addf %70, %74 : vector<512x4xf32>
    %c66_79 = arith.constant 66 : index
    %c0_80 = arith.constant 0 : index
    %76 = vector.load %arg12[%c66_79, %c0_80] : memref<640x4xbf16, #tpu.memory_space<vmem>>, vector<512x4xbf16>
    %c5_81 = arith.constant 5 : index
    %c0_82 = arith.constant 0 : index
    %c0_83 = arith.constant 0 : index
    %77 = vector.load %arg4[%c5_81, %c0_82, %c0_83] : memref<9x4x4xbf16, #tpu.memory_space<vmem>>, vector<1x4x4xbf16>
    %78 = vector.shape_cast %77 : vector<1x4x4xbf16> to vector<4x4xbf16>
    %cst_84 = arith.constant dense<0.000000e+00> : vector<512x4xf32>
    %79 = tpu.matmul %76, %78, %cst_84 {dimension_numbers = #tpu.dot_dimension_numbers<[1], [0], [0], [1], [0, 0, 1, 1], [], []>} : vector<512x4xbf16>, vector<4x4xbf16>, vector<512x4xf32> -> vector<512x4xf32>
    %80 = arith.addf %75, %79 : vector<512x4xf32>
    %c96 = arith.constant 96 : index
    %c0_85 = arith.constant 0 : index
    %81 = vector.load %arg11[%c96, %c0_85] : memref<640x4xbf16, #tpu.memory_space<vmem>>, vector<512x4xbf16>
    %c6 = arith.constant 6 : index
    %c0_86 = arith.constant 0 : index
    %c0_87 = arith.constant 0 : index
    %82 = vector.load %arg3[%c6, %c0_86, %c0_87] : memref<9x4x4xbf16, #tpu.memory_space<vmem>>, vector<1x4x4xbf16>
    %83 = vector.shape_cast %82 : vector<1x4x4xbf16> to vector<4x4xbf16>
    %cst_88 = arith.constant dense<0.000000e+00> : vector<512x4xf32>
    %84 = tpu.matmul %81, %83, %cst_88 {dimension_numbers = #tpu.dot_dimension_numbers<[1], [0], [0], [1], [0, 0, 1, 1], [], []>} : vector<512x4xbf16>, vector<4x4xbf16>, vector<512x4xf32> -> vector<512x4xf32>
    %85 = arith.addf %80, %84 : vector<512x4xf32>
    %c96_89 = arith.constant 96 : index
    %c0_90 = arith.constant 0 : index
    %86 = vector.load %arg12[%c96_89, %c0_90] : memref<640x4xbf16, #tpu.memory_space<vmem>>, vector<512x4xbf16>
    %c6_91 = arith.constant 6 : index
    %c0_92 = arith.constant 0 : index
    %c0_93 = arith.constant 0 : index
    %87 = vector.load %arg4[%c6_91, %c0_92, %c0_93] : memref<9x4x4xbf16, #tpu.memory_space<vmem>>, vector<1x4x4xbf16>
    %88 = vector.shape_cast %87 : vector<1x4x4xbf16> to vector<4x4xbf16>
    %cst_94 = arith.constant dense<0.000000e+00> : vector<512x4xf32>
    %89 = tpu.matmul %86, %88, %cst_94 {dimension_numbers = #tpu.dot_dimension_numbers<[1], [0], [0], [1], [0, 0, 1, 1], [], []>} : vector<512x4xbf16>, vector<4x4xbf16>, vector<512x4xf32> -> vector<512x4xf32>
    %90 = arith.addf %85, %89 : vector<512x4xf32>
    %c97 = arith.constant 97 : index
    %c0_95 = arith.constant 0 : index
    %91 = vector.load %arg11[%c97, %c0_95] : memref<640x4xbf16, #tpu.memory_space<vmem>>, vector<512x4xbf16>
    %c7 = arith.constant 7 : index
    %c0_96 = arith.constant 0 : index
    %c0_97 = arith.constant 0 : index
    %92 = vector.load %arg3[%c7, %c0_96, %c0_97] : memref<9x4x4xbf16, #tpu.memory_space<vmem>>, vector<1x4x4xbf16>
    %93 = vector.shape_cast %92 : vector<1x4x4xbf16> to vector<4x4xbf16>
    %cst_98 = arith.constant dense<0.000000e+00> : vector<512x4xf32>
    %94 = tpu.matmul %91, %93, %cst_98 {dimension_numbers = #tpu.dot_dimension_numbers<[1], [0], [0], [1], [0, 0, 1, 1], [], []>} : vector<512x4xbf16>, vector<4x4xbf16>, vector<512x4xf32> -> vector<512x4xf32>
    %95 = arith.addf %90, %94 : vector<512x4xf32>
    %c97_99 = arith.constant 97 : index
    %c0_100 = arith.constant 0 : index
    %96 = vector.load %arg12[%c97_99, %c0_100] : memref<640x4xbf16, #tpu.memory_space<vmem>>, vector<512x4xbf16>
    %c7_101 = arith.constant 7 : index
    %c0_102 = arith.constant 0 : index
    %c0_103 = arith.constant 0 : index
    %97 = vector.load %arg4[%c7_101, %c0_102, %c0_103] : memref<9x4x4xbf16, #tpu.memory_space<vmem>>, vector<1x4x4xbf16>
    %98 = vector.shape_cast %97 : vector<1x4x4xbf16> to vector<4x4xbf16>
    %cst_104 = arith.constant dense<0.000000e+00> : vector<512x4xf32>
    %99 = tpu.matmul %96, %98, %cst_104 {dimension_numbers = #tpu.dot_dimension_numbers<[1], [0], [0], [1], [0, 0, 1, 1], [], []>} : vector<512x4xbf16>, vector<4x4xbf16>, vector<512x4xf32> -> vector<512x4xf32>
    %100 = arith.addf %95, %99 : vector<512x4xf32>
    %c98 = arith.constant 98 : index
    %c0_105 = arith.constant 0 : index
    %101 = vector.load %arg11[%c98, %c0_105] : memref<640x4xbf16, #tpu.memory_space<vmem>>, vector<512x4xbf16>
    %c8 = arith.constant 8 : index
    %c0_106 = arith.constant 0 : index
    %c0_107 = arith.constant 0 : index
    %102 = vector.load %arg3[%c8, %c0_106, %c0_107] : memref<9x4x4xbf16, #tpu.memory_space<vmem>>, vector<1x4x4xbf16>
    %103 = vector.shape_cast %102 : vector<1x4x4xbf16> to vector<4x4xbf16>
    %cst_108 = arith.constant dense<0.000000e+00> : vector<512x4xf32>
    %104 = tpu.matmul %101, %103, %cst_108 {dimension_numbers = #tpu.dot_dimension_numbers<[1], [0], [0], [1], [0, 0, 1, 1], [], []>} : vector<512x4xbf16>, vector<4x4xbf16>, vector<512x4xf32> -> vector<512x4xf32>
    %105 = arith.addf %100, %104 : vector<512x4xf32>
    %c98_109 = arith.constant 98 : index
    %c0_110 = arith.constant 0 : index
    %106 = vector.load %arg12[%c98_109, %c0_110] : memref<640x4xbf16, #tpu.memory_space<vmem>>, vector<512x4xbf16>
    %c8_111 = arith.constant 8 : index
    %c0_112 = arith.constant 0 : index
    %c0_113 = arith.constant 0 : index
    %107 = vector.load %arg4[%c8_111, %c0_112, %c0_113] : memref<9x4x4xbf16, #tpu.memory_space<vmem>>, vector<1x4x4xbf16>
    %108 = vector.shape_cast %107 : vector<1x4x4xbf16> to vector<4x4xbf16>
    %cst_114 = arith.constant dense<0.000000e+00> : vector<512x4xf32>
    %109 = tpu.matmul %106, %108, %cst_114 {dimension_numbers = #tpu.dot_dimension_numbers<[1], [0], [0], [1], [0, 0, 1, 1], [], []>} : vector<512x4xbf16>, vector<4x4xbf16>, vector<512x4xf32> -> vector<512x4xf32>
    %110 = arith.addf %105, %109 : vector<512x4xf32>
    %c0_115 = arith.constant 0 : index
    %c0_116 = arith.constant 0 : index
    %111 = vector.load %arg5[%c0_115, %c0_116] : memref<1x4xf32, #tpu.memory_space<vmem>>, vector<1x4xf32>
    %112 = vector.broadcast %111 : vector<1x4xf32> to vector<512x4xf32>
    %113 = arith.mulf %110, %112 : vector<512x4xf32>
    %c0_117 = arith.constant 0 : index
    %c0_118 = arith.constant 0 : index
    %114 = vector.load %arg6[%c0_117, %c0_118] : memref<1x4xf32, #tpu.memory_space<vmem>>, vector<1x4xf32>
    %115 = vector.broadcast %114 : vector<1x4xf32> to vector<512x4xf32>
    %116 = arith.addf %113, %115 : vector<512x4xf32>
    %cst_119 = arith.constant 0.000000e+00 : f32
    %117 = vector.broadcast %cst_119 : f32 to vector<512x4xf32>
    %118 = arith.maximumf %116, %117 : vector<512x4xf32>
    %119 = tpu.iota {dimensions = array<i32: 1>} : vector<16x32x1xi32>
    %120 = vector.shape_cast %119 : vector<16x32x1xi32> to vector<512x1xi32>
    %c1_i32 = arith.constant 1 : i32
    %121 = vector.broadcast %c1_i32 : i32 to vector<512x1xi32>
    %122 = arith.cmpi sge, %120, %121 : vector<512x1xi32>
    %c16_i32 = arith.constant 16 : i32
    %123 = vector.broadcast %c16_i32 : i32 to vector<512x1xi32>
    %124 = arith.cmpi sle, %120, %123 : vector<512x1xi32>
    %125 = arith.andi %122, %124 : vector<512x1xi1>
    %cst_120 = arith.constant 0.000000e+00 : f32
    %126 = vector.shape_cast %125 : vector<512x1xi1> to vector<512x1xi1>
    %127 = vector.broadcast %126 : vector<512x1xi1> to vector<512x4xi1>
    %128 = vector.broadcast %cst_120 : f32 to vector<512x4xf32>
    %129 = arith.select %127, %118, %128 : vector<512x4xi1>, vector<512x4xf32>
    %130 = arith.truncf %129 : vector<512x4xf32> to vector<512x4xbf16>
    %cst_121 = arith.constant 0.000000e+00 : bf16
    %131 = vector.broadcast %cst_121 : bf16 to vector<32x4xbf16>
    %c0_122 = arith.constant 0 : index
    %c0_123 = arith.constant 0 : index
    %132 = vector.load %arg13[%c0_122, %c0_123] : memref<608x4xbf16, #tpu.memory_space<vmem>>, vector<32x4xbf16>
    tpu.vector_store %arg13[%c0_122, %c0_123], %131 {strides = array<i32>} : memref<608x4xbf16, #tpu.memory_space<vmem>>, vector<32x4xbf16>,
    %c32_124 = arith.constant 32 : index
    %c0_125 = arith.constant 0 : index
    %133 = vector.load %arg13[%c32_124, %c0_125] : memref<608x4xbf16, #tpu.memory_space<vmem>>, vector<512x4xbf16>
    tpu.vector_store %arg13[%c32_124, %c0_125], %130 {strides = array<i32>} : memref<608x4xbf16, #tpu.memory_space<vmem>>, vector<512x4xbf16>,
    %cst_126 = arith.constant 0.000000e+00 : bf16
    %134 = vector.broadcast %cst_126 : bf16 to vector<64x4xbf16>
    %c544 = arith.constant 544 : index
    %c0_127 = arith.constant 0 : index
    %135 = vector.load %arg13[%c544, %c0_127] : memref<608x4xbf16, #tpu.memory_space<vmem>>, vector<64x4xbf16>
    tpu.vector_store %arg13[%c544, %c0_127], %134 {strides = array<i32>} : memref<608x4xbf16, #tpu.memory_space<vmem>>, vector<64x4xbf16>,
    %cst_128 = arith.constant 0.000000e+00 : f32
    %136 = vector.broadcast %cst_128 : f32 to vector<512x4xf32>
    %c0_129 = arith.constant 0 : index
    %c0_130 = arith.constant 0 : index
    %137 = vector.load %arg13[%c0_129, %c0_130] : memref<608x4xbf16, #tpu.memory_space<vmem>>, vector<512x4xbf16>
    %c0_131 = arith.constant 0 : index
    %c0_132 = arith.constant 0 : index
    %c0_133 = arith.constant 0 : index
    %138 = vector.load %arg7[%c0_131, %c0_132, %c0_133] : memref<9x4x4xbf16, #tpu.memory_space<vmem>>, vector<1x4x4xbf16>
    %139 = vector.shape_cast %138 : vector<1x4x4xbf16> to vector<4x4xbf16>
    %cst_134 = arith.constant dense<0.000000e+00> : vector<512x4xf32>
    %140 = tpu.matmul %137, %139, %cst_134 {dimension_numbers = #tpu.dot_dimension_numbers<[1], [0], [0], [1], [0, 0, 1, 1], [], []>} : vector<512x4xbf16>, vector<4x4xbf16>, vector<512x4xf32> -> vector<512x4xf32>
    %141 = arith.addf %136, %140 : vector<512x4xf32>
    %c1_135 = arith.constant 1 : index
    %c0_136 = arith.constant 0 : index
    %142 = vector.load %arg13[%c1_135, %c0_136] : memref<608x4xbf16, #tpu.memory_space<vmem>>, vector<512x4xbf16>
    %c1_137 = arith.constant 1 : index
    %c0_138 = arith.constant 0 : index
    %c0_139 = arith.constant 0 : index
    %143 = vector.load %arg7[%c1_137, %c0_138, %c0_139] : memref<9x4x4xbf16, #tpu.memory_space<vmem>>, vector<1x4x4xbf16>
    %144 = vector.shape_cast %143 : vector<1x4x4xbf16> to vector<4x4xbf16>
    %cst_140 = arith.constant dense<0.000000e+00> : vector<512x4xf32>
    %145 = tpu.matmul %142, %144, %cst_140 {dimension_numbers = #tpu.dot_dimension_numbers<[1], [0], [0], [1], [0, 0, 1, 1], [], []>} : vector<512x4xbf16>, vector<4x4xbf16>, vector<512x4xf32> -> vector<512x4xf32>
    %146 = arith.addf %141, %145 : vector<512x4xf32>
    %c2_141 = arith.constant 2 : index
    %c0_142 = arith.constant 0 : index
    %147 = vector.load %arg13[%c2_141, %c0_142] : memref<608x4xbf16, #tpu.memory_space<vmem>>, vector<512x4xbf16>
    %c2_143 = arith.constant 2 : index
    %c0_144 = arith.constant 0 : index
    %c0_145 = arith.constant 0 : index
    %148 = vector.load %arg7[%c2_143, %c0_144, %c0_145] : memref<9x4x4xbf16, #tpu.memory_space<vmem>>, vector<1x4x4xbf16>
    %149 = vector.shape_cast %148 : vector<1x4x4xbf16> to vector<4x4xbf16>
    %cst_146 = arith.constant dense<0.000000e+00> : vector<512x4xf32>
    %150 = tpu.matmul %147, %149, %cst_146 {dimension_numbers = #tpu.dot_dimension_numbers<[1], [0], [0], [1], [0, 0, 1, 1], [], []>} : vector<512x4xbf16>, vector<4x4xbf16>, vector<512x4xf32> -> vector<512x4xf32>
    %151 = arith.addf %146, %150 : vector<512x4xf32>
    %c32_147 = arith.constant 32 : index
    %c0_148 = arith.constant 0 : index
    %152 = vector.load %arg13[%c32_147, %c0_148] : memref<608x4xbf16, #tpu.memory_space<vmem>>, vector<512x4xbf16>
    %c3_149 = arith.constant 3 : index
    %c0_150 = arith.constant 0 : index
    %c0_151 = arith.constant 0 : index
    %153 = vector.load %arg7[%c3_149, %c0_150, %c0_151] : memref<9x4x4xbf16, #tpu.memory_space<vmem>>, vector<1x4x4xbf16>
    %154 = vector.shape_cast %153 : vector<1x4x4xbf16> to vector<4x4xbf16>
    %cst_152 = arith.constant dense<0.000000e+00> : vector<512x4xf32>
    %155 = tpu.matmul %152, %154, %cst_152 {dimension_numbers = #tpu.dot_dimension_numbers<[1], [0], [0], [1], [0, 0, 1, 1], [], []>} : vector<512x4xbf16>, vector<4x4xbf16>, vector<512x4xf32> -> vector<512x4xf32>
    %156 = arith.addf %151, %155 : vector<512x4xf32>
    %c33_153 = arith.constant 33 : index
    %c0_154 = arith.constant 0 : index
    %157 = vector.load %arg13[%c33_153, %c0_154] : memref<608x4xbf16, #tpu.memory_space<vmem>>, vector<512x4xbf16>
    %c4_155 = arith.constant 4 : index
    %c0_156 = arith.constant 0 : index
    %c0_157 = arith.constant 0 : index
    %158 = vector.load %arg7[%c4_155, %c0_156, %c0_157] : memref<9x4x4xbf16, #tpu.memory_space<vmem>>, vector<1x4x4xbf16>
    %159 = vector.shape_cast %158 : vector<1x4x4xbf16> to vector<4x4xbf16>
    %cst_158 = arith.constant dense<0.000000e+00> : vector<512x4xf32>
    %160 = tpu.matmul %157, %159, %cst_158 {dimension_numbers = #tpu.dot_dimension_numbers<[1], [0], [0], [1], [0, 0, 1, 1], [], []>} : vector<512x4xbf16>, vector<4x4xbf16>, vector<512x4xf32> -> vector<512x4xf32>
    %161 = arith.addf %156, %160 : vector<512x4xf32>
    %c34_159 = arith.constant 34 : index
    %c0_160 = arith.constant 0 : index
    %162 = vector.load %arg13[%c34_159, %c0_160] : memref<608x4xbf16, #tpu.memory_space<vmem>>, vector<512x4xbf16>
    %c5_161 = arith.constant 5 : index
    %c0_162 = arith.constant 0 : index
    %c0_163 = arith.constant 0 : index
    %163 = vector.load %arg7[%c5_161, %c0_162, %c0_163] : memref<9x4x4xbf16, #tpu.memory_space<vmem>>, vector<1x4x4xbf16>
    %164 = vector.shape_cast %163 : vector<1x4x4xbf16> to vector<4x4xbf16>
    %cst_164 = arith.constant dense<0.000000e+00> : vector<512x4xf32>
    %165 = tpu.matmul %162, %164, %cst_164 {dimension_numbers = #tpu.dot_dimension_numbers<[1], [0], [0], [1], [0, 0, 1, 1], [], []>} : vector<512x4xbf16>, vector<4x4xbf16>, vector<512x4xf32> -> vector<512x4xf32>
    %166 = arith.addf %161, %165 : vector<512x4xf32>
    %c64_165 = arith.constant 64 : index
    %c0_166 = arith.constant 0 : index
    %167 = vector.load %arg13[%c64_165, %c0_166] : memref<608x4xbf16, #tpu.memory_space<vmem>>, vector<512x4xbf16>
    %c6_167 = arith.constant 6 : index
    %c0_168 = arith.constant 0 : index
    %c0_169 = arith.constant 0 : index
    %168 = vector.load %arg7[%c6_167, %c0_168, %c0_169] : memref<9x4x4xbf16, #tpu.memory_space<vmem>>, vector<1x4x4xbf16>
    %169 = vector.shape_cast %168 : vector<1x4x4xbf16> to vector<4x4xbf16>
    %cst_170 = arith.constant dense<0.000000e+00> : vector<512x4xf32>
    %170 = tpu.matmul %167, %169, %cst_170 {dimension_numbers = #tpu.dot_dimension_numbers<[1], [0], [0], [1], [0, 0, 1, 1], [], []>} : vector<512x4xbf16>, vector<4x4xbf16>, vector<512x4xf32> -> vector<512x4xf32>
    %171 = arith.addf %166, %170 : vector<512x4xf32>
    %c65_171 = arith.constant 65 : index
    %c0_172 = arith.constant 0 : index
    %172 = vector.load %arg13[%c65_171, %c0_172] : memref<608x4xbf16, #tpu.memory_space<vmem>>, vector<512x4xbf16>
    %c7_173 = arith.constant 7 : index
    %c0_174 = arith.constant 0 : index
    %c0_175 = arith.constant 0 : index
    %173 = vector.load %arg7[%c7_173, %c0_174, %c0_175] : memref<9x4x4xbf16, #tpu.memory_space<vmem>>, vector<1x4x4xbf16>
    %174 = vector.shape_cast %173 : vector<1x4x4xbf16> to vector<4x4xbf16>
    %cst_176 = arith.constant dense<0.000000e+00> : vector<512x4xf32>
    %175 = tpu.matmul %172, %174, %cst_176 {dimension_numbers = #tpu.dot_dimension_numbers<[1], [0], [0], [1], [0, 0, 1, 1], [], []>} : vector<512x4xbf16>, vector<4x4xbf16>, vector<512x4xf32> -> vector<512x4xf32>
    %176 = arith.addf %171, %175 : vector<512x4xf32>
    %c66_177 = arith.constant 66 : index
    %c0_178 = arith.constant 0 : index
    %177 = vector.load %arg13[%c66_177, %c0_178] : memref<608x4xbf16, #tpu.memory_space<vmem>>, vector<512x4xbf16>
    %c8_179 = arith.constant 8 : index
    %c0_180 = arith.constant 0 : index
    %c0_181 = arith.constant 0 : index
    %178 = vector.load %arg7[%c8_179, %c0_180, %c0_181] : memref<9x4x4xbf16, #tpu.memory_space<vmem>>, vector<1x4x4xbf16>
    %179 = vector.shape_cast %178 : vector<1x4x4xbf16> to vector<4x4xbf16>
    %cst_182 = arith.constant dense<0.000000e+00> : vector<512x4xf32>
    %180 = tpu.matmul %177, %179, %cst_182 {dimension_numbers = #tpu.dot_dimension_numbers<[1], [0], [0], [1], [0, 0, 1, 1], [], []>} : vector<512x4xbf16>, vector<4x4xbf16>, vector<512x4xf32> -> vector<512x4xf32>
    %181 = arith.addf %176, %180 : vector<512x4xf32>
    %c0_183 = arith.constant 0 : index
    %c0_184 = arith.constant 0 : index
    %182 = vector.load %arg8[%c0_183, %c0_184] : memref<1x4xf32, #tpu.memory_space<vmem>>, vector<1x4xf32>
    %183 = vector.broadcast %182 : vector<1x4xf32> to vector<512x4xf32>
    %184 = arith.mulf %181, %183 : vector<512x4xf32>
    %c0_185 = arith.constant 0 : index
    %c0_186 = arith.constant 0 : index
    %185 = vector.load %arg9[%c0_185, %c0_186] : memref<1x4xf32, #tpu.memory_space<vmem>>, vector<1x4xf32>
    %186 = vector.broadcast %185 : vector<1x4xf32> to vector<512x4xf32>
    %187 = arith.addf %184, %186 : vector<512x4xf32>
    %cst_187 = arith.constant 0.000000e+00 : f32
    %188 = vector.broadcast %cst_187 : f32 to vector<512x4xf32>
    %189 = arith.maximumf %187, %188 : vector<512x4xf32>
    %190 = vector.shape_cast %189 : vector<512x4xf32> to vector<16x32x4xf32>
    %191 = vector.extract_strided_slice %190 {offsets = [0, 0, 0], sizes = [16, 16, 4], strides = [1, 1, 1]} : vector<16x32x4xf32> to vector<16x16x4xf32>
    %192 = arith.truncf %191 : vector<16x16x4xf32> to vector<16x16x4xbf16>
    %193 = vector.shape_cast %192 : vector<16x16x4xbf16> to vector<1x16x16x4xbf16>
    %c0_188 = arith.constant 0 : index
    %c0_189 = arith.constant 0 : index
    %c0_190 = arith.constant 0 : index
    %c0_191 = arith.constant 0 : index
    %194 = vector.load %arg10[%c0_188, %c0_189, %c0_190, %c0_191] : memref<1x16x16x4xbf16, #tpu.memory_space<vmem>>, vector<1x16x16x4xbf16>
    tpu.vector_store %arg10[%c0_188, %c0_189, %c0_190, %c0_191], %193 {strides = array<i32>} : memref<1x16x16x4xbf16, #tpu.memory_space<vmem>>, vector<1x16x16x4xbf16>,
    return
  }
  func.func @transform_0(%arg0: i32) -> (i32, i32, i32, i32) {
    %c0_i32 = arith.constant 0 : i32
    %c0_i32_0 = arith.constant 0 : i32
    %c0_i32_1 = arith.constant 0 : i32
    %c0_i32_2 = arith.constant 0 : i32
    return %arg0, %c0_i32, %c0_i32_0, %c0_i32_1 : i32, i32, i32, i32
  }
  func.func @transform_1(%arg0: i32) -> (i32, i32, i32, i32) {
    %c0_i32 = arith.constant 0 : i32
    %c0_i32_0 = arith.constant 0 : i32
    %c0_i32_1 = arith.constant 0 : i32
    %c0_i32_2 = arith.constant 0 : i32
    return %arg0, %c0_i32, %c0_i32_0, %c0_i32_1 : i32, i32, i32, i32
  }
  func.func @transform_2(%arg0: i32) -> (i32, i32, i32) {
    %c0_i32 = arith.constant 0 : i32
    %c0_i32_0 = arith.constant 0 : i32
    %c0_i32_1 = arith.constant 0 : i32
    %c0_i32_2 = arith.constant 0 : i32
    return %c0_i32, %c0_i32_0, %c0_i32_1 : i32, i32, i32
  }
  func.func @transform_3(%arg0: i32) -> (i32, i32, i32) {
    %c0_i32 = arith.constant 0 : i32
    %c0_i32_0 = arith.constant 0 : i32
    %c0_i32_1 = arith.constant 0 : i32
    %c0_i32_2 = arith.constant 0 : i32
    return %c0_i32, %c0_i32_0, %c0_i32_1 : i32, i32, i32
  }
  func.func @transform_4(%arg0: i32) -> (i32, i32) {
    %c0_i32 = arith.constant 0 : i32
    %c0_i32_0 = arith.constant 0 : i32
    %c0_i32_1 = arith.constant 0 : i32
    return %c0_i32, %c0_i32_0 : i32, i32
  }
  func.func @transform_5(%arg0: i32) -> (i32, i32) {
    %c0_i32 = arith.constant 0 : i32
    %c0_i32_0 = arith.constant 0 : i32
    %c0_i32_1 = arith.constant 0 : i32
    return %c0_i32, %c0_i32_0 : i32, i32
  }
  func.func @transform_6(%arg0: i32) -> (i32, i32, i32) {
    %c0_i32 = arith.constant 0 : i32
    %c0_i32_0 = arith.constant 0 : i32
    %c0_i32_1 = arith.constant 0 : i32
    %c0_i32_2 = arith.constant 0 : i32
    return %c0_i32, %c0_i32_0, %c0_i32_1 : i32, i32, i32
  }
  func.func @transform_7(%arg0: i32) -> (i32, i32) {
    %c0_i32 = arith.constant 0 : i32
    %c0_i32_0 = arith.constant 0 : i32
    %c0_i32_1 = arith.constant 0 : i32
    return %c0_i32, %c0_i32_0 : i32, i32
  }
  func.func @transform_8(%arg0: i32) -> (i32, i32) {
    %c0_i32 = arith.constant 0 : i32
    %c0_i32_0 = arith.constant 0 : i32
    %c0_i32_1 = arith.constant 0 : i32
    return %c0_i32, %c0_i32_0 : i32, i32
  }
  func.func @transform_9(%arg0: i32) -> (i32, i32, i32, i32) {
    %c0_i32 = arith.constant 0 : i32
    %c0_i32_0 = arith.constant 0 : i32
    %c0_i32_1 = arith.constant 0 : i32
    %c0_i32_2 = arith.constant 0 : i32
    return %arg0, %c0_i32, %c0_i32_0, %c0_i32_1 : i32, i32, i32, i32
  }
}

</mosaic_0001>

<bundles_post_ra>
// kernel: up_forward.1
= control target key start
LH: loop header
LB: loop body
LE: loop exit
PB: predicated region body
PF: predicated region fallthrough
CT: control target
= control target key end

     0   :  { %s22291_s30 = smov 0   ;;  %s26262_s0 = inlined_call_operand.vmem [shape: bf16[2,16,16,4], index: 0, kind: input, shape index: {}]   ;;  %s26263_s1 = inlined_call_operand.vmem [shape: bf16[2,16,16,4], index: 1, kind: input, shape index: {}]   ;;  %s26264_s2 = inlined_call_operand.vmem [shape: bf16[9,4,4], index: 2, kind: input, shape index: {}]   ;;  %s26265_s3 = inlined_call_operand.vmem [shape: bf16[9,4,4], index: 3, kind: input, shape index: {}]   ;;  %s26266_s4 = inlined_call_operand.vmem [shape: f32[1,4], index: 4, kind: input, shape index: {}]   ;;  %s26267_s5 = inlined_call_operand.vmem [shape: f32[1,4], index: 5, kind: input, shape index: {}]   ;;  %s26268_s6 = inlined_call_operand.vmem [shape: bf16[9,4,4], index: 6, kind: input, shape index: {}]   ;;  %s26269_s7 = inlined_call_operand.vmem [shape: f32[1,4], index: 7, kind: input, shape index: {}]   ;;  %s26270_s8 = inlined_call_operand.vmem [shape: f32[1,4], index: 8, kind: input, shape index: {}]   ;;  %s26271_s9 = inlined_call_operand.vmem [shape: bf16[2,16,16,4], index: 9, kind: output, shape index: {}]  }
   0x1 LB: > { %s16798_s10 = sadd.s32 4294967295, %s22237_s30   ;;  %p16802_p0 = scmp.ge.s32.totalorder %s22237_s30, 1  ;;  %s22237_s30 = sphi %s22291_s30, %s19_s30  }
   0x2   : > { %p297_p1 = scmp.lt.s32.totalorder %s22237_s30, 3 }
   0x4   : > { %p298_p2 = pnand %p16802_p0, %p297_p1 }
   0x6   : > { %301 = sbr.rel (%p298_p2) target bundleno = 3240 (0xca8), region = 56 }
   0xd   : > { %vm1015_vm0 = vcmask 1041408   ;;  %v16971_v0 = vld [vmem:[%s26264_s2 + $0x4] sm:$0x3]  ;;  %vm354_vm1 = vcmask 31744   ;;  %v22239_v2 = vmov 0   ;;  %p338_p3 = scmp.lt.s32.totalorder %s16798_s10, 1 }
   0xe   : > { %22065 = vmatprep.subr.msk.bf16.mxu0 %vm1015_vm0, %v16971_v0  ;;  %v22304_v1 = vsel %vm1015_vm0, %v16971_v0, 0  ;;  %357 = vst.msk [vmem:[#allocation2 + $0x10] sm:$0xff] %vm354_vm1, %v22239_v2  ;;  %358 = vst.msk [vmem:[#allocation2 + $0x18] sm:$0xff] %vm354_vm1, %v22239_v2  ;;  %v22324_v3 = vld [vmem:[%s26265_s3 + $0x4] sm:$0x3]  ;;  %vm3227_vm2 = vcmask 1046528  }
   0xf   : > { %359 = vst.msk [vmem:[#allocation2 + $0x120] sm:$0xff] %vm354_vm1, %v22239_v2  ;;  %360 = vst.msk [vmem:[#allocation2 + $0x128] sm:$0xff] %vm354_vm1, %v22239_v2  ;;  %18958 = vmatpush3.bf16.msra.mxu0 %v22304_v1  ;;  %s26482_s10 = smov (!%p338_p3, %s16798_s10), 1  ;;  %vm491_vm3 = vcmask 1040384   ;;  %v22395_v43 = vld [vmem:[%s26264_s2 + $0x6] sm:$0x3] }
  0x10   : > { %361 = vst.msk [vmem:[#allocation2 + $0x130] sm:$0xff] %vm354_vm1, %v22239_v2  ;;  %607 = vst.msk [vmem:[#allocation3 + $0x10] sm:$0xff] %vm354_vm1, %v22239_v2  ;;  %22067 = vmatprep.subr.msk.bf16.mxu0 %vm1015_vm0, %v22324_v3  ;;  %s22333_s15 = sshll.u32 %s26482_s10, 7  ;;  %v3943_v44 = vsel %vm1015_vm0, %v22324_v3, 0  ;;  %vm1731_vm4 = vsmask.f32 7424 }
  0x11   : > { %608 = vst.msk [vmem:[#allocation3 + $0x18] sm:$0xff] %vm354_vm1, %v22239_v2  ;;  %609 = vst.msk [vmem:[#allocation3 + $0x120] sm:$0xff] %vm354_vm1, %v22239_v2  ;;  %s22339_s18 = scalar_lea.vmem %s26262_s0, %s22333_s15  ;;  %s22372_s21 = scalar_lea.vmem %s26263_s1, %s22333_s15  ;;  %vm16698_vm7 = vcmask 27648  }
  0x12   : > { %610 = vst.msk [vmem:[#allocation3 + $0x128] sm:$0xff] %vm354_vm1, %v22239_v2  ;;  %611 = vst.msk [vmem:[#allocation3 + $0x130] sm:$0xff] %vm354_vm1, %v22239_v2  ;;  %v22099_v4 = vld [vmem:[%s22339_s18] sm:$0xff]   ;;  %v22100_v10 = vld [vmem:[%s22339_s18 + $0x8] sm:$0xff]   ;;  %s26133_s11 = scalar_lea.vmem %s26271_s9, %s22333_s15 }
  0x13   : > { %11769 = vst.msk [vmem:[#allocation4] sm:$0xff] %vm354_vm1, %v22239_v2  ;;  %11770 = vst.msk [vmem:[#allocation4 + $0x8] sm:$0xff] %vm354_vm1, %v22239_v2  ;;  %v475_v9 = vrot.slane %v22099_v4, 7  ;;  %v22101_v14 = vld [vmem:[%s22339_s18 + $0x10] sm:$0xff]   ;;  %v22102_v15 = vld [vmem:[%s22339_s18 + $0x18] sm:$0xff]   ;;  %v476_v16 = vrot.slane %v22100_v10, 7 }
  0x14   : > { %11803 = vst.msk [vmem:[#allocation4 + $0x110] sm:$0xff] %vm354_vm1, %v22239_v2  ;;  %11804 = vst.msk [vmem:[#allocation4 + $0x118] sm:$0xff] %vm354_vm1, %v22239_v2  ;;  %v22103_v17 = vld [vmem:[%s22339_s18 + $0x20] sm:$0xff]   ;;  %v477_v18 = vrot.slane %v22101_v14, 7  ;;  %v478_v19 = vrot.slane %v22102_v15, 7  ;;  %v22104_v23 = vld [vmem:[%s22339_s18 + $0x28] sm:$0xff]  }
  0x15   : > { %11805 = vst.msk [vmem:[#allocation4 + $0x120] sm:$0xff] %vm354_vm1, %v22239_v2  ;;  %v1697_v5 = vld [vmem:[#allocation2 + $0x18] sm:$0xff]  ;;  %v3191_v6 = vld [vmem:[#allocation2 + $0x10] sm:$0xfe]  ;;  %v494_v12 = vsel %vm491_vm3, 0, %v475_v9  ;;  %v541_v13 = vsel %vm491_vm3, %v475_v9, 0 }
  0x16   : > { %v3228_v7 = vrot.slane %v3191_v6, 1  ;;  %v3229_v8 = vrot.slane %v1697_v5, 1  ;;  %573 = vst.msk [vmem:[#allocation2 + $0x20] sm:$0xff] %vm354_vm1, %v494_v12  ;;  %574 = vst.msk [vmem:[#allocation2 + $0x28] sm:$0xff] %vm354_vm1, %v541_v13  ;;  %v497_v20 = vsel %vm491_vm3, 0, %v476_v16  ;;  %v543_v21 = vsel %vm491_vm3, %v476_v16, 0 }
  0x17   : > { %v479_v22 = vrot.slane %v22103_v17, 7  ;;  %575 = vst.msk [vmem:[#allocation2 + $0x30] sm:$0xff] %vm354_vm1, %v497_v20  ;;  %576 = vst.msk [vmem:[#allocation2 + $0x38] sm:$0xff] %vm354_vm1, %v543_v21  ;;  %v500_v24 = vsel %vm491_vm3, 0, %v477_v18  ;;  %v545_v25 = vsel %vm491_vm3, %v477_v18, 0  ;;  %v503_v26 = vsel %vm491_vm3, 0, %v478_v19 }
  0x18   : > { %v3230_v11 = vsel %vm3227_vm2, %v3228_v7, %v3229_v8  ;;  %v547_v27 = vsel %vm491_vm3, %v478_v19, 0  ;;  %577 = vst.msk [vmem:[#allocation2 + $0x40] sm:$0xff] %vm354_vm1, %v500_v24  ;;  %578 = vst.msk [vmem:[#allocation2 + $0x48] sm:$0xff] %vm354_vm1, %v545_v25  ;;  %v480_v30 = vrot.slane %v22104_v23, 7  ;;  %v22105_v31 = vld [vmem:[%s22339_s18 + $0x30] sm:$0xff]   ;;  %v22377_v32 = vld [vmem:[%s22339_s18 + $0x38] sm:$0xff]  }
  0x19   : > { %18959 = vmatprep.mubr.msk.bf16.mxu0 %vm354_vm1, %v3230_v11  ;;  %579 = vst.msk [vmem:[#allocation2 + $0x50] sm:$0xff] %vm354_vm1, %v503_v26  ;;  %580 = vst.msk [vmem:[#allocation2 + $0x58] sm:$0xff] %vm354_vm1, %v547_v27  ;;  %v506_v28 = vsel %vm491_vm3, 0, %v479_v22  ;;  %v549_v29 = vsel %vm491_vm3, %v479_v22, 0  ;;  %v481_v35 = vrot.slane %v22105_v31, 7  ;;  %v482_v38 = vrot.slane %v22377_v32, 7 }
  0x1a   : > { %581 = vst.msk [vmem:[#allocation2 + $0x60] sm:$0xff] %vm354_vm1, %v506_v28  ;;  %582 = vst.msk [vmem:[#allocation2 + $0x68] sm:$0xff] %vm354_vm1, %v549_v29  ;;  %v509_v33 = vsel %vm491_vm3, 0, %v480_v30  ;;  %v551_v34 = vsel %vm491_vm3, %v480_v30, 0  ;;  %v22107_v39 = vld [vmem:[%s22372_s21] sm:$0xff]   ;;  %v22108_v54 = vld [vmem:[%s22372_s21 + $0x8] sm:$0xff]  }
  0x1b   : > { %583 = vst.msk [vmem:[#allocation2 + $0x70] sm:$0xff] %vm354_vm1, %v509_v33  ;;  %584 = vst.msk [vmem:[#allocation2 + $0x78] sm:$0xff] %vm354_vm1, %v551_v34  ;;  %v512_v42 = vsel %vm491_vm3, 0, %v481_v35  ;;  %v553_v45 = vsel %vm491_vm3, %v481_v35, 0  ;;  %v515_v46 = vsel %vm491_vm3, 0, %v482_v38  ;;  %v725_v47 = vrot.slane %v22107_v39, 7 }
  0x1c   : > { %585 = vst.msk [vmem:[#allocation2 + $0x80] sm:$0xff] %vm354_vm1, %v512_v42  ;;  %586 = vst.msk [vmem:[#allocation2 + $0x88] sm:$0xff] %vm354_vm1, %v553_v45  ;;  %v22109_v56 = vld [vmem:[%s22372_s21 + $0x10] sm:$0xff]   ;;  %v22110_v57 = vld [vmem:[%s22372_s21 + $0x18] sm:$0xff]   ;;  %v726_v61 = vrot.slane %v22108_v54, 7 }
  0x1d   : > { %v22381_v36 = vld [vmem:[#allocation2 + $0x20] sm:$0xff]  ;;  %v22383_v37 = vld [vmem:[#allocation2 + $0x28] sm:$0xff]  ;;  %587 = vst.msk [vmem:[#allocation2 + $0x90] sm:$0xff] %vm354_vm1, %v515_v46  ;;  %v742_v52 = vsel %vm491_vm3, 0, %v725_v47  ;;  %v789_v60 = vsel %vm491_vm3, %v725_v47, 0  ;;  %v727_v2 = vrot.slane %v22109_v56, 7 }
  0x1e   : > { %v3231_v40 = vrot.slane %v22381_v36, 1  ;;  %v3233_v41 = vrot.slane %v22383_v37, 1  ;;  %v22406_v50 = vld [vmem:[#allocation2 + $0x30] sm:$0xff]  ;;  %v22408_v51 = vld [vmem:[#allocation2 + $0x38] sm:$0xff]  ;;  %821 = vst.msk [vmem:[#allocation3 + $0x20] sm:$0xff] %vm354_vm1, %v742_v52  ;;  %v22111_v62 = vld [vmem:[%s22372_s21 + $0x20] sm:$0xff]  }
  0x1f   : > { %v3235_v53 = vrot.slane %v22406_v50, 1  ;;  %v3237_v55 = vrot.slane %v22408_v51, 1  ;;  %v22424_v59 = vld [vmem:[#allocation2 + $0x40] sm:$0xff]  ;;  %v22429_v0 = vld [vmem:[#allocation2 + $0x48] sm:$0xff]  ;;  %822 = vst.msk [vmem:[#allocation3 + $0x28] sm:$0xff] %vm354_vm1, %v789_v60  ;;  %v745_v3 = vsel %vm491_vm3, 0, %v726_v61 }
  0x20   : > { %v3232_v48 = vsel %vm3227_vm2, %v3229_v8, %v3231_v40  ;;  %v3234_v49 = vsel %vm3227_vm2, %v3231_v40, %v3233_v41  ;;  %v791_v4 = vsel %vm491_vm3, %v726_v61, 0  ;;  %v3239_v5 = vrot.slane %v22424_v59, 1  ;;  %823 = vst.msk [vmem:[#allocation3 + $0x30] sm:$0xff] %vm354_vm1, %v745_v3  ;;  %v22112_v11 = vld [vmem:[%s22372_s21 + $0x28] sm:$0xff]   ;;  %v22113_v12 = vld [vmem:[%s22372_s21 + $0x30] sm:$0xff]   ;;  %v22114_v18 = vld [vmem:[%s22372_s21 + $0x38] sm:$0xff]  }
  0x21   : > { %18960 = vmatmul.mubr.msk.bf16.vlgmr.msra.gmra.mrb[0].mxu0 %vm354_vm1, %v3232_v48  ;;  %v3236_v58 = vsel %vm3227_vm2, %v3233_v41, %v3235_v53  ;;  %v3238_v63 = vsel %vm3227_vm2, %v3235_v53, %v3237_v55  ;;  %824 = vst.msk [vmem:[#allocation3 + $0x38] sm:$0xff] %vm354_vm1, %v791_v4  ;;  %v748_v6 = vsel %vm491_vm3, 0, %v727_v2  ;;  %v793_v7 = vsel %vm491_vm3, %v727_v2, 0  ;;  %v22115_v20 = vld [vmem:[%s22372_s21 + $0x40] sm:$0xff]   ;;  %v22460_v26 = vld [vmem:[#allocation2 + $0x50] sm:$0xff]  ;;  %v22466_v30 = vld [vmem:[#allocation2 + $0x58] sm:$0xff] }
  0x22   : > { %19024 = vmatpush3.bf16.msra.mxu0 %v3943_v44  ;;  %18963 = vmatprep.mubr.msk.bf16.mxu0 %vm354_vm1, %v3234_v49  ;;  %v728_v8 = vrot.slane %v22110_v57, 7  ;;  %v3241_v9 = vrot.slane %v22429_v0, 1  ;;  %825 = vst.msk [vmem:[#allocation3 + $0x40] sm:$0xff] %vm354_vm1, %v748_v6  ;;  %826 = vst.msk [vmem:[#allocation3 + $0x48] sm:$0xff] %vm354_vm1, %v793_v7  ;;  %v729_v10 = vrot.slane %v22111_v62, 7  ;;  %v730_v17 = vrot.slane %v22112_v11, 7 }
  0x23   : > { %22068 = vmatprep.subr.msk.bf16.mxu0 %vm1015_vm0, %v22395_v43  ;;  %v731_v19 = vrot.slane %v22113_v12, 7  ;;  %v3240_v21 = vsel %vm3227_vm2, %v3237_v55, %v3239_v5  ;;  %v732_v24 = vrot.slane %v22114_v18, 7  ;;  %v733_v29 = vrot.slane %v22115_v20, 7  ;;  %v22116_v35 = vld [vmem:[%s22372_s21 + $0x48] sm:$0xff]   ;;  %v22117_v41 = vld [vmem:[%s22372_s21 + $0x50] sm:$0xff]   ;;  %v22118_v49 = vld [vmem:[%s22372_s21 + $0x58] sm:$0xff]  }
  0x24   : > { %v751_v13 = vsel %vm491_vm3, 0, %v728_v8  ;;  %v795_v14 = vsel %vm491_vm3, %v728_v8, 0  ;;  %v754_v15 = vsel %vm491_vm3, 0, %v729_v10  ;;  %v797_v16 = vsel %vm491_vm3, %v729_v10, 0  ;;  %v22491_v53 = vld [vmem:[#allocation2 + $0x60] sm:$0xff]  ;;  %v22493_v54 = vld [vmem:[#allocation2 + $0x68] sm:$0xff] }
  0x25   : > { %827 = vst.msk [vmem:[#allocation3 + $0x50] sm:$0xff] %vm354_vm1, %v751_v13  ;;  %828 = vst.msk [vmem:[#allocation3 + $0x58] sm:$0xff] %vm354_vm1, %v795_v14  ;;  %v757_v22 = vsel %vm491_vm3, 0, %v730_v17  ;;  %v799_v23 = vsel %vm491_vm3, %v730_v17, 0  ;;  %v3242_v25 = vsel %vm3227_vm2, %v3239_v5, %v3241_v9  ;;  %v760_v27 = vsel %vm491_vm3, 0, %v731_v19  ;;  %v22119_v57 = vld [vmem:[%s22372_s21 + $0x60] sm:$0xff]  }
  0x26   : > { %829 = vst.msk [vmem:[#allocation3 + $0x60] sm:$0xff] %vm354_vm1, %v754_v15  ;;  %830 = vst.msk [vmem:[#allocation3 + $0x68] sm:$0xff] %vm354_vm1, %v797_v16  ;;  %v801_v28 = vsel %vm491_vm3, %v731_v19, 0  ;;  %v763_v31 = vsel %vm491_vm3, 0, %v732_v24  ;;  %v803_v33 = vsel %vm491_vm3, %v732_v24, 0  ;;  %v766_v34 = vsel %vm491_vm3, 0, %v733_v29 }
  0x27   : > { %831 = vst.msk [vmem:[#allocation3 + $0x70] sm:$0xff] %vm354_vm1, %v757_v22  ;;  %832 = vst.msk [vmem:[#allocation3 + $0x78] sm:$0xff] %vm354_vm1, %v799_v23  ;;  %v3243_v39 = vrot.slane %v22460_v26, 1  ;;  %v805_v40 = vsel %vm491_vm3, %v733_v29, 0  ;;  %v3245_v42 = vrot.slane %v22466_v30, 1  ;;  %v734_v44 = vrot.slane %v22116_v35, 7 }
  0x28   : > { %833 = vst.msk [vmem:[#allocation3 + $0x80] sm:$0xff] %vm354_vm1, %v760_v27  ;;  %834 = vst.msk [vmem:[#allocation3 + $0x88] sm:$0xff] %vm354_vm1, %v801_v28  ;;  %v735_v48 = vrot.slane %v22117_v41, 7  ;;  %v736_v60 = vrot.slane %v22118_v49, 7  ;;  %v22120_v61 = vld [vmem:[%s22372_s21 + $0x68] sm:$0xff]   ;;  %v3249_v62 = vrot.slane %v22493_v54, 1 }
  0x29   : > { %18964 = vmatmul.mubr.msk.bf16.gmra.mrb[4].mxu0 %vm354_vm1, %v3236_v58  ;;  %835 = vst.msk [vmem:[#allocation3 + $0x90] sm:$0xff] %vm354_vm1, %v763_v31  ;;  %836 = vst.msk [vmem:[#allocation3 + $0x98] sm:$0xff] %vm354_vm1, %v803_v33  ;;  %v769_v45 = vsel %vm491_vm3, 0, %v734_v44  ;;  %v807_v46 = vsel %vm491_vm3, %v734_v44, 0  ;;  %v3244_v47 = vsel %vm3227_vm2, %v3241_v9, %v3243_v39  ;;  %v3246_v52 = vsel %vm3227_vm2, %v3243_v39, %v3245_v42  ;;  %v22512_v8 = vld [vmem:[#allocation2 + $0x70] sm:$0xff]  ;;  %v22519_v11 = vld [vmem:[#allocation2 + $0x78] sm:$0xff] }
  0x2a   : > { %18967 = vmatprep.mubr.msk.bf16.mxu0 %vm354_vm1, %v3238_v63  ;;  %837 = vst.msk [vmem:[#allocation3 + $0xa0] sm:$0xff] %vm354_vm1, %v766_v34  ;;  %838 = vst.msk [vmem:[#allocation3 + $0xa8] sm:$0xff] %vm354_vm1, %v805_v40  ;;  %v772_v55 = vsel %vm491_vm3, 0, %v735_v48  ;;  %v809_v56 = vsel %vm491_vm3, %v735_v48, 0  ;;  %v3247_v58 = vrot.slane %v22491_v53, 1  ;;  %v737_v63 = vrot.slane %v22119_v57, 7 }
  0x2b   : > { %839 = vst.msk [vmem:[#allocation3 + $0xb0] sm:$0xff] %vm354_vm1, %v769_v45  ;;  %840 = vst.msk [vmem:[#allocation3 + $0xb8] sm:$0xff] %vm354_vm1, %v807_v46  ;;  %v775_v2 = vsel %vm491_vm3, 0, %v736_v60  ;;  %v811_v3 = vsel %vm491_vm3, %v736_v60, 0  ;;  %v738_v4 = vrot.slane %v22120_v61, 7  ;;  %v3251_v12 = vrot.slane %v22512_v8, 1 }
  0x2c   : > { %841 = vst.msk [vmem:[#allocation3 + $0xc0] sm:$0xff] %vm354_vm1, %v772_v55  ;;  %842 = vst.msk [vmem:[#allocation3 + $0xc8] sm:$0xff] %vm354_vm1, %v809_v56  ;;  %v778_v5 = vsel %vm491_vm3, 0, %v737_v63  ;;  %v813_v6 = vsel %vm491_vm3, %v737_v63, 0  ;;  %v3248_v7 = vsel %vm3227_vm2, %v3245_v42, %v3247_v58  ;;  %v3250_v10 = vsel %vm3227_vm2, %v3247_v58, %v3249_v62  ;;  %v22121_v13 = vld [vmem:[%s22372_s21 + $0x70] sm:$0xff]   ;;  %v22532_v20 = vld [vmem:[#allocation2 + $0x80] sm:$0xff] }
  0x2d   : > { %843 = vst.msk [vmem:[#allocation3 + $0xd0] sm:$0xff] %vm354_vm1, %v775_v2  ;;  %844 = vst.msk [vmem:[#allocation3 + $0xd8] sm:$0xff] %vm354_vm1, %v811_v3  ;;  %v781_v9 = vsel %vm491_vm3, 0, %v738_v4  ;;  %v3253_v14 = vrot.slane %v22519_v11, 1  ;;  %v739_v15 = vrot.slane %v22121_v13, 7  ;;  %v815_v16 = vsel %vm491_vm3, %v738_v4, 0 }
  0x2e   : > { %845 = vst.msk [vmem:[#allocation3 + $0xe0] sm:$0xff] %vm354_vm1, %v778_v5  ;;  %846 = vst.msk [vmem:[#allocation3 + $0xe8] sm:$0xff] %vm354_vm1, %v813_v6  ;;  %v3252_v18 = vsel %vm3227_vm2, %v3249_v62, %v3251_v12  ;;  %v22538_v22 = vld [vmem:[%s22372_s21 + $0x78] sm:$0xff]   ;;  %v3255_v23 = vrot.slane %v22532_v20, 1  ;;  %v22552_v33 = vld [vmem:[#allocation2 + $0x90] sm:$0xff] }
  0x2f   : > { %847 = vst.msk [vmem:[#allocation3 + $0xf0] sm:$0xff] %vm354_vm1, %v781_v9  ;;  %848 = vst.msk [vmem:[#allocation3 + $0xf8] sm:$0xff] %vm354_vm1, %v815_v16  ;;  %v784_v17 = vsel %vm491_vm3, 0, %v739_v15  ;;  %v3254_v19 = vsel %vm3227_vm2, %v3251_v12, %v3253_v14  ;;  %v817_v27 = vsel %vm491_vm3, %v739_v15, 0  ;;  %v2445_v34 = vld [vmem:[#allocation3 + $0x18] sm:$0xff]  ;;  %v26272_v39 = vrot.slane %v22552_v33, 1 }
  0x30   : > { %849 = vst.msk [vmem:[#allocation3 + $0x100] sm:$0xff] %vm354_vm1, %v784_v17  ;;  %850 = vst.msk [vmem:[#allocation3 + $0x108] sm:$0xff] %vm354_vm1, %v817_v27  ;;  %v3256_v29 = vsel %vm3227_vm2, %v3253_v14, %v3255_v23  ;;  %v3745_v35 = vld [vmem:[#allocation3 + $0x10] sm:$0xfe]  ;;  %v3782_v41 = vrot.slane %v2445_v34, 1  ;;  %v22561_v45 = vld [vmem:[#allocation3 + $0x20] sm:$0xff] }
  0x31   : > { %18968 = vmatmul.mubr.msk.bf16.gmra.mrb[8].mxu0 %vm354_vm1, %v3240_v21  ;;  %v22534_v21 = vld [vmem:[#allocation2 + $0x88] sm:$0xff]  ;;  %26310 = vst [vmem:[#allocation5_spill] sm:$0xff] %v22552_v33  ;;  %v3781_v40 = vrot.slane %v3745_v35, 1  ;;  %v22573_v56 = vld [vmem:[#allocation3 + $0x30] sm:$0xff]  ;;  %v22575_v57 = vld [vmem:[#allocation3 + $0x38] sm:$0xff] }
  0x32   : > { %18971 = vmatprep.mubr.msk.bf16.mxu0 %vm354_vm1, %v3242_v25  ;;  %v3257_v24 = vrot.slane %v22534_v21, 1  ;;  %v740_v25 = vrot.slane %v22538_v22, 7  ;;  %v22563_v46 = vld [vmem:[#allocation3 + $0x28] sm:$0xff]  ;;  %v22580_v58 = vld [vmem:[%s26265_s3 + $0x6] sm:$0x3]  ;;  %v3788_v60 = vrot.slane %v22573_v56, 1 }
  0x33   : > { %v3783_v44 = vsel %vm3227_vm2, %v3781_v40, %v3782_v41  ;;  %v3786_v48 = vrot.slane %v22563_v46, 1  ;;  %v22590_v63 = vld [vmem:[#allocation3 + $0x40] sm:$0xff]  ;;  %v22592_v2 = vld [vmem:[#allocation3 + $0x48] sm:$0xff]  ;;  %v22602_v9 = vld [vmem:[#allocation3 + $0x58] sm:$0xff] }
  0x34   : > { %v787_v28 = vsel %vm491_vm3, 0, %v740_v25  ;;  %v3258_v31 = vsel %vm3227_vm2, %v3255_v23, %v3257_v24  ;;  %v3260_v42 = vsel %vm3227_vm2, %v3257_v24, %v26272_v39  ;;  %v3792_v3 = vrot.slane %v22590_v63, 1  ;;  %v22610_v15 = vld [vmem:[#allocation3 + $0x60] sm:$0xff]  ;;  %v22612_v16 = vld [vmem:[#allocation3 + $0x68] sm:$0xff]  ;;  %v22620_v24 = vld [vmem:[#allocation3 + $0x70] sm:$0xff] }
  0x35   : > { %851 = vst.msk [vmem:[#allocation3 + $0x110] sm:$0xff] %vm354_vm1, %v787_v28  ;;  %v3789_v61 = vsel %vm3227_vm2, %v3786_v48, %v3788_v60  ;;  %v3794_v4 = vrot.slane %v22592_v2, 1  ;;  %v3798_v12 = vrot.slane %v22602_v9, 1  ;;  %v3800_v17 = vrot.slane %v22610_v15, 1  ;;  %v22622_v27 = vld [vmem:[#allocation3 + $0x78] sm:$0xff]  ;;  %v22630_v35 = vld [vmem:[#allocation3 + $0x80] sm:$0xff] }
  0x36   : > { %v3804_v28 = vrot.slane %v22620_v24, 1  ;;  %v22632_v40 = vld [vmem:[#allocation3 + $0x88] sm:$0xff]  ;;  %v22655_v32 = vld [vmem:[#allocation3 + $0xa0] sm:$0xff] }
  0x37   : > { %v3795_v6 = vsel %vm3227_vm2, %v3792_v3, %v3794_v4 }
  0x39   : > { %18972 = vmatmul.mubr.msk.bf16.gmra.mrb[12].mxu0 %vm354_vm1, %v3244_v47  ;;  %v3784_v47 = vrot.slane %v22561_v45, 1 }
  0x3a   : > { %18975 = vmatprep.mubr.msk.bf16.mxu0 %vm354_vm1, %v3246_v52  ;;  %v4429_v52 = vsel %vm1015_vm0, %v22395_v43, 0  ;;  %v3790_v43 = vrot.slane %v22575_v57, 1 }
  0x3b   : > { %v3785_v49 = vsel %vm3227_vm2, %v3782_v41, %v3784_v47  ;;  %v3787_v55 = vsel %vm3227_vm2, %v3784_v47, %v3786_v48  ;;  %v3808_v41 = vrot.slane %v22630_v35, 1  ;;  %v22640_v48 = vld [vmem:[#allocation3 + $0x90] sm:$0xff] }
  0x3c   : > { %v3791_v62 = vsel %vm3227_vm2, %v3788_v60, %v3790_v43  ;;  %v3793_v5 = vsel %vm3227_vm2, %v3790_v43, %v3792_v3  ;;  %v22123_v43 = vld [vmem:[%s22339_s18 + $0x40] sm:$0xff]  }
  0x41   : > { %18976 = vmatmul.mubr.msk.bf16.gmra.mrb[16].mxu0 %vm354_vm1, %v3248_v7  ;;  %v22600_v7 = vld [vmem:[#allocation3 + $0x50] sm:$0xff] }
  0x42   : > { %18979 = vmatprep.mubr.msk.bf16.mxu0 %vm354_vm1, %v3250_v10  ;;  %v3796_v10 = vrot.slane %v22600_v7, 1 }
  0x44   : > { %v3797_v13 = vsel %vm3227_vm2, %v3794_v4, %v3796_v10  ;;  %v3799_v14 = vsel %vm3227_vm2, %v3796_v10, %v3798_v12  ;;  %v22658_v4 = vld [vmem:[#allocation3 + $0xa8] sm:$0xff] }
  0x45   : > { %v3818_v10 = vrot.slane %v22658_v4, 1 }
  0x49   : > { %18980 = vmatmul.mubr.msk.bf16.gmra.mrb[20].mxu0 %vm354_vm1, %v3252_v18  ;;  %v3802_v18 = vrot.slane %v22612_v16, 1 }
  0x4a   : > { %18983 = vmatprep.mubr.msk.bf16.mxu0 %vm354_vm1, %v3254_v19  ;;  %v3801_v19 = vsel %vm3227_vm2, %v3798_v12, %v3800_v17  ;;  %v22124_v12 = vld [vmem:[%s22339_s18 + $0x48] sm:$0xff]  }
  0x4b   : > { %v3803_v23 = vsel %vm3227_vm2, %v3800_v17, %v3802_v18 }
  0x51   : > { %18984 = vmatmul.mubr.msk.bf16.gmra.mrb[24].mxu0 %vm354_vm1, %v3256_v29  ;;  %v3806_v29 = vrot.slane %v22622_v27, 1 }
  0x52   : > { %18987 = vmatprep.mubr.msk.bf16.mxu0 %vm354_vm1, %v3258_v31  ;;  %v3805_v31 = vsel %vm3227_vm2, %v3802_v18, %v3804_v28  ;;  %v22670_v18 = vld [vmem:[#allocation3 + $0xb0] sm:$0xff] }
  0x53   : > { %v3807_v34 = vsel %vm3227_vm2, %v3804_v28, %v3806_v29 }
  0x59   : > { %18988 = vmatmul.mubr.msk.bf16.gmra.mrb[28].mxu0 %vm354_vm1, %v3260_v42  ;;  %v3810_v42 = vrot.slane %v22632_v40, 1 }
  0x5a   : > { %19025 = vmatprep.mubr.msk.bf16.mxu0 %vm354_vm1, %v3783_v44  ;;  %v3809_v44 = vsel %vm3227_vm2, %v3806_v29, %v3808_v41  ;;  %v3820_v29 = vrot.slane %v22670_v18, 1 }
  0x5b   : > { %v3811_v47 = vsel %vm3227_vm2, %v3808_v41, %v3810_v42 }
  0x61   : > { %19026 = vmatmul.mubr.msk.bf16.vlgmr.msra.gmra.mrb[0].mxu0 %vm354_vm1, %v3785_v49  ;;  %v22642_v49 = vld [vmem:[#allocation3 + $0x98] sm:$0xff] }
  0x62   : > { %19090 = vmatpush3.bf16.msra.mxu0 %v4429_v52  ;;  %19029 = vmatprep.mubr.msk.bf16.mxu0 %vm354_vm1, %v3787_v55  ;;  %v555_v52 = vsel %vm491_vm3, %v482_v38, 0  ;;  %v3812_v55 = vrot.slane %v22640_v48, 1  ;;  %v3814_v60 = vrot.slane %v22642_v49, 1 }
  0x63   : > { %22069 = vmatprep.subr.msk.bf16.mxu0 %vm1015_vm0, %v22580_v58  ;;  %588 = vst.msk [vmem:[#allocation2 + $0x98] sm:$0xff] %vm354_vm1, %v555_v52 }
  0x64   : > { %v3815_v3 = vsel %vm3227_vm2, %v3812_v55, %v3814_v60 }
  0x69   : > { %19030 = vmatmul.mubr.msk.bf16.gmra.mrb[4].mxu0 %vm354_vm1, %v3789_v61  ;;  %v483_v61 = vrot.slane %v22123_v43, 7 }
  0x6a   : > { %19033 = vmatprep.mubr.msk.bf16.mxu0 %vm354_vm1, %v3791_v62  ;;  %v3813_v62 = vsel %vm3227_vm2, %v3810_v42, %v3812_v55  ;;  %v3821_v42 = vsel %vm3227_vm2, %v3818_v10, %v3820_v29  ;;  %v22688_v55 = vld [vmem:[#allocation3 + $0xc8] sm:$0xff] }
  0x6b   : > { %v518_v38 = vsel %vm491_vm3, 0, %v483_v61 }
  0x6c   : > { %589 = vst.msk [vmem:[#allocation2 + $0xa0] sm:$0xff] %vm354_vm1, %v518_v38 }
  0x71   : > { %19034 = vmatmul.mubr.msk.bf16.gmra.mrb[8].mxu0 %vm354_vm1, %v3793_v5  ;;  %v557_v5 = vsel %vm491_vm3, %v483_v61, 0  ;;  %v3826_v61 = vrot.slane %v22688_v55, 1 }
  0x72   : > { %19037 = vmatprep.mubr.msk.bf16.mxu0 %vm354_vm1, %v3795_v6  ;;  %590 = vst.msk [vmem:[#allocation2 + $0xa8] sm:$0xff] %vm354_vm1, %v557_v5  ;;  %v3816_v6 = vrot.slane %v22655_v32, 1 }
  0x74   : > { %v3819_v17 = vsel %vm3227_vm2, %v3816_v6, %v3818_v10 }
  0x79   : > { %19038 = vmatmul.mubr.msk.bf16.gmra.mrb[12].mxu0 %vm354_vm1, %v3797_v13  ;;  %v484_v13 = vrot.slane %v22124_v12, 7  ;;  %v22703_v12 = vld [vmem:[#allocation3 + $0xd8] sm:$0xff] }
  0x7a   : > { %19041 = vmatprep.mubr.msk.bf16.mxu0 %vm354_vm1, %v3799_v14  ;;  %v3817_v14 = vsel %vm3227_vm2, %v3814_v60, %v3816_v6  ;;  %v22700_v6 = vld [vmem:[#allocation3 + $0xd0] sm:$0xff] }
  0x7b   : > { %v559_v28 = vsel %vm491_vm3, %v484_v13, 0 }
  0x7c   : > { %592 = vst.msk [vmem:[#allocation2 + $0xb8] sm:$0xff] %vm354_vm1, %v559_v28 }
  0x81   : > { %19042 = vmatmul.mubr.msk.bf16.gmra.mrb[16].mxu0 %vm354_vm1, %v3801_v19  ;;  %v521_v19 = vsel %vm491_vm3, 0, %v484_v13 }
  0x82   : > { %19045 = vmatprep.mubr.msk.bf16.mxu0 %vm354_vm1, %v3803_v23  ;;  %v22673_v23 = vld [vmem:[#allocation3 + $0xb8] sm:$0xff]  ;;  %591 = vst.msk [vmem:[#allocation2 + $0xb0] sm:$0xff] %vm354_vm1, %v521_v19  ;;  %v22127_v19 = vld [vmem:[%s22339_s18 + $0x60] sm:$0xff]  }
  0x83   : > { %v487_v28 = vrot.slane %v22127_v19, 7  ;;  %v22129_v19 = vld [vmem:[%s22339_s18 + $0x70] sm:$0xff]  }
  0x89   : > { %19046 = vmatmul.mubr.msk.bf16.gmra.mrb[20].mxu0 %vm354_vm1, %v3805_v31  ;;  %v3822_v31 = vrot.slane %v22673_v23, 1 }
  0x8a   : > { %19049 = vmatprep.mubr.msk.bf16.mxu0 %vm354_vm1, %v3807_v34  ;;  %v22125_v34 = vld [vmem:[%s22339_s18 + $0x50] sm:$0xff]  }
  0x8b   : > { %v485_v41 = vrot.slane %v22125_v34, 7  ;;  %v22715_v34 = vld [vmem:[#allocation3 + $0xe0] sm:$0xff] }
  0x8d   : > { %v524_v52 = vsel %vm491_vm3, 0, %v485_v41  ;;  %v561_v60 = vsel %vm491_vm3, %v485_v41, 0  ;;  %v530_v41 = vsel %vm491_vm3, 0, %v487_v28 }
  0x8e   : > { %593 = vst.msk [vmem:[#allocation2 + $0xc0] sm:$0xff] %vm354_vm1, %v524_v52  ;;  %594 = vst.msk [vmem:[#allocation2 + $0xc8] sm:$0xff] %vm354_vm1, %v561_v60  ;;  %v3832_v52 = vrot.slane %v22715_v34, 1 }
  0x8f   : > { %597 = vst.msk [vmem:[#allocation2 + $0xe0] sm:$0xff] %vm354_vm1, %v530_v41  ;;  %v22745_v41 = vld [vmem:[#allocation3 + $0x100] sm:$0xff] }
  0x91   : > { %19050 = vmatmul.mubr.msk.bf16.gmra.mrb[24].mxu0 %vm354_vm1, %v3809_v44  ;;  %v3823_v44 = vsel %vm3227_vm2, %v3820_v29, %v3822_v31 }
  0x92   : > { %19053 = vmatprep.mubr.msk.bf16.mxu0 %vm354_vm1, %v3811_v47  ;;  %v22685_v47 = vld [vmem:[#allocation3 + $0xc0] sm:$0xff] }
  0x93   : > { %v3824_v43 = vrot.slane %v22685_v47, 1 }
  0x95   : > { %v3825_v38 = vsel %vm3227_vm2, %v3822_v31, %v3824_v43  ;;  %v3827_v5 = vsel %vm3227_vm2, %v3824_v43, %v3826_v61  ;;  %v22128_v43 = vld [vmem:[%s22339_s18 + $0x68] sm:$0xff]  }
  0x99   : > { %19054 = vmatmul.mubr.msk.bf16.gmra.mrb[28].mxu0 %vm354_vm1, %v3813_v62  ;;  %v22126_v62 = vld [vmem:[%s22339_s18 + $0x58] sm:$0xff]  }
  0x9a   : > { %19057 = vmatprep.mubr.msk.bf16.mxu0 %vm354_vm1, %v3815_v3  ;;  %v486_v3 = vrot.slane %v22126_v62, 7 }
  0x9c   : > { %v527_v10 = vsel %vm491_vm3, 0, %v486_v3  ;;  %v563_v13 = vsel %vm491_vm3, %v486_v3, 0 }
  0x9d   : > { %595 = vst.msk [vmem:[#allocation2 + $0xd0] sm:$0xff] %vm354_vm1, %v527_v10  ;;  %596 = vst.msk [vmem:[#allocation2 + $0xd8] sm:$0xff] %vm354_vm1, %v563_v13  ;;  %v22733_v10 = vld [vmem:[#allocation3 + $0xf8] sm:$0xff] }
  0xa1   : > { %19058 = vmatmul.mubr.msk.bf16.gmra.mrb[32].mxu0 %vm354_vm1, %v3817_v14  ;;  %v3828_v14 = vrot.slane %v22700_v6, 1 }
  0xa2   : > { %19061 = vmatprep.mubr.msk.bf16.mxu0 %vm354_vm1, %v3819_v17  ;;  %v3830_v17 = vrot.slane %v22703_v12, 1 }
  0xa3   : > { %v3829_v29 = vsel %vm3227_vm2, %v3826_v61, %v3828_v14  ;;  %v488_v61 = vrot.slane %v22128_v43, 7 }
  0xa4   : > { %v3831_v31 = vsel %vm3227_vm2, %v3828_v14, %v3830_v17  ;;  %v3833_v62 = vsel %vm3227_vm2, %v3830_v17, %v3832_v52  ;;  %v3838_v17 = vrot.slane %v22733_v10, 1 }
  0xa5   : > { %v567_v13 = vsel %vm491_vm3, %v488_v61, 0 }
  0xa6   : > { %600 = vst.msk [vmem:[#allocation2 + $0xf8] sm:$0xff] %vm354_vm1, %v567_v13 }
  0xa9   : > { %19062 = vmatmul.mubr.msk.bf16.gmra.mrb[36].mxu0 %vm354_vm1, %v3821_v42  ;;  %v22718_v42 = vld [vmem:[#allocation3 + $0xe8] sm:$0xff] }
  0xaa   : > { %19065 = vmatprep.mubr.msk.bf16.mxu0 %vm354_vm1, %v3823_v44  ;;  %v565_v44 = vsel %vm491_vm3, %v487_v28, 0  ;;  %v3834_v60 = vrot.slane %v22718_v42, 1  ;;  %v489_v28 = vrot.slane %v22129_v19, 7 }
  0xab   : > { %598 = vst.msk [vmem:[#allocation2 + $0xe8] sm:$0xff] %vm354_vm1, %v565_v44 }
  0xac   : > { %v3835_v3 = vsel %vm3227_vm2, %v3832_v52, %v3834_v60  ;;  %v536_v44 = vsel %vm491_vm3, 0, %v489_v28  ;;  %v22748_v52 = vld [vmem:[#allocation3 + $0x108] sm:$0xff]  ;;  %v569_v43 = vsel %vm491_vm3, %v489_v28, 0 }
  0xad   : > { %601 = vst.msk [vmem:[#allocation2 + $0x100] sm:$0xff] %vm354_vm1, %v536_v44  ;;  %602 = vst.msk [vmem:[#allocation2 + $0x108] sm:$0xff] %vm354_vm1, %v569_v43  ;;  %v17103_v44 = vld [vmem:[%s26264_s2 + $0x8] sm:$0x3] }
  0xae   : > { %v5662_v22 = vsel %vm1015_vm0, %v17103_v44, 0 }
  0xb1   : > { %19066 = vmatmul.mubr.msk.bf16.gmra.mrb[40].mxu0 %vm354_vm1, %v3825_v38  ;;  %v22730_v38 = vld [vmem:[#allocation3 + $0xf0] sm:$0xff] }
  0xb2   : > { %19069 = vmatprep.mubr.msk.bf16.mxu0 %vm354_vm1, %v3827_v5  ;;  %v533_v5 = vsel %vm491_vm3, 0, %v488_v61  ;;  %v3836_v14 = vrot.slane %v22730_v38, 1  ;;  %v3842_v61 = vrot.slane %v22748_v52, 1 }
  0xb3   : > { %599 = vst.msk [vmem:[#allocation2 + $0xf0] sm:$0xff] %vm354_vm1, %v533_v5 }
  0xb9   : > { %19070 = vmatmul.mubr.msk.bf16.gmra.mrb[44].mxu0 %vm354_vm1, %v3829_v29  ;;  %v3837_v29 = vsel %vm3227_vm2, %v3834_v60, %v3836_v14  ;;  %v3840_v60 = vrot.slane %v22745_v41, 1 }
  0xba   : > { %19073 = vmatprep.mubr.msk.bf16.mxu0 %vm354_vm1, %v3831_v31  ;;  %v3839_v31 = vsel %vm3227_vm2, %v3836_v14, %v3838_v17  ;;  %v2476_v14 = vld [vmem:[#allocation3 + $0x110] sm:$0x1] }
  0xbb   : > { %v3841_v5 = vsel %vm3227_vm2, %v3838_v17, %v3840_v60  ;;  %v3843_v13 = vsel %vm3227_vm2, %v3840_v60, %v3842_v61  ;;  %v4915_v17 = vsel %vm1015_vm0, %v22580_v58, 0  ;;  %v22860_v58 = vld [vmem:[#allocation2 + $0x108] sm:$0xff]  ;;  %v819_v60 = vsel %vm491_vm3, %v740_v25, 0 }
  0xbc   : > { %852 = vst.msk [vmem:[#allocation3 + $0x118] sm:$0xff] %vm354_vm1, %v819_v60  ;;  %v17136_v25 = vld [vmem:[%s26265_s3 + $0x8] sm:$0x3] }
  0xc1   : > { %19074 = vmatmul.mubr.msk.bf16.gmra.mrb[48].mxu0 %vm354_vm1, %v3833_v62  ;;  %v22130_v62 = vld [vmem:[%s22339_s18 + $0x78] sm:$0xff]  }
  0xc2   : > { %19077 = vmatprep.mubr.msk.bf16.mxu0 %vm354_vm1, %v3835_v3  ;;  %v490_v3 = vrot.slane %v22130_v62, 7  ;;  %v22976_v62 = vld [vmem:[%s26264_s2 + $0xa] sm:$0x3] }
  0xc4   : > { %v539_v19 = vsel %vm491_vm3, 0, %v490_v3  ;;  %v571_v28 = vsel %vm491_vm3, %v490_v3, 0 }
  0xc5   : > { %603 = vst.msk [vmem:[#allocation2 + $0x110] sm:$0xff] %vm354_vm1, %v539_v19  ;;  %604 = vst.msk [vmem:[#allocation2 + $0x118] sm:$0xff] %vm354_vm1, %v571_v28  ;;  %v22984_v28 = vld [vmem:[#allocation2 + $0x58] sm:$0xff] }
  0xc9   : > { %19078 = vmatmul.mubr.msk.bf16.gmra.mrb[52].mxu0 %vm354_vm1, %v3837_v29  ;;  %v3844_v29 = vrot.slane %v2476_v14, 1 }
  0xca   : > { %19081 = vmatprep.mubr.msk.bf16.mxu0 %vm354_vm1, %v3839_v31 }
  0xcb   : > { %v3845_v31 = vsel %vm3227_vm2, %v3842_v61, %v3844_v29 }
  0xcc   : > { %v22862_v43 = vld [vmem:[#allocation2 + $0x110] sm:$0xff]  ;;  %v22872_v61 = vld [vmem:[#allocation2 + $0x118] sm:$0xff] }
  0xd1   : > { %19082 = vmatmul.mubr.msk.bf16.gmra.mrb[56].mxu0 %vm354_vm1, %v3841_v5 }
  0xd2   : > { %19085 = vmatprep.mubr.msk.bf16.mxu0 %vm354_vm1, %v3843_v13  ;;  %v22980_v13 = vld [vmem:[#allocation2 + $0x50] sm:$0xff] }
  0xd3   : > { %v5353_v29 = vshll.u32 %v22980_v13, 16  ;;  %v5357_v60 = vshrl.u32 %v22980_v13, 16 }
  0xd9   : > { %19086 = vmatmul.mubr.msk.bf16.gmra.mrb[60].mxu0 %vm354_vm1, %v3845_v31 }
  0xda   : > { %19091 = vmatprep.mubr.msk.bf16.mxu0 %vm354_vm1, %v22381_v36  ;;  %v22804_v36 = vld [vmem:[#allocation2 + $0x98] sm:$0xff] }
  0xe1   : > { %19092 = vmatmul.mubr.msk.bf16.vlgmr.msra.gmra.mrb[0].mxu0 %vm354_vm1, %v22383_v37  ;;  %v22806_v37 = vld [vmem:[#allocation2 + $0xa0] sm:$0xff] }
  0xe2   : > { %19156 = vmatpush3.bf16.msra.mxu0 %v4915_v17  ;;  %19095 = vmatprep.mubr.msk.bf16.mxu0 %vm354_vm1, %v22406_v50  ;;  %v22812_v50 = vld [vmem:[#allocation2 + $0xa8] sm:$0xff] }
  0xe3   : > { %22070 = vmatprep.subr.msk.bf16.mxu0 %vm1015_vm0, %v17103_v44 }
  0xe9   : > { %19096 = vmatmul.mubr.msk.bf16.gmra.mrb[4].mxu0 %vm354_vm1, %v22408_v51  ;;  %v22814_v51 = vld [vmem:[#allocation2 + $0xb0] sm:$0xff] }
  0xea   : > { %19099 = vmatprep.mubr.msk.bf16.mxu0 %vm354_vm1, %v22424_v59  ;;  %v22820_v59 = vld [vmem:[#allocation2 + $0xb8] sm:$0xff] }
  0xf1   : > { %19100 = vmatmul.mubr.msk.bf16.gmra.mrb[8].mxu0 %vm354_vm1, %v22429_v0  ;;  %v22822_v0 = vld [vmem:[#allocation2 + $0xc0] sm:$0xff] }
  0xf2   : > { %19103 = vmatprep.mubr.msk.bf16.mxu0 %vm354_vm1, %v22460_v26  ;;  %v22828_v26 = vld [vmem:[#allocation2 + $0xc8] sm:$0xff] }
  0xf9   : > { %19104 = vmatmul.mubr.msk.bf16.gmra.mrb[12].mxu0 %vm354_vm1, %v22466_v30  ;;  %v22830_v30 = vld [vmem:[#allocation2 + $0xd0] sm:$0xff] }
  0xfa   : > { %19107 = vmatprep.mubr.msk.bf16.mxu0 %vm354_vm1, %v22491_v53  ;;  %v22836_v53 = vld [vmem:[#allocation2 + $0xd8] sm:$0xff] }
 0x101   : > { %19108 = vmatmul.mubr.msk.bf16.gmra.mrb[16].mxu0 %vm354_vm1, %v22493_v54  ;;  %v22838_v54 = vld [vmem:[#allocation2 + $0xe0] sm:$0xff] }
 0x102   : > { %19111 = vmatprep.mubr.msk.bf16.mxu0 %vm354_vm1, %v22512_v8  ;;  %v22844_v8 = vld [vmem:[#allocation2 + $0xe8] sm:$0xff] }
 0x109   : > { %19112 = vmatmul.mubr.msk.bf16.gmra.mrb[20].mxu0 %vm354_vm1, %v22519_v11  ;;  %v22846_v11 = vld [vmem:[#allocation2 + $0xf0] sm:$0xff] }
 0x10a   : > { %19115 = vmatprep.mubr.msk.bf16.mxu0 %vm354_vm1, %v22532_v20  ;;  %v22852_v20 = vld [vmem:[#allocation2 + $0xf8] sm:$0xff] }
 0x111   : > { %19116 = vmatmul.mubr.msk.bf16.gmra.mrb[24].mxu0 %vm354_vm1, %v22534_v21  ;;  %v22854_v21 = vld [vmem:[#allocation2 + $0x100] sm:$0xff] }
 0x112   : > { %19119 = vmatprep.mubr.msk.bf16.mxu0 %vm354_vm1, %v22552_v33 }
 0x119   : > { %19120 = vmatmul.mubr.msk.bf16.gmra.mrb[28].mxu0 %vm354_vm1, %v22804_v36 }
 0x11a   : > { %19123 = vmatprep.mubr.msk.bf16.mxu0 %vm354_vm1, %v22806_v37 }
 0x121   : > { %19124 = vmatmul.mubr.msk.bf16.gmra.mrb[32].mxu0 %vm354_vm1, %v22812_v50 }
 0x122   : > { %19127 = vmatprep.mubr.msk.bf16.mxu0 %vm354_vm1, %v22814_v51 }
 0x129   : > { %19128 = vmatmul.mubr.msk.bf16.gmra.mrb[36].mxu0 %vm354_vm1, %v22820_v59 }
 0x12a   : > { %19131 = vmatprep.mubr.msk.bf16.mxu0 %vm354_vm1, %v22822_v0 }
 0x131   : > { %19132 = vmatmul.mubr.msk.bf16.gmra.mrb[40].mxu0 %vm354_vm1, %v22828_v26 }
 0x132   : > { %19135 = vmatprep.mubr.msk.bf16.mxu0 %vm354_vm1, %v22830_v30 }
 0x139   : > { %19136 = vmatmul.mubr.msk.bf16.gmra.mrb[44].mxu0 %vm354_vm1, %v22836_v53 }
 0x13a   : > { %19139 = vmatprep.mubr.msk.bf16.mxu0 %vm354_vm1, %v22838_v54 }
 0x141   : > { %19140 = vmatmul.mubr.msk.bf16.gmra.mrb[48].mxu0 %vm354_vm1, %v22844_v8 }
 0x142   : > { %19143 = vmatprep.mubr.msk.bf16.mxu0 %vm354_vm1, %v22846_v11 }
 0x149   : > { %19144 = vmatmul.mubr.msk.bf16.gmra.mrb[52].mxu0 %vm354_vm1, %v22852_v20 }
 0x14a   : > { %19147 = vmatprep.mubr.msk.bf16.mxu0 %vm354_vm1, %v22854_v21 }
 0x151   : > { %19148 = vmatmul.mubr.msk.bf16.gmra.mrb[56].mxu0 %vm354_vm1, %v22860_v58 }
 0x152   : > { %19151 = vmatprep.mubr.msk.bf16.mxu0 %vm354_vm1, %v22862_v43 }
 0x159   : > { %19152 = vmatmul.mubr.msk.bf16.gmra.mrb[60].mxu0 %vm354_vm1, %v22872_v61 }
 0x15a   : > { %19157 = vmatprep.mubr.msk.bf16.mxu0 %vm354_vm1, %v22561_v45  ;;  %v5270_v45 = vld [vmem:[#allocation2 + $0x20] sm:$0xff] }
 0x161   : > { %19158 = vmatmul.mubr.msk.bf16.vlgmr.msra.gmra.mrb[0].mxu0 %vm354_vm1, %v22563_v46  ;;  %v5308_v46 = vshll.u32 %v5270_v45, 16 }
 0x162   : > { %19222 = vmatpush3.bf16.msra.mxu0 %v5662_v22  ;;  %19161 = vmatprep.mubr.msk.bf16.mxu0 %vm354_vm1, %v22573_v56  ;;  %v22939_v56 = vld [vmem:[#allocation2 + $0x28] sm:$0xff]  ;;  %v5361_v22 = vshll.u32 %v22984_v28, 16 }
 0x163   : > { %22071 = vmatprep.subr.msk.bf16.mxu0 %vm1015_vm0, %v17136_v25 }
 0x169   : > { %19162 = vmatmul.mubr.msk.bf16.gmra.mrb[4].mxu0 %vm354_vm1, %v22575_v57  ;;  %v22941_v57 = vld [vmem:[#allocation3 + $0x110] sm:$0xff] }
 0x16a   : > { %19165 = vmatprep.mubr.msk.bf16.mxu0 %vm354_vm1, %v22590_v63  ;;  %v5306_v63 = vshrl.u32 %v5270_v45, 16  ;;  %v6296_v33 = vshrl.u32 %v22941_v57, 16 }
 0x171   : > { %19166 = vmatmul.mubr.msk.bf16.gmra.mrb[8].mxu0 %vm354_vm1, %v22592_v2  ;;  %v5310_v2 = vrot.slane %v5308_v46, 1  ;;  %v22994_v46 = vld [vmem:[#allocation2 + $0x60] sm:$0xff] }
 0x172   : > { %19169 = vmatprep.mubr.msk.bf16.mxu0 %vm354_vm1, %v22600_v7  ;;  %v5313_v7 = vshll.u32 %v22939_v56, 16 }
 0x179   : > { %19170 = vmatmul.mubr.msk.bf16.gmra.mrb[12].mxu0 %vm354_vm1, %v22602_v9  ;;  %v22948_v9 = vld [vmem:[#allocation2 + $0x30] sm:$0xff] }
 0x17a   : > { %19173 = vmatprep.mubr.msk.bf16.mxu0 %vm354_vm1, %v22610_v15  ;;  %v5311_v15 = vor.u32 %v5310_v2, %v5306_v63  ;;  %v5363_v2 = vrot.slane %v5361_v22, 1 }
 0x181   : > { %19174 = vmatmul.mubr.msk.bf16.gmra.mrb[16].mxu0 %vm354_vm1, %v22612_v16  ;;  %v5315_v16 = vrot.slane %v5313_v7, 1  ;;  %v22996_v7 = vld [vmem:[#allocation2 + $0x68] sm:$0xff] }
 0x182   : > { %19177 = vmatprep.mubr.msk.bf16.mxu0 %vm354_vm1, %v22620_v24  ;;  %v22950_v24 = vld [vmem:[#allocation2 + $0x38] sm:$0xff] }
 0x189   : > { %19178 = vmatmul.mubr.msk.bf16.gmra.mrb[20].mxu0 %vm354_vm1, %v22622_v27  ;;  %v5321_v27 = vshll.u32 %v22948_v9, 16 }
 0x18a   : > { %19181 = vmatprep.mubr.msk.bf16.mxu0 %vm354_vm1, %v22630_v35  ;;  %v22953_v35 = vld [vmem:[#allocation3 + $0x118] sm:$0xff] }
 0x191   : > { %19182 = vmatmul.mubr.msk.bf16.gmra.mrb[24].mxu0 %vm354_vm1, %v22632_v40  ;;  %v5317_v40 = vshrl.u32 %v22939_v56, 16 }
 0x192   : > { %19185 = vmatprep.mubr.msk.bf16.mxu0 %vm354_vm1, %v22640_v48  ;;  %v5316_v48 = vsel %vm1731_vm4, %v5311_v15, %v5315_v16  ;;  %v5369_v15 = vshll.u32 %v22994_v46, 16 }
 0x199   : > { %19186 = vmatmul.mubr.msk.bf16.gmra.mrb[28].mxu0 %vm354_vm1, %v22642_v49  ;;  %v5325_v49 = vshrl.u32 %v22948_v9, 16 }
 0x19a   : > { %19189 = vmatprep.mubr.msk.bf16.mxu0 %vm354_vm1, %v22655_v32  ;;  %v5329_v32 = vshll.u32 %v22950_v24, 16 }
 0x1a1   : > { %19190 = vmatmul.mubr.msk.bf16.gmra.mrb[32].mxu0 %vm354_vm1, %v22658_v4  ;;  %v5323_v4 = vrot.slane %v5321_v27, 1  ;;  %v5365_v27 = vshrl.u32 %v22984_v28, 16 }
 0x1a2   : > { %19193 = vmatprep.mubr.msk.bf16.mxu0 %vm354_vm1, %v22670_v18  ;;  %v5319_v18 = vor.u32 %v5317_v40, %v5315_v16 }
 0x1a9   : > { %19194 = vmatmul.mubr.msk.bf16.gmra.mrb[36].mxu0 %vm354_vm1, %v22673_v23  ;;  %v22962_v23 = vld [vmem:[#allocation2 + $0x40] sm:$0xff] }
 0x1aa   : > { %19197 = vmatprep.mubr.msk.bf16.mxu0 %vm354_vm1, %v22685_v47  ;;  %v5327_v47 = vor.u32 %v5325_v49, %v5323_v4  ;;  %v5377_v49 = vshll.u32 %v22996_v7, 16 }
 0x1b1   : > { %19198 = vmatmul.mubr.msk.bf16.gmra.mrb[40].mxu0 %vm354_vm1, %v22688_v55  ;;  %v5331_v55 = vrot.slane %v5329_v32, 1  ;;  %v5371_v32 = vrot.slane %v5369_v15, 1  ;;  %v23030_v15 = vld [vmem:[#allocation2 + $0x90] sm:$0xff] }
 0x1b2   : > { %19201 = vmatprep.mubr.msk.bf16.mxu0 %vm354_vm1, %v22700_v6  ;;  %v22964_v6 = vld [vmem:[#allocation2 + $0x48] sm:$0xff] }
 0x1b3   : > { %v5349_v17 = vshrl.u32 %v22964_v6, 16 }
 0x1b9   : > { %19202 = vmatmul.mubr.msk.bf16.gmra.mrb[44].mxu0 %vm354_vm1, %v22703_v12  ;;  %v5337_v12 = vshll.u32 %v22962_v23, 16 }
 0x1ba   : > { %19205 = vmatprep.mubr.msk.bf16.mxu0 %vm354_vm1, %v22715_v34  ;;  %v5324_v34 = vsel %vm1731_vm4, %v5319_v18, %v5323_v4  ;;  %v5367_v4 = vor.u32 %v5365_v27, %v5363_v2  ;;  %v23006_v18 = vld [vmem:[#allocation2 + $0x70] sm:$0xff] }
 0x1bb   : > { %v5339_v3 = vrot.slane %v5337_v12, 1  ;;  %v23008_v12 = vld [vmem:[#allocation2 + $0x78] sm:$0xff] }
 0x1c1   : > { %19206 = vmatmul.mubr.msk.bf16.gmra.mrb[48].mxu0 %vm354_vm1, %v22718_v42  ;;  %v5333_v42 = vshrl.u32 %v22950_v24, 16 }
 0x1c2   : > { %19209 = vmatprep.mubr.msk.bf16.mxu0 %vm354_vm1, %v22730_v38  ;;  %v6409_v38 = vsel %vm1015_vm0, %v17136_v25, 0  ;;  %v5355_v25 = vrot.slane %v5353_v29, 1 }
 0x1c3   : > { %v5335_v5 = vor.u32 %v5333_v42, %v5331_v55  ;;  %v5372_v42 = vsel %vm1731_vm4, %v5367_v4, %v5371_v32  ;;  %v5421_v4 = vshrl.u32 %v23030_v15, 16 }
 0x1c4   : > { %v5359_v63 = vor.u32 %v5357_v60, %v5355_v25  ;;  %v5397_v60 = vshrl.u32 %v23008_v12, 16 }
 0x1c5   : > { %v5340_v31 = vsel %vm1731_vm4, %v5335_v5, %v5339_v3 }
 0x1c6   : > { %v5364_v40 = vsel %vm1731_vm4, %v5359_v63, %v5363_v2 }
 0x1c9   : > { %19210 = vmatmul.mubr.msk.bf16.gmra.mrb[52].mxu0 %vm354_vm1, %v22733_v10  ;;  %v5332_v10 = vsel %vm1731_vm4, %v5327_v47, %v5331_v55  ;;  %v5379_v55 = vrot.slane %v5377_v49, 1 }
 0x1ca   : > { %19213 = vmatprep.mubr.msk.bf16.mxu0 %vm354_vm1, %v22745_v41  ;;  %v5341_v41 = vshrl.u32 %v22962_v23, 16 }
 0x1cc   : > { %v5343_v14 = vor.u32 %v5341_v41, %v5339_v3  ;;  %v5389_v41 = vshrl.u32 %v23006_v18, 16 }
 0x1d1   : > { %19214 = vmatmul.mubr.msk.bf16.gmra.mrb[56].mxu0 %vm354_vm1, %v22748_v52  ;;  %v5345_v52 = vshll.u32 %v22964_v6, 16 }
 0x1d2   : > { %19217 = vmatprep.mubr.msk.bf16.mxu0 %vm354_vm1, %v22941_v57 }
 0x1d3   : > { %v5347_v19 = vrot.slane %v5345_v52, 1  ;;  %v5393_v52 = vshll.u32 %v23008_v12, 16 }
 0x1d5   : > { %v5348_v44 = vsel %vm1731_vm4, %v5343_v14, %v5347_v19  ;;  %v5351_v45 = vor.u32 %v5349_v17, %v5347_v19  ;;  %v23018_v14 = vld [vmem:[#allocation2 + $0x80] sm:$0xff]  ;;  %v5395_v29 = vrot.slane %v5393_v52, 1  ;;  %v5429_v52 = vshrl.u32 %v22804_v36, 16 }
 0x1d6   : > { %v5401_v17 = vshll.u32 %v23018_v14, 16 }
 0x1d7   : > { %v5356_v16 = vsel %vm1731_vm4, %v5351_v45, %v5355_v25  ;;  %v5405_v25 = vshrl.u32 %v23018_v14, 16  ;;  %v5399_v2 = vor.u32 %v5397_v60, %v5395_v29 }
 0x1d8   : > { %v5403_v63 = vrot.slane %v5401_v17, 1 }
 0x1d9   : > { %19218 = vmatmul.mubr.msk.bf16.gmra.mrb[60].mxu0 %vm354_vm1, %v22953_v35 }
 0x1da   : > { %19223 = vmatprep.mubr.msk.bf16.mxu0 %vm354_vm1, %v5316_v48  ;;  %v5373_v48 = vshrl.u32 %v22994_v46, 16 }
 0x1dc   : > { %v5375_v47 = vor.u32 %v5373_v48, %v5371_v32  ;;  %v5404_v48 = vsel %vm1731_vm4, %v5399_v2, %v5403_v63 }
 0x1e1   : > { %19224 = vmatmul.mubr.msk.bf16.vlgmr.msra.gmra.mrb[0].mxu0 %vm354_vm1, %v5324_v34  ;;  %v5385_v34 = vshll.u32 %v23006_v18, 16 }
 0x1e2   : > { %19288 = vmatpush3.bf16.msra.mxu0 %v6409_v38  ;;  %19227 = vmatprep.mubr.msk.bf16.mxu0 %vm354_vm1, %v5332_v10  ;;  %v5381_v38 = vshrl.u32 %v22996_v7, 16  ;;  %v5380_v10 = vsel %vm1731_vm4, %v5375_v47, %v5379_v55  ;;  %v5425_v47 = vshll.u32 %v22804_v36, 16  ;;  %v5445_v36 = vshrl.u32 %v22812_v50, 16 }
 0x1e3   : > { %22072 = vmatprep.subr.msk.bf16.mxu0 %vm1015_vm0, %v22976_v62  ;;  %v5387_v3 = vrot.slane %v5385_v34, 1 }
 0x1e4   : > { %v5383_v5 = vor.u32 %v5381_v38, %v5379_v55  ;;  %v5427_v38 = vrot.slane %v5425_v47, 1 }
 0x1e5   : > { %v5391_v19 = vor.u32 %v5389_v41, %v5387_v3 }
 0x1e6   : > { %v5431_v17 = vor.u32 %v5429_v52, %v5427_v38  ;;  %v5489_v52 = vshll.u32 %v22836_v53, 16 }
 0x1e7   : > { %v5396_v22 = vsel %vm1731_vm4, %v5391_v19, %v5395_v29  ;;  %v5441_v19 = vshll.u32 %v22812_v50, 16  ;;  %v5461_v50 = vshrl.u32 %v22820_v59, 16 }
 0x1e9   : > { %19228 = vmatmul.mubr.msk.bf16.gmra.mrb[4].mxu0 %vm354_vm1, %v5340_v31  ;;  %v23020_v31 = vld [vmem:[#allocation2 + $0x88] sm:$0xff]  ;;  %v5443_v60 = vrot.slane %v5441_v19, 1 }
 0x1ea   : > { %19231 = vmatprep.mubr.msk.bf16.mxu0 %vm354_vm1, %v5348_v44  ;;  %v5388_v44 = vsel %vm1731_vm4, %v5383_v5, %v5387_v3  ;;  %v5409_v45 = vshll.u32 %v23020_v31, 16  ;;  %v5413_v49 = vshrl.u32 %v23020_v31, 16  ;;  %v5437_v5 = vshrl.u32 %v22806_v37, 16 }
 0x1ec   : > { %v5411_v27 = vrot.slane %v5409_v45, 1 }
 0x1ee   : > { %v5415_v34 = vor.u32 %v5413_v49, %v5411_v27 }
 0x1f1   : > { %19232 = vmatmul.mubr.msk.bf16.gmra.mrb[8].mxu0 %vm354_vm1, %v5356_v16  ;;  %v5407_v16 = vor.u32 %v5405_v25, %v5403_v63  ;;  %v5457_v63 = vshll.u32 %v22820_v59, 16  ;;  %v5477_v59 = vshrl.u32 %v22828_v26, 16 }
 0x1f2   : > { %19235 = vmatprep.mubr.msk.bf16.mxu0 %vm354_vm1, %v5364_v40  ;;  %v5417_v40 = vshll.u32 %v23030_v15, 16 }
 0x1f3   : > { %v5412_v32 = vsel %vm1731_vm4, %v5407_v16, %v5411_v27  ;;  %v5447_v16 = vor.u32 %v5445_v36, %v5443_v60 }
 0x1f4   : > { %v5419_v55 = vrot.slane %v5417_v40, 1  ;;  %v5459_v40 = vrot.slane %v5457_v63, 1  ;;  %v5513_v63 = vshll.u32 %v22846_v11, 16 }
 0x1f6   : > { %v5420_v41 = vsel %vm1731_vm4, %v5415_v34, %v5419_v55 }
 0x1f9   : > { %19236 = vmatmul.mubr.msk.bf16.gmra.mrb[12].mxu0 %vm354_vm1, %v5372_v42  ;;  %v5423_v42 = vor.u32 %v5421_v4, %v5419_v55  ;;  %v5473_v4 = vshll.u32 %v22828_v26, 16  ;;  %v5463_v55 = vor.u32 %v5461_v50, %v5459_v40  ;;  %v5493_v26 = vshrl.u32 %v22836_v53, 16 }
 0x1fa   : > { %19239 = vmatprep.mubr.msk.bf16.mxu0 %vm354_vm1, %v5380_v10  ;;  %v5433_v10 = vshll.u32 %v22806_v37, 16  ;;  %v5453_v37 = vshrl.u32 %v22814_v51, 16  ;;  %v5509_v53 = vshrl.u32 %v22844_v8, 16 }
 0x1fb   : > { %v5428_v3 = vsel %vm1731_vm4, %v5423_v42, %v5427_v38  ;;  %v5475_v42 = vrot.slane %v5473_v4, 1  ;;  %v5481_v38 = vshll.u32 %v22830_v30, 16 }
 0x1fc   : > { %v5435_v29 = vrot.slane %v5433_v10, 1 }
 0x1fe   : > { %v5436_v25 = vsel %vm1731_vm4, %v5431_v17, %v5435_v29  ;;  %v5497_v17 = vshll.u32 %v22838_v54, 16 }
 0x201   : > { %19240 = vmatmul.mubr.msk.bf16.gmra.mrb[16].mxu0 %vm354_vm1, %v5388_v44  ;;  %v5439_v44 = vor.u32 %v5437_v5, %v5435_v29  ;;  %v5479_v5 = vor.u32 %v5477_v59, %v5475_v42  ;;  %v5491_v29 = vrot.slane %v5489_v52, 1  ;;  %v6017_v52 = vld [vmem:[#allocation3 + $0x20] sm:$0xff] }
 0x202   : > { %19243 = vmatprep.mubr.msk.bf16.mxu0 %vm354_vm1, %v5396_v22  ;;  %v5449_v22 = vshll.u32 %v22814_v51, 16  ;;  %v5469_v51 = vshrl.u32 %v22822_v0, 16 }
 0x203   : > { %v5444_v45 = vsel %vm1731_vm4, %v5439_v44, %v5443_v60  ;;  %v5495_v36 = vor.u32 %v5493_v26, %v5491_v29  ;;  %v23106_v26 = vld [vmem:[#allocation3 + $0x28] sm:$0xff] }
 0x204   : > { %v5451_v2 = vrot.slane %v5449_v22, 1  ;;  %v5505_v22 = vshll.u32 %v22844_v8, 16  ;;  %v5525_v8 = vshrl.u32 %v22852_v20, 16 }
 0x206   : > { %v5455_v27 = vor.u32 %v5453_v37, %v5451_v2  ;;  %v5452_v49 = vsel %vm1731_vm4, %v5447_v16, %v5451_v2  ;;  %v5507_v37 = vrot.slane %v5505_v22, 1  ;;  %v6053_v22 = vshrl.u32 %v6017_v52, 16 }
 0x209   : > { %19244 = vmatmul.mubr.msk.bf16.gmra.mrb[20].mxu0 %vm354_vm1, %v5404_v48  ;;  %v5465_v48 = vshll.u32 %v22822_v0, 16  ;;  %v5485_v0 = vshrl.u32 %v22830_v30, 16  ;;  %v5501_v30 = vshrl.u32 %v22838_v54, 16  ;;  %v5517_v54 = vshrl.u32 %v22846_v11, 16 }
 0x20a   : > { %19247 = vmatprep.mubr.msk.bf16.mxu0 %vm354_vm1, %v5412_v32  ;;  %v5460_v32 = vsel %vm1731_vm4, %v5455_v27, %v5459_v40  ;;  %v5521_v27 = vshll.u32 %v22852_v20, 16  ;;  %v5515_v40 = vrot.slane %v5513_v63, 1  ;;  %v5533_v11 = vshrl.u32 %v22854_v21, 16  ;;  %v23115_v63 = vld [vmem:[#allocation3 + $0x30] sm:$0xff] }
 0x20b   : > { %v5467_v47 = vrot.slane %v5465_v48, 1  ;;  %v5511_v48 = vor.u32 %v5509_v53, %v5507_v37  ;;  %v5541_v20 = vshrl.u32 %v22860_v58, 16 }
 0x20c   : > { %v5523_v50 = vrot.slane %v5521_v27, 1  ;;  %v6064_v27 = vshrl.u32 %v23106_v26, 16 }
 0x20d   : > { %v5471_v34 = vor.u32 %v5469_v51, %v5467_v47  ;;  %v5468_v10 = vsel %vm1731_vm4, %v5463_v55, %v5467_v47  ;;  %v5516_v51 = vsel %vm1731_vm4, %v5511_v48, %v5515_v40  ;;  %v5537_v47 = vshll.u32 %v22860_v58, 16 }
 0x20e   : > { %v6072_v48 = vshrl.u32 %v23115_v63, 16 }
 0x211   : > { %19248 = vmatmul.mubr.msk.bf16.gmra.mrb[24].mxu0 %vm354_vm1, %v5420_v41  ;;  %v5476_v41 = vsel %vm1731_vm4, %v5471_v34, %v5475_v42  ;;  %v5527_v34 = vor.u32 %v5525_v8, %v5523_v50 }
 0x212   : > { %19251 = vmatprep.mubr.msk.bf16.mxu0 %vm354_vm1, %v5428_v3  ;;  %v5483_v3 = vrot.slane %v5481_v38, 1  ;;  %v5539_v38 = vrot.slane %v5537_v47, 1 }
 0x214   : > { %v5487_v19 = vor.u32 %v5485_v0, %v5483_v3  ;;  %v5484_v44 = vsel %vm1731_vm4, %v5479_v5, %v5483_v3  ;;  %v5553_v0 = vshll.u32 %v22872_v61, 16  ;;  %v5543_v5 = vor.u32 %v5541_v20, %v5539_v38 }
 0x215   : > { %v6962_v20 = vsel %vm1015_vm0, %v22976_v62, 0 }
 0x216   : > { %v5492_v60 = vsel %vm1731_vm4, %v5487_v19, %v5491_v29  ;;  %v5555_v29 = vrot.slane %v5553_v0, 1 }
 0x219   : > { %19252 = vmatmul.mubr.msk.bf16.gmra.mrb[28].mxu0 %vm354_vm1, %v5436_v25  ;;  %v5499_v25 = vrot.slane %v5497_v17, 1  ;;  %v23104_v17 = vld [vmem:[#allocation2 + $0x120] sm:$0x1] }
 0x21a   : > { %19255 = vmatprep.mubr.msk.bf16.mxu0 %vm354_vm1, %v5444_v45 }
 0x21b   : > { %v5503_v45 = vor.u32 %v5501_v30, %v5499_v25  ;;  %v5500_v2 = vsel %vm1731_vm4, %v5495_v36, %v5499_v25  ;;  %v6060_v36 = vshll.u32 %v23106_v26, 16 }
 0x21d   : > { %v5508_v16 = vsel %vm1731_vm4, %v5503_v45, %v5507_v37  ;;  %v6062_v53 = vrot.slane %v6060_v36, 1 }
 0x21f   : > { %v6066_v8 = vor.u32 %v6064_v27, %v6062_v53 }
 0x221   : > { %19256 = vmatmul.mubr.msk.bf16.gmra.mrb[32].mxu0 %vm354_vm1, %v5452_v49  ;;  %v5519_v49 = vor.u32 %v5517_v54, %v5515_v40 }
 0x222   : > { %19259 = vmatprep.mubr.msk.bf16.mxu0 %vm354_vm1, %v5460_v32  ;;  %v5529_v32 = vshll.u32 %v22854_v21, 16  ;;  %v5549_v21 = vshrl.u32 %v22862_v43, 16 }
 0x223   : > { %v5524_v4 = vsel %vm1731_vm4, %v5519_v49, %v5523_v50 }
 0x224   : > { %v5531_v55 = vrot.slane %v5529_v32, 1  ;;  %v918_v32 = vld [vmem:[%s26265_s3] sm:$0x3] }
 0x225   : > { %22061 = vmatprep.subr.msk.bf16.mxu1 %vm1015_vm0, %v918_v32 }
 0x226   : > { %v5535_v42 = vor.u32 %v5533_v11, %v5531_v55  ;;  %v5532_v59 = vsel %vm1731_vm4, %v5527_v34, %v5531_v55  ;;  %v1017_v11 = vsel %vm1015_vm0, %v918_v32, 0  ;;  %v887_v34 = vld [vmem:[#allocation3 + $0x18] sm:$0xff] }
 0x227   : > { %18694 = vmatpush3.bf16.msra.mxu1 %v1017_v11 }
 0x229   : > { %19260 = vmatmul.mubr.msk.bf16.gmra.mrb[36].mxu0 %vm354_vm1, %v5468_v10  ;;  %v5545_v10 = vshll.u32 %v22862_v43, 16  ;;  %v5557_v43 = vshrl.u32 %v22872_v61, 16  ;;  %v6068_v61 = vshll.u32 %v23115_v63, 16 }
 0x22a   : > { %19263 = vmatprep.mubr.msk.bf16.mxu0 %vm354_vm1, %v5476_v41  ;;  %v5540_v41 = vsel %vm1731_vm4, %v5535_v42, %v5539_v38  ;;  %v23135_v42 = vld [vmem:[#allocation3 + $0x48] sm:$0xff] }
 0x22b   : > { %v5547_v3 = vrot.slane %v5545_v10, 1  ;;  %v5559_v45 = vor.u32 %v5557_v43, %v5555_v29  ;;  %v6070_v50 = vrot.slane %v6068_v61, 1  ;;  %v6092_v0 = vshll.u32 %v23135_v42, 16  ;;  %v23174_v61 = vld [vmem:[#allocation3 + $0x68] sm:$0xff] }
 0x22d   : > { %v5551_v19 = vor.u32 %v5549_v21, %v5547_v3  ;;  %v5548_v58 = vsel %vm1731_vm4, %v5543_v5, %v5547_v3  ;;  %v6074_v47 = vor.u32 %v6072_v48, %v6070_v50  ;;  %v6071_v10 = vsel %vm1731_vm4, %v6066_v8, %v6070_v50  ;;  %v23150_v3 = vld [vmem:[%s26265_s3 + $0xa] sm:$0x3]  ;;  %v23188_v8 = vld [vmem:[#allocation3 + $0x70] sm:$0xff] }
 0x22e   : > { %v6124_v50 = vshll.u32 %v23174_v61, 16 }
 0x22f   : > { %v5556_v30 = vsel %vm1731_vm4, %v5551_v19, %v5555_v29  ;;  %v23154_v19 = vld [vmem:[#allocation3 + $0x50] sm:$0xff] }
 0x231   : > { %19264 = vmatmul.mubr.msk.bf16.gmra.mrb[40].mxu0 %vm354_vm1, %v5484_v44  ;;  %v6055_v44 = vshll.u32 %v6017_v52, 16 }
 0x232   : > { %19267 = vmatprep.mubr.msk.bf16.mxu0 %vm354_vm1, %v5492_v60  ;;  %v5561_v60 = vshll.u32 %v23104_v17, 16 }
 0x233   : > { %v6057_v25 = vrot.slane %v6055_v44, 1  ;;  %v6094_v44 = vrot.slane %v6092_v0, 1 }
 0x234   : > { %v5563_v37 = vrot.slane %v5561_v60, 1  ;;  %v6096_v60 = vshrl.u32 %v23135_v42, 16 }
 0x236   : > { %v5564_v54 = vsel %vm1731_vm4, %v5559_v45, %v5563_v37  ;;  %v6098_v45 = vor.u32 %v6096_v60, %v6094_v44  ;;  %v23172_v37 = vld [vmem:[#allocation3 + $0x60] sm:$0xff] }
 0x239   : > { %19268 = vmatmul.mubr.msk.bf16.gmra.mrb[44].mxu0 %vm354_vm1, %v5500_v2  ;;  %v6058_v2 = vor.u32 %v6057_v25, %v6053_v22  ;;  %v6104_v22 = vshrl.u32 %v23154_v19, 16 }
 0x23a   : > { %19271 = vmatprep.mubr.msk.bf16.mxu0 %vm354_vm1, %v5508_v16  ;;  %v23117_v16 = vld [vmem:[#allocation3 + $0x38] sm:$0xff] }
 0x23b   : > { %v6063_v40 = vsel %vm1731_vm4, %v6058_v2, %v6062_v53  ;;  %v6076_v49 = vshll.u32 %v23117_v16, 16 }
 0x23d   : > { %v6078_v55 = vrot.slane %v6076_v49, 1  ;;  %v6120_v49 = vshrl.u32 %v23172_v37, 16 }
 0x241   : > { %19272 = vmatmul.mubr.msk.bf16.gmra.mrb[48].mxu0 %vm354_vm1, %v5516_v51  ;;  %v886_v51 = vld [vmem:[#allocation3 + $0x10] sm:$0xff] }
 0x242   : > { %19275 = vmatprep.mubr.msk.bf16.mxu0 %vm354_vm1, %v5524_v4  ;;  %v23130_v4 = vld [vmem:[#allocation3 + $0x40] sm:$0xff]  ;;  %18695 = vmatprep.mubr.msk.bf16.mxu1 %vm354_vm1, %v886_v51 }
 0x243   : > { %v6084_v38 = vshll.u32 %v23130_v4, 16  ;;  %18696 = vmatmul.mubr.msk.bf16.vlgmr.msra.gmra.mrb[0].mxu1 %vm354_vm1, %v887_v34  ;;  %v6088_v21 = vshrl.u32 %v23130_v4, 16  ;;  %v6132_v34 = vshll.u32 %v23188_v8, 16 }
 0x244   : > { %18699 = vmatprep.mubr.msk.bf16.mxu1 %vm354_vm1, %v6017_v52  ;;  %v23158_v52 = vld [vmem:[#allocation3 + $0x58] sm:$0xff] }
 0x245   : > { %v6086_v5 = vrot.slane %v6084_v38, 1  ;;  %v6108_v25 = vshll.u32 %v23158_v52, 16 }
 0x247   : > { %v6090_v29 = vor.u32 %v6088_v21, %v6086_v5  ;;  %v6110_v53 = vrot.slane %v6108_v25, 1  ;;  %v6134_v21 = vrot.slane %v6132_v34, 1  ;;  %v23236_v34 = vld [vmem:[#allocation3 + $0xa0] sm:$0xff] }
 0x249   : > { %19276 = vmatmul.mubr.msk.bf16.gmra.mrb[52].mxu0 %vm354_vm1, %v5532_v59  ;;  %v6080_v59 = vshrl.u32 %v23117_v16, 16 }
 0x24a   : > { %19279 = vmatprep.mubr.msk.bf16.mxu0 %vm354_vm1, %v5540_v41  ;;  %v6079_v41 = vsel %vm1731_vm4, %v6074_v47, %v6078_v55  ;;  %v6126_v47 = vrot.slane %v6124_v50, 1 }
 0x24b   : > { %v6082_v62 = vor.u32 %v6080_v59, %v6078_v55  ;;  %18700 = vmatmul.mubr.msk.bf16.gmra.mrb[4].mxu1 %vm354_vm1, %v23106_v26  ;;  %v23190_v55 = vld [vmem:[#allocation3 + $0x78] sm:$0xff] }
 0x24c   : > { %18703 = vmatprep.mubr.msk.bf16.mxu1 %vm354_vm1, %v23115_v63  ;;  %v6144_v60 = vshrl.u32 %v23190_v55, 16 }
 0x24d   : > { %v6087_v43 = vsel %vm1731_vm4, %v6082_v62, %v6086_v5  ;;  %v23204_v5 = vld [vmem:[#allocation3 + $0x80] sm:$0xff] }
 0x251   : > { %19280 = vmatmul.mubr.msk.bf16.gmra.mrb[56].mxu0 %vm354_vm1, %v5548_v58  ;;  %v6100_v58 = vshll.u32 %v23154_v19, 16 }
 0x252   : > { %19283 = vmatprep.mubr.msk.bf16.mxu0 %vm354_vm1, %v5556_v30  ;;  %v6095_v30 = vsel %vm1731_vm4, %v6090_v29, %v6094_v44  ;;  %v23206_v44 = vld [vmem:[#allocation3 + $0x88] sm:$0xff] }
 0x253   : > { %v6102_v36 = vrot.slane %v6100_v58, 1  ;;  %18704 = vmatmul.mubr.msk.bf16.gmra.mrb[8].mxu1 %vm354_vm1, %v23117_v16  ;;  %v6148_v58 = vshll.u32 %v23204_v5, 16  ;;  %v6156_v25 = vshll.u32 %v23206_v44, 16 }
 0x254   : > { %18707 = vmatprep.mubr.msk.bf16.mxu1 %vm354_vm1, %v23130_v4 }
 0x255   : > { %v6106_v2 = vor.u32 %v6104_v22, %v6102_v36  ;;  %v6103_v27 = vsel %vm1731_vm4, %v6098_v45, %v6102_v36  ;;  %v6152_v22 = vshrl.u32 %v23204_v5, 16  ;;  %v6150_v36 = vrot.slane %v6148_v58, 1 }
 0x257   : > { %v6111_v48 = vsel %vm1731_vm4, %v6106_v2, %v6110_v53  ;;  %v23220_v2 = vld [vmem:[#allocation3 + $0x90] sm:$0xff] }
 0x259   : > { %19284 = vmatmul.mubr.msk.bf16.gmra.mrb[60].mxu0 %vm354_vm1, %v5564_v54  ;;  %v6116_v54 = vshll.u32 %v23172_v37, 16 }
 0x25a   : > { %19289 = vmatprep.mubr.msk.bf16.mxu0 %vm354_vm1, %v6063_v40  ;;  %v6112_v40 = vshrl.u32 %v23158_v52, 16 }
 0x25b   : > { %v6118_v32 = vrot.slane %v6116_v54, 1  ;;  %18708 = vmatmul.mubr.msk.bf16.gmra.mrb[12].mxu1 %vm354_vm1, %v23135_v42  ;;  %v6158_v54 = vrot.slane %v6156_v25, 1  ;;  %v23254_v25 = vld [vmem:[#allocation3 + $0xb8] sm:$0xff] }
 0x25c   : > { %v6114_v51 = vor.u32 %v6112_v40, %v6110_v53  ;;  %18711 = vmatprep.mubr.msk.bf16.mxu1 %vm354_vm1, %v23154_v19  ;;  %v6154_v53 = vor.u32 %v6152_v22, %v6150_v36  ;;  %v6164_v40 = vshll.u32 %v23220_v2, 16 }
 0x25d   : > { %v6122_v11 = vor.u32 %v6120_v49, %v6118_v32  ;;  %v6160_v49 = vshrl.u32 %v23206_v44, 16 }
 0x25e   : > { %v6119_v38 = vsel %vm1731_vm4, %v6114_v51, %v6118_v32  ;;  %v6159_v50 = vsel %vm1731_vm4, %v6154_v53, %v6158_v54  ;;  %v6168_v32 = vshrl.u32 %v23220_v2, 16 }
 0x25f   : > { %v6127_v59 = vsel %vm1731_vm4, %v6122_v11, %v6126_v47  ;;  %v6166_v11 = vrot.slane %v6164_v40, 1 }
 0x261   : > { %19290 = vmatmul.mubr.msk.bf16.vlgmr.msra.gmra.mrb[0].mxu0 %vm354_vm1, %v6071_v10  ;;  %v6128_v10 = vshrl.u32 %v23174_v61, 16 }
 0x262   : > { %19354 = vmatpush3.bf16.msra.mxu0 %v6962_v20  ;;  %19293 = vmatprep.mubr.msk.bf16.mxu0 %vm354_vm1, %v6079_v41  ;;  %v6136_v20 = vshrl.u32 %v23188_v8, 16  ;;  %v6140_v41 = vshll.u32 %v23190_v55, 16 }
 0x263   : > { %22073 = vmatprep.subr.msk.bf16.mxu0 %vm1015_vm0, %v23150_v3  ;;  %v6130_v0 = vor.u32 %v6128_v10, %v6126_v47  ;;  %18712 = vmatmul.mubr.msk.bf16.gmra.mrb[16].mxu1 %vm354_vm1, %v23158_v52  ;;  %v6162_v47 = vor.u32 %v6160_v49, %v6158_v54 }
 0x264   : > { %v6138_v62 = vor.u32 %v6136_v20, %v6134_v21  ;;  %v6142_v29 = vrot.slane %v6140_v41, 1  ;;  %18715 = vmatprep.mubr.msk.bf16.mxu1 %vm354_vm1, %v23172_v37  ;;  %v6180_v20 = vshll.u32 %v23236_v34, 16 }
 0x265   : > { %v6167_v41 = vsel %vm1731_vm4, %v6162_v47, %v6166_v11  ;;  %v23270_v47 = vld [vmem:[#allocation3 + $0xc8] sm:$0xff] }
 0x266   : > { %v6146_v45 = vor.u32 %v6144_v60, %v6142_v29  ;;  %v6182_v58 = vrot.slane %v6180_v20, 1  ;;  %v23252_v60 = vld [vmem:[#allocation3 + $0xb0] sm:$0xff]  ;;  %v6208_v20 = vshrl.u32 %v23254_v25, 16 }
 0x267   : > { %v6200_v40 = vshrl.u32 %v23252_v60, 16 }
 0x269   : > { %19294 = vmatmul.mubr.msk.bf16.gmra.mrb[4].mxu0 %vm354_vm1, %v6087_v43  ;;  %v6135_v43 = vsel %vm1731_vm4, %v6130_v0, %v6134_v21 }
 0x26a   : > { %19297 = vmatprep.mubr.msk.bf16.mxu0 %vm354_vm1, %v6095_v30  ;;  %v6143_v30 = vsel %vm1731_vm4, %v6138_v62, %v6142_v29  ;;  %v6184_v62 = vshrl.u32 %v23236_v34, 16 }
 0x26b   : > { %18716 = vmatmul.mubr.msk.bf16.gmra.mrb[20].mxu1 %vm354_vm1, %v23174_v61 }
 0x26c   : > { %18719 = vmatprep.mubr.msk.bf16.mxu1 %vm354_vm1, %v23188_v8 }
 0x271   : > { %19298 = vmatmul.mubr.msk.bf16.gmra.mrb[8].mxu0 %vm354_vm1, %v6103_v27  ;;  %v23222_v27 = vld [vmem:[#allocation3 + $0x98] sm:$0xff] }
 0x272   : > { %19301 = vmatprep.mubr.msk.bf16.mxu0 %vm354_vm1, %v6111_v48  ;;  %v6151_v48 = vsel %vm1731_vm4, %v6146_v45, %v6150_v36  ;;  %v6172_v51 = vshll.u32 %v23222_v27, 16  ;;  %v6176_v21 = vshrl.u32 %v23222_v27, 16  ;;  %v6196_v36 = vshll.u32 %v23252_v60, 16 }
 0x273   : > { %18720 = vmatmul.mubr.msk.bf16.gmra.mrb[24].mxu1 %vm354_vm1, %v23190_v55 }
 0x274   : > { %v6174_v10 = vrot.slane %v6172_v51, 1  ;;  %18723 = vmatprep.mubr.msk.bf16.mxu1 %vm354_vm1, %v23204_v5  ;;  %v6198_v49 = vrot.slane %v6196_v36, 1 }
 0x276   : > { %v6202_v51 = vor.u32 %v6200_v40, %v6198_v49 }
 0x279   : > { %19302 = vmatmul.mubr.msk.bf16.gmra.mrb[12].mxu0 %vm354_vm1, %v6119_v38  ;;  %v6170_v38 = vor.u32 %v6168_v32, %v6166_v11  ;;  %v23268_v32 = vld [vmem:[#allocation3 + $0xc0] sm:$0xff] }
 0x27a   : > { %19305 = vmatprep.mubr.msk.bf16.mxu0 %vm354_vm1, %v6127_v59  ;;  %v23238_v59 = vld [vmem:[#allocation3 + $0xa8] sm:$0xff] }
 0x27b   : > { %v6175_v0 = vsel %vm1731_vm4, %v6170_v38, %v6174_v10  ;;  %v6188_v29 = vshll.u32 %v23238_v59, 16  ;;  %v6192_v53 = vshrl.u32 %v23238_v59, 16  ;;  %18724 = vmatmul.mubr.msk.bf16.gmra.mrb[28].mxu1 %vm354_vm1, %v23206_v44  ;;  %v6212_v38 = vshll.u32 %v23268_v32, 16 }
 0x27c   : > { %18727 = vmatprep.mubr.msk.bf16.mxu1 %vm354_vm1, %v23220_v2 }
 0x27d   : > { %v6190_v22 = vrot.slane %v6188_v29, 1 }
 0x281   : > { %19306 = vmatmul.mubr.msk.bf16.gmra.mrb[16].mxu0 %vm354_vm1, %v6135_v43  ;;  %v6178_v43 = vor.u32 %v6176_v21, %v6174_v10  ;;  %v6216_v21 = vshrl.u32 %v23268_v32, 16 }
 0x282   : > { %19309 = vmatprep.mubr.msk.bf16.mxu0 %vm354_vm1, %v6143_v30  ;;  %v6186_v30 = vor.u32 %v6184_v62, %v6182_v58  ;;  %v6214_v62 = vrot.slane %v6212_v38, 1 }
 0x283   : > { %v6183_v45 = vsel %vm1731_vm4, %v6178_v43, %v6182_v58  ;;  %18728 = vmatmul.mubr.msk.bf16.gmra.mrb[32].mxu1 %vm354_vm1, %v23222_v27  ;;  %v23284_v58 = vld [vmem:[#allocation3 + $0xd0] sm:$0xff] }
 0x284   : > { %v6191_v54 = vsel %vm1731_vm4, %v6186_v30, %v6190_v22  ;;  %18731 = vmatprep.mubr.msk.bf16.mxu1 %vm354_vm1, %v23236_v34  ;;  %v6218_v43 = vor.u32 %v6216_v21, %v6214_v62  ;;  %v6228_v36 = vshll.u32 %v23284_v58, 16  ;;  %v6232_v40 = vshrl.u32 %v23284_v58, 16 }
 0x289   : > { %19310 = vmatmul.mubr.msk.bf16.gmra.mrb[20].mxu0 %vm354_vm1, %v6151_v48  ;;  %v6204_v48 = vshll.u32 %v23254_v25, 16 }
 0x28a   : > { %19313 = vmatprep.mubr.msk.bf16.mxu0 %vm354_vm1, %v6159_v50  ;;  %v6194_v50 = vor.u32 %v6192_v53, %v6190_v22  ;;  %v23286_v22 = vld [vmem:[#allocation3 + $0xd8] sm:$0xff]  ;;  %v6224_v53 = vshrl.u32 %v23270_v47, 16 }
 0x28b   : > { %v6206_v11 = vrot.slane %v6204_v48, 1  ;;  %18732 = vmatmul.mubr.msk.bf16.gmra.mrb[36].mxu1 %vm354_vm1, %v23238_v59  ;;  %v6236_v48 = vshll.u32 %v23286_v22, 16  ;;  %v6240_v21 = vshrl.u32 %v23286_v22, 16 }
 0x28c   : > { %v6199_v10 = vsel %vm1731_vm4, %v6194_v50, %v6198_v49  ;;  %18735 = vmatprep.mubr.msk.bf16.mxu1 %vm354_vm1, %v23252_v60  ;;  %v6230_v49 = vrot.slane %v6228_v36, 1  ;;  %v23316_v36 = vld [vmem:[#allocation3 + $0xf0] sm:$0xff] }
 0x28d   : > { %v6210_v29 = vor.u32 %v6208_v20, %v6206_v11  ;;  %v6238_v38 = vrot.slane %v6236_v48, 1 }
 0x291   : > { %19314 = vmatmul.mubr.msk.bf16.gmra.mrb[24].mxu0 %vm354_vm1, %v6167_v41  ;;  %v6207_v41 = vsel %vm1731_vm4, %v6202_v51, %v6206_v11  ;;  %v23300_v51 = vld [vmem:[#allocation3 + $0xe0] sm:$0xff]  ;;  %v6234_v11 = vor.u32 %v6232_v40, %v6230_v49  ;;  %v6260_v40 = vshll.u32 %v23316_v36, 16 }
 0x292   : > { %19317 = vmatprep.mubr.msk.bf16.mxu0 %vm354_vm1, %v6175_v0  ;;  %v6220_v0 = vshll.u32 %v23270_v47, 16  ;;  %v6244_v20 = vshll.u32 %v23300_v51, 16 }
 0x293   : > { %18736 = vmatmul.mubr.msk.bf16.gmra.mrb[40].mxu1 %vm354_vm1, %v23254_v25 }
 0x294   : > { %v6222_v30 = vrot.slane %v6220_v0, 1  ;;  %v6239_v0 = vsel %vm1731_vm4, %v6234_v11, %v6238_v38  ;;  %18739 = vmatprep.mubr.msk.bf16.mxu1 %vm354_vm1, %v23268_v32  ;;  %v6264_v11 = vshrl.u32 %v23316_v36, 16 }
 0x296   : > { %v6226_v50 = vor.u32 %v6224_v53, %v6222_v30 }
 0x299   : > { %19318 = vmatmul.mubr.msk.bf16.gmra.mrb[28].mxu0 %vm354_vm1, %v6183_v45  ;;  %v6215_v45 = vsel %vm1731_vm4, %v6210_v29, %v6214_v62  ;;  %v6248_v62 = vshrl.u32 %v23300_v51, 16 }
 0x29a   : > { %19321 = vmatprep.mubr.msk.bf16.mxu0 %vm354_vm1, %v6191_v54  ;;  %v6223_v54 = vsel %vm1731_vm4, %v6218_v43, %v6222_v30  ;;  %v6246_v43 = vrot.slane %v6244_v20, 1  ;;  %v6242_v30 = vor.u32 %v6240_v21, %v6238_v38  ;;  %v6262_v20 = vrot.slane %v6260_v40, 1  ;;  %v23332_v21 = vld [vmem:[#allocation3 + $0x100] sm:$0xff] }
 0x29b   : > { %18740 = vmatmul.mubr.msk.bf16.gmra.mrb[44].mxu1 %vm354_vm1, %v23270_v47 }
 0x29c   : > { %v6247_v48 = vsel %vm1731_vm4, %v6242_v30, %v6246_v43  ;;  %18743 = vmatprep.mubr.msk.bf16.mxu1 %vm354_vm1, %v23284_v58 }
 0x2a1   : > { %19322 = vmatmul.mubr.msk.bf16.gmra.mrb[32].mxu0 %vm354_vm1, %v6199_v10  ;;  %v23302_v10 = vld [vmem:[#allocation3 + $0xe8] sm:$0xff] }
 0x2a2   : > { %19325 = vmatprep.mubr.msk.bf16.mxu0 %vm354_vm1, %v6207_v41  ;;  %v6231_v41 = vsel %vm1731_vm4, %v6226_v50, %v6230_v49  ;;  %v6252_v29 = vshll.u32 %v23302_v10, 16  ;;  %v6256_v49 = vshrl.u32 %v23302_v10, 16 }
 0x2a3   : > { %18744 = vmatmul.mubr.msk.bf16.gmra.mrb[48].mxu1 %vm354_vm1, %v23286_v22 }
 0x2a4   : > { %v6254_v53 = vrot.slane %v6252_v29, 1  ;;  %v23334_v29 = vld [vmem:[#allocation3 + $0x108] sm:$0xff]  ;;  %18747 = vmatprep.mubr.msk.bf16.mxu1 %vm354_vm1, %v23300_v51 }
 0x2a9   : > { %19326 = vmatmul.mubr.msk.bf16.gmra.mrb[36].mxu0 %vm354_vm1, %v6215_v45  ;;  %v6250_v45 = vor.u32 %v6248_v62, %v6246_v43  ;;  %v6276_v43 = vshll.u32 %v23332_v21, 16 }
 0x2aa   : > { %19329 = vmatprep.mubr.msk.bf16.mxu0 %vm354_vm1, %v6223_v54  ;;  %v23318_v54 = vld [vmem:[#allocation3 + $0xf8] sm:$0xff] }
 0x2ab   : > { %v6255_v50 = vsel %vm1731_vm4, %v6250_v45, %v6254_v53  ;;  %v6268_v38 = vshll.u32 %v23318_v54, 16  ;;  %v6272_v45 = vshrl.u32 %v23318_v54, 16  ;;  %18748 = vmatmul.mubr.msk.bf16.gmra.mrb[52].mxu1 %vm354_vm1, %v23302_v10 }
 0x2ac   : > { %18751 = vmatprep.mubr.msk.bf16.mxu1 %vm354_vm1, %v23316_v36 }
 0x2ad   : > { %v6270_v62 = vrot.slane %v6268_v38, 1 }
 0x2b1   : > { %19330 = vmatmul.mubr.msk.bf16.gmra.mrb[40].mxu0 %vm354_vm1, %v6231_v41  ;;  %v6258_v41 = vor.u32 %v6256_v49, %v6254_v53  ;;  %v6284_v53 = vshll.u32 %v23334_v29, 16  ;;  %v6278_v49 = vrot.slane %v6276_v43, 1  ;;  %v6300_v43 = vshll.u32 %v22953_v35, 16 }
 0x2b2   : > { %19333 = vmatprep.mubr.msk.bf16.mxu0 %vm354_vm1, %v6239_v0  ;;  %v6266_v0 = vor.u32 %v6264_v11, %v6262_v20 }
 0x2b3   : > { %v6263_v30 = vsel %vm1731_vm4, %v6258_v41, %v6262_v20  ;;  %v6286_v38 = vrot.slane %v6284_v53, 1  ;;  %v6292_v20 = vshll.u32 %v22941_v57, 16  ;;  %18752 = vmatmul.mubr.msk.bf16.gmra.mrb[56].mxu1 %vm354_vm1, %v23318_v54 }
 0x2b4   : > { %v6271_v40 = vsel %vm1731_vm4, %v6266_v0, %v6270_v62  ;;  %v6288_v0 = vshrl.u32 %v23334_v29, 16  ;;  %18755 = vmatprep.mubr.msk.bf16.mxu1 %vm354_vm1, %v23332_v21 }
 0x2b9   : > { %19334 = vmatmul.mubr.msk.bf16.gmra.mrb[44].mxu0 %vm354_vm1, %v6247_v48  ;;  %v6280_v48 = vshrl.u32 %v23332_v21, 16 }
 0x2ba   : > { %19337 = vmatprep.mubr.msk.bf16.mxu0 %vm354_vm1, %v6255_v50  ;;  %v6274_v50 = vor.u32 %v6272_v45, %v6270_v62  ;;  %v6294_v62 = vrot.slane %v6292_v20, 1 }
 0x2bb   : > { %v6282_v11 = vor.u32 %v6280_v48, %v6278_v49  ;;  %v23360_v48 = vld [vmem:[#allocation3 + $0x120] sm:$0x1]  ;;  %18756 = vmatmul.mubr.msk.bf16.gmra.mrb[60].mxu1 %vm354_vm1, %v23334_v29 }
 0x2bc   : > { %v6279_v41 = vsel %vm1731_vm4, %v6274_v50, %v6278_v49  ;;  %v6298_v45 = vor.u32 %v6296_v33, %v6294_v62  ;;  %v6304_v49 = vshrl.u32 %v22953_v35, 16  ;;  %v6308_v57 = vshll.u32 %v23360_v48, 16 }
 0x2bd   : > { %v6287_v39 = vsel %vm1731_vm4, %v6282_v11, %v6286_v38  ;;  %v6801_v35 = vrot.slane %v22939_v56, 1 }
 0x2be   : > { %v6310_v11 = vrot.slane %v6308_v57, 1  ;;  %v855_v57 = vld [vmem:[#allocation2 + $0x20] sm:$0xff] }
 0x2c1   : > { %19338 = vmatmul.mubr.msk.bf16.gmra.mrb[48].mxu0 %vm354_vm1, %v6263_v30  ;;  %v6290_v30 = vor.u32 %v6288_v0, %v6286_v38  ;;  %v885_v0 = vld [vmem:[%s26264_s2] sm:$0x3] }
 0x2c2   : > { %19341 = vmatprep.mubr.msk.bf16.mxu0 %vm354_vm1, %v6271_v40  ;;  %v6302_v40 = vrot.slane %v6300_v43, 1  ;;  %v23381_v43 = vld [vmem:[#allocation2 + $0x10] sm:$0xff]  ;;  %22062 = vmatprep.subr.msk.bf16.mxu1 %vm1015_vm0, %v885_v0  ;;  %v1405_v56 = vsel %vm1015_vm0, %v885_v0, 0  ;;  %v23432_v0 = vld [vmem:[#allocation2 + $0x48] sm:$0xff] }
 0x2c3   : > { %v6295_v53 = vsel %vm1731_vm4, %v6290_v30, %v6294_v62  ;;  %v6803_v62 = vrot.slane %v22948_v9, 1  ;;  %v6805_v30 = vrot.slane %v22950_v24, 1  ;;  %18760 = vmatpush3.bf16.msra.mxu1 %v1405_v56  ;;  %18761 = vmatprep.mubr.msk.bf16.mxu1 %vm354_vm1, %v23381_v43  ;;  %v6807_v24 = vrot.slane %v22962_v23, 1  ;;  %26313 = vst [vmem:[#allocation8_spill] sm:$0xff] %v23432_v0 }
 0x2c4   : > { %v6303_v50 = vsel %vm1731_vm4, %v6298_v45, %v6302_v40  ;;  %v6306_v33 = vor.u32 %v6304_v49, %v6302_v40  ;;  %v854_v45 = vld [vmem:[#allocation2 + $0x18] sm:$0xff]  ;;  %v23398_v49 = vld [vmem:[%s26264_s2 + $0xc] sm:$0x3]  ;;  %v6811_v23 = vrot.slane %v22980_v13, 1  ;;  %v6815_v13 = vrot.slane %v22994_v46, 1 }
 0x2c5   : > { %v6804_v40 = vsel %vm3227_vm2, %v6801_v35, %v6803_v62  ;;  %v6806_v9 = vsel %vm3227_vm2, %v6803_v62, %v6805_v30  ;;  %v6819_v46 = vrot.slane %v23006_v18, 1  ;;  %v6823_v18 = vrot.slane %v23018_v14, 1 }
 0x2c6   : > { %v6311_v20 = vsel %vm1731_vm4, %v6306_v33, %v6310_v11  ;;  %18762 = vmatmul.mubr.msk.bf16.vlgmr.msra.gmra.mrb[0].mxu1 %vm354_vm1, %v854_v45  ;;  %v23411_v11 = vld [vmem:[#allocation2 + $0x30] sm:$0xff]  ;;  %v23446_v45 = vld [vmem:[#allocation2 + $0x58] sm:$0xff]  ;;  %v6827_v14 = vrot.slane %v23030_v15, 1  ;;  %v22132_v15 = vld [vmem:[#allocation2 + $0xa0] sm:$0xff] }
 0x2c7   : > { %18765 = vmatprep.mubr.msk.bf16.mxu1 %vm354_vm1, %v855_v57  ;;  %26315 = vst [vmem:[#allocation10_spill] sm:$0xff] %v23446_v45 }
 0x2c9   : > { %19342 = vmatmul.mubr.msk.bf16.gmra.mrb[52].mxu0 %vm354_vm1, %v6279_v41 }
 0x2ca   : > { %19345 = vmatprep.mubr.msk.bf16.mxu0 %vm354_vm1, %v6287_v39  ;;  %v6764_v39 = vld [vmem:[#allocation2 + $0x20] sm:$0xfe] }
 0x2cb   : > { %v6800_v38 = vrot.slane %v6764_v39, 1  ;;  %v6808_v39 = vsel %vm3227_vm2, %v6805_v30, %v6807_v24  ;;  %v23439_v30 = vld [vmem:[#allocation2 + $0x50] sm:$0xff] }
 0x2cc   : > { %26314 = vst [vmem:[#allocation9_spill] sm:$0xff] %v23439_v30 }
 0x2cd   : > { %v6802_v41 = vsel %vm3227_vm2, %v6800_v38, %v6801_v35  ;;  %v23418_v38 = vld [vmem:[#allocation2 + $0x38] sm:$0xff] }
 0x2ce   : > { %26311 = vst [vmem:[#allocation6_spill] sm:$0xff] %v23418_v38 }
 0x2d1   : > { %19346 = vmatmul.mubr.msk.bf16.gmra.mrb[56].mxu0 %vm354_vm1, %v6295_v53  ;;  %v7515_v53 = vsel %vm1015_vm0, %v23150_v3, 0  ;;  %v856_v3 = vld [vmem:[#allocation2 + $0x28] sm:$0xff] }
 0x2d2   : > { %19349 = vmatprep.mubr.msk.bf16.mxu0 %vm354_vm1, %v6303_v50  ;;  %v6809_v50 = vrot.slane %v22964_v6, 1  ;;  %18766 = vmatmul.mubr.msk.bf16.gmra.mrb[4].mxu1 %vm354_vm1, %v856_v3  ;;  %v6813_v6 = vrot.slane %v22984_v28, 1  ;;  %v6817_v28 = vrot.slane %v22996_v7, 1  ;;  %v6821_v7 = vrot.slane %v23008_v12, 1  ;;  %v23467_v3 = vld [vmem:[#allocation2 + $0x70] sm:$0xff] }
 0x2d3   : > { %18769 = vmatprep.mubr.msk.bf16.mxu1 %vm354_vm1, %v23411_v11  ;;  %v6825_v12 = vrot.slane %v23020_v31, 1  ;;  %26318 = vst [vmem:[#allocation13_spill] sm:$0xff] %v23467_v3  ;;  %v22131_v31 = vld [vmem:[#allocation2 + $0x98] sm:$0xff] }
 0x2d4   : > { %v6810_v33 = vsel %vm3227_vm2, %v6807_v24, %v6809_v50  ;;  %v6812_v35 = vsel %vm3227_vm2, %v6809_v50, %v6811_v23  ;;  %v6816_v62 = vsel %vm3227_vm2, %v6813_v6, %v6815_v13  ;;  %v6818_v56 = vsel %vm3227_vm2, %v6815_v13, %v6817_v28  ;;  %v23460_v24 = vld [vmem:[#allocation2 + $0x68] sm:$0xff] }
 0x2d5   : > { %26317 = vst [vmem:[#allocation12_spill] sm:$0xff] %v23460_v24  ;;  %v6824_v57 = vsel %vm3227_vm2, %v6821_v7, %v6823_v18  ;;  %v6826_v50 = vsel %vm3227_vm2, %v6823_v18, %v6825_v12  ;;  %v22133_v13 = vld [vmem:[#allocation2 + $0xa8] sm:$0xff]  ;;  %v22135_v18 = vld [vmem:[#allocation2 + $0xb8] sm:$0xff] }
 0x2d9   : > { %19350 = vmatmul.mubr.msk.bf16.gmra.mrb[60].mxu0 %vm354_vm1, %v6311_v20  ;;  %v6814_v20 = vsel %vm3227_vm2, %v6811_v23, %v6813_v6  ;;  %v6828_v23 = vsel %vm3227_vm2, %v6825_v12, %v6827_v14  ;;  %v6837_v12 = vrot.slane %v22135_v18, 1 }
 0x2da   : > { %19355 = vmatprep.mubr.msk.bf16.mxu0 %vm354_vm1, %v6802_v41  ;;  %18770 = vmatmul.mubr.msk.bf16.gmra.mrb[8].mxu1 %vm354_vm1, %v23418_v38  ;;  %v23425_v41 = vld [vmem:[#allocation2 + $0x40] sm:$0xff]  ;;  %v7356_v38 = vrot.slane %v23115_v63, 1  ;;  %v8001_v63 = vsel %vm1015_vm0, %v23398_v49, 0 }
 0x2db   : > { %26312 = vst [vmem:[#allocation7_spill] sm:$0xff] %v23425_v41  ;;  %18773 = vmatprep.mubr.msk.bf16.mxu1 %vm354_vm1, %v23425_v41 }
 0x2e1   : > { %19356 = vmatmul.mubr.msk.bf16.vlgmr.msra.gmra.mrb[0].mxu0 %vm354_vm1, %v6804_v40  ;;  %v6820_v40 = vsel %vm3227_vm2, %v6817_v28, %v6819_v46  ;;  %v6833_v28 = vrot.slane %v22133_v13, 1 }
 0x2e2   : > { %19420 = vmatpush3.bf16.msra.mxu0 %v7515_v53  ;;  %19359 = vmatprep.mubr.msk.bf16.mxu0 %vm354_vm1, %v6806_v9  ;;  %v6822_v53 = vsel %vm3227_vm2, %v6819_v46, %v6821_v7  ;;  %v23453_v9 = vld [vmem:[#allocation2 + $0x60] sm:$0xff]  ;;  %v23492_v7 = vld [vmem:[#allocation2 + $0x90] sm:$0xff] }
 0x2e3   : > { %22074 = vmatprep.subr.msk.bf16.mxu0 %vm1015_vm0, %v23398_v49  ;;  %18774 = vmatmul.mubr.msk.bf16.gmra.mrb[12].mxu1 %vm354_vm1, %v23432_v0  ;;  %26316 = vst [vmem:[#allocation11_spill] sm:$0xff] %v23453_v9  ;;  %26322 = vst [vmem:[#allocation17_spill] sm:$0xff] %v23492_v7  ;;  %v7360_v49 = vrot.slane %v23130_v4, 1 }
 0x2e4   : > { %18777 = vmatprep.mubr.msk.bf16.mxu1 %vm354_vm1, %v23439_v30 }
 0x2e9   : > { %19360 = vmatmul.mubr.msk.bf16.gmra.mrb[4].mxu0 %vm354_vm1, %v6808_v39  ;;  %v6829_v39 = vrot.slane %v22131_v31, 1  ;;  %v23504_v31 = vld [vmem:[#allocation2 + $0xa0] sm:$0xff] }
 0x2ea   : > { %19363 = vmatprep.mubr.msk.bf16.mxu0 %vm354_vm1, %v6810_v33  ;;  %v23473_v33 = vld [vmem:[#allocation2 + $0x78] sm:$0xff] }
 0x2eb   : > { %18778 = vmatmul.mubr.msk.bf16.gmra.mrb[16].mxu1 %vm354_vm1, %v23446_v45  ;;  %26319 = vst [vmem:[#allocation14_spill] sm:$0xff] %v23473_v33  ;;  %v6830_v6 = vsel %vm3227_vm2, %v6827_v14, %v6829_v39 }
 0x2ec   : > { %18781 = vmatprep.mubr.msk.bf16.mxu1 %vm354_vm1, %v23453_v9  ;;  %v22148_v9 = vld [vmem:[#allocation2 + $0x20] sm:$0xff] }
 0x2ed   : > { %v1748_v45 = vshll.u32 %v22148_v9, 16 }
 0x2f1   : > { %19364 = vmatmul.mubr.msk.bf16.gmra.mrb[8].mxu0 %vm354_vm1, %v6812_v35  ;;  %v23480_v35 = vld [vmem:[#allocation2 + $0x80] sm:$0xff] }
 0x2f2   : > { %19367 = vmatprep.mubr.msk.bf16.mxu0 %vm354_vm1, %v6814_v20  ;;  %26320 = vst [vmem:[#allocation15_spill] sm:$0xff] %v23480_v35  ;;  %v6831_v20 = vrot.slane %v22132_v15, 1 }
 0x2f3   : > { %18782 = vmatmul.mubr.msk.bf16.gmra.mrb[20].mxu1 %vm354_vm1, %v23460_v24  ;;  %v23583_v24 = vld [vmem:[#allocation2 + $0x108] sm:$0xff] }
 0x2f4   : > { %18785 = vmatprep.mubr.msk.bf16.mxu1 %vm354_vm1, %v23467_v3  ;;  %v6834_v46 = vsel %vm3227_vm2, %v6831_v20, %v6833_v28  ;;  %v23569_v3 = vld [vmem:[#allocation2 + $0xf8] sm:$0xff] }
 0x2f9   : > { %19368 = vmatmul.mubr.msk.bf16.gmra.mrb[12].mxu0 %vm354_vm1, %v6816_v62  ;;  %v23485_v62 = vld [vmem:[#allocation2 + $0x88] sm:$0xff] }
 0x2fa   : > { %19371 = vmatprep.mubr.msk.bf16.mxu0 %vm354_vm1, %v6818_v56  ;;  %26321 = vst [vmem:[#allocation16_spill] sm:$0xff] %v23485_v62  ;;  %v6832_v56 = vsel %vm3227_vm2, %v6829_v39, %v6831_v20  ;;  %v22136_v39 = vld [vmem:[#allocation2 + $0xc0] sm:$0xff]  ;;  %v23509_v20 = vld [vmem:[#allocation2 + $0xa8] sm:$0xff] }
 0x2fb   : > { %18786 = vmatmul.mubr.msk.bf16.gmra.mrb[24].mxu1 %vm354_vm1, %v23473_v33 }
 0x2fc   : > { %18789 = vmatprep.mubr.msk.bf16.mxu1 %vm354_vm1, %v23480_v35  ;;  %v23557_v35 = vld [vmem:[#allocation2 + $0xe8] sm:$0xff] }
 0x301   : > { %19372 = vmatmul.mubr.msk.bf16.gmra.mrb[16].mxu0 %vm354_vm1, %v6820_v40  ;;  %v22134_v40 = vld [vmem:[#allocation2 + $0xb0] sm:$0xff] }
 0x302   : > { %19375 = vmatprep.mubr.msk.bf16.mxu0 %vm354_vm1, %v6822_v53  ;;  %v6835_v53 = vrot.slane %v22134_v40, 1 }
 0x303   : > { %18790 = vmatmul.mubr.msk.bf16.gmra.mrb[28].mxu1 %vm354_vm1, %v23485_v62 }
 0x304   : > { %18793 = vmatprep.mubr.msk.bf16.mxu1 %vm354_vm1, %v23492_v7  ;;  %v6838_v14 = vsel %vm3227_vm2, %v6835_v53, %v6837_v12  ;;  %v23545_v7 = vld [vmem:[#allocation2 + $0xd8] sm:$0xff] }
 0x309   : > { %19376 = vmatmul.mubr.msk.bf16.gmra.mrb[20].mxu0 %vm354_vm1, %v6824_v57  ;;  %v23497_v57 = vld [vmem:[#allocation2 + $0x98] sm:$0xff] }
 0x30a   : > { %19379 = vmatprep.mubr.msk.bf16.mxu0 %vm354_vm1, %v6826_v50  ;;  %v6836_v50 = vsel %vm3227_vm2, %v6833_v28, %v6835_v53  ;;  %v22139_v53 = vld [vmem:[#allocation2 + $0xd8] sm:$0xff] }
 0x30b   : > { %18794 = vmatmul.mubr.msk.bf16.gmra.mrb[32].mxu1 %vm354_vm1, %v23497_v57  ;;  %v6845_v18 = vrot.slane %v22139_v53, 1  ;;  %v23540_v53 = vld [vmem:[#allocation2 + $0xd0] sm:$0xff] }
 0x30c   : > { %18797 = vmatprep.mubr.msk.bf16.mxu1 %vm354_vm1, %v23504_v31 }
 0x311   : > { %19380 = vmatmul.mubr.msk.bf16.gmra.mrb[24].mxu0 %vm354_vm1, %v6828_v23  ;;  %v6839_v23 = vrot.slane %v22136_v39, 1  ;;  %v23528_v39 = vld [vmem:[#allocation2 + $0xc0] sm:$0xff] }
 0x312   : > { %19383 = vmatprep.mubr.msk.bf16.mxu0 %vm354_vm1, %v6830_v6  ;;  %v22137_v6 = vld [vmem:[#allocation2 + $0xc8] sm:$0xff] }
 0x313   : > { %v6841_v15 = vrot.slane %v22137_v6, 1  ;;  %v6840_v13 = vsel %vm3227_vm2, %v6837_v12, %v6839_v23  ;;  %18798 = vmatmul.mubr.msk.bf16.gmra.mrb[36].mxu1 %vm354_vm1, %v23509_v20 }
 0x315   : > { %v6842_v28 = vsel %vm3227_vm2, %v6839_v23, %v6841_v15  ;;  %v22140_v23 = vld [vmem:[#allocation2 + $0xe0] sm:$0xff] }
 0x316   : > { %v6847_v6 = vrot.slane %v22140_v23, 1  ;;  %v22143_v23 = vld [vmem:[#allocation2 + $0xf8] sm:$0xff] }
 0x319   : > { %19384 = vmatmul.mubr.msk.bf16.gmra.mrb[28].mxu0 %vm354_vm1, %v6832_v56  ;;  %v23516_v56 = vld [vmem:[#allocation2 + $0xb0] sm:$0xff] }
 0x31a   : > { %19387 = vmatprep.mubr.msk.bf16.mxu0 %vm354_vm1, %v6834_v46  ;;  %v22138_v46 = vld [vmem:[#allocation2 + $0xd0] sm:$0xff]  ;;  %18801 = vmatprep.mubr.msk.bf16.mxu1 %vm354_vm1, %v23516_v56 }
 0x31b   : > { %v6843_v40 = vrot.slane %v22138_v46, 1  ;;  %v23533_v46 = vld [vmem:[#allocation2 + $0xc8] sm:$0xff] }
 0x31d   : > { %v6844_v12 = vsel %vm3227_vm2, %v6841_v15, %v6843_v40  ;;  %v6848_v15 = vsel %vm3227_vm2, %v6845_v18, %v6847_v6 }
 0x321   : > { %19388 = vmatmul.mubr.msk.bf16.gmra.mrb[32].mxu0 %vm354_vm1, %v6836_v50  ;;  %v23521_v50 = vld [vmem:[#allocation2 + $0xb8] sm:$0xff] }
 0x322   : > { %19391 = vmatprep.mubr.msk.bf16.mxu0 %vm354_vm1, %v6838_v14  ;;  %18802 = vmatmul.mubr.msk.bf16.gmra.mrb[40].mxu1 %vm354_vm1, %v23521_v50  ;;  %v6846_v14 = vsel %vm3227_vm2, %v6843_v40, %v6845_v18 }
 0x323   : > { %18805 = vmatprep.mubr.msk.bf16.mxu1 %vm354_vm1, %v23528_v39 }
 0x329   : > { %19392 = vmatmul.mubr.msk.bf16.gmra.mrb[36].mxu0 %vm354_vm1, %v6840_v13  ;;  %v22141_v13 = vld [vmem:[#allocation2 + $0xe8] sm:$0xff] }
 0x32a   : > { %19395 = vmatprep.mubr.msk.bf16.mxu0 %vm354_vm1, %v6842_v28  ;;  %v6849_v28 = vrot.slane %v22141_v13, 1  ;;  %18806 = vmatmul.mubr.msk.bf16.gmra.mrb[44].mxu1 %vm354_vm1, %v23533_v46  ;;  %v6853_v13 = vrot.slane %v22143_v23, 1  ;;  %v22145_v23 = vld [vmem:[#allocation2 + $0x108] sm:$0xff] }
 0x32b   : > { %18809 = vmatprep.mubr.msk.bf16.mxu1 %vm354_vm1, %v23540_v53  ;;  %v6857_v62 = vrot.slane %v22145_v23, 1  ;;  %v22147_v23 = vld [vmem:[#allocation2 + $0x118] sm:$0xff] }
 0x32c   : > { %v6850_v40 = vsel %vm3227_vm2, %v6847_v6, %v6849_v28  ;;  %v6861_v33 = vrot.slane %v22147_v23, 1 }
 0x331   : > { %19396 = vmatmul.mubr.msk.bf16.gmra.mrb[40].mxu0 %vm354_vm1, %v6844_v12  ;;  %v22142_v12 = vld [vmem:[#allocation2 + $0xf0] sm:$0xff] }
 0x332   : > { %19399 = vmatprep.mubr.msk.bf16.mxu0 %vm354_vm1, %v6846_v14  ;;  %v6851_v14 = vrot.slane %v22142_v12, 1  ;;  %18810 = vmatmul.mubr.msk.bf16.gmra.mrb[48].mxu1 %vm354_vm1, %v23545_v7 }
 0x334   : > { %v6852_v18 = vsel %vm3227_vm2, %v6849_v28, %v6851_v14  ;;  %v6854_v6 = vsel %vm3227_vm2, %v6851_v14, %v6853_v13 }
 0x339   : > { %19400 = vmatmul.mubr.msk.bf16.gmra.mrb[44].mxu0 %vm354_vm1, %v6848_v15  ;;  %v23552_v15 = vld [vmem:[#allocation2 + $0xe0] sm:$0xff] }
 0x33a   : > { %19403 = vmatprep.mubr.msk.bf16.mxu0 %vm354_vm1, %v6850_v40  ;;  %v22144_v40 = vld [vmem:[#allocation2 + $0x100] sm:$0xff]  ;;  %18813 = vmatprep.mubr.msk.bf16.mxu1 %vm354_vm1, %v23552_v15 }
 0x33b   : > { %v6855_v12 = vrot.slane %v22144_v40, 1  ;;  %18814 = vmatmul.mubr.msk.bf16.gmra.mrb[52].mxu1 %vm354_vm1, %v23557_v35 }
 0x33d   : > { %v6856_v28 = vsel %vm3227_vm2, %v6853_v13, %v6855_v12  ;;  %v6858_v14 = vsel %vm3227_vm2, %v6855_v12, %v6857_v62 }
 0x341   : > { %19404 = vmatmul.mubr.msk.bf16.gmra.mrb[48].mxu0 %vm354_vm1, %v6852_v18  ;;  %v23564_v18 = vld [vmem:[#allocation2 + $0xf0] sm:$0xff] }
 0x342   : > { %19407 = vmatprep.mubr.msk.bf16.mxu0 %vm354_vm1, %v6854_v6  ;;  %v22146_v6 = vld [vmem:[#allocation2 + $0x110] sm:$0xff]  ;;  %18817 = vmatprep.mubr.msk.bf16.mxu1 %vm354_vm1, %v23564_v18 }
 0x343   : > { %v6859_v40 = vrot.slane %v22146_v6, 1  ;;  %18818 = vmatmul.mubr.msk.bf16.gmra.mrb[56].mxu1 %vm354_vm1, %v23569_v3  ;;  %v6863_v6 = vrot.slane %v23104_v17, 1 }
 0x345   : > { %v6860_v13 = vsel %vm3227_vm2, %v6857_v62, %v6859_v40  ;;  %v6862_v12 = vsel %vm3227_vm2, %v6859_v40, %v6861_v33  ;;  %v7354_v62 = vrot.slane %v23106_v26, 1  ;;  %v6864_v40 = vsel %vm3227_vm2, %v6861_v33, %v6863_v6  ;;  %v16905_v26 = vld [vmem:[%s26264_s2 + $0x2] sm:$0x3] }
 0x346   : > { %v1750_v6 = vrot.slane %v1748_v45, 1  ;;  %22063 = vmatprep.subr.msk.bf16.mxu1 %vm1015_vm0, %v16905_v26 }
 0x347   : > { %v7357_v45 = vsel %vm3227_vm2, %v7354_v62, %v7356_v38 }
 0x349   : > { %19408 = vmatmul.mubr.msk.bf16.gmra.mrb[52].mxu0 %vm354_vm1, %v6856_v28  ;;  %v7317_v28 = vld [vmem:[#allocation3 + $0x20] sm:$0xfe] }
 0x34a   : > { %19411 = vmatprep.mubr.msk.bf16.mxu0 %vm354_vm1, %v6858_v14  ;;  %v23576_v14 = vld [vmem:[#allocation2 + $0x100] sm:$0xff]  ;;  %v7353_v23 = vrot.slane %v7317_v28, 1  ;;  %v1733_v28 = vshrl.u32 %v23381_v43, 16 }
 0x34b   : > { %18821 = vmatprep.mubr.msk.bf16.mxu1 %vm354_vm1, %v23576_v14 }
 0x34c   : > { %18822 = vmatmul.mubr.msk.bf16.gmra.mrb[60].mxu1 %vm354_vm1, %v23583_v24  ;;  %v7355_v17 = vsel %vm3227_vm2, %v7353_v23, %v7354_v62  ;;  %v2089_v23 = vsel %vm1015_vm0, %v16905_v26, 0  ;;  %v22151_v62 = vld [vmem:[#allocation2 + $0x30] sm:$0xff] }
 0x34d   : > { %18826 = vmatpush3.bf16.msra.mxu1 %v2089_v23  ;;  %v1764_v23 = vshll.u32 %v22151_v62, 16 }
 0x351   : > { %19412 = vmatmul.mubr.msk.bf16.gmra.mrb[56].mxu0 %vm354_vm1, %v6860_v13  ;;  %v1735_v13 = vshll.u32 %v23381_v43, 16  ;;  %v7358_v43 = vrot.slane %v23117_v16, 1  ;;  %v23611_v16 = vld [vmem:[%s26265_s3 + $0xc] sm:$0x3] }
 0x352   : > { %19415 = vmatprep.mubr.msk.bf16.mxu0 %vm354_vm1, %v6862_v12  ;;  %v22149_v12 = vld [vmem:[#allocation2 + $0x18] sm:$0xff] }
 0x353   : > { %v1744_v30 = vshrl.u32 %v22149_v12, 16  ;;  %v1740_v0 = vshll.u32 %v22149_v12, 16  ;;  %v1737_v41 = vrot.slane %v1735_v13, 1 }
 0x355   : > { %v1742_v33 = vrot.slane %v1740_v0, 1  ;;  %v1738_v12 = vor.u32 %v1737_v41, %v1733_v28  ;;  %v22150_v41 = vld [vmem:[#allocation2 + $0x28] sm:$0xff] }
 0x356   : > { %v1756_v28 = vshll.u32 %v22150_v41, 16 }
 0x357   : > { %v1746_v13 = vor.u32 %v1744_v30, %v1742_v33  ;;  %v1752_v30 = vshrl.u32 %v22148_v9, 16 }
 0x358   : > { %v1758_v26 = vrot.slane %v1756_v28, 1  ;;  %v22153_v28 = vld [vmem:[#allocation2 + $0x40] sm:$0xff] }
 0x359   : > { %19416 = vmatmul.mubr.msk.bf16.gmra.mrb[60].mxu0 %vm354_vm1, %v6864_v40  ;;  %v1743_v40 = vsel %vm1731_vm4, %v1738_v12, %v1742_v33  ;;  %v1751_v0 = vsel %vm1731_vm4, %v1746_v13, %v1750_v6  ;;  %v1760_v33 = vshrl.u32 %v22150_v41, 16  ;;  %v7362_v12 = vrot.slane %v23135_v42, 1 }
 0x35a   : > { %19421 = vmatprep.mubr.msk.bf16.mxu0 %vm354_vm1, %v7355_v17  ;;  %18827 = vmatprep.mubr.msk.bf16.mxu1 %vm354_vm1, %v1743_v40  ;;  %v7359_v17 = vsel %vm3227_vm2, %v7356_v38, %v7358_v43  ;;  %v1754_v38 = vor.u32 %v1752_v30, %v1750_v6  ;;  %v1766_v40 = vrot.slane %v1764_v23, 1  ;;  %v22152_v6 = vld [vmem:[#allocation2 + $0x38] sm:$0xff]  ;;  %v1768_v42 = vshrl.u32 %v22151_v62, 16 }
 0x35b   : > { %18828 = vmatmul.mubr.msk.bf16.vlgmr.msra.gmra.mrb[0].mxu1 %vm354_vm1, %v1751_v0  ;;  %v1762_v13 = vor.u32 %v1760_v33, %v1758_v26  ;;  %v7363_v4 = vsel %vm3227_vm2, %v7360_v49, %v7362_v12  ;;  %v1776_v41 = vshrl.u32 %v22152_v6, 16  ;;  %v1780_v30 = vshll.u32 %v22153_v28, 16 }
 0x35c   : > { %v1759_v9 = vsel %vm1731_vm4, %v1754_v38, %v1758_v26  ;;  %v7364_v26 = vrot.slane %v23154_v19, 1  ;;  %v1770_v33 = vor.u32 %v1768_v42, %v1766_v40  ;;  %v1784_v19 = vshrl.u32 %v22153_v28, 16 }
 0x35d   : > { %18831 = vmatprep.mubr.msk.bf16.mxu1 %vm354_vm1, %v1759_v9  ;;  %v1767_v0 = vsel %vm1731_vm4, %v1762_v13, %v1766_v40  ;;  %v1782_v38 = vrot.slane %v1780_v30, 1 }
 0x35e   : > { %v7365_v13 = vsel %vm3227_vm2, %v7362_v12, %v7364_v26  ;;  %v7370_v12 = vrot.slane %v23174_v61, 1 }
 0x35f   : > { %v1786_v42 = vor.u32 %v1784_v19, %v1782_v38 }
 0x361   : > { %19422 = vmatmul.mubr.msk.bf16.vlgmr.msra.gmra.mrb[0].mxu0 %vm354_vm1, %v7357_v45  ;;  %v7361_v45 = vsel %vm3227_vm2, %v7358_v43, %v7360_v49  ;;  %v7366_v43 = vrot.slane %v23158_v52, 1 }
 0x362   : > { %19486 = vmatpush3.bf16.msra.mxu0 %v8001_v63  ;;  %19425 = vmatprep.mubr.msk.bf16.mxu0 %vm354_vm1, %v7359_v17  ;;  %v1772_v63 = vshll.u32 %v22152_v6, 16 }
 0x363   : > { %22075 = vmatprep.subr.msk.bf16.mxu0 %vm1015_vm0, %v23611_v16  ;;  %18832 = vmatmul.mubr.msk.bf16.gmra.mrb[4].mxu1 %vm354_vm1, %v1767_v0  ;;  %v7367_v9 = vsel %vm3227_vm2, %v7364_v26, %v7366_v43  ;;  %v22154_v0 = vld [vmem:[#allocation2 + $0x48] sm:$0xff] }
 0x364   : > { %v1774_v17 = vrot.slane %v1772_v63, 1  ;;  %v1792_v40 = vshrl.u32 %v22154_v0, 16  ;;  %v7368_v63 = vrot.slane %v23172_v37, 1 }
 0x366   : > { %v1778_v23 = vor.u32 %v1776_v41, %v1774_v17  ;;  %v1775_v49 = vsel %vm1731_vm4, %v1770_v33, %v1774_v17  ;;  %v7369_v26 = vsel %vm3227_vm2, %v7366_v43, %v7368_v63  ;;  %v7371_v33 = vsel %vm3227_vm2, %v7368_v63, %v7370_v12  ;;  %v22158_v63 = vld [vmem:[#allocation2 + $0x68] sm:$0xff] }
 0x367   : > { %18835 = vmatprep.mubr.msk.bf16.mxu1 %vm354_vm1, %v1775_v49  ;;  %v7374_v43 = vrot.slane %v23190_v55, 1 }
 0x368   : > { %v1783_v62 = vsel %vm1731_vm4, %v1778_v23, %v1782_v38  ;;  %v22156_v23 = vld [vmem:[#allocation2 + $0x58] sm:$0xff] }
 0x369   : > { %19426 = vmatmul.mubr.msk.bf16.gmra.mrb[4].mxu0 %vm354_vm1, %v7361_v45  ;;  %v1788_v45 = vshll.u32 %v22154_v0, 16  ;;  %v1804_v49 = vshll.u32 %v22156_v23, 16  ;;  %v1808_v38 = vshrl.u32 %v22156_v23, 16 }
 0x36a   : > { %19429 = vmatprep.mubr.msk.bf16.mxu0 %vm354_vm1, %v7363_v4  ;;  %v22155_v4 = vld [vmem:[#allocation2 + $0x50] sm:$0xff] }
 0x36b   : > { %18836 = vmatmul.mubr.msk.bf16.gmra.mrb[8].mxu1 %vm354_vm1, %v1783_v62  ;;  %v1790_v52 = vrot.slane %v1788_v45, 1  ;;  %v1796_v6 = vshll.u32 %v22155_v4, 16  ;;  %v1800_v37 = vshrl.u32 %v22155_v4, 16  ;;  %v1806_v61 = vrot.slane %v1804_v49, 1  ;;  %v22157_v62 = vld [vmem:[#allocation2 + $0x60] sm:$0xff] }
 0x36d   : > { %v1794_v17 = vor.u32 %v1792_v40, %v1790_v52  ;;  %v1798_v41 = vrot.slane %v1796_v6, 1  ;;  %v1791_v30 = vsel %vm1731_vm4, %v1786_v42, %v1790_v52  ;;  %v1810_v45 = vor.u32 %v1808_v38, %v1806_v61 }
 0x36e   : > { %18839 = vmatprep.mubr.msk.bf16.mxu1 %vm354_vm1, %v1791_v30  ;;  %v1820_v42 = vshll.u32 %v22158_v63, 16 }
 0x36f   : > { %v1799_v28 = vsel %vm1731_vm4, %v1794_v17, %v1798_v41  ;;  %v1802_v0 = vor.u32 %v1800_v37, %v1798_v41  ;;  %v1824_v17 = vshrl.u32 %v22158_v63, 16  ;;  %v22159_v41 = vld [vmem:[#allocation2 + $0x70] sm:$0xff] }
 0x370   : > { %v1822_v55 = vrot.slane %v1820_v42, 1  ;;  %v1828_v30 = vshll.u32 %v22159_v41, 16 }
 0x371   : > { %19430 = vmatmul.mubr.msk.bf16.gmra.mrb[8].mxu0 %vm354_vm1, %v7365_v13  ;;  %v1812_v13 = vshll.u32 %v22157_v62, 16  ;;  %v1807_v52 = vsel %vm1731_vm4, %v1802_v0, %v1806_v61  ;;  %v22161_v0 = vld [vmem:[#allocation2 + $0x80] sm:$0xff] }
 0x372   : > { %19433 = vmatprep.mubr.msk.bf16.mxu0 %vm354_vm1, %v7367_v9  ;;  %v7372_v9 = vrot.slane %v23188_v8, 1  ;;  %v1816_v8 = vshrl.u32 %v22157_v62, 16  ;;  %v1830_v23 = vrot.slane %v1828_v30, 1  ;;  %v22160_v62 = vld [vmem:[#allocation2 + $0x78] sm:$0xff]  ;;  %v22163_v30 = vld [vmem:[#allocation2 + $0x90] sm:$0xff] }
 0x373   : > { %18840 = vmatmul.mubr.msk.bf16.gmra.mrb[12].mxu1 %vm354_vm1, %v1799_v28  ;;  %v1814_v19 = vrot.slane %v1812_v13, 1  ;;  %v7376_v28 = vrot.slane %v23204_v5, 1  ;;  %v1836_v13 = vshll.u32 %v22160_v62, 16  ;;  %v1832_v5 = vshrl.u32 %v22159_v41, 16 }
 0x374   : > { %18843 = vmatprep.mubr.msk.bf16.mxu1 %vm354_vm1, %v1807_v52  ;;  %v7373_v4 = vsel %vm3227_vm2, %v7370_v12, %v7372_v9  ;;  %v7375_v6 = vsel %vm3227_vm2, %v7372_v9, %v7374_v43  ;;  %v7378_v12 = vrot.slane %v23206_v44, 1  ;;  %v1840_v9 = vshrl.u32 %v22160_v62, 16 }
 0x375   : > { %v1815_v40 = vsel %vm1731_vm4, %v1810_v45, %v1814_v19  ;;  %v7377_v61 = vsel %vm3227_vm2, %v7374_v43, %v7376_v28  ;;  %v1838_v44 = vrot.slane %v1836_v13, 1  ;;  %v1844_v45 = vshll.u32 %v22161_v0, 16 }
 0x376   : > { %v7379_v38 = vsel %vm3227_vm2, %v7376_v28, %v7378_v12  ;;  %v1834_v52 = vor.u32 %v1832_v5, %v1830_v23  ;;  %v7382_v43 = vrot.slane %v23222_v27, 1  ;;  %v1860_v28 = vshll.u32 %v22163_v30, 16 }
 0x377   : > { %v1868_v13 = vshll.u32 %v23497_v57, 16  ;;  %v1872_v5 = vshrl.u32 %v23497_v57, 16 }
 0x379   : > { %19434 = vmatmul.mubr.msk.bf16.gmra.mrb[12].mxu0 %vm354_vm1, %v7369_v26  ;;  %v1818_v26 = vor.u32 %v1816_v8, %v1814_v19  ;;  %v7380_v19 = vrot.slane %v23220_v2, 1  ;;  %v1848_v2 = vshrl.u32 %v22161_v0, 16 }
 0x37a   : > { %19437 = vmatprep.mubr.msk.bf16.mxu0 %vm354_vm1, %v7371_v33  ;;  %v1826_v33 = vor.u32 %v1824_v17, %v1822_v55 }
 0x37b   : > { %18844 = vmatmul.mubr.msk.bf16.gmra.mrb[16].mxu1 %vm354_vm1, %v1815_v40  ;;  %v1823_v49 = vsel %vm1731_vm4, %v1818_v26, %v1822_v55  ;;  %v1842_v40 = vor.u32 %v1840_v9, %v1838_v44  ;;  %v7381_v42 = vsel %vm3227_vm2, %v7378_v12, %v7380_v19  ;;  %v7383_v8 = vsel %vm3227_vm2, %v7380_v19, %v7382_v43  ;;  %v22162_v55 = vld [vmem:[#allocation2 + $0x88] sm:$0xff] }
 0x37c   : > { %18847 = vmatprep.mubr.msk.bf16.mxu1 %vm354_vm1, %v1823_v49  ;;  %v1831_v37 = vsel %vm1731_vm4, %v1826_v33, %v1830_v23  ;;  %v1852_v17 = vshll.u32 %v22162_v55, 16  ;;  %v1856_v41 = vshrl.u32 %v22162_v55, 16  ;;  %v7384_v26 = vrot.slane %v23236_v34, 1 }
 0x37d   : > { %v7386_v12 = vrot.slane %v23238_v59, 1  ;;  %v1862_v49 = vrot.slane %v1860_v28, 1  ;;  %v1864_v34 = vshrl.u32 %v22163_v30, 16  ;;  %v1870_v59 = vrot.slane %v1868_v13, 1 }
 0x37e   : > { %v1854_v27 = vrot.slane %v1852_v17, 1  ;;  %v7388_v9 = vrot.slane %v23252_v60, 1  ;;  %v1880_v60 = vshrl.u32 %v23504_v31, 16  ;;  %v7392_v55 = vrot.slane %v23268_v32, 1 }
 0x37f   : > { %v7387_v62 = vsel %vm3227_vm2, %v7384_v26, %v7386_v12  ;;  %v1866_v0 = vor.u32 %v1864_v34, %v1862_v49  ;;  %v1874_v19 = vor.u32 %v1872_v5, %v1870_v59  ;;  %v1896_v32 = vshrl.u32 %v23516_v56, 16 }
 0x380   : > { %v1858_v23 = vor.u32 %v1856_v41, %v1854_v27 }
 0x381   : > { %19438 = vmatmul.mubr.msk.bf16.gmra.mrb[16].mxu0 %vm354_vm1, %v7373_v4  ;;  %v1846_v4 = vrot.slane %v1844_v45, 1  ;;  %v7390_v45 = vrot.slane %v23254_v25, 1 }
 0x382   : > { %19441 = vmatprep.mubr.msk.bf16.mxu0 %vm354_vm1, %v7375_v6  ;;  %v1839_v6 = vsel %vm1731_vm4, %v1834_v52, %v1838_v44  ;;  %v1876_v44 = vshll.u32 %v23504_v31, 16 }
 0x383   : > { %18848 = vmatmul.mubr.msk.bf16.gmra.mrb[20].mxu1 %vm354_vm1, %v1831_v37  ;;  %v1847_v63 = vsel %vm1731_vm4, %v1842_v40, %v1846_v4  ;;  %v1850_v33 = vor.u32 %v1848_v2, %v1846_v4  ;;  %v7389_v4 = vsel %vm3227_vm2, %v7386_v12, %v7388_v9  ;;  %v7394_v2 = vrot.slane %v23270_v47, 1 }
 0x384   : > { %18851 = vmatprep.mubr.msk.bf16.mxu1 %vm354_vm1, %v1839_v6  ;;  %v1878_v52 = vrot.slane %v1876_v44, 1  ;;  %v7391_v6 = vsel %vm3227_vm2, %v7388_v9, %v7390_v45  ;;  %v1900_v12 = vshll.u32 %v23521_v50, 16  ;;  %v1916_v9 = vshll.u32 %v23533_v46, 16 }
 0x385   : > { %v1855_v37 = vsel %vm1731_vm4, %v1850_v33, %v1854_v27  ;;  %v7395_v33 = vsel %vm3227_vm2, %v7392_v55, %v7394_v2 }
 0x386   : > { %v1879_v40 = vsel %vm1731_vm4, %v1874_v19, %v1878_v52  ;;  %v1882_v17 = vor.u32 %v1880_v60, %v1878_v52  ;;  %v1902_v47 = vrot.slane %v1900_v12, 1  ;;  %v7400_v19 = vrot.slane %v23300_v51, 1 }
 0x387   : > { %v1928_v51 = vshrl.u32 %v23540_v53, 16 }
 0x389   : > { %19442 = vmatmul.mubr.msk.bf16.gmra.mrb[20].mxu0 %vm354_vm1, %v7377_v61  ;;  %v1863_v61 = vsel %vm1731_vm4, %v1858_v23, %v1862_v49  ;;  %v1904_v23 = vshrl.u32 %v23521_v50, 16  ;;  %v1908_v49 = vshll.u32 %v23528_v39, 16 }
 0x38a   : > { %19445 = vmatprep.mubr.msk.bf16.mxu0 %vm354_vm1, %v7379_v38  ;;  %v7385_v38 = vsel %vm3227_vm2, %v7382_v43, %v7384_v26  ;;  %v1871_v43 = vsel %vm1731_vm4, %v1866_v0, %v1870_v59  ;;  %v7393_v26 = vsel %vm3227_vm2, %v7390_v45, %v7392_v55  ;;  %v1920_v0 = vshrl.u32 %v23533_v46, 16 }
 0x38b   : > { %18852 = vmatmul.mubr.msk.bf16.gmra.mrb[24].mxu1 %vm354_vm1, %v1847_v63  ;;  %v1884_v63 = vshll.u32 %v23509_v20, 16  ;;  %v1910_v13 = vrot.slane %v1908_v49, 1  ;;  %v1924_v45 = vshll.u32 %v23540_v53, 16  ;;  %v1940_v55 = vshll.u32 %v23552_v15, 16 }
 0x38c   : > { %18855 = vmatprep.mubr.msk.bf16.mxu1 %vm354_vm1, %v1855_v37  ;;  %v7396_v37 = vrot.slane %v23284_v58, 1  ;;  %v1912_v58 = vshrl.u32 %v23528_v39, 16  ;;  %v7408_v49 = vrot.slane %v23332_v21, 1  ;;  %v1960_v21 = vshrl.u32 %v23564_v18, 16 }
 0x38d   : > { %v1886_v25 = vrot.slane %v1884_v63, 1 }
 0x38e   : > { %v7397_v5 = vsel %vm3227_vm2, %v7394_v2, %v7396_v37  ;;  %v1914_v52 = vor.u32 %v1912_v58, %v1910_v13  ;;  %v1972_v58 = vshll.u32 %v23576_v14, 16 }
 0x38f   : > { %v1887_v30 = vsel %vm1731_vm4, %v1882_v17, %v1886_v25  ;;  %v7404_v17 = vrot.slane %v23316_v36, 1  ;;  %v1944_v36 = vshrl.u32 %v23552_v15, 16 }
 0x391   : > { %19446 = vmatmul.mubr.msk.bf16.gmra.mrb[24].mxu0 %vm354_vm1, %v7381_v42  ;;  %v1888_v42 = vshrl.u32 %v23509_v20, 16 }
 0x392   : > { %19449 = vmatprep.mubr.msk.bf16.mxu0 %vm354_vm1, %v7383_v8  ;;  %v1892_v8 = vshll.u32 %v23516_v56, 16 }
 0x393   : > { %18856 = vmatmul.mubr.msk.bf16.gmra.mrb[28].mxu1 %vm354_vm1, %v1863_v61  ;;  %v1890_v27 = vor.u32 %v1888_v42, %v1886_v25  ;;  %v1932_v42 = vshll.u32 %v23545_v7, 16 }
 0x394   : > { %18859 = vmatprep.mubr.msk.bf16.mxu1 %vm354_vm1, %v1871_v43  ;;  %v1894_v41 = vrot.slane %v1892_v8, 1  ;;  %v7402_v43 = vrot.slane %v23302_v10, 1  ;;  %v1936_v8 = vshrl.u32 %v23545_v7, 16 }
 0x395   : > { %v1934_v10 = vrot.slane %v1932_v42, 1  ;;  %v1976_v42 = vshrl.u32 %v23576_v14, 16 }
 0x396   : > { %v1895_v28 = vsel %vm1731_vm4, %v1890_v27, %v1894_v41  ;;  %v1898_v61 = vor.u32 %v1896_v32, %v1894_v41  ;;  %v7403_v25 = vsel %vm3227_vm2, %v7400_v19, %v7402_v43  ;;  %v7406_v27 = vrot.slane %v23318_v54, 1 }
 0x397   : > { %v1938_v41 = vor.u32 %v1936_v8, %v1934_v10  ;;  %v1948_v32 = vshll.u32 %v23557_v35, 16  ;;  %v1984_v8 = vshrl.u32 %v23583_v24, 16 }
 0x398   : > { %v1903_v34 = vsel %vm1731_vm4, %v1898_v61, %v1902_v47  ;;  %v7407_v12 = vsel %vm3227_vm2, %v7404_v17, %v7406_v27  ;;  %v7410_v61 = vrot.slane %v23334_v29, 1 }
 0x399   : > { %19450 = vmatmul.mubr.msk.bf16.gmra.mrb[28].mxu0 %vm354_vm1, %v7385_v38  ;;  %v7398_v38 = vrot.slane %v23286_v22, 1  ;;  %v1918_v22 = vrot.slane %v1916_v9, 1  ;;  %v1950_v54 = vrot.slane %v1948_v32, 1  ;;  %v1968_v9 = vshrl.u32 %v23569_v3, 16 }
 0x39a   : > { %19453 = vmatprep.mubr.msk.bf16.mxu0 %vm354_vm1, %v7387_v62  ;;  %v1906_v62 = vor.u32 %v1904_v23, %v1902_v47  ;;  %v1952_v47 = vshrl.u32 %v23557_v35, 16  ;;  %v1956_v23 = vshll.u32 %v23564_v18, 16 }
 0x39b   : > { %18860 = vmatmul.mubr.msk.bf16.gmra.mrb[32].mxu1 %vm354_vm1, %v1879_v40  ;;  %v7399_v44 = vsel %vm3227_vm2, %v7396_v37, %v7398_v38  ;;  %v1922_v40 = vor.u32 %v1920_v0, %v1918_v22  ;;  %v7401_v60 = vsel %vm3227_vm2, %v7398_v38, %v7400_v19  ;;  %v22165_v19 = vld [vmem:[#allocation3 + $0x118] sm:$0xff] }
 0x39c   : > { %18863 = vmatprep.mubr.msk.bf16.mxu1 %vm354_vm1, %v1887_v30  ;;  %v1911_v59 = vsel %vm1731_vm4, %v1906_v62, %v1910_v13  ;;  %v1942_v30 = vrot.slane %v1940_v55, 1  ;;  %v1954_v38 = vor.u32 %v1952_v47, %v1950_v54  ;;  %v1958_v62 = vrot.slane %v1956_v23, 1 }
 0x39e   : > { %v1946_v37 = vor.u32 %v1944_v36, %v1942_v30 }
 0x3a0   : > { %v1951_v13 = vsel %vm1731_vm4, %v1946_v37, %v1950_v54 }
 0x3a1   : > { %19454 = vmatmul.mubr.msk.bf16.gmra.mrb[32].mxu0 %vm354_vm1, %v7389_v4  ;;  %v1926_v4 = vrot.slane %v1924_v45, 1  ;;  %v1962_v45 = vor.u32 %v1960_v21, %v1958_v62 }
 0x3a2   : > { %19457 = vmatprep.mubr.msk.bf16.mxu0 %vm354_vm1, %v7391_v6  ;;  %v1919_v6 = vsel %vm1731_vm4, %v1914_v52, %v1918_v22  ;;  %v22164_v22 = vld [vmem:[#allocation3 + $0x110] sm:$0xff]  ;;  %v7414_v52 = vrot.slane %v22165_v19, 1 }
 0x3a3   : > { %18864 = vmatmul.mubr.msk.bf16.gmra.mrb[36].mxu1 %vm354_vm1, %v1895_v28  ;;  %v1927_v63 = vsel %vm1731_vm4, %v1922_v40, %v1926_v4  ;;  %v1930_v2 = vor.u32 %v1928_v51, %v1926_v4  ;;  %v7412_v0 = vrot.slane %v22164_v22, 1  ;;  %v1974_v40 = vrot.slane %v1972_v58, 1  ;;  %v23782_v51 = vld [vmem:[#allocation2 + $0x110] sm:$0x1]  ;;  %v26323_v58 = vld [vmem:[#allocation6_spill] sm:$0xff] }
 0x3a4   : > { %18867 = vmatprep.mubr.msk.bf16.mxu1 %vm354_vm1, %v1903_v34  ;;  %v1959_v34 = vsel %vm1731_vm4, %v1954_v38, %v1958_v62  ;;  %v1988_v55 = vshll.u32 %v23782_v51, 16 }
 0x3a5   : > { %v1935_v28 = vsel %vm1731_vm4, %v1930_v2, %v1934_v10  ;;  %v1978_v2 = vor.u32 %v1976_v42, %v1974_v40 }
 0x3a9   : > { %19458 = vmatmul.mubr.msk.bf16.gmra.mrb[36].mxu0 %vm354_vm1, %v7393_v26  ;;  %v1943_v26 = vsel %vm1731_vm4, %v1938_v41, %v1942_v30  ;;  %v1990_v41 = vrot.slane %v1988_v55, 1 }
 0x3aa   : > { %19461 = vmatprep.mubr.msk.bf16.mxu0 %vm354_vm1, %v7395_v33  ;;  %v7405_v33 = vsel %vm3227_vm2, %v7402_v43, %v7404_v17  ;;  %v7416_v17 = vrot.slane %v23360_v48, 1  ;;  %v16938_v48 = vld [vmem:[%s26265_s3 + $0x2] sm:$0x3] }
 0x3ab   : > { %18868 = vmatmul.mubr.msk.bf16.gmra.mrb[40].mxu1 %vm354_vm1, %v1911_v59  ;;  %v7409_v59 = vsel %vm3227_vm2, %v7406_v27, %v7408_v49  ;;  %22064 = vmatprep.subr.msk.bf16.mxu1 %vm1015_vm0, %v16938_v48 }
 0x3ac   : > { %18871 = vmatprep.mubr.msk.bf16.mxu1 %vm354_vm1, %v1919_v6 }
 0x3b1   : > { %19462 = vmatmul.mubr.msk.bf16.gmra.mrb[40].mxu0 %vm354_vm1, %v7397_v5  ;;  %v7411_v5 = vsel %vm3227_vm2, %v7408_v49, %v7410_v61  ;;  %v22167_v49 = vld [vmem:[#allocation3 + $0x20] sm:$0xff] }
 0x3b2   : > { %19465 = vmatprep.mubr.msk.bf16.mxu0 %vm354_vm1, %v7399_v44  ;;  %v1964_v44 = vshll.u32 %v23569_v3, 16  ;;  %v2495_v37 = vshll.u32 %v22167_v49, 16 }
 0x3b3   : > { %18872 = vmatmul.mubr.msk.bf16.gmra.mrb[44].mxu1 %vm354_vm1, %v1927_v63  ;;  %v7413_v63 = vsel %vm3227_vm2, %v7410_v61, %v7412_v0  ;;  %v2836_v61 = vsel %vm1015_vm0, %v16938_v48, 0 }
 0x3b4   : > { %18875 = vmatprep.mubr.msk.bf16.mxu1 %vm354_vm1, %v1935_v28  ;;  %v1966_v29 = vrot.slane %v1964_v44, 1  ;;  %18892 = vmatpush3.bf16.msra.mxu1 %v2836_v61  ;;  %v22169_v44 = vld [vmem:[#allocation3 + $0x28] sm:$0xff] }
 0x3b5   : > { %v2503_v21 = vshll.u32 %v22169_v44, 16 }
 0x3b6   : > { %v1970_v43 = vor.u32 %v1968_v9, %v1966_v29  ;;  %v1967_v4 = vsel %vm1731_vm4, %v1962_v45, %v1966_v29  ;;  %v23816_v29 = vld [vmem:[%s26264_s2 + $0xe] sm:$0x3]  ;;  %v2499_v9 = vshrl.u32 %v22167_v49, 16  ;;  %v22170_v45 = vld [vmem:[#allocation3 + $0x30] sm:$0xff] }
 0x3b7   : > { %v2505_v22 = vrot.slane %v2503_v21, 1  ;;  %v2511_v19 = vshll.u32 %v22170_v45, 16 }
 0x3b8   : > { %v1975_v6 = vsel %vm1731_vm4, %v1970_v43, %v1974_v40 }
 0x3b9   : > { %19466 = vmatmul.mubr.msk.bf16.gmra.mrb[44].mxu0 %vm354_vm1, %v7401_v60  ;;  %v7415_v60 = vsel %vm3227_vm2, %v7412_v0, %v7414_v52  ;;  %v2507_v0 = vshrl.u32 %v22169_v44, 16  ;;  %v2513_v43 = vrot.slane %v2511_v19, 1  ;;  %v22176_v44 = vld [vmem:[#allocation3 + $0x60] sm:$0xff] }
 0x3ba   : > { %19469 = vmatprep.mubr.msk.bf16.mxu0 %vm354_vm1, %v7403_v25  ;;  %v1980_v25 = vshll.u32 %v23583_v24, 16  ;;  %v2559_v21 = vshll.u32 %v22176_v44, 16 }
 0x3bb   : > { %18876 = vmatmul.mubr.msk.bf16.gmra.mrb[48].mxu1 %vm354_vm1, %v1943_v26  ;;  %v2444_v26 = vld [vmem:[#allocation3 + $0x10] sm:$0xff] }
 0x3bc   : > { %18879 = vmatprep.mubr.msk.bf16.mxu1 %vm354_vm1, %v1951_v13  ;;  %v1982_v10 = vrot.slane %v1980_v25, 1  ;;  %v2482_v24 = vshll.u32 %v2444_v26, 16  ;;  %v2480_v36 = vshrl.u32 %v2444_v26, 16  ;;  %v2497_v13 = vrot.slane %v2495_v37, 1  ;;  %v26325_v25 = vld [vmem:[#allocation8_spill] sm:$0xff] }
 0x3bd   : > { %v22173_v26 = vld [vmem:[#allocation3 + $0x48] sm:$0xff] }
 0x3be   : > { %v1986_v27 = vor.u32 %v1984_v8, %v1982_v10  ;;  %v1983_v30 = vsel %vm1731_vm4, %v1978_v2, %v1982_v10  ;;  %v2484_v54 = vrot.slane %v2482_v24, 1  ;;  %v22172_v8 = vld [vmem:[#allocation3 + $0x40] sm:$0xff] }
 0x3bf   : > { %v2527_v55 = vshll.u32 %v22172_v8, 16  ;;  %v2531_v24 = vshrl.u32 %v22172_v8, 16 }
 0x3c0   : > { %v1991_v28 = vsel %vm1731_vm4, %v1986_v27, %v1990_v41  ;;  %v2485_v38 = vor.u32 %v2484_v54, %v2480_v36  ;;  %v2539_v36 = vshrl.u32 %v22173_v26, 16  ;;  %v22174_v54 = vld [vmem:[#allocation3 + $0x50] sm:$0xff] }
 0x3c1   : > { %19470 = vmatmul.mubr.msk.bf16.gmra.mrb[48].mxu0 %vm354_vm1, %v7405_v33  ;;  %v7417_v33 = vsel %vm3227_vm2, %v7414_v52, %v7416_v17  ;;  %v26324_v52 = vld [vmem:[#allocation7_spill] sm:$0xff]  ;;  %v26326_v17 = vld [vmem:[#allocation9_spill] sm:$0xff]  ;;  %v2529_v41 = vrot.slane %v2527_v55, 1  ;;  %v2543_v48 = vshll.u32 %v22174_v54, 16 }
 0x3c2   : > { %19473 = vmatprep.mubr.msk.bf16.mxu0 %vm354_vm1, %v7407_v12  ;;  %v22166_v12 = vld [vmem:[#allocation3 + $0x18] sm:$0xff] }
 0x3c3   : > { %18880 = vmatmul.mubr.msk.bf16.gmra.mrb[52].mxu1 %vm354_vm1, %v1959_v34  ;;  %v2487_v32 = vshll.u32 %v22166_v12, 16  ;;  %v2491_v23 = vshrl.u32 %v22166_v12, 16  ;;  %v26327_v12 = vld [vmem:[#allocation10_spill] sm:$0xff]  ;;  %v2545_v37 = vrot.slane %v2543_v48, 1 }
 0x3c4   : > { %18883 = vmatprep.mubr.msk.bf16.mxu1 %vm354_vm1, %v1967_v4 }
 0x3c5   : > { %v2489_v47 = vrot.slane %v2487_v32, 1 }
 0x3c7   : > { %v2493_v62 = vor.u32 %v2491_v23, %v2489_v47  ;;  %v2490_v34 = vsel %vm1731_vm4, %v2485_v38, %v2489_v47  ;;  %v26328_v47 = vld [vmem:[#allocation11_spill] sm:$0xff]  ;;  %v2533_v23 = vor.u32 %v2531_v24, %v2529_v41  ;;  %v26334_v24 = vld [vmem:[#allocation17_spill] sm:$0xff] }
 0x3c9   : > { %19474 = vmatmul.mubr.msk.bf16.gmra.mrb[52].mxu0 %vm354_vm1, %v7409_v59  ;;  %v22168_v59 = vld [vmem:[%s26264_s2 + $0x4] sm:$0x3] }
 0x3ca   : > { %19477 = vmatprep.mubr.msk.bf16.mxu0 %vm354_vm1, %v7411_v5  ;;  %22066 = vmatprep.subr.msk.bf16.mxu1 %vm1015_vm0, %v22168_v59  ;;  %v8487_v5 = vsel %vm1015_vm0, %v23611_v16, 0  ;;  %v2501_v16 = vor.u32 %v2499_v9, %v2497_v13  ;;  %v26329_v59 = vld [vmem:[#allocation12_spill] sm:$0xff]  ;;  %v26330_v9 = vld [vmem:[#allocation13_spill] sm:$0xff] }
 0x3cb   : > { %18884 = vmatmul.mubr.msk.bf16.gmra.mrb[56].mxu1 %vm354_vm1, %v1975_v6  ;;  %v22171_v6 = vld [vmem:[#allocation3 + $0x38] sm:$0xff] }
 0x3cc   : > { %18887 = vmatprep.mubr.msk.bf16.mxu1 %vm354_vm1, %v1983_v30  ;;  %v2506_v40 = vsel %vm1731_vm4, %v2501_v16, %v2505_v22  ;;  %v2523_v10 = vshrl.u32 %v22171_v6, 16 }
 0x3d1   : > { %19478 = vmatmul.mubr.msk.bf16.gmra.mrb[56].mxu0 %vm354_vm1, %v7413_v63  ;;  %v2519_v63 = vshll.u32 %v22171_v6, 16  ;;  %v22178_v6 = vld [vmem:[#allocation3 + $0x70] sm:$0xff] }
 0x3d2   : > { %19481 = vmatprep.mubr.msk.bf16.mxu0 %vm354_vm1, %v7415_v60  ;;  %v2515_v60 = vshrl.u32 %v22170_v45, 16 }
 0x3d3   : > { %18888 = vmatmul.mubr.msk.bf16.gmra.mrb[60].mxu1 %vm354_vm1, %v1991_v28  ;;  %v2521_v42 = vrot.slane %v2519_v63, 1  ;;  %v2575_v63 = vshll.u32 %v22178_v6, 16 }
 0x3d4   : > { %18893 = vmatprep.mubr.msk.bf16.mxu1 %vm354_vm1, %v2490_v34  ;;  %v2517_v2 = vor.u32 %v2515_v60, %v2513_v43  ;;  %v2547_v34 = vshrl.u32 %v22174_v54, 16  ;;  %v26332_v60 = vld [vmem:[#allocation15_spill] sm:$0xff] }
 0x3d5   : > { %v2525_v27 = vor.u32 %v2523_v10, %v2521_v42  ;;  %v2577_v10 = vrot.slane %v2575_v63, 1 }
 0x3d6   : > { %v2522_v30 = vsel %vm1731_vm4, %v2517_v2, %v2521_v42 }
 0x3d7   : > { %v2530_v28 = vsel %vm1731_vm4, %v2525_v27, %v2529_v41  ;;  %v2579_v27 = vshrl.u32 %v22178_v6, 16  ;;  %v26333_v41 = vld [vmem:[#allocation16_spill] sm:$0xff] }
 0x3d9   : > { %19482 = vmatmul.mubr.msk.bf16.gmra.mrb[60].mxu0 %vm354_vm1, %v7417_v33  ;;  %v2535_v33 = vshll.u32 %v22173_v26, 16  ;;  %v22180_v26 = vld [vmem:[#allocation3 + $0x80] sm:$0xff] }
 0x3da   : > { %19487 = vmatprep.mubr.msk.bf16.mxu0 %vm354_vm1, %v23411_v11  ;;  %v2498_v11 = vsel %vm1731_vm4, %v2493_v62, %v2497_v13  ;;  %v22175_v62 = vld [vmem:[#allocation3 + $0x58] sm:$0xff] }
 0x3db   : > { %18894 = vmatmul.mubr.msk.bf16.vlgmr.msra.gmra.mrb[0].mxu1 %vm354_vm1, %v2498_v11  ;;  %v2537_v32 = vrot.slane %v2535_v33, 1  ;;  %v2551_v13 = vshll.u32 %v22175_v62, 16  ;;  %v2591_v33 = vshll.u32 %v22180_v26, 16 }
 0x3dc   : > { %20476 = vmatpush3.bf16.msra.mxu1 %v22304_v1  ;;  %v2509_v1 = vor.u32 %v2507_v0, %v2505_v22  ;;  %18897 = vmatprep.mubr.msk.bf16.mxu1 %vm354_vm1, %v2506_v40  ;;  %v2561_v0 = vrot.slane %v2559_v21, 1 }
 0x3dd   : > { %v2541_v49 = vor.u32 %v2539_v36, %v2537_v32  ;;  %v2538_v61 = vsel %vm1731_vm4, %v2533_v23, %v2537_v32  ;;  %v2553_v11 = vrot.slane %v2551_v13, 1  ;;  %v2593_v36 = vrot.slane %v2591_v33, 1 }
 0x3de   : > { %v2514_v4 = vsel %vm1731_vm4, %v2509_v1, %v2513_v43  ;;  %v2563_v1 = vshrl.u32 %v22176_v44, 16  ;;  %v26331_v43 = vld [vmem:[#allocation14_spill] sm:$0xff] }
 0x3df   : > { %v2546_v38 = vsel %vm1731_vm4, %v2541_v49, %v2545_v37  ;;  %v2595_v49 = vshrl.u32 %v22180_v26, 16  ;;  %v22183_v44 = vld [vmem:[#allocation3 + $0x98] sm:$0xff] }
 0x3e1   : > { %19488 = vmatmul.mubr.msk.bf16.vlgmr.msra.gmra.mrb[0].mxu0 %vm354_vm1, %v26323_v58  ;;  %v2549_v58 = vor.u32 %v2547_v34, %v2545_v37  ;;  %v2597_v13 = vor.u32 %v2595_v49, %v2593_v36 }
 0x3e2   : > { %19552 = vmatpush3.bf16.msra.mxu0 %v8487_v5  ;;  %19491 = vmatprep.mubr.msk.bf16.mxu0 %vm354_vm1, %v26324_v52  ;;  %v2555_v5 = vshrl.u32 %v22175_v62, 16  ;;  %v22177_v52 = vld [vmem:[#allocation3 + $0x68] sm:$0xff] }
 0x3e3   : > { %22076 = vmatprep.subr.msk.bf16.mxu0 %vm1015_vm0, %v23816_v29  ;;  %18898 = vmatmul.mubr.msk.bf16.gmra.mrb[4].mxu1 %vm354_vm1, %v2514_v4  ;;  %v2554_v45 = vsel %vm1731_vm4, %v2549_v58, %v2553_v11  ;;  %v2567_v16 = vshll.u32 %v22177_v52, 16  ;;  %v2571_v4 = vshrl.u32 %v22177_v52, 16  ;;  %v2619_v58 = vshrl.u32 %v22183_v44, 16 }
 0x3e4   : > { %18901 = vmatprep.mubr.msk.bf16.mxu1 %vm354_vm1, %v2522_v30  ;;  %v2557_v22 = vor.u32 %v2555_v5, %v2553_v11 }
 0x3e5   : > { %v2569_v40 = vrot.slane %v2567_v16, 1 }
 0x3e6   : > { %v2562_v19 = vsel %vm1731_vm4, %v2557_v22, %v2561_v0 }
 0x3e7   : > { %v2573_v42 = vor.u32 %v2571_v4, %v2569_v40 }
 0x3e9   : > { %19492 = vmatmul.mubr.msk.bf16.gmra.mrb[4].mxu0 %vm354_vm1, %v26325_v25  ;;  %v2565_v25 = vor.u32 %v2563_v1, %v2561_v0  ;;  %v2578_v55 = vsel %vm1731_vm4, %v2573_v42, %v2577_v10  ;;  %v22185_v1 = vld [vmem:[#allocation3 + $0xa8] sm:$0xff] }
 0x3ea   : > { %19495 = vmatprep.mubr.msk.bf16.mxu0 %vm354_vm1, %v26326_v17  ;;  %v22179_v17 = vld [vmem:[#allocation3 + $0x78] sm:$0xff]  ;;  %v2635_v4 = vshrl.u32 %v22185_v1, 16 }
 0x3eb   : > { %18902 = vmatmul.mubr.msk.bf16.gmra.mrb[8].mxu1 %vm354_vm1, %v2530_v28  ;;  %v2570_v8 = vsel %vm1731_vm4, %v2565_v25, %v2569_v40  ;;  %v2583_v2 = vshll.u32 %v22179_v17, 16  ;;  %v2587_v28 = vshrl.u32 %v22179_v17, 16 }
 0x3ec   : > { %18905 = vmatprep.mubr.msk.bf16.mxu1 %vm354_vm1, %v2538_v61 }
 0x3ed   : > { %v2585_v30 = vrot.slane %v2583_v2, 1 }
 0x3ef   : > { %v2589_v32 = vor.u32 %v2587_v28, %v2585_v30 }
 0x3f1   : > { %19496 = vmatmul.mubr.msk.bf16.gmra.mrb[8].mxu0 %vm354_vm1, %v26327_v12  ;;  %v2581_v12 = vor.u32 %v2579_v27, %v2577_v10  ;;  %v2594_v48 = vsel %vm1731_vm4, %v2589_v32, %v2593_v36 }
 0x3f2   : > { %19499 = vmatprep.mubr.msk.bf16.mxu0 %vm354_vm1, %v26328_v47  ;;  %v22181_v47 = vld [vmem:[#allocation3 + $0x88] sm:$0xff] }
 0x3f3   : > { %18906 = vmatmul.mubr.msk.bf16.gmra.mrb[12].mxu1 %vm354_vm1, %v2546_v38  ;;  %v2586_v54 = vsel %vm1731_vm4, %v2581_v12, %v2585_v30  ;;  %v2599_v23 = vshll.u32 %v22181_v47, 16  ;;  %v2603_v61 = vshrl.u32 %v22181_v47, 16  ;;  %v22182_v38 = vld [vmem:[#allocation3 + $0x90] sm:$0xff] }
 0x3f4   : > { %18909 = vmatprep.mubr.msk.bf16.mxu1 %vm354_vm1, %v2554_v45  ;;  %v2607_v62 = vshll.u32 %v22182_v38, 16  ;;  %v2611_v21 = vshrl.u32 %v22182_v38, 16 }
 0x3f5   : > { %v2601_v37 = vrot.slane %v2599_v23, 1 }
 0x3f7   : > { %v2605_v34 = vor.u32 %v2603_v61, %v2601_v37  ;;  %v2602_v11 = vsel %vm1731_vm4, %v2597_v13, %v2601_v37  ;;  %v22191_v61 = vld [vmem:[#allocation3 + $0xd8] sm:$0xff] }
 0x3f8   : > { %v2683_v13 = vshrl.u32 %v22191_v61, 16 }
 0x3f9   : > { %19500 = vmatmul.mubr.msk.bf16.gmra.mrb[12].mxu0 %vm354_vm1, %v26329_v59  ;;  %v2609_v59 = vrot.slane %v2607_v62, 1 }
 0x3fa   : > { %19503 = vmatprep.mubr.msk.bf16.mxu0 %vm354_vm1, %v26330_v9 }
 0x3fb   : > { %18910 = vmatmul.mubr.msk.bf16.gmra.mrb[16].mxu1 %vm354_vm1, %v2562_v19  ;;  %v2610_v5 = vsel %vm1731_vm4, %v2605_v34, %v2609_v59  ;;  %v2613_v0 = vor.u32 %v2611_v21, %v2609_v59  ;;  %v22193_v21 = vld [vmem:[#allocation3 + $0xe8] sm:$0xff] }
 0x3fc   : > { %18913 = vmatprep.mubr.msk.bf16.mxu1 %vm354_vm1, %v2570_v8  ;;  %v22187_v8 = vld [vmem:[#allocation3 + $0xb8] sm:$0xff] }
 0x3fd   : > { %v2651_v2 = vshrl.u32 %v22187_v8, 16 }
 0x401   : > { %19504 = vmatmul.mubr.msk.bf16.gmra.mrb[16].mxu0 %vm354_vm1, %v26331_v43 }
 0x402   : > { %19507 = vmatprep.mubr.msk.bf16.mxu0 %vm354_vm1, %v26332_v60 }
 0x403   : > { %18914 = vmatmul.mubr.msk.bf16.gmra.mrb[20].mxu1 %vm354_vm1, %v2578_v55 }
 0x404   : > { %18917 = vmatprep.mubr.msk.bf16.mxu1 %vm354_vm1, %v2586_v54 }
 0x409   : > { %19508 = vmatmul.mubr.msk.bf16.gmra.mrb[20].mxu0 %vm354_vm1, %v26333_v41 }
 0x40a   : > { %19511 = vmatprep.mubr.msk.bf16.mxu0 %vm354_vm1, %v26334_v24  ;;  %v22189_v24 = vld [vmem:[#allocation3 + $0xc8] sm:$0xff] }
 0x40b   : > { %18918 = vmatmul.mubr.msk.bf16.gmra.mrb[24].mxu1 %vm354_vm1, %v2594_v48  ;;  %v2667_v36 = vshrl.u32 %v22189_v24, 16 }
 0x40c   : > { %18921 = vmatprep.mubr.msk.bf16.mxu1 %vm354_vm1, %v2602_v11 }
 0x411   : > { %19512 = vmatmul.mubr.msk.bf16.gmra.mrb[24].mxu0 %vm354_vm1, %v23497_v57  ;;  %v2615_v57 = vshll.u32 %v22183_v44, 16 }
 0x412   : > { %19515 = vmatprep.mubr.msk.bf16.mxu0 %vm354_vm1, %v23504_v31  ;;  %v22184_v31 = vld [vmem:[#allocation3 + $0xa0] sm:$0xff] }
 0x413   : > { %18922 = vmatmul.mubr.msk.bf16.gmra.mrb[28].mxu1 %vm354_vm1, %v2610_v5  ;;  %v2617_v9 = vrot.slane %v2615_v57, 1  ;;  %v2623_v22 = vshll.u32 %v22184_v31, 16  ;;  %v2627_v43 = vshrl.u32 %v22184_v31, 16  ;;  %v2699_v31 = vshrl.u32 %v22193_v21, 16 }
 0x415   : > { %v2621_v45 = vor.u32 %v2619_v58, %v2617_v9  ;;  %v2625_v19 = vrot.slane %v2623_v22, 1  ;;  %v2618_v52 = vsel %vm1731_vm4, %v2613_v0, %v2617_v9 }
 0x416   : > { %18925 = vmatprep.mubr.msk.bf16.mxu1 %vm354_vm1, %v2618_v52 }
 0x417   : > { %v2626_v16 = vsel %vm1731_vm4, %v2621_v45, %v2625_v19  ;;  %v2629_v63 = vor.u32 %v2627_v43, %v2625_v19 }
 0x419   : > { %19516 = vmatmul.mubr.msk.bf16.gmra.mrb[28].mxu0 %vm354_vm1, %v23509_v20  ;;  %v2631_v20 = vshll.u32 %v22185_v1, 16  ;;  %v7898_v1 = vld [vmem:[#allocation2 + $0x110] sm:$0xff] }
 0x41a   : > { %19519 = vmatprep.mubr.msk.bf16.mxu0 %vm354_vm1, %v23516_v56  ;;  %v22186_v56 = vld [vmem:[#allocation3 + $0xb0] sm:$0xff] }
 0x41b   : > { %18926 = vmatmul.mubr.msk.bf16.gmra.mrb[32].mxu1 %vm354_vm1, %v2626_v16  ;;  %v2633_v40 = vrot.slane %v2631_v20, 1  ;;  %v2639_v6 = vshll.u32 %v22186_v56, 16  ;;  %v2643_v55 = vshrl.u32 %v22186_v56, 16  ;;  %v22197_v56 = vld [vmem:[#allocation3 + $0x100] sm:$0xff] }
 0x41d   : > { %v2637_v60 = vor.u32 %v2635_v4, %v2633_v40  ;;  %v2641_v25 = vrot.slane %v2639_v6, 1  ;;  %v2634_v42 = vsel %vm1731_vm4, %v2629_v63, %v2633_v40  ;;  %v23924_v40 = vld [vmem:[#allocation2 + $0x108] sm:$0xff]  ;;  %v2719_v6 = vshll.u32 %v22197_v56, 16 }
 0x41e   : > { %18929 = vmatprep.mubr.msk.bf16.mxu1 %vm354_vm1, %v2634_v42 }
 0x41f   : > { %v2642_v10 = vsel %vm1731_vm4, %v2637_v60, %v2641_v25  ;;  %v2645_v41 = vor.u32 %v2643_v55, %v2641_v25  ;;  %v2721_v25 = vrot.slane %v2719_v6, 1  ;;  %v22198_v55 = vld [vmem:[#allocation3 + $0x108] sm:$0xff] }
 0x421   : > { %19520 = vmatmul.mubr.msk.bf16.gmra.mrb[32].mxu0 %vm354_vm1, %v23521_v50  ;;  %v2647_v50 = vshll.u32 %v22187_v8, 16  ;;  %v7899_v8 = vld [vmem:[#allocation2 + $0x118] sm:$0xff] }
 0x422   : > { %19523 = vmatprep.mubr.msk.bf16.mxu0 %vm354_vm1, %v23528_v39  ;;  %v22188_v39 = vld [vmem:[#allocation3 + $0xc0] sm:$0xff] }
 0x423   : > { %18930 = vmatmul.mubr.msk.bf16.gmra.mrb[36].mxu1 %vm354_vm1, %v2642_v10  ;;  %v2649_v17 = vrot.slane %v2647_v50, 1  ;;  %v2655_v27 = vshll.u32 %v22188_v39, 16  ;;  %v2659_v12 = vshrl.u32 %v22188_v39, 16  ;;  %v7900_v50 = vld [vmem:[#allocation2 + $0x120] sm:$0xff] }
 0x425   : > { %v2653_v30 = vor.u32 %v2651_v2, %v2649_v17  ;;  %v2657_v28 = vrot.slane %v2655_v27, 1  ;;  %v2650_v26 = vsel %vm1731_vm4, %v2645_v41, %v2649_v17  ;;  %v2727_v17 = vshll.u32 %v22198_v55, 16  ;;  %v22199_v41 = vld [vmem:[#allocation3 + $0x110] sm:$0x1] }
 0x426   : > { %18933 = vmatprep.mubr.msk.bf16.mxu1 %vm354_vm1, %v2650_v26  ;;  %v2723_v2 = vshrl.u32 %v22197_v56, 16  ;;  %v2731_v27 = vshrl.u32 %v22198_v55, 16 }
 0x427   : > { %v2658_v33 = vsel %vm1731_vm4, %v2653_v30, %v2657_v28  ;;  %v2661_v48 = vor.u32 %v2659_v12, %v2657_v28  ;;  %v2729_v39 = vrot.slane %v2727_v17, 1  ;;  %v2735_v30 = vshll.u32 %v22199_v41, 16  ;;  %v7901_v12 = vld [vmem:[#allocation2 + $0x128] sm:$0xff] }
 0x428   : > { %v2725_v28 = vor.u32 %v2723_v2, %v2721_v25  ;;  %v8367_v2 = vld [vmem:[#allocation3 + $0x88] sm:$0xff] }
 0x429   : > { %19524 = vmatmul.mubr.msk.bf16.gmra.mrb[36].mxu0 %vm354_vm1, %v23533_v46  ;;  %v2663_v46 = vshll.u32 %v22189_v24, 16  ;;  %v2733_v26 = vor.u32 %v2731_v27, %v2729_v39  ;;  %v22212_v27 = vld [vmem:[#allocation2 + $0xf8] sm:$0xff] }
 0x42a   : > { %19527 = vmatprep.mubr.msk.bf16.mxu0 %vm354_vm1, %v23540_v53  ;;  %v22190_v53 = vld [vmem:[#allocation3 + $0xd0] sm:$0xff]  ;;  %v2730_v24 = vsel %vm1731_vm4, %v2725_v28, %v2729_v39  ;;  %v3285_v41 = vrot.slane %v22212_v27, 1 }
 0x42b   : > { %18934 = vmatmul.mubr.msk.bf16.gmra.mrb[40].mxu1 %vm354_vm1, %v2658_v33  ;;  %v2665_v32 = vrot.slane %v2663_v46, 1  ;;  %v2671_v54 = vshll.u32 %v22190_v53, 16  ;;  %v2675_v38 = vshrl.u32 %v22190_v53, 16  ;;  %v2737_v33 = vrot.slane %v2735_v30, 1  ;;  %v8368_v39 = vld [vmem:[#allocation3 + $0x90] sm:$0xff]  ;;  %v22213_v30 = vld [vmem:[#allocation2 + $0x100] sm:$0xff] }
 0x42c   : > { %v3287_v28 = vrot.slane %v22213_v30, 1 }
 0x42d   : > { %v2669_v47 = vor.u32 %v2667_v36, %v2665_v32  ;;  %v2673_v23 = vrot.slane %v2671_v54, 1  ;;  %v2666_v49 = vsel %vm1731_vm4, %v2661_v48, %v2665_v32  ;;  %v2738_v46 = vsel %vm1731_vm4, %v2733_v26, %v2737_v33  ;;  %v8356_v32 = vld [vmem:[#allocation3 + $0x30] sm:$0xff]  ;;  %v22200_v36 = vld [vmem:[#allocation2 + $0x98] sm:$0xff]  ;;  %v22201_v54 = vld [vmem:[#allocation2 + $0xa0] sm:$0xff] }
 0x42e   : > { %18937 = vmatprep.mubr.msk.bf16.mxu1 %vm354_vm1, %v2666_v49  ;;  %v3261_v53 = vrot.slane %v22200_v36, 1  ;;  %v3263_v48 = vrot.slane %v22201_v54, 1  ;;  %v3288_v33 = vsel %vm3227_vm2, %v3285_v41, %v3287_v28  ;;  %v8371_v54 = vld [vmem:[#allocation3 + $0xa8] sm:$0xff] }
 0x42f   : > { %v2674_v37 = vsel %vm1731_vm4, %v2669_v47, %v2673_v23  ;;  %v2677_v59 = vor.u32 %v2675_v38, %v2673_v23  ;;  %v26335_v47 = vld [vmem:[#allocation5_spill] sm:$0xff]  ;;  %v8358_v38 = vld [vmem:[#allocation3 + $0x40] sm:$0xff] }
 0x430   : > { %v26336_v23 = vrot.slane %v26335_v47, 1  ;;  %v8373_v47 = vld [vmem:[#allocation3 + $0xb8] sm:$0xff] }
 0x431   : > { %19528 = vmatmul.mubr.msk.bf16.gmra.mrb[40].mxu0 %vm354_vm1, %v23545_v7  ;;  %v2679_v7 = vshll.u32 %v22191_v61, 16  ;;  %v8357_v61 = vld [vmem:[#allocation3 + $0x38] sm:$0xff] }
 0x432   : > { %19531 = vmatprep.mubr.msk.bf16.mxu0 %vm354_vm1, %v23552_v15  ;;  %v22192_v15 = vld [vmem:[#allocation3 + $0xe0] sm:$0xff]  ;;  %v3262_v49 = vsel %vm3227_vm2, %v26336_v23, %v3261_v53  ;;  %v8376_v23 = vld [vmem:[#allocation3 + $0xd0] sm:$0xff] }
 0x433   : > { %18938 = vmatmul.mubr.msk.bf16.gmra.mrb[44].mxu1 %vm354_vm1, %v2674_v37  ;;  %v2681_v62 = vrot.slane %v2679_v7, 1  ;;  %v2687_v34 = vshll.u32 %v22192_v15, 16  ;;  %v2691_v9 = vshrl.u32 %v22192_v15, 16  ;;  %v3264_v37 = vsel %vm3227_vm2, %v3261_v53, %v3263_v48 }
 0x434   : > { %v9234_v7 = vsel %vm1015_vm0, %v23816_v29, 0 }
 0x435   : > { %v2685_v11 = vor.u32 %v2683_v13, %v2681_v62  ;;  %v2689_v5 = vrot.slane %v2687_v34, 1  ;;  %v2682_v44 = vsel %vm1731_vm4, %v2677_v59, %v2681_v62  ;;  %v23952_v62 = vld [vmem:[%s26265_s3 + $0xe] sm:$0x3]  ;;  %v22203_v34 = vld [vmem:[#allocation2 + $0xb0] sm:$0xff] }
 0x436   : > { %18941 = vmatprep.mubr.msk.bf16.mxu1 %vm354_vm1, %v2682_v44  ;;  %v22202_v13 = vld [vmem:[#allocation2 + $0xa8] sm:$0xff]  ;;  %v3267_v59 = vrot.slane %v22203_v34, 1  ;;  %v8360_v44 = vld [vmem:[#allocation3 + $0x50] sm:$0xff] }
 0x437   : > { %v2690_v57 = vsel %vm1731_vm4, %v2685_v11, %v2689_v5  ;;  %v2693_v0 = vor.u32 %v2691_v9, %v2689_v5  ;;  %v3265_v15 = vrot.slane %v22202_v13, 1  ;;  %v8359_v5 = vld [vmem:[#allocation3 + $0x48] sm:$0xff]  ;;  %v8382_v13 = vld [vmem:[#allocation3 + $0x100] sm:$0xff]  ;;  %v8384_v34 = vld [vmem:[#allocation3 + $0x110] sm:$0xff] }
 0x439   : > { %19532 = vmatmul.mubr.msk.bf16.gmra.mrb[44].mxu0 %vm354_vm1, %v23557_v35  ;;  %v2695_v35 = vshll.u32 %v22193_v21, 16  ;;  %v3266_v29 = vsel %vm3227_vm2, %v3263_v48, %v3265_v15  ;;  %v3268_v11 = vsel %vm3227_vm2, %v3265_v15, %v3267_v59  ;;  %v8372_v48 = vld [vmem:[#allocation3 + $0xb0] sm:$0xff]  ;;  %v8383_v15 = vld [vmem:[#allocation3 + $0x108] sm:$0xff] }
 0x43a   : > { %19535 = vmatprep.mubr.msk.bf16.mxu0 %vm354_vm1, %v23564_v18  ;;  %v22194_v18 = vld [vmem:[#allocation3 + $0xf0] sm:$0xff] }
 0x43b   : > { %18942 = vmatmul.mubr.msk.bf16.gmra.mrb[48].mxu1 %vm354_vm1, %v2690_v57  ;;  %v2697_v58 = vrot.slane %v2695_v35, 1  ;;  %v2703_v22 = vshll.u32 %v22194_v18, 16  ;;  %v2707_v43 = vshrl.u32 %v22194_v18, 16  ;;  %v22204_v57 = vld [vmem:[#allocation2 + $0xb8] sm:$0xff]  ;;  %v22205_v35 = vld [vmem:[#allocation2 + $0xc0] sm:$0xff] }
 0x43c   : > { %v3269_v21 = vrot.slane %v22204_v57, 1  ;;  %v3271_v9 = vrot.slane %v22205_v35, 1  ;;  %v8361_v18 = vld [vmem:[#allocation3 + $0x58] sm:$0xff] }
 0x43d   : > { %v2701_v45 = vor.u32 %v2699_v31, %v2697_v58  ;;  %v2705_v19 = vrot.slane %v2703_v22, 1  ;;  %v2698_v52 = vsel %vm1731_vm4, %v2693_v0, %v2697_v58  ;;  %v8362_v22 = vld [vmem:[#allocation3 + $0x60] sm:$0xff]  ;;  %v22206_v0 = vld [vmem:[#allocation2 + $0xc8] sm:$0xff] }
 0x43e   : > { %18945 = vmatprep.mubr.msk.bf16.mxu1 %vm354_vm1, %v2698_v52  ;;  %v3270_v58 = vsel %vm3227_vm2, %v3267_v59, %v3269_v21  ;;  %v3272_v31 = vsel %vm3227_vm2, %v3269_v21, %v3271_v9  ;;  %v8842_v59 = vld [vmem:[#allocation2 + $0x30] sm:$0xff] }
 0x43f   : > { %v2706_v16 = vsel %vm1731_vm4, %v2701_v45, %v2705_v19  ;;  %v2709_v63 = vor.u32 %v2707_v43, %v2705_v19  ;;  %v3273_v45 = vrot.slane %v22206_v0, 1  ;;  %v22207_v19 = vld [vmem:[#allocation2 + $0xd0] sm:$0xff]  ;;  %v22208_v43 = vld [vmem:[#allocation2 + $0xd8] sm:$0xff]  ;;  %v8878_v57 = vshrl.u32 %v8842_v59, 16  ;;  %v8387_v0 = vld [vmem:[#allocation3 + $0x128] sm:$0xff] }
 0x440   : > { %v3275_v52 = vrot.slane %v22207_v19, 1 }
 0x441   : > { %19536 = vmatmul.mubr.msk.bf16.gmra.mrb[48].mxu0 %vm354_vm1, %v23569_v3  ;;  %v22195_v3 = vld [vmem:[#allocation3 + $0xf8] sm:$0xff] }
 0x442   : > { %19539 = vmatprep.mubr.msk.bf16.mxu0 %vm354_vm1, %v23576_v14  ;;  %v2711_v20 = vshll.u32 %v22195_v3, 16  ;;  %v2715_v4 = vshrl.u32 %v22195_v3, 16  ;;  %v8363_v3 = vld [vmem:[#allocation3 + $0x68] sm:$0xff] }
 0x443   : > { %18946 = vmatmul.mubr.msk.bf16.gmra.mrb[52].mxu1 %vm354_vm1, %v2706_v16  ;;  %v3274_v16 = vsel %vm3227_vm2, %v3271_v9, %v3273_v45  ;;  %v8844_v9 = vld [vmem:[#allocation2 + $0x40] sm:$0xff] }
 0x444   : > { %v2713_v14 = vrot.slane %v2711_v20, 1  ;;  %v8364_v20 = vld [vmem:[#allocation3 + $0x70] sm:$0xff] }
 0x446   : > { %v2717_v60 = vor.u32 %v2715_v4, %v2713_v14  ;;  %v2714_v42 = vsel %vm1731_vm4, %v2709_v63, %v2713_v14  ;;  %v3277_v14 = vrot.slane %v22208_v43, 1  ;;  %v22209_v4 = vld [vmem:[#allocation2 + $0xe0] sm:$0xff] }
 0x447   : > { %18949 = vmatprep.mubr.msk.bf16.mxu1 %vm354_vm1, %v2714_v42  ;;  %v3279_v56 = vrot.slane %v22209_v4, 1  ;;  %v22210_v42 = vld [vmem:[#allocation2 + $0xe8] sm:$0xff]  ;;  %v8847_v4 = vld [vmem:[#allocation2 + $0x58] sm:$0xff] }
 0x448   : > { %v2722_v10 = vsel %vm1731_vm4, %v2717_v60, %v2721_v25  ;;  %v3278_v6 = vsel %vm3227_vm2, %v3275_v52, %v3277_v14  ;;  %v8365_v60 = vld [vmem:[#allocation3 + $0x78] sm:$0xff]  ;;  %v8366_v25 = vld [vmem:[#allocation3 + $0x80] sm:$0xff]  ;;  %v8921_v30 = vshrl.u32 %v8847_v4, 16 }
 0x449   : > { %19540 = vmatmul.mubr.msk.bf16.gmra.mrb[52].mxu0 %vm354_vm1, %v23924_v40  ;;  %v3280_v63 = vsel %vm3227_vm2, %v3277_v14, %v3279_v56 }
 0x44a   : > { %19543 = vmatprep.mubr.msk.bf16.mxu0 %vm354_vm1, %v7898_v1  ;;  %v3276_v1 = vsel %vm3227_vm2, %v3273_v45, %v3275_v52  ;;  %v8897_v52 = vshrl.u32 %v8844_v9, 16 }
 0x44b   : > { %18950 = vmatmul.mubr.msk.bf16.gmra.mrb[56].mxu1 %vm354_vm1, %v2722_v10  ;;  %v3281_v10 = vrot.slane %v22210_v42, 1 }
 0x44c   : > { %18953 = vmatprep.mubr.msk.bf16.mxu1 %vm354_vm1, %v2730_v24  ;;  %v8369_v24 = vld [vmem:[#allocation3 + $0x98] sm:$0xff] }
 0x44d   : > { %v3282_v55 = vsel %vm3227_vm2, %v3279_v56, %v3281_v10 }
 0x451   : > { %19544 = vmatmul.mubr.msk.bf16.gmra.mrb[56].mxu0 %vm354_vm1, %v7899_v8  ;;  %v22211_v8 = vld [vmem:[#allocation2 + $0xf0] sm:$0xff] }
 0x452   : > { %19547 = vmatprep.mubr.msk.bf16.mxu0 %vm354_vm1, %v7900_v50  ;;  %v3283_v50 = vrot.slane %v22211_v8, 1  ;;  %v24026_v8 = vld [vmem:[%s26264_s2 + $0x10] sm:$0x3] }
 0x453   : > { %18954 = vmatmul.mubr.msk.bf16.gmra.mrb[60].mxu1 %vm354_vm1, %v2738_v46  ;;  %v8370_v46 = vld [vmem:[#allocation3 + $0xa0] sm:$0xff] }
 0x454   : > { %18991 = vmatprep.mubr.msk.bf16.mxu1 %vm354_vm1, %v3262_v49  ;;  %v3284_v17 = vsel %vm3227_vm2, %v3281_v10, %v3283_v50  ;;  %v3286_v26 = vsel %vm3227_vm2, %v3283_v50, %v3285_v41  ;;  %v8377_v49 = vld [vmem:[#allocation3 + $0xd8] sm:$0xff]  ;;  %v8917_v10 = vshll.u32 %v8847_v4, 16 }
 0x459   : > { %19548 = vmatmul.mubr.msk.bf16.gmra.mrb[60].mxu0 %vm354_vm1, %v7901_v12  ;;  %v3289_v12 = vrot.slane %v23924_v40, 1  ;;  %v8374_v40 = vld [vmem:[#allocation3 + $0xc0] sm:$0xff] }
 0x45a   : > { %19553 = vmatprep.mubr.msk.bf16.mxu0 %vm354_vm1, %v8356_v32  ;;  %v3291_v32 = vrot.slane %v23782_v51, 1  ;;  %v8375_v51 = vld [vmem:[#allocation3 + $0xc8] sm:$0xff] }
 0x45b   : > { %18992 = vmatmul.mubr.msk.bf16.vlgmr.msra.gmra.mrb[32].mxu1 %vm354_vm1, %v3264_v37  ;;  %v3290_v36 = vsel %vm3227_vm2, %v3287_v28, %v3289_v12  ;;  %v8378_v37 = vld [vmem:[#allocation3 + $0xe0] sm:$0xff] }
 0x45c   : > { %18995 = vmatprep.mubr.msk.bf16.mxu1 %vm354_vm1, %v3266_v29  ;;  %v3292_v53 = vsel %vm3227_vm2, %v3289_v12, %v3291_v32  ;;  %v8880_v29 = vshll.u32 %v8842_v59, 16  ;;  %v24043_v12 = vld [vmem:[#allocation2 + $0x70] sm:$0xff] }
 0x45e   : > { %v8882_v21 = vrot.slane %v8880_v29, 1  ;;  %v24063_v29 = vld [vmem:[#allocation2 + $0x88] sm:$0xff] }
 0x461   : > { %19554 = vmatmul.mubr.msk.bf16.vlgmr.msra.gmra.mrb[0].mxu0 %vm354_vm1, %v8357_v61  ;;  %v8379_v61 = vld [vmem:[#allocation3 + $0xe8] sm:$0xff] }
 0x462   : > { %19618 = vmatpush3.bf16.msra.mxu0 %v9234_v7  ;;  %19557 = vmatprep.mubr.msk.bf16.mxu0 %vm354_vm1, %v8358_v38  ;;  %v8380_v7 = vld [vmem:[#allocation3 + $0xf0] sm:$0xff]  ;;  %v8381_v38 = vld [vmem:[#allocation3 + $0xf8] sm:$0xff] }
 0x463   : > { %22077 = vmatprep.subr.msk.bf16.mxu0 %vm1015_vm0, %v23952_v62  ;;  %18996 = vmatmul.mubr.msk.bf16.gmra.mrb[36].mxu1 %vm354_vm1, %v3268_v11  ;;  %v8843_v11 = vld [vmem:[#allocation2 + $0x38] sm:$0xff] }
 0x464   : > { %18999 = vmatprep.mubr.msk.bf16.mxu1 %vm354_vm1, %v3270_v58  ;;  %v8885_v35 = vshll.u32 %v8843_v11, 16  ;;  %v8883_v58 = vor.u32 %v8882_v21, %v8878_v57  ;;  %v8889_v45 = vshrl.u32 %v8843_v11, 16 }
 0x469   : > { %19558 = vmatmul.mubr.msk.bf16.gmra.mrb[4].mxu0 %vm354_vm1, %v8359_v5  ;;  %v8385_v5 = vld [vmem:[#allocation3 + $0x118] sm:$0xff] }
 0x46a   : > { %19561 = vmatprep.mubr.msk.bf16.mxu0 %vm354_vm1, %v8360_v44  ;;  %v8386_v44 = vld [vmem:[#allocation3 + $0x120] sm:$0xff] }
 0x46b   : > { %19000 = vmatmul.mubr.msk.bf16.gmra.mrb[40].mxu1 %vm354_vm1, %v3272_v31  ;;  %v8887_v31 = vrot.slane %v8885_v35, 1 }
 0x46c   : > { %19003 = vmatprep.mubr.msk.bf16.mxu1 %vm354_vm1, %v3274_v16 }
 0x46d   : > { %v8888_v19 = vsel %vm1731_vm4, %v8883_v58, %v8887_v31 }
 0x471   : > { %19562 = vmatmul.mubr.msk.bf16.gmra.mrb[8].mxu0 %vm354_vm1, %v8361_v18  ;;  %v8845_v18 = vld [vmem:[#allocation2 + $0x48] sm:$0xff] }
 0x472   : > { %19565 = vmatprep.mubr.msk.bf16.mxu0 %vm354_vm1, %v8362_v22  ;;  %v8893_v22 = vshll.u32 %v8844_v9, 16  ;;  %v8901_v16 = vshll.u32 %v8845_v18, 16  ;;  %v8965_v9 = vshll.u32 %v24063_v29, 16 }
 0x473   : > { %19004 = vmatmul.mubr.msk.bf16.gmra.mrb[44].mxu1 %vm354_vm1, %v3276_v1 }
 0x474   : > { %19007 = vmatprep.mubr.msk.bf16.mxu1 %vm354_vm1, %v3278_v6  ;;  %v8895_v1 = vrot.slane %v8893_v22, 1  ;;  %v8903_v14 = vrot.slane %v8901_v16, 1  ;;  %v24077_v22 = vld [vmem:[#allocation2 + $0x90] sm:$0xff]  ;;  %v24081_v16 = vld [vmem:[#allocation2 + $0x98] sm:$0xff] }
 0x475   : > { %v8977_v4 = vshrl.u32 %v24077_v22, 16 }
 0x476   : > { %v8899_v43 = vor.u32 %v8897_v52, %v8895_v1 }
 0x479   : > { %19566 = vmatmul.mubr.msk.bf16.gmra.mrb[12].mxu0 %vm354_vm1, %v8363_v3  ;;  %v8891_v3 = vor.u32 %v8889_v45, %v8887_v31 }
 0x47a   : > { %19569 = vmatprep.mubr.msk.bf16.mxu0 %vm354_vm1, %v8364_v20  ;;  %v8846_v20 = vld [vmem:[#allocation2 + $0x50] sm:$0xff] }
 0x47b   : > { %19008 = vmatmul.mubr.msk.bf16.gmra.mrb[48].mxu1 %vm354_vm1, %v3280_v63  ;;  %v8909_v56 = vshll.u32 %v8846_v20, 16  ;;  %v8896_v6 = vsel %vm1731_vm4, %v8891_v3, %v8895_v1  ;;  %v8905_v63 = vshrl.u32 %v8845_v18, 16  ;;  %v8913_v42 = vshrl.u32 %v8846_v20, 16 }
 0x47c   : > { %19011 = vmatprep.mubr.msk.bf16.mxu1 %vm354_vm1, %v3282_v55  ;;  %v8973_v3 = vshll.u32 %v24077_v22, 16 }
 0x47d   : > { %v8911_v50 = vrot.slane %v8909_v56, 1  ;;  %v8907_v55 = vor.u32 %v8905_v63, %v8903_v14  ;;  %v8981_v56 = vshll.u32 %v24081_v16, 16 }
 0x47f   : > { %v8912_v41 = vsel %vm1731_vm4, %v8907_v55, %v8911_v50 }
 0x481   : > { %19570 = vmatmul.mubr.msk.bf16.gmra.mrb[16].mxu0 %vm354_vm1, %v8365_v60  ;;  %v9981_v60 = vsel %vm1015_vm0, %v23952_v62, 0  ;;  %v8919_v62 = vrot.slane %v8917_v10, 1 }
 0x482   : > { %19573 = vmatprep.mubr.msk.bf16.mxu0 %vm354_vm1, %v8366_v25  ;;  %v8904_v25 = vsel %vm1731_vm4, %v8899_v43, %v8903_v14  ;;  %v8969_v43 = vshrl.u32 %v24063_v29, 16 }
 0x483   : > { %19012 = vmatmul.mubr.msk.bf16.gmra.mrb[52].mxu1 %vm354_vm1, %v3284_v17  ;;  %v24030_v17 = vld [vmem:[#allocation2 + $0x60] sm:$0xff] }
 0x484   : > { %19015 = vmatprep.mubr.msk.bf16.mxu1 %vm354_vm1, %v3286_v26  ;;  %v8925_v27 = vshll.u32 %v24030_v17, 16  ;;  %v8929_v26 = vshrl.u32 %v24030_v17, 16 }
 0x489   : > { %19574 = vmatmul.mubr.msk.bf16.gmra.mrb[20].mxu0 %vm354_vm1, %v8367_v2  ;;  %v8915_v2 = vor.u32 %v8913_v42, %v8911_v50  ;;  %v8983_v50 = vrot.slane %v8981_v56, 1 }
 0x48a   : > { %19577 = vmatprep.mubr.msk.bf16.mxu0 %vm354_vm1, %v8368_v39  ;;  %v24034_v39 = vld [vmem:[#allocation2 + $0x68] sm:$0xff] }
 0x48b   : > { %19016 = vmatmul.mubr.msk.bf16.gmra.mrb[56].mxu1 %vm354_vm1, %v3288_v33  ;;  %v8920_v28 = vsel %vm1731_vm4, %v8915_v2, %v8919_v62  ;;  %v8933_v33 = vshll.u32 %v24034_v39, 16  ;;  %v24099_v2 = vld [vmem:[#allocation2 + $0xa8] sm:$0xff] }
 0x48c   : > { %19019 = vmatprep.mubr.msk.bf16.mxu1 %vm354_vm1, %v3290_v36 }
 0x491   : > { %19578 = vmatmul.mubr.msk.bf16.gmra.mrb[24].mxu0 %vm354_vm1, %v8369_v24  ;;  %v8927_v24 = vrot.slane %v8925_v27, 1 }
 0x492   : > { %19581 = vmatprep.mubr.msk.bf16.mxu0 %vm354_vm1, %v8370_v46  ;;  %v8923_v46 = vor.u32 %v8921_v30, %v8919_v62  ;;  %v8985_v30 = vshrl.u32 %v24081_v16, 16 }
 0x493   : > { %19020 = vmatmul.mubr.msk.bf16.gmra.mrb[60].mxu1 %vm354_vm1, %v3292_v53  ;;  %v8931_v36 = vor.u32 %v8929_v26, %v8927_v24  ;;  %v8935_v53 = vrot.slane %v8933_v33, 1  ;;  %v8997_v33 = vshll.u32 %v24099_v2, 16 }
 0x499   : > { %19582 = vmatmul.mubr.msk.bf16.gmra.mrb[28].mxu0 %vm354_vm1, %v8371_v54  ;;  %v24047_v54 = vld [vmem:[#allocation2 + $0x78] sm:$0xff] }
 0x49a   : > { %19585 = vmatprep.mubr.msk.bf16.mxu0 %vm354_vm1, %v8372_v48  ;;  %v8941_v48 = vshll.u32 %v24043_v12, 16  ;;  %v8953_v57 = vshrl.u32 %v24047_v54, 16 }
 0x4a1   : > { %19586 = vmatmul.mubr.msk.bf16.gmra.mrb[32].mxu0 %vm354_vm1, %v8373_v47  ;;  %v8928_v47 = vsel %vm1731_vm4, %v8923_v46, %v8927_v24 }
 0x4a2   : > { %19589 = vmatprep.mubr.msk.bf16.mxu0 %vm354_vm1, %v8374_v40  ;;  %v8937_v40 = vshrl.u32 %v24034_v39, 16 }
 0x4a9   : > { %19590 = vmatmul.mubr.msk.bf16.gmra.mrb[36].mxu0 %vm354_vm1, %v8375_v51  ;;  %v8936_v51 = vsel %vm1731_vm4, %v8931_v36, %v8935_v53  ;;  %v8987_v36 = vor.u32 %v8985_v30, %v8983_v50 }
 0x4aa   : > { %19593 = vmatprep.mubr.msk.bf16.mxu0 %vm354_vm1, %v8376_v23  ;;  %v8945_v23 = vshrl.u32 %v24043_v12, 16 }
 0x4ae   : > { %v24045_v32 = vpop.f32.mrb[0].mxu1 }
 0x4af   : > { %26337 = vst [vmem:[#allocation6_spill] sm:$0xff] %v24045_v32 }
 0x4b1   : > { %19594 = vmatmul.mubr.msk.bf16.gmra.mrb[40].mxu0 %vm354_vm1, %v8377_v49  ;;  %v8949_v49 = vshll.u32 %v24047_v54, 16 }
 0x4b2   : > { %19597 = vmatprep.mubr.msk.bf16.mxu0 %vm354_vm1, %v8378_v37  ;;  %v8943_v37 = vrot.slane %v8941_v48, 1 }
 0x4b9   : > { %19598 = vmatmul.mubr.msk.bf16.gmra.mrb[44].mxu0 %vm354_vm1, %v8379_v61  ;;  %v24056_v61 = vpop.f32.mrb[1].mxu1 }
 0x4ba   : > { %19601 = vmatprep.mubr.msk.bf16.mxu0 %vm354_vm1, %v8380_v7  ;;  %26338 = vst [vmem:[#allocation7_spill] sm:$0xff] %v24056_v61  ;;  %v8939_v7 = vor.u32 %v8937_v40, %v8935_v53  ;;  %v24113_v53 = vld [vmem:[#allocation2 + $0xb0] sm:$0xff]  ;;  %v8999_v40 = vrot.slane %v8997_v33, 1  ;;  %v24413_v61 = vld [vmem:[#allocation3 + $0xd8] sm:$0xff] }
 0x4bb   : > { %26388 = vst [vmem:[#allocation56_spill] sm:$0xff] %v24413_v61 }
 0x4c1   : > { %19602 = vmatmul.mubr.msk.bf16.gmra.mrb[48].mxu0 %vm354_vm1, %v8381_v38  ;;  %v24059_v38 = vld [vmem:[#allocation2 + $0x80] sm:$0xff] }
 0x4c2   : > { %19605 = vmatprep.mubr.msk.bf16.mxu0 %vm354_vm1, %v8382_v13  ;;  %v18896_v13 = vpop.f32.mrb[2].mxu1  ;;  %v8961_v35 = vshrl.u32 %v24059_v38, 16 }
 0x4c3   : > { %v24061_v59 = vpop.f32.mrb[3].mxu1  ;;  %v9001_v13 = vshrl.u32 %v24099_v2, 16 }
 0x4c4   : > { %26339 = vst [vmem:[#allocation8_spill] sm:$0xff] %v24061_v59  ;;  %v24065_v11 = vpop.f32.mrb[4].mxu1 }
 0x4c5   : > { %26340 = vst [vmem:[#allocation9_spill] sm:$0xff] %v24065_v11  ;;  %v24074_v31 = vpop.f32.mrb[5].mxu1  ;;  %v24401_v11 = vld [vmem:[#allocation3 + $0xc8] sm:$0xff] }
 0x4c6   : > { %26341 = vst [vmem:[#allocation10_spill] sm:$0xff] %v24074_v31  ;;  %26386 = vst [vmem:[#allocation54_spill] sm:$0xff] %v24401_v11 }
 0x4c9   : > { %19606 = vmatmul.mubr.msk.bf16.gmra.mrb[52].mxu0 %vm354_vm1, %v8383_v15  ;;  %v8947_v15 = vor.u32 %v8945_v23, %v8943_v37  ;;  %v24117_v23 = vld [vmem:[#allocation2 + $0xb8] sm:$0xff] }
 0x4ca   : > { %19609 = vmatprep.mubr.msk.bf16.mxu0 %vm354_vm1, %v8384_v34  ;;  %v8951_v34 = vrot.slane %v8949_v49, 1 }
 0x4cc   : > { %v8952_v21 = vsel %vm1731_vm4, %v8947_v15, %v8951_v34  ;;  %v8955_v18 = vor.u32 %v8953_v57, %v8951_v34  ;;  %v9009_v34 = vshrl.u32 %v24113_v53, 16 }
 0x4d1   : > { %19610 = vmatmul.mubr.msk.bf16.gmra.mrb[56].mxu0 %vm354_vm1, %v8385_v5  ;;  %v8957_v5 = vshll.u32 %v24059_v38, 16 }
 0x4d2   : > { %19613 = vmatprep.mubr.msk.bf16.mxu0 %vm354_vm1, %v8386_v44  ;;  %v8944_v44 = vsel %vm1731_vm4, %v8939_v7, %v8943_v37  ;;  %v9005_v37 = vshll.u32 %v24113_v53, 16 }
 0x4d3   : > { %v8959_v58 = vrot.slane %v8957_v5, 1  ;;  %v9013_v5 = vshll.u32 %v24117_v23, 16 }
 0x4d5   : > { %v8963_v45 = vor.u32 %v8961_v35, %v8959_v58  ;;  %v8960_v20 = vsel %vm1731_vm4, %v8955_v18, %v8959_v58  ;;  %v24131_v35 = vld [vmem:[#allocation2 + $0xc0] sm:$0xff]  ;;  %v9015_v18 = vrot.slane %v9013_v5, 1 }
 0x4d9   : > { %19614 = vmatmul.mubr.msk.bf16.gmra.mrb[60].mxu0 %vm354_vm1, %v8387_v0  ;;  %v18900_v0 = vpop.f32.mrb[6].mxu1 }
 0x4da   : > { %19619 = vmatprep.mubr.msk.bf16.mxu0 %vm354_vm1, %v8888_v19  ;;  %v8967_v19 = vrot.slane %v8965_v9, 1  ;;  %v24079_v52 = vpop.f32.mrb[7].mxu1 }
 0x4db   : > { %26342 = vst [vmem:[#allocation11_spill] sm:$0xff] %v24079_v52  ;;  %v24083_v1 = vpop.f32.mrb[8].mxu1  ;;  %v24389_v52 = vld [vmem:[#allocation3 + $0xb8] sm:$0xff] }
 0x4dc   : > { %26343 = vst [vmem:[#allocation12_spill] sm:$0xff] %v24083_v1  ;;  %v8968_v14 = vsel %vm1731_vm4, %v8963_v45, %v8967_v19  ;;  %v24092_v63 = vpop.f32.mrb[9].mxu1  ;;  %v24135_v45 = vld [vmem:[#allocation2 + $0xc8] sm:$0xff] }
 0x4dd   : > { %26344 = vst [vmem:[#allocation13_spill] sm:$0xff] %v24092_v63  ;;  %v18904_v42 = vpop.f32.mrb[10].mxu1  ;;  %v9029_v56 = vshll.u32 %v24135_v45, 16  ;;  %v24377_v63 = vld [vmem:[#allocation3 + $0xa8] sm:$0xff] }
 0x4de   : > { %v24097_v55 = vpop.f32.mrb[11].mxu1 }
 0x4df   : > { %26345 = vst [vmem:[#allocation14_spill] sm:$0xff] %v24097_v55  ;;  %v24101_v62 = vpop.f32.mrb[12].mxu1 }
 0x4e0   : > { %26346 = vst [vmem:[#allocation15_spill] sm:$0xff] %v24101_v62  ;;  %v24110_v46 = vpop.f32.mrb[13].mxu1  ;;  %v24365_v62 = vld [vmem:[#allocation3 + $0x98] sm:$0xff] }
 0x4e1   : > { %19620 = vmatmul.mubr.msk.bf16.vlgmr.msra.gmra.mrb[0].mxu0 %vm354_vm1, %v8896_v6  ;;  %v8975_v6 = vrot.slane %v8973_v3, 1  ;;  %26347 = vst [vmem:[#allocation16_spill] sm:$0xff] %v24110_v46  ;;  %v18908_v48 = vpop.f32.mrb[14].mxu1  ;;  %v9021_v3 = vshll.u32 %v24131_v35, 16 }
 0x4e2   : > { %19684 = vmatpush3.bf16.msra.mxu0 %v9981_v60  ;;  %19623 = vmatprep.mubr.msk.bf16.mxu0 %vm354_vm1, %v8904_v25  ;;  %v8971_v60 = vor.u32 %v8969_v43, %v8967_v19  ;;  %v24095_v25 = vld [vmem:[#allocation2 + $0xa0] sm:$0xff]  ;;  %v9017_v43 = vshrl.u32 %v24117_v23, 16 }
 0x4e3   : > { %22078 = vmatprep.subr.msk.bf16.mxu0 %vm1015_vm0, %v24026_v8  ;;  %v8979_v10 = vor.u32 %v8977_v4, %v8975_v6  ;;  %v8989_v27 = vshll.u32 %v24095_v25, 16  ;;  %v8993_v26 = vshrl.u32 %v24095_v25, 16  ;;  %v9025_v4 = vshrl.u32 %v24131_v35, 16 }
 0x4e4   : > { %v9019_v42 = vor.u32 %v9017_v43, %v9015_v18 }
 0x4e5   : > { %v8991_v24 = vrot.slane %v8989_v27, 1 }
 0x4e7   : > { %v8992_v7 = vsel %vm1731_vm4, %v8987_v36, %v8991_v24  ;;  %v9033_v36 = vshrl.u32 %v24135_v45, 16 }
 0x4e9   : > { %19624 = vmatmul.mubr.msk.bf16.gmra.mrb[4].mxu0 %vm354_vm1, %v8912_v41  ;;  %v8976_v41 = vsel %vm1731_vm4, %v8971_v60, %v8975_v6  ;;  %v9023_v6 = vrot.slane %v9021_v3, 1 }
 0x4ea   : > { %19627 = vmatprep.mubr.msk.bf16.mxu0 %vm354_vm1, %v8920_v28  ;;  %v8984_v28 = vsel %vm1731_vm4, %v8979_v10, %v8983_v50  ;;  %v24149_v10 = vld [vmem:[#allocation2 + $0xd0] sm:$0xff] }
 0x4eb   : > { %v9027_v27 = vor.u32 %v9025_v4, %v9023_v6  ;;  %v9037_v33 = vshll.u32 %v24149_v10, 16 }
 0x4f1   : > { %19628 = vmatmul.mubr.msk.bf16.gmra.mrb[8].mxu0 %vm354_vm1, %v8928_v47  ;;  %v8995_v47 = vor.u32 %v8993_v26, %v8991_v24  ;;  %v9024_v24 = vsel %vm1731_vm4, %v9019_v42, %v9023_v6 }
 0x4f2   : > { %19631 = vmatprep.mubr.msk.bf16.mxu0 %vm354_vm1, %v8936_v51  ;;  %v24115_v51 = vpop.f32.mrb[15].mxu1 }
 0x4f3   : > { %26348 = vst [vmem:[#allocation17_spill] sm:$0xff] %v24115_v51  ;;  %v24119_v49 = vpop.f32.mrb[16].mxu1  ;;  %v9000_v15 = vsel %vm1731_vm4, %v8995_v47, %v8999_v40  ;;  %v9041_v47 = vshrl.u32 %v24149_v10, 16 }
 0x4f4   : > { %26349 = vst [vmem:[#allocation5_spill] sm:$0xff] %v24119_v49  ;;  %v24128_v57 = vpop.f32.mrb[17].mxu1 }
 0x4f5   : > { %26350 = vst [vmem:[#allocation18_spill] sm:$0xff] %v24128_v57  ;;  %v18912_v9 = vpop.f32.mrb[18].mxu1 }
 0x4f6   : > { %v24133_v0 = vpop.f32.mrb[19].mxu1  ;;  %v24171_v9 = vld [vmem:[#allocation2 + $0xe8] sm:$0xff] }
 0x4f7   : > { %26351 = vst [vmem:[#allocation19_spill] sm:$0xff] %v24133_v0  ;;  %v24137_v19 = vpop.f32.mrb[20].mxu1  ;;  %v9061_v4 = vshll.u32 %v24171_v9, 16  ;;  %v24321_v0 = vld [vmem:[#allocation3 + $0x68] sm:$0xff] }
 0x4f8   : > { %26352 = vst [vmem:[#allocation20_spill] sm:$0xff] %v24137_v19  ;;  %v24146_v60 = vpop.f32.mrb[21].mxu1 }
 0x4f9   : > { %19632 = vmatmul.mubr.msk.bf16.gmra.mrb[12].mxu0 %vm354_vm1, %v8944_v44  ;;  %v9007_v44 = vrot.slane %v9005_v37, 1  ;;  %26353 = vst [vmem:[#allocation21_spill] sm:$0xff] %v24146_v60  ;;  %v18916_v50 = vpop.f32.mrb[22].mxu1  ;;  %v9039_v37 = vrot.slane %v9037_v33, 1  ;;  %v9063_v33 = vrot.slane %v9061_v4, 1 }
 0x4fa   : > { %19635 = vmatprep.mubr.msk.bf16.mxu0 %vm354_vm1, %v8952_v21  ;;  %v9003_v21 = vor.u32 %v9001_v13, %v8999_v40  ;;  %v24151_v30 = vpop.f32.mrb[23].mxu1  ;;  %v24185_v50 = vld [vmem:[#allocation2 + $0xf0] sm:$0xff] }
 0x4fb   : > { %v9011_v58 = vor.u32 %v9009_v34, %v9007_v44  ;;  %26354 = vst [vmem:[#allocation22_spill] sm:$0xff] %v24151_v30  ;;  %v24155_v26 = vpop.f32.mrb[24].mxu1  ;;  %v9043_v5 = vor.u32 %v9041_v47, %v9039_v37 }
 0x4fc   : > { %26355 = vst [vmem:[#allocation23_spill] sm:$0xff] %v24155_v26 }
 0x501   : > { %19636 = vmatmul.mubr.msk.bf16.gmra.mrb[16].mxu0 %vm354_vm1, %v8960_v20  ;;  %v9008_v20 = vsel %vm1731_vm4, %v9003_v21, %v9007_v44 }
 0x502   : > { %19639 = vmatprep.mubr.msk.bf16.mxu0 %vm354_vm1, %v8968_v14  ;;  %v9016_v14 = vsel %vm1731_vm4, %v9011_v58, %v9015_v18 }
 0x509   : > { %19640 = vmatmul.mubr.msk.bf16.gmra.mrb[20].mxu0 %vm354_vm1, %v8976_v41  ;;  %v9031_v41 = vrot.slane %v9029_v56, 1 }
 0x50a   : > { %19643 = vmatprep.mubr.msk.bf16.mxu0 %vm354_vm1, %v8984_v28  ;;  %v24153_v28 = vld [vmem:[#allocation2 + $0xd8] sm:$0xff] }
 0x50b   : > { %v9032_v48 = vsel %vm1731_vm4, %v9027_v27, %v9031_v41  ;;  %v9045_v40 = vshll.u32 %v24153_v28, 16  ;;  %v9035_v13 = vor.u32 %v9033_v36, %v9031_v41  ;;  %v24189_v36 = vld [vmem:[#allocation2 + $0xf8] sm:$0xff] }
 0x50d   : > { %v9047_v44 = vrot.slane %v9045_v40, 1  ;;  %v9040_v3 = vsel %vm1731_vm4, %v9035_v13, %v9039_v37  ;;  %v9065_v40 = vshrl.u32 %v24171_v9, 16  ;;  %v9073_v13 = vshrl.u32 %v24185_v50, 16 }
 0x50f   : > { %v9048_v43 = vsel %vm1731_vm4, %v9043_v5, %v9047_v44 }
 0x511   : > { %19644 = vmatmul.mubr.msk.bf16.gmra.mrb[24].mxu0 %vm354_vm1, %v8992_v7  ;;  %v24164_v7 = vpop.f32.mrb[25].mxu1 }
 0x512   : > { %19647 = vmatprep.mubr.msk.bf16.mxu0 %vm354_vm1, %v9000_v15  ;;  %26356 = vst [vmem:[#allocation24_spill] sm:$0xff] %v24164_v7  ;;  %v24167_v15 = vld [vmem:[#allocation2 + $0xe0] sm:$0xff]  ;;  %v18920_v34 = vpop.f32.mrb[26].mxu1  ;;  %v24259_v7 = vld [vmem:[#allocation3 + $0x38] sm:$0xff] }
 0x513   : > { %v24169_v21 = vpop.f32.mrb[27].mxu1  ;;  %v9053_v18 = vshll.u32 %v24167_v15, 16  ;;  %v9077_v34 = vshll.u32 %v24189_v36, 16 }
 0x514   : > { %26357 = vst [vmem:[#allocation25_spill] sm:$0xff] %v24169_v21  ;;  %v24173_v58 = vpop.f32.mrb[28].mxu1 }
 0x515   : > { %26358 = vst [vmem:[#allocation26_spill] sm:$0xff] %v24173_v58  ;;  %v9055_v56 = vrot.slane %v9053_v18, 1  ;;  %v24182_v6 = vpop.f32.mrb[29].mxu1  ;;  %v9067_v18 = vor.u32 %v9065_v40, %v9063_v33 }
 0x516   : > { %26359 = vst [vmem:[#allocation27_spill] sm:$0xff] %v24182_v6  ;;  %v18924_v27 = vpop.f32.mrb[30].mxu1 }
 0x519   : > { %19648 = vmatmul.mubr.msk.bf16.gmra.mrb[28].mxu0 %vm354_vm1, %v9008_v20  ;;  %v9049_v20 = vshrl.u32 %v24153_v28, 16 }
 0x51a   : > { %19651 = vmatprep.mubr.msk.bf16.mxu0 %vm354_vm1, %v9016_v14  ;;  %v9057_v14 = vshrl.u32 %v24167_v15, 16 }
 0x51b   : > { %v9051_v42 = vor.u32 %v9049_v20, %v9047_v44 }
 0x51c   : > { %v9059_v41 = vor.u32 %v9057_v14, %v9055_v56  ;;  %v9079_v14 = vrot.slane %v9077_v34, 1 }
 0x51d   : > { %v9056_v47 = vsel %vm1731_vm4, %v9051_v42, %v9055_v56  ;;  %v24205_v56 = vld [vmem:[#allocation2 + $0x108] sm:$0xff] }
 0x51e   : > { %v9064_v37 = vsel %vm1731_vm4, %v9059_v41, %v9063_v33  ;;  %v9093_v40 = vshll.u32 %v24205_v56, 16 }
 0x521   : > { %19652 = vmatmul.mubr.msk.bf16.gmra.mrb[32].mxu0 %vm354_vm1, %v9024_v24  ;;  %v24187_v24 = vpop.f32.mrb[31].mxu1 }
 0x522   : > { %19655 = vmatprep.mubr.msk.bf16.mxu0 %vm354_vm1, %v9032_v48  ;;  %26360 = vst [vmem:[#allocation28_spill] sm:$0xff] %v24187_v24  ;;  %v9069_v48 = vshll.u32 %v24185_v50, 16 }
 0x524   : > { %v9071_v5 = vrot.slane %v9069_v48, 1  ;;  %v9081_v48 = vshrl.u32 %v24189_v36, 16 }
 0x526   : > { %v9072_v41 = vsel %vm1731_vm4, %v9067_v18, %v9071_v5  ;;  %v9083_v34 = vor.u32 %v9081_v48, %v9079_v14  ;;  %v9095_v18 = vrot.slane %v9093_v40, 1 }
 0x529   : > { %19656 = vmatmul.mubr.msk.bf16.gmra.mrb[36].mxu0 %vm354_vm1, %v9040_v3  ;;  %v24201_v3 = vld [vmem:[#allocation2 + $0x100] sm:$0xff] }
 0x52a   : > { %19659 = vmatprep.mubr.msk.bf16.mxu0 %vm354_vm1, %v9048_v43  ;;  %v9075_v43 = vor.u32 %v9073_v13, %v9071_v5  ;;  %v9085_v27 = vshll.u32 %v24201_v3, 16  ;;  %v9089_v33 = vshrl.u32 %v24201_v3, 16 }
 0x52e   : > { %v24198_v44 = vpop.f32.mrb[32].mxu1 }
 0x52f   : > { %26361 = vst [vmem:[#allocation29_spill] sm:$0xff] %v24198_v44  ;;  %v24203_v20 = vpop.f32.mrb[33].mxu1 }
 0x530   : > { %26362 = vst [vmem:[#allocation30_spill] sm:$0xff] %v24203_v20  ;;  %v18994_v4 = vpop.f32.mrb[34].mxu1 }
 0x531   : > { %19660 = vmatmul.mubr.msk.bf16.gmra.mrb[40].mxu0 %vm354_vm1, %v9056_v47  ;;  %v24207_v42 = vpop.f32.mrb[35].mxu1  ;;  %v9080_v47 = vsel %vm1731_vm4, %v9075_v43, %v9079_v14  ;;  %v24219_v4 = vld [vmem:[#allocation2 + $0x110] sm:$0xff]  ;;  %v24223_v43 = vld [vmem:[#allocation2 + $0x118] sm:$0xff] }
 0x532   : > { %19663 = vmatprep.mubr.msk.bf16.mxu0 %vm354_vm1, %v9064_v37  ;;  %26363 = vst [vmem:[#allocation31_spill] sm:$0xff] %v24207_v42  ;;  %v9087_v37 = vrot.slane %v9085_v27, 1  ;;  %v9101_v24 = vshll.u32 %v24219_v4, 16  ;;  %v9105_v14 = vshrl.u32 %v24219_v4, 16  ;;  %v9109_v48 = vshll.u32 %v24223_v43, 16 }
 0x534   : > { %v9091_v5 = vor.u32 %v9089_v33, %v9087_v37  ;;  %v9088_v27 = vsel %vm1731_vm4, %v9083_v34, %v9087_v37  ;;  %v9103_v33 = vrot.slane %v9101_v24, 1  ;;  %v9111_v34 = vrot.slane %v9109_v48, 1 }
 0x536   : > { %v24216_v13 = vpop.f32.mrb[36].mxu1  ;;  %v9107_v37 = vor.u32 %v9105_v14, %v9103_v33 }
 0x537   : > { %26364 = vst [vmem:[#allocation32_spill] sm:$0xff] %v24216_v13  ;;  %v24221_v42 = vpop.f32.mrb[37].mxu1 }
 0x538   : > { %26365 = vst [vmem:[#allocation33_spill] sm:$0xff] %v24221_v42  ;;  %v18998_v20 = vpop.f32.mrb[38].mxu1 }
 0x539   : > { %19664 = vmatmul.mubr.msk.bf16.gmra.mrb[44].mxu0 %vm354_vm1, %v9072_v41  ;;  %v24225_v44 = vpop.f32.mrb[39].mxu1  ;;  %v9097_v41 = vshrl.u32 %v24205_v56, 16 }
 0x53a   : > { %19667 = vmatprep.mubr.msk.bf16.mxu0 %vm354_vm1, %v9080_v47  ;;  %26366 = vst [vmem:[#allocation34_spill] sm:$0xff] %v24225_v44  ;;  %v9096_v47 = vsel %vm1731_vm4, %v9091_v5, %v9095_v18  ;;  %v24237_v44 = vld [vmem:[#allocation2 + $0x120] sm:$0xff]  ;;  %v24241_v5 = vld [vmem:[#allocation2 + $0x128] sm:$0xff] }
 0x53b   : > { %v9099_v40 = vor.u32 %v9097_v41, %v9095_v18  ;;  %v9117_v58 = vshll.u32 %v24237_v44, 16  ;;  %v9121_v18 = vshrl.u32 %v24237_v44, 16  ;;  %v9125_v41 = vshll.u32 %v24241_v5, 16 }
 0x53d   : > { %v9104_v24 = vsel %vm1731_vm4, %v9099_v40, %v9103_v33  ;;  %v9127_v40 = vrot.slane %v9125_v41, 1 }
 0x53e   : > { %v24234_v20 = vpop.f32.mrb[40].mxu1 }
 0x53f   : > { %26367 = vst [vmem:[#allocation35_spill] sm:$0xff] %v24234_v20  ;;  %v24239_v42 = vpop.f32.mrb[41].mxu1  ;;  %v24257_v20 = vld [vmem:[#allocation2 + $0x130] sm:$0x1] }
 0x540   : > { %26368 = vst [vmem:[#allocation36_spill] sm:$0xff] %v24239_v42  ;;  %v19002_v13 = vpop.f32.mrb[42].mxu1  ;;  %v9589_v42 = vld [vmem:[#allocation3 + $0x30] sm:$0xff] }
 0x541   : > { %19668 = vmatmul.mubr.msk.bf16.gmra.mrb[48].mxu0 %vm354_vm1, %v9088_v27  ;;  %v24243_v6 = vpop.f32.mrb[43].mxu1  ;;  %v9113_v27 = vshrl.u32 %v24223_v43, 16  ;;  %v9119_v13 = vrot.slane %v9117_v58, 1  ;;  %v9129_v58 = vshrl.u32 %v24241_v5, 16 }
 0x542   : > { %19671 = vmatprep.mubr.msk.bf16.mxu0 %vm354_vm1, %v9096_v47  ;;  %26369 = vst [vmem:[#allocation37_spill] sm:$0xff] %v24243_v6  ;;  %v9112_v47 = vsel %vm1731_vm4, %v9107_v37, %v9111_v34  ;;  %v9627_v37 = vshll.u32 %v9589_v42, 16 }
 0x543   : > { %v9115_v48 = vor.u32 %v9113_v27, %v9111_v34  ;;  %v9123_v33 = vor.u32 %v9121_v18, %v9119_v13  ;;  %v9625_v27 = vshrl.u32 %v9589_v42, 16  ;;  %v9632_v18 = vshll.u32 %v24259_v7, 16 }
 0x545   : > { %v9128_v34 = vsel %vm1731_vm4, %v9123_v33, %v9127_v40  ;;  %v9634_v30 = vrot.slane %v9632_v18, 1  ;;  %v24276_v33 = vld [vmem:[#allocation3 + $0x48] sm:$0xff] }
 0x546   : > { %v24252_v14 = vpop.f32.mrb[44].mxu1 }
 0x547   : > { %26370 = vst [vmem:[#allocation38_spill] sm:$0xff] %v24252_v14  ;;  %v24255_v6 = vpop.f32.mrb[45].mxu1  ;;  %v9133_v14 = vshll.u32 %v24257_v20, 16 }
 0x548   : > { %26371 = vst [vmem:[#allocation39_spill] sm:$0xff] %v24255_v6  ;;  %v19006_v21 = vpop.f32.mrb[46].mxu1  ;;  %v24272_v6 = vld [vmem:[#allocation3 + $0x40] sm:$0xff] }
 0x549   : > { %19672 = vmatmul.mubr.msk.bf16.gmra.mrb[52].mxu0 %vm354_vm1, %v9104_v24  ;;  %v24261_v26 = vpop.f32.mrb[47].mxu1  ;;  %v9120_v24 = vsel %vm1731_vm4, %v9115_v48, %v9119_v13  ;;  %v9131_v21 = vor.u32 %v9129_v58, %v9127_v40  ;;  %v9648_v58 = vshll.u32 %v24276_v33, 16 }
 0x54a   : > { %19675 = vmatprep.mubr.msk.bf16.mxu0 %vm354_vm1, %v9112_v47  ;;  %26372 = vst [vmem:[#allocation40_spill] sm:$0xff] %v24261_v26  ;;  %v9629_v47 = vrot.slane %v9627_v37, 1  ;;  %v9135_v26 = vrot.slane %v9133_v14, 1  ;;  %v9640_v37 = vshll.u32 %v24272_v6, 16  ;;  %v9644_v14 = vshrl.u32 %v24272_v6, 16 }
 0x54c   : > { %v9630_v48 = vor.u32 %v9629_v47, %v9625_v27  ;;  %v24290_v47 = vld [vmem:[#allocation3 + $0x50] sm:$0xff] }
 0x54d   : > { %v9656_v19 = vshll.u32 %v24290_v47, 16 }
 0x54e   : > { %v24269_v41 = vpop.f32.mrb[48].mxu1  ;;  %v9635_v40 = vsel %vm1731_vm4, %v9630_v48, %v9634_v30  ;;  %v24294_v48 = vld [vmem:[#allocation3 + $0x58] sm:$0xff] }
 0x54f   : > { %26373 = vst [vmem:[#allocation41_spill] sm:$0xff] %v24269_v41  ;;  %v24274_v13 = vpop.f32.mrb[49].mxu1  ;;  %v9636_v41 = vshrl.u32 %v24259_v7, 16 }
 0x550   : > { %26374 = vst [vmem:[#allocation42_spill] sm:$0xff] %v24274_v13  ;;  %v19010_v60 = vpop.f32.mrb[50].mxu1 }
 0x551   : > { %19676 = vmatmul.mubr.msk.bf16.gmra.mrb[56].mxu0 %vm354_vm1, %v9120_v24  ;;  %v24278_v42 = vpop.f32.mrb[51].mxu1  ;;  %v9136_v24 = vsel %vm1731_vm4, %v9131_v21, %v9135_v26  ;;  %v9638_v27 = vor.u32 %v9636_v41, %v9634_v30  ;;  %v9650_v21 = vrot.slane %v9648_v58, 1  ;;  %v10534_v30 = vsel %vm1015_vm0, %v24026_v8, 0 }
 0x552   : > { %19679 = vmatprep.mubr.msk.bf16.mxu0 %vm354_vm1, %v9128_v34  ;;  %26375 = vst [vmem:[#allocation43_spill] sm:$0xff] %v24278_v42  ;;  %v9642_v34 = vrot.slane %v9640_v37, 1  ;;  %v9658_v58 = vrot.slane %v9656_v19, 1 }
 0x554   : > { %v9646_v26 = vor.u32 %v9644_v14, %v9642_v34  ;;  %v9643_v37 = vsel %vm1731_vm4, %v9638_v27, %v9642_v34  ;;  %v9664_v14 = vshll.u32 %v24294_v48, 16  ;;  %v24315_v27 = vld [vmem:[#allocation3 + $0x60] sm:$0xff] }
 0x555   : > { %v9672_v19 = vshll.u32 %v24315_v27, 16 }
 0x556   : > { %v24287_v60 = vpop.f32.mrb[52].mxu1  ;;  %v9651_v41 = vsel %vm1731_vm4, %v9646_v26, %v9650_v21 }
 0x557   : > { %26376 = vst [vmem:[#allocation44_spill] sm:$0xff] %v24287_v60  ;;  %v24292_v18 = vpop.f32.mrb[53].mxu1 }
 0x558   : > { %26377 = vst [vmem:[#allocation45_spill] sm:$0xff] %v24292_v18  ;;  %v19014_v42 = vpop.f32.mrb[54].mxu1  ;;  %v9666_v18 = vrot.slane %v9664_v14, 1  ;;  %v9674_v14 = vrot.slane %v9672_v19, 1 }
 0x559   : > { %19680 = vmatmul.mubr.msk.bf16.gmra.mrb[60].mxu0 %vm354_vm1, %v9136_v24  ;;  %v24296_v13 = vpop.f32.mrb[55].mxu1  ;;  %v9652_v24 = vshrl.u32 %v24276_v33, 16  ;;  %v24309_v42 = vld [vmem:[%s26265_s3 + $0x10] sm:$0x3] }
 0x55a   : > { %19685 = vmatprep.mubr.msk.bf16.mxu0 %vm354_vm1, %v9635_v40  ;;  %26378 = vst [vmem:[#allocation46_spill] sm:$0xff] %v24296_v13  ;;  %v9660_v40 = vshrl.u32 %v24290_v47, 16 }
 0x55b   : > { %v9654_v8 = vor.u32 %v9652_v24, %v9650_v21  ;;  %v9668_v21 = vshrl.u32 %v24294_v48, 16 }
 0x55c   : > { %v9662_v13 = vor.u32 %v9660_v40, %v9658_v58  ;;  %v9680_v40 = vshll.u32 %v24321_v0, 16 }
 0x55e   : > { %v24312_v34 = vpop.f32.mrb[56].mxu1  ;;  %v9667_v24 = vsel %vm1731_vm4, %v9662_v13, %v9666_v18  ;;  %v24339_v13 = vld [vmem:[#allocation3 + $0x78] sm:$0xff] }
 0x55f   : > { %26379 = vst [vmem:[#allocation47_spill] sm:$0xff] %v24312_v34  ;;  %v24317_v26 = vpop.f32.mrb[57].mxu1 }
 0x560   : > { %26380 = vst [vmem:[#allocation48_spill] sm:$0xff] %v24317_v26  ;;  %v19018_v60 = vpop.f32.mrb[58].mxu1  ;;  %v24335_v26 = vld [vmem:[#allocation3 + $0x70] sm:$0xff] }
 0x561   : > { %19686 = vmatmul.mubr.msk.bf16.vlgmr.msra.gmra.mrb[0].mxu0 %vm354_vm1, %v9643_v37  ;;  %v24323_v37 = vpop.f32.mrb[59].mxu1  ;;  %v9688_v51 = vshll.u32 %v24335_v26, 16 }
 0x562   : > { %19750 = vmatpush3.bf16.msra.mxu0 %v10534_v30  ;;  %19689 = vmatprep.mubr.msk.bf16.mxu0 %vm354_vm1, %v9651_v41  ;;  %26381 = vst [vmem:[#allocation49_spill] sm:$0xff] %v24323_v37  ;;  %v9659_v30 = vsel %vm1731_vm4, %v9654_v8, %v9658_v58  ;;  %v9676_v41 = vshrl.u32 %v24315_v27, 16  ;;  %v9670_v37 = vor.u32 %v9668_v21, %v9666_v18  ;;  %v9682_v8 = vrot.slane %v9680_v40, 1  ;;  %v24351_v40 = vld [vmem:[#allocation3 + $0x80] sm:$0xff] }
 0x563   : > { %22079 = vmatprep.subr.msk.bf16.mxu0 %vm1015_vm0, %v24309_v42  ;;  %v9692_v18 = vshrl.u32 %v24335_v26, 16  ;;  %v9696_v21 = vshll.u32 %v24339_v13, 16 }
 0x564   : > { %v9678_v58 = vor.u32 %v9676_v41, %v9674_v14  ;;  %v9675_v19 = vsel %vm1731_vm4, %v9670_v37, %v9674_v14  ;;  %v9690_v41 = vrot.slane %v9688_v51, 1  ;;  %v9704_v37 = vshll.u32 %v24351_v40, 16 }
 0x566   : > { %v24332_v60 = vpop.f32.mrb[60].mxu1 }
 0x567   : > { %26382 = vst [vmem:[#allocation50_spill] sm:$0xff] %v24332_v60  ;;  %v24337_v34 = vpop.f32.mrb[61].mxu1  ;;  %v24353_v60 = vld [vmem:[#allocation3 + $0x88] sm:$0xff] }
 0x568   : > { %26383 = vst [vmem:[#allocation51_spill] sm:$0xff] %v24337_v34  ;;  %v19022_v57 = vpop.f32.mrb[62].mxu1  ;;  %v9698_v34 = vrot.slane %v9696_v21, 1  ;;  %v9712_v51 = vshll.u32 %v24353_v60, 16 }
 0x569   : > { %19690 = vmatmul.mubr.msk.bf16.gmra.mrb[4].mxu0 %vm354_vm1, %v9659_v30  ;;  %v24341_v49 = vpop.f32.mrb[63].mxu1  ;;  %v9684_v30 = vshrl.u32 %v24321_v0, 16 }
 0x56a   : > { %19693 = vmatprep.mubr.msk.bf16.mxu0 %vm354_vm1, %v9667_v24  ;;  %26384 = vst [vmem:[#allocation52_spill] sm:$0xff] %v24341_v49  ;;  %v9683_v24 = vsel %vm1731_vm4, %v9678_v58, %v9682_v8  ;;  %v9694_v49 = vor.u32 %v9692_v18, %v9690_v41  ;;  %v9700_v58 = vshrl.u32 %v24339_v13, 16  ;;  %v9714_v21 = vrot.slane %v9712_v51, 1 }
 0x56b   : > { %v9686_v57 = vor.u32 %v9684_v30, %v9682_v8  ;;  %v9706_v8 = vrot.slane %v9704_v37, 1  ;;  %v9728_v37 = vshll.u32 %v24365_v62, 16 }
 0x56c   : > { %v9699_v46 = vsel %vm1731_vm4, %v9694_v49, %v9698_v34  ;;  %v9702_v30 = vor.u32 %v9700_v58, %v9698_v34  ;;  %v24375_v58 = vld [vmem:[#allocation3 + $0xa0] sm:$0xff] }
 0x56d   : > { %v9691_v14 = vsel %vm1731_vm4, %v9686_v57, %v9690_v41  ;;  %v9716_v57 = vshrl.u32 %v24353_v60, 16  ;;  %v9730_v51 = vrot.slane %v9728_v37, 1 }
 0x56e   : > { %v9707_v49 = vsel %vm1731_vm4, %v9702_v30, %v9706_v8 }
 0x56f   : > { %v9718_v34 = vor.u32 %v9716_v57, %v9714_v21  ;;  %v24387_v57 = vld [vmem:[#allocation3 + $0xb0] sm:$0xff] }
 0x571   : > { %19694 = vmatmul.mubr.msk.bf16.gmra.mrb[8].mxu0 %vm354_vm1, %v9675_v19  ;;  %v9708_v19 = vshrl.u32 %v24351_v40, 16 }
 0x572   : > { %19697 = vmatprep.mubr.msk.bf16.mxu0 %vm354_vm1, %v9683_v24  ;;  %v24363_v24 = vld [vmem:[#allocation3 + $0x90] sm:$0xff] }
 0x573   : > { %v9710_v18 = vor.u32 %v9708_v19, %v9706_v8  ;;  %v9720_v41 = vshll.u32 %v24363_v24, 16  ;;  %v9736_v8 = vshll.u32 %v24375_v58, 16 }
 0x575   : > { %v9715_v55 = vsel %vm1731_vm4, %v9710_v18, %v9714_v21  ;;  %v9732_v18 = vshrl.u32 %v24365_v62, 16 }
 0x577   : > { %v9734_v21 = vor.u32 %v9732_v18, %v9730_v51  ;;  %v24399_v18 = vld [vmem:[#allocation3 + $0xc0] sm:$0xff] }
 0x578   : > { %26385 = vst [vmem:[#allocation53_spill] sm:$0xff] %v24399_v18 }
 0x579   : > { %19698 = vmatmul.mubr.msk.bf16.gmra.mrb[12].mxu0 %vm354_vm1, %v9691_v14  ;;  %v9724_v14 = vshrl.u32 %v24363_v24, 16 }
 0x57a   : > { %19701 = vmatprep.mubr.msk.bf16.mxu0 %vm354_vm1, %v9699_v46  ;;  %v9722_v46 = vrot.slane %v9720_v41, 1  ;;  %v9744_v41 = vshll.u32 %v24377_v63, 16 }
 0x57c   : > { %v9726_v19 = vor.u32 %v9724_v14, %v9722_v46  ;;  %v9723_v30 = vsel %vm1731_vm4, %v9718_v34, %v9722_v46  ;;  %v9746_v37 = vrot.slane %v9744_v41, 1  ;;  %v9752_v46 = vshll.u32 %v24387_v57, 16 }
 0x57e   : > { %v9731_v1 = vsel %vm1731_vm4, %v9726_v19, %v9730_v51  ;;  %v9748_v19 = vshrl.u32 %v24377_v63, 16 }
 0x580   : > { %v9750_v51 = vor.u32 %v9748_v19, %v9746_v37  ;;  %v24411_v19 = vld [vmem:[#allocation3 + $0xd0] sm:$0xff] }
 0x581   : > { %19702 = vmatmul.mubr.msk.bf16.gmra.mrb[16].mxu0 %vm354_vm1, %v9707_v49  ;;  %v9740_v49 = vshrl.u32 %v24375_v58, 16  ;;  %26387 = vst [vmem:[#allocation55_spill] sm:$0xff] %v24411_v19 }
 0x582   : > { %19705 = vmatprep.mubr.msk.bf16.mxu0 %vm354_vm1, %v9715_v55  ;;  %v9738_v55 = vrot.slane %v9736_v8, 1  ;;  %v9760_v8 = vshll.u32 %v24389_v52, 16 }
 0x584   : > { %v9742_v14 = vor.u32 %v9740_v49, %v9738_v55  ;;  %v9739_v34 = vsel %vm1731_vm4, %v9734_v21, %v9738_v55  ;;  %v9762_v41 = vrot.slane %v9760_v8, 1  ;;  %v9768_v55 = vshll.u32 %v24399_v18, 16 }
 0x586   : > { %v9747_v31 = vsel %vm1731_vm4, %v9742_v14, %v9746_v37  ;;  %v9764_v14 = vshrl.u32 %v24389_v52, 16 }
 0x588   : > { %v9766_v37 = vor.u32 %v9764_v14, %v9762_v41  ;;  %v24423_v14 = vld [vmem:[#allocation3 + $0xe0] sm:$0xff] }
 0x589   : > { %19706 = vmatmul.mubr.msk.bf16.gmra.mrb[20].mxu0 %vm354_vm1, %v9723_v30  ;;  %v9756_v30 = vshrl.u32 %v24387_v57, 16  ;;  %26389 = vst [vmem:[#allocation57_spill] sm:$0xff] %v24423_v14 }
 0x58a   : > { %19709 = vmatprep.mubr.msk.bf16.mxu0 %vm354_vm1, %v9731_v1  ;;  %v9754_v1 = vrot.slane %v9752_v46, 1  ;;  %v9776_v46 = vshll.u32 %v24401_v11, 16 }
 0x58c   : > { %v9758_v49 = vor.u32 %v9756_v30, %v9754_v1  ;;  %v9755_v21 = vsel %vm1731_vm4, %v9750_v51, %v9754_v1  ;;  %v9778_v8 = vrot.slane %v9776_v46, 1  ;;  %v9784_v1 = vshll.u32 %v24411_v19, 16 }
 0x58e   : > { %v9763_v59 = vsel %vm1731_vm4, %v9758_v49, %v9762_v41  ;;  %v9780_v49 = vshrl.u32 %v24401_v11, 16  ;;  %v24437_v11 = vld [vmem:[#allocation3 + $0xf8] sm:$0xff] }
 0x58f   : > { %26392 = vst [vmem:[#allocation60_spill] sm:$0xff] %v24437_v11 }
 0x590   : > { %v9782_v41 = vor.u32 %v9780_v49, %v9778_v8  ;;  %v24435_v49 = vld [vmem:[#allocation3 + $0xf0] sm:$0xff] }
 0x591   : > { %19710 = vmatmul.mubr.msk.bf16.gmra.mrb[24].mxu0 %vm354_vm1, %v9739_v34  ;;  %v9772_v34 = vshrl.u32 %v24399_v18, 16  ;;  %v24425_v18 = vld [vmem:[#allocation3 + $0xe8] sm:$0xff]  ;;  %26391 = vst [vmem:[#allocation59_spill] sm:$0xff] %v24435_v49 }
 0x592   : > { %19713 = vmatprep.mubr.msk.bf16.mxu0 %vm354_vm1, %v9747_v31  ;;  %v9770_v31 = vrot.slane %v9768_v55, 1  ;;  %v9792_v55 = vshll.u32 %v24413_v61, 16  ;;  %26390 = vst [vmem:[#allocation58_spill] sm:$0xff] %v24425_v18 }
 0x594   : > { %v9774_v30 = vor.u32 %v9772_v34, %v9770_v31  ;;  %v9771_v51 = vsel %vm1731_vm4, %v9766_v37, %v9770_v31  ;;  %v9794_v46 = vrot.slane %v9792_v55, 1  ;;  %v9800_v31 = vshll.u32 %v24423_v14, 16 }
 0x596   : > { %v9779_v32 = vsel %vm1731_vm4, %v9774_v30, %v9778_v8  ;;  %v9796_v30 = vshrl.u32 %v24413_v61, 16  ;;  %v24449_v61 = vld [vmem:[#allocation3 + $0x108] sm:$0xff] }
 0x598   : > { %v9798_v8 = vor.u32 %v9796_v30, %v9794_v46  ;;  %v24447_v30 = vld [vmem:[#allocation3 + $0x100] sm:$0xff] }
 0x599   : > { %19714 = vmatmul.mubr.msk.bf16.gmra.mrb[28].mxu0 %vm354_vm1, %v9755_v21  ;;  %v9788_v21 = vshrl.u32 %v24411_v19, 16  ;;  %26393 = vst [vmem:[#allocation61_spill] sm:$0xff] %v24447_v30 }
 0x59a   : > { %19717 = vmatprep.mubr.msk.bf16.mxu0 %vm354_vm1, %v9763_v59  ;;  %v9786_v59 = vrot.slane %v9784_v1, 1  ;;  %v9808_v1 = vshll.u32 %v24425_v18, 16 }
 0x59c   : > { %v9790_v34 = vor.u32 %v9788_v21, %v9786_v59  ;;  %v9787_v37 = vsel %vm1731_vm4, %v9782_v41, %v9786_v59  ;;  %v9810_v55 = vrot.slane %v9808_v1, 1  ;;  %v9816_v59 = vshll.u32 %v24435_v49, 16 }
 0x59e   : > { %v9795_v19 = vsel %vm1731_vm4, %v9790_v34, %v9794_v46  ;;  %v9812_v34 = vshrl.u32 %v24425_v18, 16  ;;  %v24461_v18 = vld [vmem:[#allocation3 + $0x118] sm:$0xff] }
 0x59f   : > { %26395 = vst [vmem:[#allocation63_spill] sm:$0xff] %v24461_v18 }
 0x5a0   : > { %v9814_v46 = vor.u32 %v9812_v34, %v9810_v55  ;;  %v24459_v34 = vld [vmem:[#allocation3 + $0x110] sm:$0xff] }
 0x5a1   : > { %19718 = vmatmul.mubr.msk.bf16.gmra.mrb[32].mxu0 %vm354_vm1, %v9771_v51  ;;  %v9804_v51 = vshrl.u32 %v24423_v14, 16  ;;  %26394 = vst [vmem:[#allocation62_spill] sm:$0xff] %v24459_v34 }
 0x5a2   : > { %19721 = vmatprep.mubr.msk.bf16.mxu0 %vm354_vm1, %v9779_v32  ;;  %v9802_v32 = vrot.slane %v9800_v31, 1  ;;  %v9824_v31 = vshll.u32 %v24437_v11, 16 }
 0x5a4   : > { %v9806_v21 = vor.u32 %v9804_v51, %v9802_v32  ;;  %v9803_v41 = vsel %vm1731_vm4, %v9798_v8, %v9802_v32  ;;  %v9826_v1 = vrot.slane %v9824_v31, 1  ;;  %v9832_v32 = vshll.u32 %v24447_v30, 16 }
 0x5a6   : > { %v9811_v14 = vsel %vm1731_vm4, %v9806_v21, %v9810_v55  ;;  %v9828_v21 = vshrl.u32 %v24437_v11, 16  ;;  %v24473_v11 = vld [vmem:[#allocation3 + $0x128] sm:$0xff] }
 0x5a8   : > { %v9830_v55 = vor.u32 %v9828_v21, %v9826_v1  ;;  %v24471_v21 = vld [vmem:[#allocation3 + $0x120] sm:$0xff] }
 0x5a9   : > { %19722 = vmatmul.mubr.msk.bf16.gmra.mrb[36].mxu0 %vm354_vm1, %v9787_v37  ;;  %v9820_v37 = vshrl.u32 %v24435_v49, 16  ;;  %26396 = vst [vmem:[#allocation64_spill] sm:$0xff] %v24471_v21 }
 0x5aa   : > { %19725 = vmatprep.mubr.msk.bf16.mxu0 %vm354_vm1, %v9795_v19  ;;  %v9818_v19 = vrot.slane %v9816_v59, 1  ;;  %v9840_v59 = vshll.u32 %v24449_v61, 16 }
 0x5ac   : > { %v9822_v51 = vor.u32 %v9820_v37, %v9818_v19  ;;  %v9819_v8 = vsel %vm1731_vm4, %v9814_v46, %v9818_v19  ;;  %v9842_v31 = vrot.slane %v9840_v59, 1  ;;  %v9848_v19 = vshll.u32 %v24459_v34, 16 }
 0x5ae   : > { %v9827_v49 = vsel %vm1731_vm4, %v9822_v51, %v9826_v1  ;;  %v9844_v51 = vshrl.u32 %v24449_v61, 16 }
 0x5b0   : > { %v9846_v1 = vor.u32 %v9844_v51, %v9842_v31 }
 0x5b1   : > { %19726 = vmatmul.mubr.msk.bf16.gmra.mrb[40].mxu0 %vm354_vm1, %v9803_v41  ;;  %v9836_v41 = vshrl.u32 %v24447_v30, 16 }
 0x5b2   : > { %19729 = vmatprep.mubr.msk.bf16.mxu0 %vm354_vm1, %v9811_v14  ;;  %v9834_v14 = vrot.slane %v9832_v32, 1  ;;  %v9856_v32 = vshll.u32 %v24461_v18, 16 }
 0x5b4   : > { %v9838_v37 = vor.u32 %v9836_v41, %v9834_v14  ;;  %v9835_v46 = vsel %vm1731_vm4, %v9830_v55, %v9834_v14  ;;  %v9858_v59 = vrot.slane %v9856_v32, 1  ;;  %v9864_v14 = vshll.u32 %v24471_v21, 16  ;;  %v24483_v32 = vld [vmem:[#allocation3 + $0x130] sm:$0x1] }
 0x5b5   : > { %26397 = vst [vmem:[#allocation65_spill] sm:$0xff] %v24483_v32 }
 0x5b6   : > { %v9843_v30 = vsel %vm1731_vm4, %v9838_v37, %v9842_v31  ;;  %v9860_v37 = vshrl.u32 %v24461_v18, 16  ;;  %v10336_v18 = vld [vmem:[#allocation2 + $0x30] sm:$0xfe] }
 0x5b8   : > { %v9862_v31 = vor.u32 %v9860_v37, %v9858_v59 }
 0x5b9   : > { %19730 = vmatmul.mubr.msk.bf16.gmra.mrb[44].mxu0 %vm354_vm1, %v9819_v8  ;;  %v9852_v8 = vshrl.u32 %v24459_v34, 16 }
 0x5ba   : > { %19733 = vmatprep.mubr.msk.bf16.mxu0 %vm354_vm1, %v9827_v49  ;;  %v9850_v49 = vrot.slane %v9848_v19, 1  ;;  %v9872_v19 = vshll.u32 %v24473_v11, 16 }
 0x5bc   : > { %v9854_v41 = vor.u32 %v9852_v8, %v9850_v49  ;;  %v9851_v55 = vsel %vm1731_vm4, %v9846_v1, %v9850_v49  ;;  %v9874_v8 = vrot.slane %v9872_v19, 1  ;;  %v9876_v1 = vshrl.u32 %v24473_v11, 16 }
 0x5be   : > { %v9859_v34 = vsel %vm1731_vm4, %v9854_v41, %v9858_v59  ;;  %v9880_v41 = vshll.u32 %v24483_v32, 16  ;;  %v10372_v59 = vrot.slane %v10336_v18, 1 }
 0x5c1   : > { %19734 = vmatmul.mubr.msk.bf16.gmra.mrb[48].mxu0 %vm354_vm1, %v9835_v46  ;;  %v9868_v46 = vshrl.u32 %v24471_v21, 16 }
 0x5c2   : > { %19737 = vmatprep.mubr.msk.bf16.mxu0 %vm354_vm1, %v9843_v30  ;;  %v9866_v30 = vrot.slane %v9864_v14, 1  ;;  %v9878_v14 = vor.u32 %v9876_v1, %v9874_v8 }
 0x5c4   : > { %v9870_v51 = vor.u32 %v9868_v46, %v9866_v30  ;;  %v9867_v49 = vsel %vm1731_vm4, %v9862_v31, %v9866_v30  ;;  %v22215_v30 = vld [vmem:[#allocation2 + $0x40] sm:$0xff] }
 0x5c5   : > { %v10375_v31 = vrot.slane %v22215_v30, 1 }
 0x5c6   : > { %v9875_v21 = vsel %vm1731_vm4, %v9870_v51, %v9874_v8  ;;  %v22216_v51 = vld [vmem:[#allocation2 + $0x48] sm:$0xff]  ;;  %v22217_v8 = vld [vmem:[#allocation2 + $0x50] sm:$0xff] }
 0x5c7   : > { %v10377_v32 = vrot.slane %v22216_v51, 1  ;;  %v10379_v1 = vrot.slane %v22217_v8, 1 }
 0x5c9   : > { %19738 = vmatmul.mubr.msk.bf16.gmra.mrb[52].mxu0 %vm354_vm1, %v9851_v55  ;;  %v22214_v55 = vld [vmem:[#allocation2 + $0x38] sm:$0xff]  ;;  %v10378_v18 = vsel %vm3227_vm2, %v10375_v31, %v10377_v32 }
 0x5ca   : > { %19741 = vmatprep.mubr.msk.bf16.mxu0 %vm354_vm1, %v9859_v34  ;;  %v9882_v34 = vrot.slane %v9880_v41, 1  ;;  %v10373_v37 = vrot.slane %v22214_v55, 1  ;;  %v22218_v41 = vld [vmem:[#allocation2 + $0x58] sm:$0xff]  ;;  %v10385_v55 = vrot.slane %v24034_v39, 1  ;;  %v10393_v39 = vrot.slane %v24063_v29, 1 }
 0x5cb   : > { %v10401_v29 = vrot.slane %v24099_v2, 1  ;;  %v10409_v2 = vrot.slane %v24135_v45, 1  ;;  %v10417_v45 = vrot.slane %v24171_v9, 1  ;;  %v10425_v9 = vrot.slane %v24205_v56, 1 }
 0x5cc   : > { %v9883_v46 = vsel %vm1731_vm4, %v9878_v14, %v9882_v34  ;;  %v10374_v19 = vsel %vm3227_vm2, %v10372_v59, %v10373_v37  ;;  %v10381_v14 = vrot.slane %v22218_v41, 1  ;;  %v10380_v34 = vsel %vm3227_vm2, %v10377_v32, %v10379_v1 }
 0x5cd   : > { %v10387_v32 = vrot.slane %v24043_v12, 1  ;;  %v10395_v12 = vrot.slane %v24077_v22, 1  ;;  %v10403_v22 = vrot.slane %v24113_v53, 1  ;;  %v10411_v53 = vrot.slane %v24149_v10, 1 }
 0x5ce   : > { %v10382_v59 = vsel %vm3227_vm2, %v10379_v1, %v10381_v14  ;;  %v10419_v10 = vrot.slane %v24185_v50, 1  ;;  %v10427_v50 = vrot.slane %v24219_v4, 1  ;;  %v10433_v56 = vrot.slane %v24241_v5, 1  ;;  %v17435_v5 = vld [vmem:[%s26268_s6 + $0x2] sm:$0x3] }
 0x5cf   : > { %v10388_v30 = vsel %vm3227_vm2, %v10385_v55, %v10387_v32  ;;  %v10404_v41 = vsel %vm3227_vm2, %v10401_v29, %v10403_v22  ;;  %v10435_v4 = vrot.slane %v24257_v20, 1  ;;  %22080 = vmatprep.subr.msk.bf16.mxu1 %vm1015_vm0, %v17435_v5  ;;  %v12200_v20 = vsel %vm1015_vm0, %v17435_v5, 0 }
 0x5d0   : > { %19882 = vmatpush3.bf16.msra.mxu1 %v12200_v20 }
 0x5d1   : > { %19742 = vmatmul.mubr.msk.bf16.gmra.mrb[56].mxu0 %vm354_vm1, %v9867_v49  ;;  %v10376_v49 = vsel %vm3227_vm2, %v10373_v37, %v10375_v31 }
 0x5d2   : > { %19745 = vmatprep.mubr.msk.bf16.mxu0 %vm354_vm1, %v9875_v21  ;;  %v11087_v21 = vsel %vm1015_vm0, %v24309_v42, 0  ;;  %v10383_v42 = vrot.slane %v24030_v17, 1  ;;  %v10391_v17 = vrot.slane %v24059_v38, 1  ;;  %v10399_v38 = vrot.slane %v24095_v25, 1 }
 0x5d3   : > { %v10407_v25 = vrot.slane %v24131_v35, 1  ;;  %v10415_v35 = vrot.slane %v24167_v15, 1  ;;  %v10423_v15 = vrot.slane %v24201_v3, 1  ;;  %v10431_v3 = vrot.slane %v24237_v44, 1 }
 0x5d4   : > { %v10384_v37 = vsel %vm3227_vm2, %v10381_v14, %v10383_v42  ;;  %v10402_v1 = vsel %vm3227_vm2, %v10399_v38, %v10401_v29 }
 0x5d9   : > { %19746 = vmatmul.mubr.msk.bf16.gmra.mrb[60].mxu0 %vm354_vm1, %v9883_v46  ;;  %v10386_v46 = vsel %vm3227_vm2, %v10383_v42, %v10385_v55  ;;  %v10412_v42 = vsel %vm3227_vm2, %v10409_v2, %v10411_v53 }
 0x5da   : > { %19751 = vmatprep.mubr.msk.bf16.mxu0 %vm354_vm1, %v10374_v19  ;;  %v10389_v19 = vrot.slane %v24047_v54, 1  ;;  %v10397_v54 = vrot.slane %v24081_v16, 1  ;;  %v10405_v16 = vrot.slane %v24117_v23, 1  ;;  %v10413_v23 = vrot.slane %v24153_v28, 1 }
 0x5db   : > { %v10421_v28 = vrot.slane %v24189_v36, 1  ;;  %v10429_v36 = vrot.slane %v24223_v43, 1 }
 0x5dc   : > { %v10390_v31 = vsel %vm3227_vm2, %v10387_v32, %v10389_v19  ;;  %v10392_v51 = vsel %vm3227_vm2, %v10389_v19, %v10391_v17  ;;  %v10400_v8 = vsel %vm3227_vm2, %v10397_v54, %v10399_v38  ;;  %v10406_v14 = vsel %vm3227_vm2, %v10403_v22, %v10405_v16 }
 0x5dd   : > { %v10414_v55 = vsel %vm3227_vm2, %v10411_v53, %v10413_v23  ;;  %v10420_v32 = vsel %vm3227_vm2, %v10417_v45, %v10419_v10  ;;  %v10422_v19 = vsel %vm3227_vm2, %v10419_v10, %v10421_v28 }
 0x5e1   : > { %19752 = vmatmul.mubr.msk.bf16.vlgmr.msra.gmra.mrb[0].mxu0 %vm354_vm1, %v10376_v49  ;;  %v10394_v49 = vsel %vm3227_vm2, %v10391_v17, %v10393_v39  ;;  %v10428_v17 = vsel %vm3227_vm2, %v10425_v9, %v10427_v50 }
 0x5e2   : > { %19816 = vmatpush3.bf16.msra.mxu0 %v11087_v21  ;;  %19755 = vmatprep.mubr.msk.bf16.mxu0 %vm354_vm1, %v10378_v18  ;;  %v10396_v21 = vsel %vm3227_vm2, %v10393_v39, %v10395_v12  ;;  %v10398_v18 = vsel %vm3227_vm2, %v10395_v12, %v10397_v54  ;;  %v10430_v39 = vsel %vm3227_vm2, %v10427_v50, %v10429_v36  ;;  %v10889_v12 = vld [vmem:[#allocation3 + $0x30] sm:$0xfe]  ;;  %v10926_v54 = vrot.slane %v24259_v7, 1  ;;  %v26403_v50 = vld [vmem:[#allocation58_spill] sm:$0xff] }
 0x5e3   : > { %v10925_v43 = vrot.slane %v10889_v12, 1  ;;  %v10930_v7 = vrot.slane %v24276_v33, 1  ;;  %v10936_v33 = vrot.slane %v24315_v27, 1  ;;  %v10946_v27 = vrot.slane %v24353_v60, 1 }
 0x5e4   : > { %v10952_v60 = vrot.slane %v24375_v58, 1 }
 0x5e5   : > { %v10927_v44 = vsel %vm3227_vm2, %v10925_v43, %v10926_v54  ;;  %v26406_v43 = vld [vmem:[#allocation61_spill] sm:$0xff] }
 0x5e9   : > { %19756 = vmatmul.mubr.msk.bf16.gmra.mrb[4].mxu0 %vm354_vm1, %v10380_v34  ;;  %v10408_v34 = vsel %vm3227_vm2, %v10405_v16, %v10407_v25  ;;  %v10938_v16 = vrot.slane %v24321_v0, 1  ;;  %v10944_v0 = vrot.slane %v24351_v40, 1  ;;  %v10954_v40 = vrot.slane %v24377_v63, 1  ;;  %v26398_v63 = vld [vmem:[#allocation53_spill] sm:$0xff] }
 0x5ea   : > { %19759 = vmatprep.mubr.msk.bf16.mxu0 %vm354_vm1, %v10382_v59  ;;  %v10410_v59 = vsel %vm3227_vm2, %v10407_v25, %v10409_v2  ;;  %v10960_v58 = vrot.slane %v26398_v63, 1 }
 0x5f1   : > { %19760 = vmatmul.mubr.msk.bf16.gmra.mrb[8].mxu0 %vm354_vm1, %v10384_v37  ;;  %v10416_v37 = vsel %vm3227_vm2, %v10413_v23, %v10415_v35 }
 0x5f2   : > { %19763 = vmatprep.mubr.msk.bf16.mxu0 %vm354_vm1, %v10386_v46  ;;  %v10418_v46 = vsel %vm3227_vm2, %v10415_v35, %v10417_v45 }
 0x5f9   : > { %19764 = vmatmul.mubr.msk.bf16.gmra.mrb[12].mxu0 %vm354_vm1, %v10388_v30  ;;  %v10424_v30 = vsel %vm3227_vm2, %v10421_v28, %v10423_v15 }
 0x5fa   : > { %19767 = vmatprep.mubr.msk.bf16.mxu0 %vm354_vm1, %v10390_v31  ;;  %v10426_v31 = vsel %vm3227_vm2, %v10423_v15, %v10425_v9 }
 0x601   : > { %19768 = vmatmul.mubr.msk.bf16.gmra.mrb[16].mxu0 %vm354_vm1, %v10392_v51  ;;  %v10432_v51 = vsel %vm3227_vm2, %v10429_v36, %v10431_v3  ;;  %v10970_v36 = vrot.slane %v26403_v50, 1  ;;  %v26414_v50 = vld [vmem:[#allocation9_spill] sm:$0xff] }
 0x602   : > { %19771 = vmatprep.mubr.msk.bf16.mxu0 %vm354_vm1, %v10394_v49  ;;  %v10434_v49 = vsel %vm3227_vm2, %v10431_v3, %v10433_v56  ;;  %v26404_v3 = vld [vmem:[#allocation59_spill] sm:$0xff] }
 0x609   : > { %19772 = vmatmul.mubr.msk.bf16.gmra.mrb[20].mxu0 %vm354_vm1, %v10396_v21  ;;  %v10436_v21 = vsel %vm3227_vm2, %v10433_v56, %v10435_v4  ;;  %v10972_v56 = vrot.slane %v26404_v3, 1 }
 0x60a   : > { %19775 = vmatprep.mubr.msk.bf16.mxu0 %vm354_vm1, %v10398_v18  ;;  %v10928_v18 = vrot.slane %v24272_v6, 1 }
 0x60b   : > { %v10973_v12 = vsel %vm3227_vm2, %v10970_v36, %v10972_v56 }
 0x60c   : > { %v10929_v38 = vsel %vm3227_vm2, %v10926_v54, %v10928_v18  ;;  %v10931_v29 = vsel %vm3227_vm2, %v10928_v18, %v10930_v7  ;;  %v10976_v54 = vrot.slane %v26406_v43, 1  ;;  %v26407_v18 = vld [vmem:[#allocation62_spill] sm:$0xff] }
 0x60d   : > { %v10980_v20 = vrot.slane %v26407_v18, 1 }
 0x611   : > { %19776 = vmatmul.mubr.msk.bf16.gmra.mrb[24].mxu0 %vm354_vm1, %v10400_v8  ;;  %v10932_v8 = vrot.slane %v24290_v47, 1  ;;  %v10940_v47 = vrot.slane %v24335_v26, 1  ;;  %v10948_v26 = vrot.slane %v24363_v24, 1  ;;  %v10958_v24 = vrot.slane %v24389_v52, 1  ;;  %v26400_v52 = vld [vmem:[#allocation55_spill] sm:$0xff] }
 0x612   : > { %19779 = vmatprep.mubr.msk.bf16.mxu0 %vm354_vm1, %v10402_v1  ;;  %v10934_v1 = vrot.slane %v24294_v48, 1  ;;  %v10942_v48 = vrot.slane %v24339_v13, 1  ;;  %v10950_v13 = vrot.slane %v24365_v62, 1  ;;  %v10956_v62 = vrot.slane %v24387_v57, 1 }
 0x613   : > { %v10933_v6 = vsel %vm3227_vm2, %v10930_v7, %v10932_v8  ;;  %v10941_v25 = vsel %vm3227_vm2, %v10938_v16, %v10940_v47  ;;  %v10949_v53 = vsel %vm3227_vm2, %v10946_v27, %v10948_v26  ;;  %v10961_v10 = vsel %vm3227_vm2, %v10958_v24, %v10960_v58  ;;  %v26408_v7 = vld [vmem:[#allocation63_spill] sm:$0xff] }
 0x614   : > { %v10935_v22 = vsel %vm3227_vm2, %v10932_v8, %v10934_v1  ;;  %v10943_v2 = vsel %vm3227_vm2, %v10940_v47, %v10942_v48  ;;  %v10951_v23 = vsel %vm3227_vm2, %v10948_v26, %v10950_v13  ;;  %v10957_v35 = vsel %vm3227_vm2, %v10954_v40, %v10956_v62  ;;  %v11807_v8 = vld [vmem:[#allocation4] sm:$0xff] }
 0x615   : > { %v10959_v45 = vsel %vm3227_vm2, %v10956_v62, %v10958_v24  ;;  %v10964_v57 = vrot.slane %v26400_v52, 1  ;;  %v24713_v62 = vld [vmem:[%s26267_s5] ss:$0 sm:$0xff] }
 0x619   : > { %19780 = vmatmul.mubr.msk.bf16.gmra.mrb[28].mxu0 %vm354_vm1, %v10404_v41  ;;  %v10937_v41 = vsel %vm3227_vm2, %v10934_v1, %v10936_v33 }
 0x61a   : > { %19783 = vmatprep.mubr.msk.bf16.mxu0 %vm354_vm1, %v10406_v14  ;;  %v10939_v14 = vsel %vm3227_vm2, %v10936_v33, %v10938_v16  ;;  %v11844_v33 = vshrl.u32 %v11807_v8, 16 }
 0x621   : > { %19784 = vmatmul.mubr.msk.bf16.gmra.mrb[32].mxu0 %vm354_vm1, %v10408_v34  ;;  %v10945_v34 = vsel %vm3227_vm2, %v10942_v48, %v10944_v0  ;;  %v10986_v48 = vrot.slane %v24473_v11, 1  ;;  %v24697_v11 = vld [vmem:[%s26268_s6] sm:$0x3] }
 0x622   : > { %19787 = vmatprep.mubr.msk.bf16.mxu0 %vm354_vm1, %v10410_v59  ;;  %v10947_v59 = vsel %vm3227_vm2, %v10944_v0, %v10946_v27  ;;  %22081 = vmatprep.subr.msk.bf16.mxu1 %vm1015_vm0, %v24697_v11 }
 0x629   : > { %19788 = vmatmul.mubr.msk.bf16.gmra.mrb[36].mxu0 %vm354_vm1, %v10412_v42  ;;  %v10953_v42 = vsel %vm3227_vm2, %v10950_v13, %v10952_v60  ;;  %v11648_v13 = vlaneseq }
 0x62a   : > { %19791 = vmatprep.mubr.msk.bf16.mxu0 %vm354_vm1, %v10414_v55  ;;  %v10955_v55 = vsel %vm3227_vm2, %v10952_v60, %v10954_v40  ;;  %v24707_v60 = vld [vmem:[%s26266_s4] ss:$0 sm:$0xff]  ;;  %v26411_v40 = vld [vmem:[#allocation6_spill] sm:$0xff] }
 0x631   : > { %19792 = vmatmul.mubr.msk.bf16.gmra.mrb[40].mxu0 %vm354_vm1, %v10416_v37  ;;  %v26399_v37 = vld [vmem:[#allocation54_spill] sm:$0xff] }
 0x632   : > { %19795 = vmatprep.mubr.msk.bf16.mxu0 %vm354_vm1, %v10418_v46  ;;  %v10962_v46 = vrot.slane %v26399_v37, 1 }
 0x634   : > { %v10963_v28 = vsel %vm3227_vm2, %v10960_v58, %v10962_v46  ;;  %v10965_v15 = vsel %vm3227_vm2, %v10962_v46, %v10964_v57 }
 0x639   : > { %19796 = vmatmul.mubr.msk.bf16.gmra.mrb[44].mxu0 %vm354_vm1, %v10420_v32  ;;  %v26401_v32 = vld [vmem:[#allocation56_spill] sm:$0xff] }
 0x63a   : > { %19799 = vmatprep.mubr.msk.bf16.mxu0 %vm354_vm1, %v10422_v19  ;;  %v10966_v19 = vrot.slane %v26401_v32, 1 }
 0x63c   : > { %v10967_v9 = vsel %vm3227_vm2, %v10964_v57, %v10966_v19 }
 0x641   : > { %19800 = vmatmul.mubr.msk.bf16.gmra.mrb[48].mxu0 %vm354_vm1, %v10424_v30  ;;  %v26402_v30 = vld [vmem:[#allocation57_spill] sm:$0xff] }
 0x642   : > { %19803 = vmatprep.mubr.msk.bf16.mxu0 %vm354_vm1, %v10426_v31  ;;  %v10968_v31 = vrot.slane %v26402_v30, 1 }
 0x649   : > { %19804 = vmatmul.mubr.msk.bf16.gmra.mrb[52].mxu0 %vm354_vm1, %v10428_v17  ;;  %v10969_v17 = vsel %vm3227_vm2, %v10966_v19, %v10968_v31 }
 0x64a   : > { %19807 = vmatprep.mubr.msk.bf16.mxu0 %vm354_vm1, %v10430_v39  ;;  %v10971_v39 = vsel %vm3227_vm2, %v10968_v31, %v10970_v36 }
 0x651   : > { %19808 = vmatmul.mubr.msk.bf16.gmra.mrb[56].mxu0 %vm354_vm1, %v10432_v51  ;;  %v26405_v51 = vld [vmem:[#allocation60_spill] sm:$0xff] }
 0x652   : > { %19811 = vmatprep.mubr.msk.bf16.mxu0 %vm354_vm1, %v10434_v49  ;;  %v10974_v49 = vrot.slane %v26405_v51, 1 }
 0x654   : > { %v10975_v4 = vsel %vm3227_vm2, %v10972_v56, %v10974_v49 }
 0x659   : > { %19812 = vmatmul.mubr.msk.bf16.gmra.mrb[60].mxu0 %vm354_vm1, %v10436_v21  ;;  %v10978_v21 = vrot.slane %v24449_v61, 1  ;;  %v11846_v61 = vshll.u32 %v11807_v8, 16 }
 0x65a   : > { %19817 = vmatprep.mubr.msk.bf16.mxu0 %vm354_vm1, %v10927_v44  ;;  %v10977_v44 = vsel %vm3227_vm2, %v10974_v49, %v10976_v54  ;;  %v26415_v49 = vld [vmem:[#allocation10_spill] sm:$0xff] }
 0x65b   : > { %v10979_v5 = vsel %vm3227_vm2, %v10976_v54, %v10978_v21  ;;  %v11848_v16 = vrot.slane %v11846_v61, 1 }
 0x661   : > { %19818 = vmatmul.mubr.msk.bf16.vlgmr.msra.gmra.mrb[0].mxu0 %vm354_vm1, %v10929_v38  ;;  %v10982_v38 = vrot.slane %v26408_v7, 1 }
 0x662   : > { %19821 = vmatprep.mubr.msk.bf16.mxu0 %vm354_vm1, %v10931_v29  ;;  %v10981_v29 = vsel %vm3227_vm2, %v10978_v21, %v10980_v20 }
 0x663   : > { %v10983_v1 = vsel %vm3227_vm2, %v10980_v20, %v10982_v38 }
 0x669   : > { %19822 = vmatmul.mubr.msk.bf16.gmra.mrb[4].mxu0 %vm354_vm1, %v10933_v6  ;;  %v24676_v6 = vld [vmem:[#allocation4 + $0x8] sm:$0xff] }
 0x66a   : > { %19825 = vmatprep.mubr.msk.bf16.mxu0 %vm354_vm1, %v10935_v22  ;;  %v11851_v22 = vshll.u32 %v24676_v6, 16 }
 0x66c   : > { %v24682_v47 = vrot.slane %v11851_v22, 1 }
 0x671   : > { %19826 = vmatmul.mubr.msk.bf16.gmra.mrb[8].mxu0 %vm354_vm1, %v10937_v41  ;;  %v26409_v41 = vld [vmem:[#allocation64_spill] sm:$0xff] }
 0x672   : > { %19829 = vmatprep.mubr.msk.bf16.mxu0 %vm354_vm1, %v10939_v14  ;;  %v10984_v14 = vrot.slane %v26409_v41, 1 }
 0x674   : > { %v10985_v0 = vsel %vm3227_vm2, %v10982_v38, %v10984_v14  ;;  %v10987_v27 = vsel %vm3227_vm2, %v10984_v14, %v10986_v48 }
 0x679   : > { %19830 = vmatmul.mubr.msk.bf16.gmra.mrb[12].mxu0 %vm354_vm1, %v10941_v25  ;;  %v11849_v25 = vor.u32 %v11848_v16, %v11844_v33  ;;  %v26417_v33 = vld [vmem:[#allocation12_spill] sm:$0xff] }
 0x67a   : > { %19833 = vmatprep.mubr.msk.bf16.mxu0 %vm354_vm1, %v10943_v2 }
 0x67b   : > { %v11854_v2 = vsel %vm1731_vm4, %v11849_v25, %v24682_v47 }
 0x67c   : > { %19883 = vmatprep.mubr.msk.bf16.mxu1 %vm354_vm1, %v11854_v2  ;;  %v26418_v2 = vld [vmem:[#allocation13_spill] sm:$0xff] }
 0x681   : > { %19834 = vmatmul.mubr.msk.bf16.gmra.mrb[16].mxu0 %vm354_vm1, %v10945_v34  ;;  %v26410_v34 = vld [vmem:[#allocation65_spill] sm:$0xff] }
 0x682   : > { %19837 = vmatprep.mubr.msk.bf16.mxu0 %vm354_vm1, %v10947_v59  ;;  %v10988_v59 = vrot.slane %v26410_v34, 1 }
 0x684   : > { %v10989_v26 = vsel %vm3227_vm2, %v10986_v48, %v10988_v59 }
 0x689   : > { %19838 = vmatmul.mubr.msk.bf16.gmra.mrb[20].mxu0 %vm354_vm1, %v10949_v53  ;;  %v24702_v53 = vshrl.u32 %v11648_v13, 7 }
 0x68a   : > { %19841 = vmatprep.mubr.msk.bf16.mxu0 %vm354_vm1, %v10951_v23 }
 0x68b   : > { %v24716_v24 = vadd.s32 16, %v24702_v53  ;;  %vm11653_vm6 = vcmp.ge.s32.totalorder %v24702_v53, 1 }
 0x68d   : > { %vm11659_vm5 = vcmp.le.s32.totalorder %v24716_v24, 16 }
 0x691   : > { %19842 = vmatmul.mubr.msk.bf16.gmra.mrb[24].mxu0 %vm354_vm1, %v10953_v42 }
 0x692   : > { %19845 = vmatprep.mubr.msk.bf16.mxu0 %vm354_vm1, %v10955_v55 }
 0x699   : > { %19846 = vmatmul.mubr.msk.bf16.gmra.mrb[28].mxu0 %vm354_vm1, %v10957_v35  ;;  %v26412_v35 = vld [vmem:[#allocation7_spill] sm:$0xff] }
 0x69a   : > { %19849 = vmatprep.mubr.msk.bf16.mxu0 %vm354_vm1, %v10959_v45 }
 0x6a1   : > { %19850 = vmatmul.mubr.msk.bf16.gmra.mrb[32].mxu0 %vm354_vm1, %v10961_v10  ;;  %v26413_v10 = vld [vmem:[#allocation8_spill] sm:$0xff] }
 0x6a2   : > { %19853 = vmatprep.mubr.msk.bf16.mxu0 %vm354_vm1, %v10963_v28 }
 0x6a9   : > { %19854 = vmatmul.mubr.msk.bf16.gmra.mrb[36].mxu0 %vm354_vm1, %v10965_v15 }
 0x6aa   : > { %19857 = vmatprep.mubr.msk.bf16.mxu0 %vm354_vm1, %v10967_v9 }
 0x6b1   : > { %19858 = vmatmul.mubr.msk.bf16.gmra.mrb[40].mxu0 %vm354_vm1, %v10969_v17 }
 0x6b2   : > { %19861 = vmatprep.mubr.msk.bf16.mxu0 %vm354_vm1, %v10971_v39  ;;  %v22240_v39 = vmov 0.0  }
 0x6b9   : > { %19862 = vmatmul.mubr.msk.bf16.gmra.mrb[44].mxu0 %vm354_vm1, %v10973_v12 }
 0x6ba   : > { %19865 = vmatprep.mubr.msk.bf16.mxu0 %vm354_vm1, %v10975_v4 }
 0x6c1   : > { %19866 = vmatmul.mubr.msk.bf16.gmra.mrb[48].mxu0 %vm354_vm1, %v10977_v44 }
 0x6c2   : > { %19869 = vmatprep.mubr.msk.bf16.mxu0 %vm354_vm1, %v10979_v5  ;;  %v26416_v5 = vld [vmem:[#allocation11_spill] sm:$0xff] }
 0x6c9   : > { %19870 = vmatmul.mubr.msk.bf16.gmra.mrb[52].mxu0 %vm354_vm1, %v10981_v29 }
 0x6ca   : > { %19873 = vmatprep.mubr.msk.bf16.mxu0 %vm354_vm1, %v10983_v1 }
 0x6d1   : > { %19874 = vmatmul.mubr.msk.bf16.gmra.mrb[56].mxu0 %vm354_vm1, %v10985_v0 }
 0x6d2   : > { %19877 = vmatprep.mubr.msk.bf16.mxu0 %vm354_vm1, %v10987_v27 }
 0x6d9   : > { %19878 = vmatmul.mubr.msk.bf16.gmra.mrb[60].mxu0 %vm354_vm1, %v10989_v26  ;;  %v11855_v26 = vshrl.u32 %v24676_v6, 16 }
 0x6db   : > { %v11857_v6 = vor.u32 %v11855_v26, %v24682_v47 }
 0x734   : > { %v19819_v23 = vpop.f32.mrb[0].mxu0 }
 0x735   : > { %v20477_v42 = vadd.f32 %v19819_v23, %v26411_v40  ;;  %v11123_v55 = vpop.f32.mrb[1].mxu0  ;;  %v26419_v40 = vld [vmem:[#allocation14_spill] sm:$0xff] }
 0x736   : > { %v20478_v45 = vadd.f32 %v11123_v55, %v26412_v35  ;;  %v19820_v63 = vpop.f32.mrb[2].mxu0 }
 0x737   : > { %v11451_v58 = vmul.f32 %v20477_v42, %v24707_v60  ;;  %v11126_v37 = vpop.f32.mrb[3].mxu0 }
 0x738   : > { %v11449_v46 = vmul.f32 %v20478_v45, %v24707_v60  ;;  %v20479_v28 = vadd.f32 %v11126_v37, %v26413_v10 }
 0x739   : > { %v11522_v52 = vadd.f32 %v24713_v62, %v11451_v58 }
 0x73a   : > { %v11520_v57 = vadd.f32 %v24713_v62, %v11449_v46  ;;  %v11450_v32 = vmul.f32 %v20479_v28, %v24707_v60 }
 0x73b   : > { %v11586_v19 = vmax.f32 %v11522_v52, 0.0 }
 0x73c   : > { %v11584_v15 = vmax.f32 %v11520_v57, 0.0  ;;  %v11521_v9 = vadd.f32 %v24713_v62, %v11450_v32  ;;  %v19823_v30 = vpop.f32.mrb[4].mxu0 }
 0x73d   : > { %v11675_v31 = vsel %vm11659_vm5, %v11586_v19, 0.0  ;;  %v20480_v36 = vadd.f32 %v19823_v30, %v26414_v50  ;;  %v11139_v17 = vpop.f32.mrb[5].mxu0 }
 0x73e   : > { %v11738_v3 = vpack.c.bf16 %v22240_v39, %v11675_v31  ;;  %v11673_v56 = vsel %vm11653_vm6, %v11584_v15, 0.0  ;;  %v11585_v51 = vmax.f32 %v11521_v9, 0.0  ;;  %v20481_v12 = vadd.f32 %v11139_v17, %v26415_v49  ;;  %v19824_v4 = vpop.f32.mrb[6].mxu0  ;;  %v26420_v15 = vld [vmem:[#allocation15_spill] sm:$0xff] }
 0x73f   : > { %v11455_v43 = vmul.f32 %v20480_v36, %v24707_v60  ;;  %v11142_v54 = vpop.f32.mrb[7].mxu0  ;;  %v12524_v31 = vsel %vm1015_vm0, %v24697_v11, 0  ;;  %v24776_v11 = vld [vmem:[%s26268_s6 + $0x4] sm:$0x3] }
 0x740   : > { %11772 = vst.msk [vmem:[#allocation4 + $0x18] sm:$0xff] %vm354_vm1, %v11738_v3  ;;  %v11737_v21 = vpack.c.bf16 %v11585_v51, %v11673_v56  ;;  %v11453_v44 = vmul.f32 %v20481_v12, %v24707_v60  ;;  %v20482_v18 = vadd.f32 %v11142_v54, %v26416_v5  ;;  %v26421_v3 = vld [vmem:[#allocation16_spill] sm:$0xff]  ;;  %v26422_v5 = vld [vmem:[#allocation17_spill] sm:$0xff] }
 0x741   : > { %v11526_v20 = vadd.f32 %v24713_v62, %v11455_v43 }
 0x742   : > { %11771 = vst.msk [vmem:[#allocation4 + $0x10] sm:$0xff] %vm354_vm1, %v11737_v21  ;;  %v11524_v7 = vadd.f32 %v24713_v62, %v11453_v44  ;;  %v11454_v38 = vmul.f32 %v20482_v18, %v24707_v60 }
 0x743   : > { %v11590_v29 = vmax.f32 %v11526_v20, 0.0 }
 0x744   : > { %v11588_v8 = vmax.f32 %v11524_v7, 0.0  ;;  %v11525_v1 = vadd.f32 %v24713_v62, %v11454_v38  ;;  %v19827_v61 = vpop.f32.mrb[8].mxu0 }
 0x745   : > { %v11679_v22 = vsel %vm11659_vm5, %v11590_v29, 0.0  ;;  %v20483_v16 = vadd.f32 %v19827_v61, %v26417_v33  ;;  %v11155_v41 = vpop.f32.mrb[9].mxu0 }
 0x746   : > { %v11740_v14 = vpack.c.bf16 %v22240_v39, %v11679_v22  ;;  %v11677_v48 = vsel %vm11653_vm6, %v11588_v8, 0.0  ;;  %v11589_v25 = vmax.f32 %v11525_v1, 0.0  ;;  %v20484_v0 = vadd.f32 %v11155_v41, %v26418_v2  ;;  %v19828_v27 = vpop.f32.mrb[10].mxu0 }
 0x747   : > { %v11459_v34 = vmul.f32 %v20483_v16, %v24707_v60  ;;  %v11158_v59 = vpop.f32.mrb[11].mxu0  ;;  %v11810_v55 = vld [vmem:[#allocation4 + $0x18] sm:$0xff] }
 0x748   : > { %11774 = vst.msk [vmem:[#allocation4 + $0x28] sm:$0xff] %vm354_vm1, %v11740_v14  ;;  %v11739_v13 = vpack.c.bf16 %v11589_v25, %v11677_v48  ;;  %v11457_v23 = vmul.f32 %v20484_v0, %v24707_v60  ;;  %v20485_v42 = vadd.f32 %v11158_v59, %v26419_v40  ;;  %v11867_v10 = vshll.u32 %v11810_v55, 16  ;;  %v26423_v0 = vld [vmem:[#allocation5_spill] sm:$0xff] }
 0x749   : > { %v11530_v35 = vadd.f32 %v24713_v62, %v11459_v34  ;;  %v11809_v45 = vld [vmem:[#allocation4 + $0x10] sm:$0xff]  ;;  %v11871_v33 = vshrl.u32 %v11810_v55, 16 }
 0x74a   : > { %11773 = vst.msk [vmem:[#allocation4 + $0x20] sm:$0xff] %vm354_vm1, %v11739_v13  ;;  %v11528_v63 = vadd.f32 %v24713_v62, %v11457_v23  ;;  %v11458_v58 = vmul.f32 %v20485_v42, %v24707_v60  ;;  %v11859_v37 = vshll.u32 %v11809_v45, 16  ;;  %v11863_v50 = vshrl.u32 %v11809_v45, 16  ;;  %v26424_v42 = vld [vmem:[#allocation18_spill] sm:$0xff] }
 0x74b   : > { %v11594_v46 = vmax.f32 %v11530_v35, 0.0  ;;  %v11869_v54 = vrot.slane %v11867_v10, 1 }
 0x74c   : > { %v11592_v28 = vmax.f32 %v11528_v63, 0.0  ;;  %v11529_v52 = vadd.f32 %v24713_v62, %v11458_v58  ;;  %v19831_v57 = vpop.f32.mrb[12].mxu0  ;;  %v11861_v32 = vrot.slane %v11859_v37, 1 }
 0x74d   : > { %v11683_v19 = vsel %vm11659_vm5, %v11594_v46, 0.0  ;;  %v20486_v9 = vadd.f32 %v19831_v57, %v26420_v15  ;;  %v11171_v30 = vpop.f32.mrb[13].mxu0  ;;  %v11873_v59 = vor.u32 %v11871_v33, %v11869_v54 }
 0x74e   : > { %v11742_v36 = vpack.c.bf16 %v22240_v39, %v11683_v19  ;;  %v11681_v47 = vsel %vm11653_vm6, %v11592_v28, 0.0  ;;  %v11593_v17 = vmax.f32 %v11529_v52, 0.0  ;;  %v20487_v56 = vadd.f32 %v11171_v30, %v26421_v3  ;;  %v19832_v51 = vpop.f32.mrb[14].mxu0  ;;  %v26425_v28 = vld [vmem:[#allocation19_spill] sm:$0xff] }
 0x74f   : > { %v11463_v49 = vmul.f32 %v20486_v9, %v24707_v60  ;;  %v11174_v12 = vpop.f32.mrb[15].mxu0  ;;  %v11862_v4 = vsel %vm1731_vm4, %v11857_v6, %v11861_v32  ;;  %v11865_v43 = vor.u32 %v11863_v50, %v11861_v32  ;;  %v24782_v20 = vld [vmem:[#allocation4 + $0x28] sm:$0xff] }
 0x750   : > { %11776 = vst.msk [vmem:[#allocation4 + $0x38] sm:$0xff] %vm354_vm1, %v11742_v36  ;;  %v11741_v21 = vpack.c.bf16 %v11593_v17, %v11681_v47  ;;  %v11461_v44 = vmul.f32 %v20487_v56, %v24707_v60  ;;  %v20488_v18 = vadd.f32 %v11174_v12, %v26422_v5  ;;  %19884 = vmatmul.mubr.msk.bf16.vlgmr.msra.gmra.mrb[64].mxu1 %vm354_vm1, %v11862_v4  ;;  %v11883_v16 = vshll.u32 %v24782_v20, 16  ;;  %v26426_v12 = vld [vmem:[#allocation20_spill] sm:$0xff] }
 0x751   : > { %v11534_v7 = vadd.f32 %v24713_v62, %v11463_v49  ;;  %19948 = vmatpush3.bf16.msra.mxu1 %v12524_v31  ;;  %v11870_v38 = vsel %vm1731_vm4, %v11865_v43, %v11869_v54  ;;  %v24786_v29 = vld [vmem:[#allocation4 + $0x20] sm:$0xff]  ;;  %v11887_v36 = vshrl.u32 %v24782_v20, 16 }
 0x752   : > { %11775 = vst.msk [vmem:[#allocation4 + $0x30] sm:$0xff] %vm354_vm1, %v11741_v21  ;;  %v11532_v8 = vadd.f32 %v24713_v62, %v11461_v44  ;;  %v11462_v1 = vmul.f32 %v20488_v18, %v24707_v60  ;;  %19887 = vmatprep.mubr.msk.bf16.mxu1 %vm354_vm1, %v11870_v38  ;;  %v11875_v61 = vshll.u32 %v24786_v29, 16  ;;  %22082 = vmatprep.subr.msk.bf16.mxu1 %vm1015_vm0, %v24776_v11  ;;  %v11879_v26 = vshrl.u32 %v24786_v29, 16 }
 0x753   : > { %v11598_v22 = vmax.f32 %v11534_v7, 0.0  ;;  %v11885_v46 = vrot.slane %v11883_v16, 1  ;;  %v26427_v7 = vld [vmem:[#allocation21_spill] sm:$0xff] }
 0x754   : > { %v11596_v41 = vmax.f32 %v11532_v8, 0.0  ;;  %v11533_v14 = vadd.f32 %v24713_v62, %v11462_v1  ;;  %v19835_v48 = vpop.f32.mrb[16].mxu0  ;;  %v11877_v25 = vrot.slane %v11875_v61, 1 }
 0x755   : > { %v11687_v2 = vsel %vm11659_vm5, %v11598_v22, 0.0  ;;  %v20489_v27 = vadd.f32 %v19835_v48, %v26423_v0  ;;  %v11187_v34 = vpop.f32.mrb[17].mxu0  ;;  %v11889_v54 = vor.u32 %v11887_v36, %v11885_v46  ;;  %v26428_v48 = vld [vmem:[#allocation22_spill] sm:$0xff] }
 0x756   : > { %v11744_v13 = vpack.c.bf16 %v22240_v39, %v11687_v2  ;;  %v11685_v23 = vsel %vm11653_vm6, %v11596_v41, 0.0  ;;  %v11597_v40 = vmax.f32 %v11533_v14, 0.0  ;;  %v20490_v55 = vadd.f32 %v11187_v34, %v26424_v42  ;;  %v19836_v35 = vpop.f32.mrb[18].mxu0 }
 0x757   : > { %v11467_v45 = vmul.f32 %v20489_v27, %v24707_v60  ;;  %v11190_v63 = vpop.f32.mrb[19].mxu0  ;;  %v11878_v58 = vsel %vm1731_vm4, %v11873_v59, %v11877_v25  ;;  %v11881_v37 = vor.u32 %v11879_v26, %v11877_v25  ;;  %v24811_v57 = vld [vmem:[#allocation4 + $0x38] sm:$0xff] }
 0x758   : > { %11778 = vst.msk [vmem:[#allocation4 + $0x48] sm:$0xff] %vm354_vm1, %v11744_v13  ;;  %v11743_v6 = vpack.c.bf16 %v11597_v40, %v11685_v23  ;;  %v11465_v10 = vmul.f32 %v20490_v55, %v24707_v60  ;;  %v20491_v52 = vadd.f32 %v11190_v63, %v26425_v28  ;;  %19888 = vmatmul.mubr.msk.bf16.gmra.mrb[68].mxu1 %vm354_vm1, %v11878_v58  ;;  %v11899_v47 = vshll.u32 %v24811_v57, 16 }
 0x759   : > { %v11538_v32 = vadd.f32 %v24713_v62, %v11467_v45  ;;  %v11886_v19 = vsel %vm1731_vm4, %v11881_v37, %v11885_v46  ;;  %v24815_v15 = vld [vmem:[#allocation4 + $0x30] sm:$0xff]  ;;  %v11903_v40 = vshrl.u32 %v24811_v57, 16  ;;  %v26429_v37 = vld [vmem:[#allocation23_spill] sm:$0xff] }
 0x75a   : > { %11777 = vst.msk [vmem:[#allocation4 + $0x40] sm:$0xff] %vm354_vm1, %v11743_v6  ;;  %v11536_v9 = vadd.f32 %v24713_v62, %v11465_v10  ;;  %v11466_v30 = vmul.f32 %v20491_v52, %v24707_v60  ;;  %19891 = vmatprep.mubr.msk.bf16.mxu1 %vm354_vm1, %v11886_v19  ;;  %v11891_v31 = vshll.u32 %v24815_v15, 16  ;;  %v11895_v21 = vshrl.u32 %v24815_v15, 16 }
 0x75b   : > { %v11602_v50 = vmax.f32 %v11538_v32, 0.0  ;;  %v11901_v16 = vrot.slane %v11899_v47, 1 }
 0x75c   : > { %v11600_v17 = vmax.f32 %v11536_v9, 0.0  ;;  %v11537_v3 = vadd.f32 %v24713_v62, %v11466_v30  ;;  %v19839_v56 = vpop.f32.mrb[20].mxu0  ;;  %v11893_v51 = vrot.slane %v11891_v31, 1  ;;  %v26430_v9 = vld [vmem:[#allocation24_spill] sm:$0xff] }
 0x75d   : > { %v11691_v49 = vsel %vm11659_vm5, %v11602_v50, 0.0  ;;  %v20492_v4 = vadd.f32 %v19839_v56, %v26426_v12  ;;  %v11203_v43 = vpop.f32.mrb[21].mxu0  ;;  %v11905_v10 = vor.u32 %v11903_v40, %v11901_v16 }
 0x75e   : > { %v11746_v44 = vpack.c.bf16 %v22240_v39, %v11691_v49  ;;  %v11689_v5 = vsel %vm11653_vm6, %v11600_v17, 0.0  ;;  %v11601_v18 = vmax.f32 %v11537_v3, 0.0  ;;  %v20493_v38 = vadd.f32 %v11203_v43, %v26427_v7  ;;  %v19840_v8 = vpop.f32.mrb[22].mxu0  ;;  %v26431_v49 = vld [vmem:[#allocation25_spill] sm:$0xff] }
 0x75f   : > { %v11471_v1 = vmul.f32 %v20492_v4, %v24707_v60  ;;  %v11206_v61 = vpop.f32.mrb[23].mxu0  ;;  %v11894_v22 = vsel %vm1731_vm4, %v11889_v54, %v11893_v51  ;;  %v11897_v33 = vor.u32 %v11895_v21, %v11893_v51  ;;  %v24839_v2 = vld [vmem:[#allocation4 + $0x48] sm:$0xff] }
 0x760   : > { %11780 = vst.msk [vmem:[#allocation4 + $0x58] sm:$0xff] %vm354_vm1, %v11746_v44  ;;  %v11745_v41 = vpack.c.bf16 %v11601_v18, %v11689_v5  ;;  %v11469_v14 = vmul.f32 %v20493_v38, %v24707_v60  ;;  %v20494_v25 = vadd.f32 %v11206_v61, %v26428_v48  ;;  %19892 = vmatmul.mubr.msk.bf16.gmra.mrb[72].mxu1 %vm354_vm1, %v11894_v22  ;;  %v11915_v42 = vshll.u32 %v24839_v2, 16 }
 0x761   : > { %v11542_v0 = vadd.f32 %v24713_v62, %v11471_v1  ;;  %v11902_v27 = vsel %vm1731_vm4, %v11897_v33, %v11901_v16  ;;  %v24843_v34 = vld [vmem:[#allocation4 + $0x40] sm:$0xff]  ;;  %v11919_v38 = vshrl.u32 %v24839_v2, 16 }
 0x762   : > { %11779 = vst.msk [vmem:[#allocation4 + $0x50] sm:$0xff] %vm354_vm1, %v11745_v41  ;;  %v11540_v59 = vadd.f32 %v24713_v62, %v11469_v14  ;;  %v11470_v26 = vmul.f32 %v20494_v25, %v24707_v60  ;;  %19895 = vmatprep.mubr.msk.bf16.mxu1 %vm354_vm1, %v11902_v27  ;;  %v11907_v13 = vshll.u32 %v24843_v34, 16  ;;  %v11911_v28 = vshrl.u32 %v24843_v34, 16  ;;  %v26432_v41 = vld [vmem:[#allocation26_spill] sm:$0xff] }
 0x763   : > { %v11606_v23 = vmax.f32 %v11542_v0, 0.0  ;;  %v11917_v3 = vrot.slane %v11915_v42, 1 }
 0x764   : > { %v11604_v55 = vmax.f32 %v11540_v59, 0.0  ;;  %v11541_v35 = vadd.f32 %v24713_v62, %v11470_v26  ;;  %v19843_v45 = vpop.f32.mrb[24].mxu0  ;;  %v11909_v63 = vrot.slane %v11907_v13, 1  ;;  %v26433_v13 = vld [vmem:[#allocation27_spill] sm:$0xff] }
 0x765   : > { %v11695_v58 = vsel %vm11659_vm5, %v11606_v23, 0.0  ;;  %v20495_v46 = vadd.f32 %v19843_v45, %v26429_v37  ;;  %v11219_v6 = vpop.f32.mrb[25].mxu0  ;;  %v11921_v25 = vor.u32 %v11919_v38, %v11917_v3  ;;  %v26436_v38 = vld [vmem:[#allocation30_spill] sm:$0xff] }
 0x766   : > { %v11748_v52 = vpack.c.bf16 %v22240_v39, %v11695_v58  ;;  %v11693_v32 = vsel %vm11653_vm6, %v11604_v55, 0.0  ;;  %v11605_v19 = vmax.f32 %v11541_v35, 0.0  ;;  %v20496_v30 = vadd.f32 %v11219_v6, %v26430_v9  ;;  %v19844_v31 = vpop.f32.mrb[26].mxu0 }
 0x767   : > { %v11475_v50 = vmul.f32 %v20495_v46, %v24707_v60  ;;  %v11222_v36 = vpop.f32.mrb[27].mxu0  ;;  %v11910_v47 = vsel %vm1731_vm4, %v11905_v10, %v11909_v63  ;;  %v11913_v17 = vor.u32 %v11911_v28, %v11909_v63  ;;  %v24867_v4 = vld [vmem:[#allocation4 + $0x58] sm:$0xff]  ;;  %v26434_v46 = vld [vmem:[#allocation28_spill] sm:$0xff] }
 0x768   : > { %11782 = vst.msk [vmem:[#allocation4 + $0x68] sm:$0xff] %vm354_vm1, %v11748_v52  ;;  %v11747_v56 = vpack.c.bf16 %v11605_v19, %v11693_v32  ;;  %v11473_v51 = vmul.f32 %v20496_v30, %v24707_v60  ;;  %v20497_v12 = vadd.f32 %v11222_v36, %v26431_v49  ;;  %19896 = vmatmul.mubr.msk.bf16.gmra.mrb[76].mxu1 %vm354_vm1, %v11910_v47  ;;  %v11931_v8 = vshll.u32 %v24867_v4, 16  ;;  %v26435_v49 = vld [vmem:[#allocation29_spill] sm:$0xff] }
 0x769   : > { %v11546_v43 = vadd.f32 %v24713_v62, %v11475_v50  ;;  %v11918_v54 = vsel %vm1731_vm4, %v11913_v17, %v11917_v3  ;;  %v24871_v21 = vld [vmem:[#allocation4 + $0x50] sm:$0xff]  ;;  %v11935_v50 = vshrl.u32 %v24867_v4, 16 }
 0x76a   : > { %11781 = vst.msk [vmem:[#allocation4 + $0x60] sm:$0xff] %vm354_vm1, %v11747_v56  ;;  %v11544_v44 = vadd.f32 %v24713_v62, %v11473_v51  ;;  %v11474_v5 = vmul.f32 %v20497_v12, %v24707_v60  ;;  %19899 = vmatprep.mubr.msk.bf16.mxu1 %vm354_vm1, %v11918_v54  ;;  %v11923_v18 = vshll.u32 %v24871_v21, 16  ;;  %v11927_v0 = vshrl.u32 %v24871_v21, 16 }
 0x76b   : > { %v11610_v7 = vmax.f32 %v11546_v43, 0.0  ;;  %v11933_v63 = vrot.slane %v11931_v8, 1 }
 0x76c   : > { %v11608_v1 = vmax.f32 %v11544_v44, 0.0  ;;  %v11545_v61 = vadd.f32 %v24713_v62, %v11474_v5  ;;  %v19847_v22 = vpop.f32.mrb[28].mxu0  ;;  %v11925_v33 = vrot.slane %v11923_v18, 1 }
 0x76d   : > { %v11699_v16 = vsel %vm11659_vm5, %v11610_v7, 0.0  ;;  %v20498_v14 = vadd.f32 %v19847_v22, %v26432_v41  ;;  %v11235_v48 = vpop.f32.mrb[29].mxu0  ;;  %v11937_v54 = vor.u32 %v11935_v50, %v11933_v63 }
 0x76e   : > { %v11750_v27 = vpack.c.bf16 %v22240_v39, %v11699_v16  ;;  %v11697_v59 = vsel %vm11653_vm6, %v11608_v1, 0.0  ;;  %v11609_v26 = vmax.f32 %v11545_v61, 0.0  ;;  %v20499_v23 = vadd.f32 %v11235_v48, %v26433_v13  ;;  %v19848_v40 = vpop.f32.mrb[30].mxu0 }
 0x76f   : > { %v11479_v42 = vmul.f32 %v20498_v14, %v24707_v60  ;;  %v11238_v55 = vpop.f32.mrb[31].mxu0  ;;  %v11926_v35 = vsel %vm1731_vm4, %v11921_v25, %v11925_v33  ;;  %v11929_v45 = vor.u32 %v11927_v0, %v11925_v33  ;;  %v24895_v10 = vld [vmem:[#allocation4 + $0x68] sm:$0xff]  ;;  %v26437_v25 = vld [vmem:[#allocation31_spill] sm:$0xff] }
 0x770   : > { %11784 = vst.msk [vmem:[#allocation4 + $0x78] sm:$0xff] %vm354_vm1, %v11750_v27  ;;  %v11749_v58 = vpack.c.bf16 %v11609_v26, %v11697_v59  ;;  %v11477_v37 = vmul.f32 %v20499_v23, %v24707_v60  ;;  %v20500_v6 = vadd.f32 %v11238_v55, %v26434_v46  ;;  %19900 = vmatmul.mubr.msk.bf16.gmra.mrb[80].mxu1 %vm354_vm1, %v11926_v35  ;;  %v11947_v36 = vshll.u32 %v24895_v10, 16 }
 0x771   : > { %v11550_v28 = vadd.f32 %v24713_v62, %v11479_v42  ;;  %v11934_v52 = vsel %vm1731_vm4, %v11929_v45, %v11933_v63  ;;  %v24899_v32 = vld [vmem:[#allocation4 + $0x60] sm:$0xff]  ;;  %v11951_v35 = vshrl.u32 %v24895_v10, 16 }
 0x772   : > { %11783 = vst.msk [vmem:[#allocation4 + $0x70] sm:$0xff] %vm354_vm1, %v11749_v58  ;;  %v11548_v19 = vadd.f32 %v24713_v62, %v11477_v37  ;;  %v11478_v9 = vmul.f32 %v20500_v6, %v24707_v60  ;;  %19903 = vmatprep.mubr.msk.bf16.mxu1 %vm354_vm1, %v11934_v52  ;;  %v11939_v30 = vshll.u32 %v24899_v32, 16  ;;  %v11943_v44 = vshrl.u32 %v24899_v32, 16 }
 0x773   : > { %v11614_v31 = vmax.f32 %v11550_v28, 0.0  ;;  %v11949_v41 = vrot.slane %v11947_v36, 1  ;;  %v26438_v28 = vld [vmem:[#allocation32_spill] sm:$0xff] }
 0x774   : > { %v11612_v47 = vmax.f32 %v11548_v19, 0.0  ;;  %v11549_v17 = vadd.f32 %v24713_v62, %v11478_v9  ;;  %v19851_v3 = vpop.f32.mrb[32].mxu0  ;;  %v11941_v56 = vrot.slane %v11939_v30, 1 }
 0x775   : > { %v11703_v51 = vsel %vm11659_vm5, %v11614_v31, 0.0  ;;  %v20501_v12 = vadd.f32 %v19851_v3, %v26435_v49  ;;  %v11251_v43 = vpop.f32.mrb[33].mxu0  ;;  %v11953_v9 = vor.u32 %v11951_v35, %v11949_v41 }
 0x776   : > { %v11752_v5 = vpack.c.bf16 %v22240_v39, %v11703_v51  ;;  %v11701_v18 = vsel %vm11653_vm6, %v11612_v47, 0.0  ;;  %v11613_v7 = vmax.f32 %v11549_v17, 0.0  ;;  %v20502_v8 = vadd.f32 %v11251_v43, %v26436_v38  ;;  %v19852_v1 = vpop.f32.mrb[34].mxu0  ;;  %v26439_v47 = vld [vmem:[#allocation33_spill] sm:$0xff] }
 0x777   : > { %v11483_v61 = vmul.f32 %v20501_v12, %v24707_v60  ;;  %v11254_v22 = vpop.f32.mrb[35].mxu0  ;;  %v11942_v33 = vsel %vm1731_vm4, %v11937_v54, %v11941_v56  ;;  %v11945_v16 = vor.u32 %v11943_v44, %v11941_v56  ;;  %v24923_v27 = vld [vmem:[#allocation4 + $0x78] sm:$0xff] }
 0x778   : > { %11786 = vst.msk [vmem:[#allocation4 + $0x88] sm:$0xff] %vm354_vm1, %v11752_v5  ;;  %v11751_v14 = vpack.c.bf16 %v11613_v7, %v11701_v18  ;;  %v11481_v48 = vmul.f32 %v20502_v8, %v24707_v60  ;;  %v20503_v0 = vadd.f32 %v11254_v22, %v26437_v25  ;;  %19904 = vmatmul.mubr.msk.bf16.gmra.mrb[84].mxu1 %vm354_vm1, %v11942_v33  ;;  %v11963_v45 = vshll.u32 %v24923_v27, 16  ;;  %v26440_v5 = vld [vmem:[#allocation34_spill] sm:$0xff] }
 0x779   : > { %v11554_v59 = vadd.f32 %v24713_v62, %v11483_v61  ;;  %v11950_v26 = vsel %vm1731_vm4, %v11945_v16, %v11949_v41  ;;  %v24927_v13 = vld [vmem:[#allocation4 + $0x70] sm:$0xff]  ;;  %v11967_v41 = vshrl.u32 %v24923_v27, 16 }
 0x77a   : > { %11785 = vst.msk [vmem:[#allocation4 + $0x80] sm:$0xff] %vm354_vm1, %v11751_v14  ;;  %v11552_v23 = vadd.f32 %v24713_v62, %v11481_v48  ;;  %v11482_v40 = vmul.f32 %v20503_v0, %v24707_v60  ;;  %19907 = vmatprep.mubr.msk.bf16.mxu1 %vm354_vm1, %v11950_v26  ;;  %v11955_v42 = vshll.u32 %v24927_v13, 16  ;;  %v11959_v30 = vshrl.u32 %v24927_v13, 16 }
 0x77b   : > { %v11618_v55 = vmax.f32 %v11554_v59, 0.0  ;;  %v11965_v43 = vrot.slane %v11963_v45, 1 }
 0x77c   : > { %v11616_v63 = vmax.f32 %v11552_v23, 0.0  ;;  %v11553_v58 = vadd.f32 %v24713_v62, %v11482_v40  ;;  %v19855_v37 = vpop.f32.mrb[36].mxu0  ;;  %v11957_v46 = vrot.slane %v11955_v42, 1  ;;  %v26441_v23 = vld [vmem:[#allocation35_spill] sm:$0xff] }
 0x77d   : > { %v11707_v6 = vsel %vm11659_vm5, %v11618_v55, 0.0  ;;  %v20504_v52 = vadd.f32 %v19855_v37, %v26438_v28  ;;  %v11267_v19 = vpop.f32.mrb[37].mxu0  ;;  %v11969_v55 = vor.u32 %v11967_v41, %v11965_v43  ;;  %v26442_v37 = vld [vmem:[#allocation36_spill] sm:$0xff] }
 0x77e   : > { %v11754_v31 = vpack.c.bf16 %v22240_v39, %v11707_v6  ;;  %v11705_v50 = vsel %vm11653_vm6, %v11616_v63, 0.0  ;;  %v11617_v36 = vmax.f32 %v11553_v58, 0.0  ;;  %v20505_v17 = vadd.f32 %v11267_v19, %v26439_v47  ;;  %v19856_v3 = vpop.f32.mrb[38].mxu0 }
 0x77f   : > { %v11487_v56 = vmul.f32 %v20504_v52, %v24707_v60  ;;  %v11270_v51 = vpop.f32.mrb[39].mxu0  ;;  %v11958_v49 = vsel %vm1731_vm4, %v11953_v9, %v11957_v46  ;;  %v11961_v12 = vor.u32 %v11959_v30, %v11957_v46  ;;  %v24951_v7 = vld [vmem:[#allocation4 + $0x88] sm:$0xff] }
 0x780   : > { %11788 = vst.msk [vmem:[#allocation4 + $0x98] sm:$0xff] %vm354_vm1, %v11754_v31  ;;  %v11753_v54 = vpack.c.bf16 %v11617_v36, %v11705_v50  ;;  %v11485_v44 = vmul.f32 %v20505_v17, %v24707_v60  ;;  %v20506_v18 = vadd.f32 %v11270_v51, %v26440_v5  ;;  %19908 = vmatmul.mubr.msk.bf16.gmra.mrb[88].mxu1 %vm354_vm1, %v11958_v49  ;;  %v11979_v14 = vshll.u32 %v24951_v7, 16  ;;  %v26443_v36 = vld [vmem:[#allocation37_spill] sm:$0xff] }
 0x781   : > { %v11558_v38 = vadd.f32 %v24713_v62, %v11487_v56  ;;  %v11966_v8 = vsel %vm1731_vm4, %v11961_v12, %v11965_v43  ;;  %v24955_v1 = vld [vmem:[#allocation4 + $0x80] sm:$0xff] }
 0x782   : > { %11787 = vst.msk [vmem:[#allocation4 + $0x90] sm:$0xff] %vm354_vm1, %v11753_v54  ;;  %v11556_v61 = vadd.f32 %v24713_v62, %v11485_v44  ;;  %v11486_v22 = vmul.f32 %v20506_v18, %v24707_v60  ;;  %19911 = vmatprep.mubr.msk.bf16.mxu1 %vm354_vm1, %v11966_v8  ;;  %v11971_v33 = vshll.u32 %v24955_v1, 16  ;;  %v11975_v35 = vshrl.u32 %v24955_v1, 16 }
 0x783   : > { %v11622_v16 = vmax.f32 %v11558_v38, 0.0  ;;  %v11981_v30 = vrot.slane %v11979_v14, 1  ;;  %v11983_v44 = vshrl.u32 %v24951_v7, 16 }
 0x784   : > { %v11620_v48 = vmax.f32 %v11556_v61, 0.0  ;;  %v11557_v25 = vadd.f32 %v24713_v62, %v11486_v22  ;;  %v19859_v0 = vpop.f32.mrb[40].mxu0  ;;  %v11973_v59 = vrot.slane %v11971_v33, 1  ;;  %v26444_v33 = vld [vmem:[#allocation38_spill] sm:$0xff] }
 0x785   : > { %v11711_v26 = vsel %vm11659_vm5, %v11622_v16, 0.0  ;;  %v20507_v40 = vadd.f32 %v19859_v0, %v26441_v23  ;;  %v11283_v42 = vpop.f32.mrb[41].mxu0  ;;  %v11985_v14 = vor.u32 %v11983_v44, %v11981_v30  ;;  %v26447_v44 = vld [vmem:[#allocation41_spill] sm:$0xff] }
 0x786   : > { %v11756_v45 = vpack.c.bf16 %v22240_v39, %v11711_v26  ;;  %v11709_v63 = vsel %vm11653_vm6, %v11620_v48, 0.0  ;;  %v11621_v58 = vmax.f32 %v11557_v25, 0.0  ;;  %v20508_v46 = vadd.f32 %v11283_v42, %v26442_v37  ;;  %v19860_v6 = vpop.f32.mrb[42].mxu0  ;;  %v26445_v26 = vld [vmem:[#allocation39_spill] sm:$0xff] }
 0x787   : > { %v11491_v28 = vmul.f32 %v20507_v40, %v24707_v60  ;;  %v11286_v52 = vpop.f32.mrb[43].mxu0  ;;  %v11974_v19 = vsel %vm1731_vm4, %v11969_v55, %v11973_v59  ;;  %v11977_v9 = vor.u32 %v11975_v35, %v11973_v59  ;;  %v24979_v17 = vld [vmem:[#allocation4 + $0x98] sm:$0xff] }
 0x788   : > { %11790 = vst.msk [vmem:[#allocation4 + $0xa8] sm:$0xff] %vm354_vm1, %v11756_v45  ;;  %v11755_v31 = vpack.c.bf16 %v11621_v58, %v11709_v63  ;;  %v11489_v50 = vmul.f32 %v20508_v46, %v24707_v60  ;;  %v20509_v47 = vadd.f32 %v11286_v52, %v26443_v36  ;;  %19912 = vmatmul.mubr.msk.bf16.gmra.mrb[92].mxu1 %vm354_vm1, %v11974_v19  ;;  %v11995_v5 = vshll.u32 %v24979_v17, 16  ;;  %v26446_v46 = vld [vmem:[#allocation40_spill] sm:$0xff] }
 0x789   : > { %v11562_v3 = vadd.f32 %v24713_v62, %v11491_v28  ;;  %v11982_v56 = vsel %vm1731_vm4, %v11977_v9, %v11981_v30  ;;  %v24983_v51 = vld [vmem:[#allocation4 + $0x90] sm:$0xff] }
 0x78a   : > { %11789 = vst.msk [vmem:[#allocation4 + $0xa0] sm:$0xff] %vm354_vm1, %v11755_v31  ;;  %v11560_v49 = vadd.f32 %v24713_v62, %v11489_v50  ;;  %v11490_v12 = vmul.f32 %v20509_v47, %v24707_v60  ;;  %19915 = vmatprep.mubr.msk.bf16.mxu1 %vm354_vm1, %v11982_v56  ;;  %v11987_v43 = vshll.u32 %v24983_v51, 16  ;;  %v11991_v48 = vshrl.u32 %v24983_v51, 16 }
 0x78b   : > { %v11626_v54 = vmax.f32 %v11562_v3, 0.0  ;;  %v11997_v63 = vrot.slane %v11995_v5, 1  ;;  %v11999_v47 = vshrl.u32 %v24979_v17, 16 }
 0x78c   : > { %v11624_v18 = vmax.f32 %v11560_v49, 0.0  ;;  %v11561_v38 = vadd.f32 %v24713_v62, %v11490_v12  ;;  %v19863_v8 = vpop.f32.mrb[44].mxu0  ;;  %v24993_v61 = vrot.slane %v11987_v43, 1 }
 0x78d   : > { %v11715_v22 = vsel %vm11659_vm5, %v11626_v54, 0.0  ;;  %v20510_v16 = vadd.f32 %v19863_v8, %v26444_v33  ;;  %v11299_v41 = vpop.f32.mrb[45].mxu0 }
 0x78e   : > { %v11758_v25 = vpack.c.bf16 %v22240_v39, %v11715_v22  ;;  %v11713_v0 = vsel %vm11653_vm6, %v11624_v18, 0.0  ;;  %v11625_v59 = vmax.f32 %v11561_v38, 0.0  ;;  %v20511_v23 = vadd.f32 %v11299_v41, %v26445_v26  ;;  %v19864_v40 = vpop.f32.mrb[46].mxu0  ;;  %v26448_v41 = vld [vmem:[#allocation42_spill] sm:$0xff] }
 0x78f   : > { %v11495_v42 = vmul.f32 %v20510_v16, %v24707_v60  ;;  %v11302_v55 = vpop.f32.mrb[47].mxu0  ;;  %v11990_v35 = vsel %vm1731_vm4, %v11985_v14, %v24993_v61  ;;  %v11993_v45 = vor.u32 %v11991_v48, %v24993_v61  ;;  %v25011_v28 = vld [vmem:[#allocation4 + $0xa8] sm:$0xff]  ;;  %v12001_v38 = vor.u32 %v11999_v47, %v11997_v63 }
 0x790   : > { %11792 = vst.msk [vmem:[#allocation4 + $0xb8] sm:$0xff] %vm354_vm1, %v11758_v25  ;;  %v11757_v58 = vpack.c.bf16 %v11625_v59, %v11713_v0  ;;  %v11493_v37 = vmul.f32 %v20511_v23, %v24707_v60  ;;  %v20512_v6 = vadd.f32 %v11302_v55, %v26446_v46  ;;  %19916 = vmatmul.mubr.msk.bf16.gmra.mrb[96].mxu1 %vm354_vm1, %v11990_v35  ;;  %v12011_v3 = vshll.u32 %v25011_v28, 16  ;;  %v26449_v55 = vld [vmem:[#allocation43_spill] sm:$0xff] }
 0x791   : > { %v11566_v52 = vadd.f32 %v24713_v62, %v11495_v42  ;;  %v25015_v19 = vsel %vm1731_vm4, %v11993_v45, %v11997_v63  ;;  %v25017_v9 = vld [vmem:[#allocation4 + $0xa0] sm:$0xff] }
 0x792   : > { %11791 = vst.msk [vmem:[#allocation4 + $0xb0] sm:$0xff] %vm354_vm1, %v11757_v58  ;;  %v11564_v30 = vadd.f32 %v24713_v62, %v11493_v37  ;;  %v11494_v31 = vmul.f32 %v20512_v6, %v24707_v60  ;;  %19919 = vmatprep.mubr.msk.bf16.mxu1 %vm354_vm1, %v25015_v19  ;;  %v12003_v50 = vshll.u32 %v25017_v9, 16  ;;  %v12007_v8 = vshrl.u32 %v25017_v9, 16 }
 0x793   : > { %v11630_v36 = vmax.f32 %v11566_v52, 0.0  ;;  %v12013_v23 = vrot.slane %v12011_v3, 1 }
 0x794   : > { %v11628_v56 = vmax.f32 %v11564_v30, 0.0  ;;  %v11565_v49 = vadd.f32 %v24713_v62, %v11494_v31  ;;  %v19867_v12 = vpop.f32.mrb[48].mxu0  ;;  %v12005_v43 = vrot.slane %v12003_v50, 1  ;;  %v12015_v31 = vshrl.u32 %v25011_v28, 16 }
 0x795   : > { %v11719_v54 = vsel %vm11659_vm5, %v11630_v36, 0.0  ;;  %v20513_v5 = vadd.f32 %v19867_v12, %v26447_v44  ;;  %v11315_v18 = vpop.f32.mrb[49].mxu0  ;;  %v26450_v12 = vld [vmem:[#allocation44_spill] sm:$0xff] }
 0x796   : > { %v11760_v22 = vpack.c.bf16 %v22240_v39, %v11719_v54  ;;  %v11717_v33 = vsel %vm11653_vm6, %v11628_v56, 0.0  ;;  %v11629_v16 = vmax.f32 %v11565_v49, 0.0  ;;  %v20514_v14 = vadd.f32 %v11315_v18, %v26448_v41  ;;  %v19868_v48 = vpop.f32.mrb[50].mxu0 }
 0x797   : > { %v11499_v25 = vmul.f32 %v20513_v5, %v24707_v60  ;;  %v11318_v0 = vpop.f32.mrb[51].mxu0  ;;  %v25038_v59 = vsel %vm1731_vm4, %v12001_v38, %v12005_v43  ;;  %v12009_v26 = vor.u32 %v12007_v8, %v12005_v43  ;;  %v25045_v45 = vld [vmem:[#allocation4 + $0xb8] sm:$0xff]  ;;  %v12017_v44 = vor.u32 %v12015_v31, %v12013_v23 }
 0x798   : > { %11794 = vst.msk [vmem:[#allocation4 + $0xc8] sm:$0xff] %vm354_vm1, %v11760_v22  ;;  %v11759_v40 = vpack.c.bf16 %v11629_v16, %v11717_v33  ;;  %v11497_v42 = vmul.f32 %v20514_v14, %v24707_v60  ;;  %v20515_v35 = vadd.f32 %v11318_v0, %v26449_v55  ;;  %19920 = vmatmul.mubr.msk.bf16.gmra.mrb[100].mxu1 %vm354_vm1, %v25038_v59  ;;  %v12027_v50 = vshll.u32 %v25045_v45, 16  ;;  %v26451_v22 = vld [vmem:[#allocation45_spill] sm:$0xff] }
 0x799   : > { %v11570_v63 = vadd.f32 %v24713_v62, %v11499_v25  ;;  %v25049_v58 = vsel %vm1731_vm4, %v12009_v26, %v12013_v23  ;;  %v25051_v37 = vld [vmem:[#allocation4 + $0xb0] sm:$0xff] }
 0x79a   : > { %11793 = vst.msk [vmem:[#allocation4 + $0xc0] sm:$0xff] %vm354_vm1, %v11759_v40  ;;  %v11568_v46 = vadd.f32 %v24713_v62, %v11497_v42  ;;  %v11498_v6 = vmul.f32 %v20515_v35, %v24707_v60  ;;  %19923 = vmatprep.mubr.msk.bf16.mxu1 %vm354_vm1, %v25049_v58  ;;  %v12019_v52 = vshll.u32 %v25051_v37, 16  ;;  %v12023_v5 = vshrl.u32 %v25051_v37, 16  ;;  %v26452_v40 = vld [vmem:[#allocation46_spill] sm:$0xff] }
 0x79b   : > { %v11634_v30 = vmax.f32 %v11570_v63, 0.0  ;;  %v12029_v0 = vrot.slane %v12027_v50, 1  ;;  %v12031_v50 = vshrl.u32 %v25045_v45, 16 }
 0x79c   : > { %v11632_v36 = vmax.f32 %v11568_v46, 0.0  ;;  %v11569_v47 = vadd.f32 %v24713_v62, %v11498_v6  ;;  %v19871_v3 = vpop.f32.mrb[52].mxu0  ;;  %v12021_v56 = vrot.slane %v12019_v52, 1 }
 0x79d   : > { %v11723_v49 = vsel %vm11659_vm5, %v11634_v30, 0.0  ;;  %v20516_v43 = vadd.f32 %v19871_v3, %v26450_v12  ;;  %v11331_v54 = vpop.f32.mrb[53].mxu0 }
 0x79e   : > { %v11762_v18 = vpack.c.bf16 %v22240_v39, %v11723_v49  ;;  %v11721_v38 = vsel %vm11653_vm6, %v11632_v36, 0.0  ;;  %v11633_v8 = vmax.f32 %v11569_v47, 0.0  ;;  %v20517_v33 = vadd.f32 %v11331_v54, %v26451_v22  ;;  %v19872_v16 = vpop.f32.mrb[54].mxu0 }
 0x79f   : > { %v11503_v41 = vmul.f32 %v20516_v43, %v24707_v60  ;;  %v11334_v14 = vpop.f32.mrb[55].mxu0  ;;  %v25072_v48 = vsel %vm1731_vm4, %v12017_v44, %v12021_v56  ;;  %v12025_v25 = vor.u32 %v12023_v5, %v12021_v56  ;;  %v25079_v55 = vld [vmem:[#allocation4 + $0xc8] sm:$0xff]  ;;  %v26453_v43 = vld [vmem:[#allocation47_spill] sm:$0xff]  ;;  %v12033_v5 = vor.u32 %v12031_v50, %v12029_v0 }
 0x7a0   : > { %11796 = vst.msk [vmem:[#allocation4 + $0xd8] sm:$0xff] %vm354_vm1, %v11762_v18  ;;  %v11761_v26 = vpack.c.bf16 %v11633_v8, %v11721_v38  ;;  %v11501_v23 = vmul.f32 %v20517_v33, %v24707_v60  ;;  %v20518_v42 = vadd.f32 %v11334_v14, %v26452_v40  ;;  %19924 = vmatmul.mubr.msk.bf16.gmra.mrb[104].mxu1 %vm354_vm1, %v25072_v48  ;;  %v12043_v36 = vshll.u32 %v25079_v55, 16  ;;  %v26454_v33 = vld [vmem:[#allocation48_spill] sm:$0xff] }
 0x7a1   : > { %v11574_v35 = vadd.f32 %v24713_v62, %v11503_v41  ;;  %v25083_v63 = vsel %vm1731_vm4, %v12025_v25, %v12029_v0  ;;  %v25085_v46 = vld [vmem:[#allocation4 + $0xc0] sm:$0xff] }
 0x7a2   : > { %11795 = vst.msk [vmem:[#allocation4 + $0xd0] sm:$0xff] %vm354_vm1, %v11761_v26  ;;  %v11572_v6 = vadd.f32 %v24713_v62, %v11501_v23  ;;  %v11502_v52 = vmul.f32 %v20518_v42, %v24707_v60  ;;  %19927 = vmatprep.mubr.msk.bf16.mxu1 %vm354_vm1, %v25083_v63  ;;  %v12035_v30 = vshll.u32 %v25085_v46, 16  ;;  %v12039_v18 = vshrl.u32 %v25085_v46, 16 }
 0x7a3   : > { %v11638_v31 = vmax.f32 %v11574_v35, 0.0  ;;  %v12045_v40 = vrot.slane %v12043_v36, 1  ;;  %v26455_v35 = vld [vmem:[#allocation49_spill] sm:$0xff] }
 0x7a4   : > { %v11636_v47 = vmax.f32 %v11572_v6, 0.0  ;;  %v11573_v3 = vadd.f32 %v24713_v62, %v11502_v52  ;;  %v19875_v56 = vpop.f32.mrb[56].mxu0  ;;  %v12037_v49 = vrot.slane %v12035_v30, 1 }
 0x7a5   : > { %v11727_v12 = vsel %vm11659_vm5, %v11638_v31, 0.0  ;;  %v20519_v54 = vadd.f32 %v19875_v56, %v26453_v43  ;;  %v11347_v44 = vpop.f32.mrb[57].mxu0 }
 0x7a6   : > { %v11764_v38 = vpack.c.bf16 %v22240_v39, %v11727_v12  ;;  %v11725_v8 = vsel %vm11653_vm6, %v11636_v47, 0.0  ;;  %v11637_v22 = vmax.f32 %v11573_v3, 0.0  ;;  %v20520_v16 = vadd.f32 %v11347_v44, %v26454_v33  ;;  %v19876_v41 = vpop.f32.mrb[58].mxu0 }
 0x7a7   : > { %v11507_v14 = vmul.f32 %v20519_v54, %v24707_v60  ;;  %v11350_v25 = vpop.f32.mrb[59].mxu0  ;;  %v25106_v26 = vsel %vm1731_vm4, %v12033_v5, %v12037_v49  ;;  %v12041_v23 = vor.u32 %v12039_v18, %v12037_v49  ;;  %v25113_v52 = vld [vmem:[#allocation4 + $0xd8] sm:$0xff]  ;;  %v12047_v49 = vshrl.u32 %v25079_v55, 16 }
 0x7a8   : > { %11798 = vst.msk [vmem:[#allocation4 + $0xe8] sm:$0xff] %vm354_vm1, %v11764_v38  ;;  %v11763_v0 = vpack.c.bf16 %v11637_v22, %v11725_v8  ;;  %v11505_v42 = vmul.f32 %v20520_v16, %v24707_v60  ;;  %v20521_v6 = vadd.f32 %v11350_v25, %v26455_v35  ;;  %19928 = vmatmul.mubr.msk.bf16.gmra.mrb[108].mxu1 %vm354_vm1, %v25106_v26  ;;  %v12059_v12 = vshll.u32 %v25113_v52, 16  ;;  %v26456_v38 = vld [vmem:[#allocation50_spill] sm:$0xff]  ;;  %v26457_v25 = vld [vmem:[#allocation51_spill] sm:$0xff] }
 0x7a9   : > { %v11578_v30 = vadd.f32 %v24713_v62, %v11507_v14  ;;  %v25117_v31 = vsel %vm1731_vm4, %v12041_v23, %v12045_v40  ;;  %v25119_v50 = vld [vmem:[#allocation4 + $0xd0] sm:$0xff]  ;;  %v12049_v22 = vor.u32 %v12047_v49, %v12045_v40 }
 0x7aa   : > { %11797 = vst.msk [vmem:[#allocation4 + $0xe0] sm:$0xff] %vm354_vm1, %v11763_v0  ;;  %v11576_v36 = vadd.f32 %v24713_v62, %v11505_v42  ;;  %v11506_v47 = vmul.f32 %v20521_v6, %v24707_v60  ;;  %19931 = vmatprep.mubr.msk.bf16.mxu1 %vm354_vm1, %v25117_v31  ;;  %v12051_v3 = vshll.u32 %v25119_v50, 16  ;;  %v12055_v33 = vshrl.u32 %v25119_v50, 16  ;;  %v22219_v0 = vld [vmem:[%s26266_s4] ss:$0 sm:$0xff] }
 0x7ab   : > { %v11642_v56 = vmax.f32 %v11578_v30, 0.0  ;;  %v12061_v30 = vrot.slane %v12059_v12, 1 }
 0x7ac   : > { %v11640_v43 = vmax.f32 %v11576_v36, 0.0  ;;  %v11577_v54 = vadd.f32 %v24713_v62, %v11506_v47  ;;  %v19879_v44 = vpop.f32.mrb[60].mxu0  ;;  %v12053_v5 = vrot.slane %v12051_v3, 1  ;;  %v26458_v3 = vld [vmem:[#allocation52_spill] sm:$0xff] }
 0x7ad   : > { %v11731_v18 = vsel %vm11659_vm5, %v11642_v56, 0.0  ;;  %v20522_v60 = vadd.f32 %v19879_v44, %v26456_v38  ;;  %v11363_v8 = vpop.f32.mrb[61].mxu0  ;;  %v12063_v38 = vshrl.u32 %v25113_v52, 16 }
 0x7ae   : > { %v11766_v16 = vpack.c.bf16 %v22240_v39, %v11731_v18  ;;  %v11729_v41 = vsel %vm11653_vm6, %v11640_v43, 0.0  ;;  %v11641_v14 = vmax.f32 %v11577_v54, 0.0  ;;  %v20523_v23 = vadd.f32 %v11363_v8, %v26457_v25  ;;  %v19880_v62 = vpop.f32.mrb[62].mxu0  ;;  %v22220_v43 = vld [vmem:[%s26267_s5] ss:$0 sm:$0xff] }
 0x7af   : > { %v11511_v42 = vmul.f32 %v22219_v0, %v20522_v60  ;;  %v11366_v35 = vpop.f32.mrb[63].mxu0  ;;  %v25142_v6 = vsel %vm1731_vm4, %v12049_v22, %v12053_v5  ;;  %v12057_v40 = vor.u32 %v12055_v33, %v12053_v5  ;;  %v25148_v49 = vld [vmem:[#allocation4 + $0xe8] sm:$0xff] }
 0x7b0   : > { %11800 = vst.msk [vmem:[#allocation4 + $0xf8] sm:$0xff] %vm354_vm1, %v11766_v16  ;;  %v11765_v36 = vpack.c.bf16 %v11641_v14, %v11729_v41  ;;  %v11509_v47 = vmul.f32 %v22219_v0, %v20523_v23  ;;  %v20524_v56 = vadd.f32 %v11366_v35, %v26458_v3  ;;  %19932 = vmatmul.mubr.msk.bf16.gmra.mrb[112].mxu1 %vm354_vm1, %v25142_v6  ;;  %v12075_v22 = vshll.u32 %v25148_v49, 16 }
 0x7b1   : > { %v11582_v54 = vadd.f32 %v22220_v43, %v11511_v42  ;;  %v25154_v44 = vsel %vm1731_vm4, %v12057_v40, %v12061_v30  ;;  %v25156_v12 = vld [vmem:[#allocation4 + $0xe0] sm:$0xff]  ;;  %v12065_v41 = vor.u32 %v12063_v38, %v12061_v30  ;;  %v12079_v53 = vshrl.u32 %v25148_v49, 16 }
 0x7b2   : > { %11799 = vst.msk [vmem:[#allocation4 + $0xf0] sm:$0xff] %vm354_vm1, %v11765_v36  ;;  %v11580_v5 = vadd.f32 %v22220_v43, %v11509_v47  ;;  %v11510_v18 = vmul.f32 %v22219_v0, %v20524_v56  ;;  %19935 = vmatprep.mubr.msk.bf16.mxu1 %vm354_vm1, %v25154_v44  ;;  %v12067_v60 = vshll.u32 %v25156_v12, 16  ;;  %v12071_v23 = vshrl.u32 %v25156_v12, 16 }
 0x7b3   : > { %v11646_v8 = vmax.f32 %v11582_v54, 0.0  ;;  %v12077_v36 = vrot.slane %v12075_v22, 1 }
 0x7b4   : > { %v11644_v33 = vmax.f32 %v11580_v5, 0.0  ;;  %v11581_v16 = vadd.f32 %v22220_v43, %v11510_v18  ;;  %v12069_v14 = vrot.slane %v12067_v60, 1 }
 0x7b5   : > { %v11735_v25 = vsel %vm11659_vm5, %v11646_v8, 0.0  ;;  %v12081_v43 = vor.u32 %v12079_v53, %v12077_v36 }
 0x7b6   : > { %v11768_v62 = vpack.c.bf16 %v22240_v39, %v11735_v25  ;;  %v11733_v0 = vsel %vm11653_vm6, %v11644_v33, 0.0  ;;  %v11645_v42 = vmax.f32 %v11581_v16, 0.0  ;;  %v25171_v35 = vsel %vm1731_vm4, %v12065_v41, %v12069_v14 }
 0x7b7   : > { %v12073_v40 = vor.u32 %v12071_v23, %v12069_v14  ;;  %v25173_v47 = vld [vmem:[#allocation4 + $0xf8] sm:$0xff]  ;;  %v22221_v23 = vld [vmem:[#allocation4] sm:$0xff] }
 0x7b8   : > { %11802 = vst.msk [vmem:[#allocation4 + $0x108] sm:$0xff] %vm354_vm1, %v11768_v62  ;;  %v11767_v30 = vpack.c.bf16 %v11645_v42, %v11733_v0  ;;  %19936 = vmatmul.mubr.msk.bf16.gmra.mrb[116].mxu1 %vm354_vm1, %v25171_v35  ;;  %v12091_v56 = vshll.u32 %v25173_v47, 16  ;;  %v12095_v33 = vshrl.u32 %v25173_v47, 16  ;;  %v12981_v62 = vsel %vm1015_vm0, %v24776_v11, 0  ;;  %v17533_v0 = vld [vmem:[%s26268_s6 + $0x6] sm:$0x3] }
 0x7b9   : > { %v25179_v24 = vsel %vm1731_vm4, %v12073_v40, %v12077_v36  ;;  %v25181_v39 = vld [vmem:[#allocation4 + $0xf0] sm:$0xff]  ;;  %v22222_v42 = vld [vmem:[#allocation4 + $0x8] sm:$0xff]  ;;  %v22224_v36 = vld [vmem:[#allocation4 + $0x18] sm:$0xff] }
 0x7ba   : > { %11801 = vst.msk [vmem:[#allocation4 + $0x100] sm:$0xff] %vm354_vm1, %v11767_v30  ;;  %19939 = vmatprep.mubr.msk.bf16.mxu1 %vm354_vm1, %v25179_v24  ;;  %v12083_v3 = vshll.u32 %v25181_v39, 16  ;;  %v12087_v5 = vshrl.u32 %v25181_v39, 16  ;;  %v12093_v60 = vrot.slane %v12091_v56, 1  ;;  %v22223_v40 = vld [vmem:[#allocation4 + $0x10] sm:$0xff] }
 0x7bc   : > { %v12085_v54 = vrot.slane %v12083_v3, 1  ;;  %v25204_v41 = vor.u32 %v12095_v33, %v12093_v60  ;;  %v12783_v3 = vld [vmem:[#allocation4] sm:$0xfe] }
 0x7bd   : > { %v12819_v56 = vrot.slane %v12783_v3, 1  ;;  %v12832_v3 = vrot.slane %v24811_v57, 1 }
 0x7be   : > { %v25191_v18 = vsel %vm1731_vm4, %v12081_v43, %v12085_v54  ;;  %v12089_v38 = vor.u32 %v12087_v5, %v12085_v54  ;;  %v12820_v43 = vrot.slane %v22222_v42, 1  ;;  %v12822_v5 = vrot.slane %v22223_v40, 1 }
 0x7bf   : > { %v25233_v30 = vld [vmem:[#allocation4 + $0x108] sm:$0xff] }
 0x7c0   : > { %19940 = vmatmul.mubr.msk.bf16.gmra.mrb[120].mxu1 %vm354_vm1, %v25191_v18  ;;  %v25196_v8 = vsel %vm1731_vm4, %v12089_v38, %v12093_v60  ;;  %26460 = vst [vmem:[#allocation54_spill] sm:$0xff] %v25233_v30  ;;  %v12821_v54 = vsel %vm3227_vm2, %v12819_v56, %v12820_v43  ;;  %v13403_v38 = vsel %vm1015_vm0, %v17533_v0, 0  ;;  %v12824_v60 = vrot.slane %v22224_v36, 1 }
 0x7c1   : > { %19943 = vmatprep.mubr.msk.bf16.mxu1 %vm354_vm1, %v25196_v8  ;;  %v25200_v22 = vld [vmem:[#allocation4 + $0x100] sm:$0x1]  ;;  %v12823_v33 = vsel %vm3227_vm2, %v12820_v43, %v12822_v5 }
 0x7c2   : > { %v12099_v16 = vshll.u32 %v25200_v22, 16  ;;  %v25231_v11 = vld [vmem:[#allocation4 + $0x100] sm:$0xff] }
 0x7c3   : > { %26459 = vst [vmem:[#allocation53_spill] sm:$0xff] %v25231_v11 }
 0x7c4   : > { %v12101_v14 = vrot.slane %v12099_v16, 1  ;;  %v25295_v16 = vld [vmem:[%s26268_s6 + $0x8] sm:$0x3] }
 0x7c6   : > { %v12102_v25 = vsel %vm1731_vm4, %v25204_v41, %v12101_v14  ;;  %v12825_v14 = vsel %vm3227_vm2, %v12822_v5, %v12824_v60  ;;  %v12836_v5 = vrot.slane %v24839_v2, 1 }
 0x7c8   : > { %19944 = vmatmul.mubr.msk.bf16.gmra.mrb[124].mxu1 %vm354_vm1, %v12102_v25  ;;  %v22225_v25 = vld [vmem:[#allocation4 + $0x20] sm:$0xff] }
 0x7c9   : > { %19949 = vmatprep.mubr.msk.bf16.mxu1 %vm354_vm1, %v22221_v23  ;;  %v12826_v23 = vrot.slane %v22225_v25, 1 }
 0x7d0   : > { %19950 = vmatmul.mubr.msk.bf16.vlgmr.msra.gmra.mrb[64].mxu1 %vm354_vm1, %v22222_v42  ;;  %v12827_v42 = vsel %vm3227_vm2, %v12824_v60, %v12826_v23  ;;  %v12840_v60 = vrot.slane %v24867_v4, 1 }
 0x7d1   : > { %20014 = vmatpush3.bf16.msra.mxu1 %v12981_v62  ;;  %19953 = vmatprep.mubr.msk.bf16.mxu1 %vm354_vm1, %v22223_v40  ;;  %v22226_v62 = vld [vmem:[#allocation4 + $0x28] sm:$0xff] }
 0x7d2   : > { %22083 = vmatprep.subr.msk.bf16.mxu1 %vm1015_vm0, %v17533_v0  ;;  %v12828_v0 = vrot.slane %v22226_v62, 1 }
 0x7d4   : > { %v12829_v40 = vsel %vm3227_vm2, %v12826_v23, %v12828_v0  ;;  %v12848_v23 = vrot.slane %v24923_v27, 1 }
 0x7d8   : > { %19954 = vmatmul.mubr.msk.bf16.gmra.mrb[68].mxu1 %vm354_vm1, %v22224_v36  ;;  %v12830_v36 = vrot.slane %v24815_v15, 1 }
 0x7d9   : > { %19957 = vmatprep.mubr.msk.bf16.mxu1 %vm354_vm1, %v24786_v29  ;;  %v26299_v29 = vrot.slane %v25233_v30, 1 }
 0x7da   : > { %v12831_v56 = vsel %vm3227_vm2, %v12828_v0, %v12830_v36  ;;  %v12833_v43 = vsel %vm3227_vm2, %v12830_v36, %v12832_v3 }
 0x7e0   : > { %19958 = vmatmul.mubr.msk.bf16.gmra.mrb[72].mxu1 %vm354_vm1, %v24782_v20  ;;  %v26300_v20 = vrot.slane %v25231_v11, 1 }
 0x7e1   : > { %19961 = vmatprep.mubr.msk.bf16.mxu1 %vm354_vm1, %v24815_v15 }
 0x7e2   : > { %v25244_v53 = vsel %vm3227_vm2, %v26300_v20, %v26299_v29  ;;  %v22227_v29 = vld [vmem:[#allocation4 + $0x50] sm:$0xff]  ;;  %v22228_v20 = vld [vmem:[#allocation4 + $0x58] sm:$0xff] }
 0x7e3   : > { %26461 = vst [vmem:[#allocation55_spill] sm:$0xff] %v25244_v53 }
 0x7e8   : > { %19962 = vmatmul.mubr.msk.bf16.gmra.mrb[76].mxu1 %vm354_vm1, %v24811_v57  ;;  %v12838_v57 = vrot.slane %v24871_v21, 1 }
 0x7e9   : > { %19965 = vmatprep.mubr.msk.bf16.mxu1 %vm354_vm1, %v24843_v34 }
 0x7f0   : > { %19966 = vmatmul.mubr.msk.bf16.gmra.mrb[80].mxu1 %vm354_vm1, %v24839_v2  ;;  %v12842_v2 = vrot.slane %v24899_v32, 1 }
 0x7f1   : > { %19969 = vmatprep.mubr.msk.bf16.mxu1 %vm354_vm1, %v24871_v21 }
 0x7f2   : > { %v12843_v25 = vsel %vm3227_vm2, %v12840_v60, %v12842_v2 }
 0x7f8   : > { %19970 = vmatmul.mubr.msk.bf16.gmra.mrb[84].mxu1 %vm354_vm1, %v24867_v4  ;;  %v12846_v4 = vrot.slane %v24927_v13, 1 }
 0x7f9   : > { %19973 = vmatprep.mubr.msk.bf16.mxu1 %vm354_vm1, %v24899_v32 }
 0x7fa   : > { %v12849_v0 = vsel %vm3227_vm2, %v12846_v4, %v12848_v23 }
 0x800   : > { %19974 = vmatmul.mubr.msk.bf16.gmra.mrb[88].mxu1 %vm354_vm1, %v24895_v10 }
 0x801   : > { %19977 = vmatprep.mubr.msk.bf16.mxu1 %vm354_vm1, %v24927_v13 }
 0x808   : > { %19978 = vmatmul.mubr.msk.bf16.gmra.mrb[92].mxu1 %vm354_vm1, %v24923_v27 }
 0x809   : > { %19981 = vmatprep.mubr.msk.bf16.mxu1 %vm354_vm1, %v24955_v1 }
 0x810   : > { %19982 = vmatmul.mubr.msk.bf16.gmra.mrb[96].mxu1 %vm354_vm1, %v24951_v7 }
 0x811   : > { %19985 = vmatprep.mubr.msk.bf16.mxu1 %vm354_vm1, %v24983_v51 }
 0x818   : > { %19986 = vmatmul.mubr.msk.bf16.gmra.mrb[100].mxu1 %vm354_vm1, %v24979_v17 }
 0x819   : > { %19989 = vmatprep.mubr.msk.bf16.mxu1 %vm354_vm1, %v25017_v9 }
 0x820   : > { %19990 = vmatmul.mubr.msk.bf16.gmra.mrb[104].mxu1 %vm354_vm1, %v25011_v28 }
 0x821   : > { %19993 = vmatprep.mubr.msk.bf16.mxu1 %vm354_vm1, %v25051_v37 }
 0x828   : > { %19994 = vmatmul.mubr.msk.bf16.gmra.mrb[108].mxu1 %vm354_vm1, %v25045_v45 }
 0x829   : > { %19997 = vmatprep.mubr.msk.bf16.mxu1 %vm354_vm1, %v25085_v46 }
 0x830   : > { %19998 = vmatmul.mubr.msk.bf16.gmra.mrb[112].mxu1 %vm354_vm1, %v25079_v55 }
 0x831   : > { %20001 = vmatprep.mubr.msk.bf16.mxu1 %vm354_vm1, %v25119_v50 }
 0x838   : > { %20002 = vmatmul.mubr.msk.bf16.gmra.mrb[116].mxu1 %vm354_vm1, %v25113_v52 }
 0x839   : > { %20005 = vmatprep.mubr.msk.bf16.mxu1 %vm354_vm1, %v25156_v12 }
 0x840   : > { %20006 = vmatmul.mubr.msk.bf16.gmra.mrb[120].mxu1 %vm354_vm1, %v25148_v49 }
 0x841   : > { %20009 = vmatprep.mubr.msk.bf16.mxu1 %vm354_vm1, %v25181_v39 }
 0x848   : > { %20010 = vmatmul.mubr.msk.bf16.gmra.mrb[124].mxu1 %vm354_vm1, %v25173_v47 }
 0x849   : > { %20015 = vmatprep.mubr.msk.bf16.mxu1 %vm354_vm1, %v12821_v54  ;;  %v12834_v54 = vrot.slane %v24843_v34, 1  ;;  %v12841_v34 = vsel %vm3227_vm2, %v12838_v57, %v12840_v60 }
 0x84b   : > { %v12837_v15 = vsel %vm3227_vm2, %v12834_v54, %v12836_v5 }
 0x850   : > { %20016 = vmatmul.mubr.msk.bf16.vlgmr.msra.gmra.mrb[64].mxu1 %vm354_vm1, %v12823_v33  ;;  %v12839_v33 = vsel %vm3227_vm2, %v12836_v5, %v12838_v57 }
 0x851   : > { %20080 = vmatpush3.bf16.msra.mxu1 %v13403_v38  ;;  %20019 = vmatprep.mubr.msk.bf16.mxu1 %vm354_vm1, %v12825_v14  ;;  %v12835_v38 = vsel %vm3227_vm2, %v12832_v3, %v12834_v54  ;;  %v12844_v14 = vrot.slane %v24895_v10, 1 }
 0x852   : > { %22084 = vmatprep.subr.msk.bf16.mxu1 %vm1015_vm0, %v25295_v16 }
 0x853   : > { %v12845_v21 = vsel %vm3227_vm2, %v12842_v2, %v12844_v14  ;;  %v12847_v62 = vsel %vm3227_vm2, %v12844_v14, %v12846_v4 }
 0x858   : > { %20020 = vmatmul.mubr.msk.bf16.gmra.mrb[68].mxu1 %vm354_vm1, %v12827_v42  ;;  %v12850_v42 = vrot.slane %v24955_v1, 1 }
 0x859   : > { %20023 = vmatprep.mubr.msk.bf16.mxu1 %vm354_vm1, %v12829_v40  ;;  %v12852_v40 = vrot.slane %v24951_v7, 1 }
 0x85a   : > { %v12851_v36 = vsel %vm3227_vm2, %v12848_v23, %v12850_v42 }
 0x85b   : > { %v12853_v3 = vsel %vm3227_vm2, %v12850_v42, %v12852_v40 }
 0x860   : > { %20024 = vmatmul.mubr.msk.bf16.gmra.mrb[72].mxu1 %vm354_vm1, %v12831_v56  ;;  %v25343_v56 = vrot.slane %v24983_v51, 1 }
 0x861   : > { %20027 = vmatprep.mubr.msk.bf16.mxu1 %vm354_vm1, %v12833_v43  ;;  %v12856_v43 = vrot.slane %v24979_v17, 1 }
 0x862   : > { %v12855_v54 = vsel %vm3227_vm2, %v12852_v40, %v25343_v56 }
 0x863   : > { %v25351_v5 = vsel %vm3227_vm2, %v25343_v56, %v12856_v43 }
 0x868   : > { %20028 = vmatmul.mubr.msk.bf16.gmra.mrb[76].mxu1 %vm354_vm1, %v12835_v38  ;;  %v12858_v38 = vrot.slane %v25017_v9, 1 }
 0x869   : > { %20031 = vmatprep.mubr.msk.bf16.mxu1 %vm354_vm1, %v12837_v15  ;;  %v12860_v15 = vrot.slane %v25011_v28, 1 }
 0x86a   : > { %v25358_v57 = vsel %vm3227_vm2, %v12856_v43, %v12858_v38 }
 0x86b   : > { %v25363_v60 = vsel %vm3227_vm2, %v12858_v38, %v12860_v15  ;;  %v12878_v38 = vrot.slane %v25181_v39, 1 }
 0x870   : > { %20032 = vmatmul.mubr.msk.bf16.gmra.mrb[80].mxu1 %vm354_vm1, %v12839_v33  ;;  %v12862_v33 = vrot.slane %v25051_v37, 1 }
 0x871   : > { %20035 = vmatprep.mubr.msk.bf16.mxu1 %vm354_vm1, %v12841_v34  ;;  %v12864_v34 = vrot.slane %v25045_v45, 1 }
 0x872   : > { %v25370_v2 = vsel %vm3227_vm2, %v12860_v15, %v12862_v33  ;;  %v25417_v15 = vrot.slane %v25173_v47, 1 }
 0x873   : > { %v25375_v14 = vsel %vm3227_vm2, %v12862_v33, %v12864_v34 }
 0x878   : > { %20036 = vmatmul.mubr.msk.bf16.gmra.mrb[84].mxu1 %vm354_vm1, %v12843_v25  ;;  %v12866_v25 = vrot.slane %v25085_v46, 1 }
 0x879   : > { %20039 = vmatprep.mubr.msk.bf16.mxu1 %vm354_vm1, %v12845_v21  ;;  %v12868_v21 = vrot.slane %v25079_v55, 1 }
 0x87a   : > { %v25382_v4 = vsel %vm3227_vm2, %v12864_v34, %v12866_v25  ;;  %v25426_v34 = vsel %vm3227_vm2, %v12878_v38, %v25417_v15 }
 0x87b   : > { %v25387_v23 = vsel %vm3227_vm2, %v12866_v25, %v12868_v21  ;;  %v12882_v25 = vrot.slane %v25200_v22, 1  ;;  %v25444_v22 = vld [vmem:[#allocation4 + $0x20] sm:$0xff] }
 0x880   : > { %20040 = vmatmul.mubr.msk.bf16.gmra.mrb[88].mxu1 %vm354_vm1, %v12847_v62  ;;  %v12870_v62 = vrot.slane %v25119_v50, 1 }
 0x881   : > { %20043 = vmatprep.mubr.msk.bf16.mxu1 %vm354_vm1, %v12849_v0  ;;  %v12872_v0 = vrot.slane %v25113_v52, 1 }
 0x882   : > { %v25394_v42 = vsel %vm3227_vm2, %v12868_v21, %v12870_v62  ;;  %v12883_v21 = vsel %vm3227_vm2, %v25417_v15, %v12882_v25  ;;  %v25457_v25 = vld [vmem:[#allocation4 + $0x38] sm:$0xff] }
 0x883   : > { %v25399_v40 = vsel %vm3227_vm2, %v12870_v62, %v12872_v0  ;;  %v13272_v62 = vld [vmem:[#allocation4 + $0x10] sm:$0xff] }
 0x888   : > { %20044 = vmatmul.mubr.msk.bf16.gmra.mrb[92].mxu1 %vm354_vm1, %v12851_v36  ;;  %v12874_v36 = vrot.slane %v25156_v12, 1 }
 0x889   : > { %20047 = vmatprep.mubr.msk.bf16.mxu1 %vm354_vm1, %v12853_v3  ;;  %v12876_v3 = vrot.slane %v25148_v49, 1 }
 0x88a   : > { %v25406_v43 = vsel %vm3227_vm2, %v12872_v0, %v12874_v36  ;;  %v14086_v0 = vsel %vm1015_vm0, %v25295_v16, 0  ;;  %v25453_v16 = vld [vmem:[#allocation4 + $0x30] sm:$0xff] }
 0x88b   : > { %v25420_v33 = vsel %vm3227_vm2, %v12876_v3, %v12878_v38  ;;  %v25449_v38 = vld [vmem:[#allocation4 + $0x28] sm:$0xff] }
 0x890   : > { %20048 = vmatmul.mubr.msk.bf16.gmra.mrb[96].mxu1 %vm354_vm1, %v12855_v54  ;;  %v25411_v54 = vsel %vm3227_vm2, %v12874_v36, %v12876_v3  ;;  %v25437_v36 = vld [vmem:[#allocation4 + $0x18] sm:$0xff]  ;;  %v17599_v3 = vld [vmem:[%s26268_s6 + $0xa] sm:$0x3] }
 0x891   : > { %20051 = vmatprep.mubr.msk.bf16.mxu1 %vm354_vm1, %v25351_v5 }
 0x898   : > { %20052 = vmatmul.mubr.msk.bf16.gmra.mrb[100].mxu1 %vm354_vm1, %v25358_v57 }
 0x899   : > { %20055 = vmatprep.mubr.msk.bf16.mxu1 %vm354_vm1, %v25363_v60 }
 0x8a0   : > { %20056 = vmatmul.mubr.msk.bf16.gmra.mrb[104].mxu1 %vm354_vm1, %v25370_v2 }
 0x8a1   : > { %20059 = vmatprep.mubr.msk.bf16.mxu1 %vm354_vm1, %v25375_v14 }
 0x8a8   : > { %20060 = vmatmul.mubr.msk.bf16.gmra.mrb[108].mxu1 %vm354_vm1, %v25382_v4 }
 0x8a9   : > { %20063 = vmatprep.mubr.msk.bf16.mxu1 %vm354_vm1, %v25387_v23 }
 0x8b0   : > { %20064 = vmatmul.mubr.msk.bf16.gmra.mrb[112].mxu1 %vm354_vm1, %v25394_v42 }
 0x8b1   : > { %20067 = vmatprep.mubr.msk.bf16.mxu1 %vm354_vm1, %v25399_v40 }
 0x8b8   : > { %20068 = vmatmul.mubr.msk.bf16.gmra.mrb[116].mxu1 %vm354_vm1, %v25406_v43 }
 0x8b9   : > { %20071 = vmatprep.mubr.msk.bf16.mxu1 %vm354_vm1, %v25411_v54 }
 0x8c0   : > { %20072 = vmatmul.mubr.msk.bf16.gmra.mrb[120].mxu1 %vm354_vm1, %v25420_v33 }
 0x8c1   : > { %20075 = vmatprep.mubr.msk.bf16.mxu1 %vm354_vm1, %v25426_v34 }
 0x8c8   : > { %20076 = vmatmul.mubr.msk.bf16.gmra.mrb[124].mxu1 %vm354_vm1, %v12883_v21  ;;  %v25461_v21 = vld [vmem:[#allocation4 + $0x40] sm:$0xff] }
 0x8c9   : > { %20081 = vmatprep.mubr.msk.bf16.mxu1 %vm354_vm1, %v13272_v62 }
 0x8d0   : > { %20082 = vmatmul.mubr.msk.bf16.vlgmr.msra.gmra.mrb[64].mxu1 %vm354_vm1, %v25437_v36 }
 0x8d1   : > { %20146 = vmatpush3.bf16.msra.mxu1 %v14086_v0  ;;  %20085 = vmatprep.mubr.msk.bf16.mxu1 %vm354_vm1, %v25444_v22  ;;  %v25465_v0 = vld [vmem:[#allocation4 + $0x48] sm:$0xff] }
 0x8d2   : > { %22085 = vmatprep.subr.msk.bf16.mxu1 %vm1015_vm0, %v17599_v3 }
 0x8d8   : > { %20086 = vmatmul.mubr.msk.bf16.gmra.mrb[68].mxu1 %vm354_vm1, %v25449_v38 }
 0x8d9   : > { %20089 = vmatprep.mubr.msk.bf16.mxu1 %vm354_vm1, %v25453_v16 }
 0x8e0   : > { %20090 = vmatmul.mubr.msk.bf16.gmra.mrb[72].mxu1 %vm354_vm1, %v25457_v25 }
 0x8e1   : > { %20093 = vmatprep.mubr.msk.bf16.mxu1 %vm354_vm1, %v25461_v21 }
 0x8e8   : > { %20094 = vmatmul.mubr.msk.bf16.gmra.mrb[76].mxu1 %vm354_vm1, %v25465_v0 }
 0x8e9   : > { %20097 = vmatprep.mubr.msk.bf16.mxu1 %vm354_vm1, %v22227_v29 }
 0x8f0   : > { %20098 = vmatmul.mubr.msk.bf16.gmra.mrb[80].mxu1 %vm354_vm1, %v22228_v20  ;;  %v25532_v20 = vld [vmem:[%s26268_s6 + $0xc] sm:$0x3] }
 0x8f1   : > { %20101 = vmatprep.mubr.msk.bf16.mxu1 %vm354_vm1, %v24899_v32  ;;  %v25511_v32 = vld [vmem:[#allocation4 + $0x100] sm:$0xff] }
 0x8f8   : > { %20102 = vmatmul.mubr.msk.bf16.gmra.mrb[84].mxu1 %vm354_vm1, %v24895_v10  ;;  %v13732_v10 = vshll.u32 %v13272_v62, 16 }
 0x8f9   : > { %20105 = vmatprep.mubr.msk.bf16.mxu1 %vm354_vm1, %v24927_v13  ;;  %v13730_v13 = vshrl.u32 %v13272_v62, 16 }
 0x900   : > { %20106 = vmatmul.mubr.msk.bf16.gmra.mrb[88].mxu1 %vm354_vm1, %v24923_v27  ;;  %v13734_v27 = vrot.slane %v13732_v10, 1  ;;  %v13769_v10 = vshll.u32 %v25457_v25, 16 }
 0x901   : > { %20109 = vmatprep.mubr.msk.bf16.mxu1 %vm354_vm1, %v24955_v1 }
 0x902   : > { %v13735_v1 = vor.u32 %v13734_v27, %v13730_v13  ;;  %v13757_v27 = vshrl.u32 %v25449_v38, 16 }
 0x908   : > { %20110 = vmatmul.mubr.msk.bf16.gmra.mrb[92].mxu1 %vm354_vm1, %v24951_v7  ;;  %v13737_v7 = vshll.u32 %v25437_v36, 16 }
 0x909   : > { %20113 = vmatprep.mubr.msk.bf16.mxu1 %vm354_vm1, %v24983_v51 }
 0x90a   : > { %v13739_v51 = vrot.slane %v13737_v7, 1  ;;  %v13777_v7 = vshll.u32 %v25461_v21, 16 }
 0x910   : > { %20114 = vmatmul.mubr.msk.bf16.gmra.mrb[96].mxu1 %vm354_vm1, %v24979_v17  ;;  %v13745_v17 = vshll.u32 %v25444_v22, 16 }
 0x911   : > { %20117 = vmatprep.mubr.msk.bf16.mxu1 %vm354_vm1, %v25017_v9  ;;  %v13740_v9 = vsel %vm1731_vm4, %v13735_v1, %v13739_v51 }
 0x918   : > { %20118 = vmatmul.mubr.msk.bf16.gmra.mrb[100].mxu1 %vm354_vm1, %v25011_v28  ;;  %v25517_v28 = vld [vmem:[#allocation4 + $0x108] sm:$0xff] }
 0x919   : > { %20121 = vmatprep.mubr.msk.bf16.mxu1 %vm354_vm1, %v25051_v37  ;;  %v13749_v37 = vshrl.u32 %v25444_v22, 16 }
 0x920   : > { %20122 = vmatmul.mubr.msk.bf16.gmra.mrb[104].mxu1 %vm354_vm1, %v25045_v45  ;;  %v13747_v45 = vrot.slane %v13745_v17, 1  ;;  %v13771_v17 = vrot.slane %v13769_v10, 1 }
 0x921   : > { %20125 = vmatprep.mubr.msk.bf16.mxu1 %vm354_vm1, %v25085_v46  ;;  %v13741_v46 = vshrl.u32 %v25437_v36, 16 }
 0x928   : > { %20126 = vmatmul.mubr.msk.bf16.gmra.mrb[108].mxu1 %vm354_vm1, %v25079_v55  ;;  %v13753_v55 = vshll.u32 %v25449_v38, 16 }
 0x929   : > { %20129 = vmatprep.mubr.msk.bf16.mxu1 %vm354_vm1, %v25119_v50  ;;  %v13761_v50 = vshll.u32 %v25453_v16, 16 }
 0x92b   : > { %v13763_v62 = vrot.slane %v13761_v50, 1 }
 0x930   : > { %20130 = vmatmul.mubr.msk.bf16.gmra.mrb[112].mxu1 %vm354_vm1, %v25113_v52  ;;  %v13751_v52 = vor.u32 %v13749_v37, %v13747_v45  ;;  %v25556_v37 = vld [vmem:[#allocation4 + $0x50] sm:$0xff] }
 0x931   : > { %20133 = vmatprep.mubr.msk.bf16.mxu1 %vm354_vm1, %v25156_v12  ;;  %v14575_v12 = vsel %vm1015_vm0, %v17599_v3, 0  ;;  %v13765_v3 = vshrl.u32 %v25453_v16, 16 }
 0x933   : > { %v13767_v13 = vor.u32 %v13765_v3, %v13763_v62 }
 0x938   : > { %20134 = vmatmul.mubr.msk.bf16.gmra.mrb[116].mxu1 %vm354_vm1, %v25148_v49  ;;  %v13743_v49 = vor.u32 %v13741_v46, %v13739_v51  ;;  %v13785_v46 = vshll.u32 %v25465_v0, 16 }
 0x939   : > { %20137 = vmatprep.mubr.msk.bf16.mxu1 %vm354_vm1, %v25181_v39 }
 0x93a   : > { %v13748_v39 = vsel %vm1731_vm4, %v13743_v49, %v13747_v45  ;;  %v13779_v45 = vrot.slane %v13777_v7, 1  ;;  %v13793_v49 = vshll.u32 %v25556_v37, 16 }
 0x93c   : > { %v13795_v10 = vrot.slane %v13793_v49, 1 }
 0x940   : > { %20138 = vmatmul.mubr.msk.bf16.gmra.mrb[120].mxu1 %vm354_vm1, %v25173_v47  ;;  %v13755_v47 = vrot.slane %v13753_v55, 1  ;;  %v13781_v55 = vshrl.u32 %v25461_v21, 16 }
 0x941   : > { %20141 = vmatprep.mubr.msk.bf16.mxu1 %vm354_vm1, %v25511_v32 }
 0x942   : > { %v25536_v29 = vsel %vm1731_vm4, %v13751_v52, %v13755_v47  ;;  %v13759_v1 = vor.u32 %v13757_v27, %v13755_v47  ;;  %v13773_v52 = vshrl.u32 %v25457_v25, 16  ;;  %v13783_v50 = vor.u32 %v13781_v55, %v13779_v45  ;;  %v25574_v27 = vld [vmem:[#allocation4 + $0x60] sm:$0xff] }
 0x943   : > { %v13787_v47 = vrot.slane %v13785_v46, 1 }
 0x944   : > { %v25547_v51 = vsel %vm1731_vm4, %v13759_v1, %v13763_v62  ;;  %v25565_v62 = vld [vmem:[#allocation4 + $0x58] sm:$0xff]  ;;  %v13789_v1 = vshrl.u32 %v25465_v0, 16 }
 0x945   : > { %v25570_v3 = vsel %vm1731_vm4, %v13783_v50, %v13787_v47  ;;  %v13801_v7 = vshll.u32 %v25565_v62, 16  ;;  %v25583_v50 = vld [vmem:[#allocation4 + $0x68] sm:$0xff] }
 0x946   : > { %26463 = vst [vmem:[#allocation57_spill] sm:$0xff] %v25570_v3  ;;  %v13791_v55 = vor.u32 %v13789_v1, %v13787_v47  ;;  %v13813_v47 = vshrl.u32 %v25574_v27, 16 }
 0x947   : > { %v13803_v46 = vrot.slane %v13801_v7, 1  ;;  %v13817_v7 = vshll.u32 %v25583_v50, 16 }
 0x948   : > { %20142 = vmatmul.mubr.msk.bf16.gmra.mrb[124].mxu1 %vm354_vm1, %v25517_v28 }
 0x949   : > { %20147 = vmatprep.mubr.msk.bf16.mxu1 %vm354_vm1, %v13740_v9  ;;  %v25552_v9 = vsel %vm1731_vm4, %v13767_v13, %v13771_v17  ;;  %v13797_v13 = vshrl.u32 %v25556_v37, 16  ;;  %v13819_v53 = vrot.slane %v13817_v7, 1 }
 0x950   : > { %20148 = vmatmul.mubr.msk.bf16.vlgmr.msra.gmra.mrb[64].mxu1 %vm354_vm1, %v13748_v39 }
 0x951   : > { %20212 = vmatpush3.bf16.msra.mxu1 %v14575_v12  ;;  %20151 = vmatprep.mubr.msk.bf16.mxu1 %vm354_vm1, %v25536_v29  ;;  %v13775_v12 = vor.u32 %v13773_v52, %v13771_v17  ;;  %v13799_v17 = vor.u32 %v13797_v13, %v13795_v10  ;;  %v25581_v52 = vsel %vm1731_vm4, %v13791_v55, %v13795_v10  ;;  %v25592_v13 = vld [vmem:[#allocation4 + $0x70] sm:$0xff]  ;;  %v13805_v10 = vshrl.u32 %v25565_v62, 16 }
 0x952   : > { %22086 = vmatprep.subr.msk.bf16.mxu1 %vm1015_vm0, %v25532_v20  ;;  %26464 = vst [vmem:[#allocation58_spill] sm:$0xff] %v25581_v52  ;;  %v13825_v55 = vshll.u32 %v25592_v13, 16 }
 0x953   : > { %v25563_v39 = vsel %vm1731_vm4, %v13775_v12, %v13779_v45  ;;  %v13809_v45 = vshll.u32 %v25574_v27, 16  ;;  %v25588_v49 = vsel %vm1731_vm4, %v13799_v17, %v13803_v46  ;;  %v13807_v30 = vor.u32 %v13805_v10, %v13803_v46 }
 0x954   : > { %26462 = vst [vmem:[#allocation56_spill] sm:$0xff] %v25563_v39  ;;  %26465 = vst [vmem:[#allocation59_spill] sm:$0xff] %v25588_v49  ;;  %v13829_v46 = vshrl.u32 %v25592_v13, 16 }
 0x955   : > { %v13811_v12 = vrot.slane %v13809_v45, 1  ;;  %v25601_v45 = vld [vmem:[#allocation4 + $0x78] sm:$0xff] }
 0x956   : > { %v13833_v7 = vshll.u32 %v25601_v45, 16 }
 0x957   : > { %v13815_v1 = vor.u32 %v13813_v47, %v13811_v12  ;;  %v25599_v17 = vsel %vm1731_vm4, %v13807_v30, %v13811_v12  ;;  %v25610_v47 = vld [vmem:[#allocation4 + $0x80] sm:$0xff]  ;;  %v13821_v30 = vshrl.u32 %v25583_v50, 16 }
 0x958   : > { %20152 = vmatmul.mubr.msk.bf16.gmra.mrb[68].mxu1 %vm354_vm1, %v25547_v51  ;;  %26466 = vst [vmem:[#allocation60_spill] sm:$0xff] %v25599_v17  ;;  %v13841_v10 = vshll.u32 %v25610_v47, 16 }
 0x959   : > { %20155 = vmatprep.mubr.msk.bf16.mxu1 %vm354_vm1, %v25552_v9  ;;  %v25606_v11 = vsel %vm1731_vm4, %v13815_v1, %v13819_v53 }
 0x95a   : > { %26467 = vst [vmem:[#allocation61_spill] sm:$0xff] %v25606_v11 }
 0x960   : > { %20156 = vmatmul.mubr.msk.bf16.gmra.mrb[72].mxu1 %vm354_vm1, %v25563_v39 }
 0x961   : > { %20159 = vmatprep.mubr.msk.bf16.mxu1 %vm354_vm1, %v25570_v3  ;;  %v13843_v3 = vrot.slane %v13841_v10, 1 }
 0x968   : > { %20160 = vmatmul.mubr.msk.bf16.gmra.mrb[76].mxu1 %vm354_vm1, %v25581_v52  ;;  %v13823_v52 = vor.u32 %v13821_v30, %v13819_v53 }
 0x969   : > { %20163 = vmatprep.mubr.msk.bf16.mxu1 %vm354_vm1, %v25588_v49  ;;  %v13827_v49 = vrot.slane %v13825_v55, 1  ;;  %v25619_v55 = vld [vmem:[#allocation4 + $0x88] sm:$0xff] }
 0x96a   : > { %v13849_v53 = vshll.u32 %v25619_v55, 16  ;;  %v13853_v10 = vshrl.u32 %v25619_v55, 16 }
 0x96b   : > { %v13831_v12 = vor.u32 %v13829_v46, %v13827_v49  ;;  %v25617_v1 = vsel %vm1731_vm4, %v13823_v52, %v13827_v49  ;;  %v13845_v46 = vshrl.u32 %v25610_v47, 16 }
 0x96c   : > { %v13851_v30 = vrot.slane %v13849_v53, 1 }
 0x96d   : > { %v13847_v52 = vor.u32 %v13845_v46, %v13843_v3  ;;  %v14414_v46 = vrot.slane %v25437_v36, 1  ;;  %v25701_v36 = vld [vmem:[%s26268_s6 + $0xe] sm:$0x3] }
 0x970   : > { %20164 = vmatmul.mubr.msk.bf16.gmra.mrb[80].mxu1 %vm354_vm1, %v25599_v17  ;;  %v13835_v17 = vrot.slane %v13833_v7, 1  ;;  %v13837_v7 = vshrl.u32 %v25601_v45, 16 }
 0x971   : > { %20167 = vmatprep.mubr.msk.bf16.mxu1 %vm354_vm1, %v25606_v11 }
 0x972   : > { %v25624_v11 = vsel %vm1731_vm4, %v13831_v12, %v13835_v17  ;;  %v13839_v49 = vor.u32 %v13837_v7, %v13835_v17  ;;  %v25637_v12 = vsel %vm1731_vm4, %v13847_v52, %v13851_v30  ;;  %v14416_v7 = vrot.slane %v25444_v22, 1 }
 0x973   : > { %26468 = vst [vmem:[#allocation62_spill] sm:$0xff] %v25624_v11  ;;  %v14997_v52 = vsel %vm1015_vm0, %v25532_v20, 0  ;;  %v14420_v20 = vrot.slane %v25453_v16, 1 }
 0x974   : > { %v25632_v39 = vsel %vm1731_vm4, %v13839_v49, %v13843_v3  ;;  %v25695_v49 = vrot.slane %v25449_v38, 1 }
 0x978   : > { %20168 = vmatmul.mubr.msk.bf16.gmra.mrb[84].mxu1 %vm354_vm1, %v25617_v1 }
 0x979   : > { %20171 = vmatprep.mubr.msk.bf16.mxu1 %vm354_vm1, %v25624_v11  ;;  %v25642_v11 = vor.u32 %v13853_v10, %v13851_v30  ;;  %v14417_v30 = vsel %vm3227_vm2, %v14414_v46, %v14416_v7  ;;  %v14419_v10 = vsel %vm3227_vm2, %v14416_v7, %v25695_v49 }
 0x97b   : > { %v13860_v17 = vsel %vm1731_vm4, %v25642_v11, %v24993_v61  ;;  %v13969_v61 = vshll.u32 %v25511_v32, 16 }
 0x980   : > { %20172 = vmatmul.mubr.msk.bf16.gmra.mrb[88].mxu1 %vm354_vm1, %v25632_v39 }
 0x981   : > { %20175 = vmatprep.mubr.msk.bf16.mxu1 %vm354_vm1, %v25637_v12 }
 0x988   : > { %20176 = vmatmul.mubr.msk.bf16.gmra.mrb[92].mxu1 %vm354_vm1, %v13860_v17  ;;  %v14422_v17 = vrot.slane %v25457_v25, 1 }
 0x989   : > { %20179 = vmatprep.mubr.msk.bf16.mxu1 %vm354_vm1, %v25015_v19  ;;  %v13971_v19 = vrot.slane %v13969_v61, 1  ;;  %v25713_v61 = vsel %vm3227_vm2, %v25695_v49, %v14420_v20 }
 0x990   : > { %20180 = vmatmul.mubr.msk.bf16.gmra.mrb[96].mxu1 %vm354_vm1, %v25038_v59  ;;  %v13973_v59 = vshrl.u32 %v25511_v32, 16 }
 0x991   : > { %20183 = vmatprep.mubr.msk.bf16.mxu1 %vm354_vm1, %v25049_v58  ;;  %v13977_v58 = vshll.u32 %v25517_v28, 16 }
 0x998   : > { %20184 = vmatmul.mubr.msk.bf16.gmra.mrb[100].mxu1 %vm354_vm1, %v25072_v48  ;;  %v13975_v48 = vor.u32 %v13973_v59, %v13971_v19  ;;  %v14424_v59 = vrot.slane %v25461_v21, 1 }
 0x999   : > { %20187 = vmatprep.mubr.msk.bf16.mxu1 %vm354_vm1, %v25083_v63  ;;  %v13979_v63 = vrot.slane %v13977_v58, 1  ;;  %v14426_v58 = vrot.slane %v25465_v0, 1 }
 0x9a0   : > { %20188 = vmatmul.mubr.msk.bf16.gmra.mrb[104].mxu1 %vm354_vm1, %v25106_v26  ;;  %v25677_v26 = vld [vmem:[#allocation4 + $0x110] sm:$0x1] }
 0x9a1   : > { %20191 = vmatprep.mubr.msk.bf16.mxu1 %vm354_vm1, %v25117_v31  ;;  %v13972_v31 = vsel %vm1731_vm4, %v25204_v41, %v13971_v19  ;;  %v25718_v19 = vsel %vm3227_vm2, %v14420_v20, %v14422_v17 }
 0x9a8   : > { %20192 = vmatmul.mubr.msk.bf16.gmra.mrb[108].mxu1 %vm354_vm1, %v25142_v6  ;;  %v13985_v6 = vshll.u32 %v25677_v26, 16 }
 0x9a9   : > { %20195 = vmatprep.mubr.msk.bf16.mxu1 %vm354_vm1, %v25154_v44  ;;  %v13980_v44 = vsel %vm1731_vm4, %v13975_v48, %v13979_v63  ;;  %v25725_v48 = vsel %vm3227_vm2, %v14422_v17, %v14424_v59 }
 0x9b0   : > { %20196 = vmatmul.mubr.msk.bf16.gmra.mrb[112].mxu1 %vm354_vm1, %v25171_v35  ;;  %v13981_v35 = vshrl.u32 %v25517_v28, 16 }
 0x9b1   : > { %20199 = vmatprep.mubr.msk.bf16.mxu1 %vm354_vm1, %v25179_v24  ;;  %v14377_v24 = vld [vmem:[#allocation4 + $0x10] sm:$0xfe] }
 0x9b2   : > { %v14413_v3 = vrot.slane %v14377_v24, 1  ;;  %v14432_v24 = vrot.slane %v25574_v27, 1 }
 0x9b4   : > { %v14415_v41 = vsel %vm3227_vm2, %v14413_v3, %v14414_v46  ;;  %v14436_v46 = vrot.slane %v25592_v13, 1 }
 0x9b8   : > { %20200 = vmatmul.mubr.msk.bf16.gmra.mrb[116].mxu1 %vm354_vm1, %v25191_v18  ;;  %v13983_v18 = vor.u32 %v13981_v35, %v13979_v63  ;;  %v25730_v63 = vsel %vm3227_vm2, %v14424_v59, %v14426_v58 }
 0x9b9   : > { %20203 = vmatprep.mubr.msk.bf16.mxu1 %vm354_vm1, %v25196_v8  ;;  %v13987_v8 = vrot.slane %v13985_v6, 1  ;;  %v14430_v6 = vrot.slane %v25565_v62, 1 }
 0x9bb   : > { %v13988_v53 = vsel %vm1731_vm4, %v13983_v18, %v13987_v8  ;;  %v14434_v18 = vrot.slane %v25583_v50, 1  ;;  %v25749_v8 = vsel %vm3227_vm2, %v14430_v6, %v14432_v24 }
 0x9bd   : > { %v25754_v3 = vsel %vm3227_vm2, %v14432_v24, %v14434_v18 }
 0x9c0   : > { %20204 = vmatmul.mubr.msk.bf16.gmra.mrb[120].mxu1 %vm354_vm1, %v13972_v31  ;;  %v14428_v31 = vrot.slane %v25556_v37, 1 }
 0x9c1   : > { %20207 = vmatprep.mubr.msk.bf16.mxu1 %vm354_vm1, %v13980_v44 }
 0x9c2   : > { %v25737_v44 = vsel %vm3227_vm2, %v14426_v58, %v14428_v31  ;;  %v25742_v35 = vsel %vm3227_vm2, %v14428_v31, %v14430_v6 }
 0x9c8   : > { %20208 = vmatmul.mubr.msk.bf16.gmra.mrb[124].mxu1 %vm354_vm1, %v13988_v53  ;;  %v14438_v53 = vrot.slane %v25601_v45, 1 }
 0x9c9   : > { %20213 = vmatprep.mubr.msk.bf16.mxu1 %vm354_vm1, %v14415_v41  ;;  %v25761_v41 = vsel %vm3227_vm2, %v14434_v18, %v14436_v46 }
 0x9ca   : > { %v25766_v7 = vsel %vm3227_vm2, %v14436_v46, %v14438_v53 }
 0x9d0   : > { %20214 = vmatmul.mubr.msk.bf16.vlgmr.msra.gmra.mrb[64].mxu1 %vm354_vm1, %v14417_v30  ;;  %v25772_v30 = vrot.slane %v25619_v55, 1 }
 0x9d1   : > { %20278 = vmatpush3.bf16.msra.mxu1 %v14997_v52  ;;  %20217 = vmatprep.mubr.msk.bf16.mxu1 %vm354_vm1, %v14419_v10  ;;  %v14440_v52 = vrot.slane %v25610_v47, 1 }
 0x9d2   : > { %22087 = vmatprep.subr.msk.bf16.mxu1 %vm1015_vm0, %v25701_v36  ;;  %v14445_v17 = vsel %vm3227_vm2, %v25772_v30, %v25343_v56  ;;  %v14472_v56 = vrot.slane %v25511_v32, 1 }
 0x9d3   : > { %v25775_v10 = vsel %vm3227_vm2, %v14438_v53, %v14440_v52  ;;  %v25781_v20 = vsel %vm3227_vm2, %v14440_v52, %v25772_v30 }
 0x9d8   : > { %20218 = vmatmul.mubr.msk.bf16.gmra.mrb[68].mxu1 %vm354_vm1, %v25713_v61 }
 0x9d9   : > { %20221 = vmatprep.mubr.msk.bf16.mxu1 %vm354_vm1, %v25718_v19 }
 0x9e0   : > { %20222 = vmatmul.mubr.msk.bf16.gmra.mrb[72].mxu1 %vm354_vm1, %v25725_v48 }
 0x9e1   : > { %20225 = vmatprep.mubr.msk.bf16.mxu1 %vm354_vm1, %v25730_v63 }
 0x9e8   : > { %20226 = vmatmul.mubr.msk.bf16.gmra.mrb[76].mxu1 %vm354_vm1, %v25737_v44 }
 0x9e9   : > { %20229 = vmatprep.mubr.msk.bf16.mxu1 %vm354_vm1, %v25742_v35 }
 0x9f0   : > { %20230 = vmatmul.mubr.msk.bf16.gmra.mrb[80].mxu1 %vm354_vm1, %v25749_v8 }
 0x9f1   : > { %20233 = vmatprep.mubr.msk.bf16.mxu1 %vm354_vm1, %v25754_v3 }
 0x9f8   : > { %20234 = vmatmul.mubr.msk.bf16.gmra.mrb[84].mxu1 %vm354_vm1, %v25761_v41 }
 0x9f9   : > { %20237 = vmatprep.mubr.msk.bf16.mxu1 %vm354_vm1, %v25766_v7 }
 0xa00   : > { %20238 = vmatmul.mubr.msk.bf16.gmra.mrb[88].mxu1 %vm354_vm1, %v25775_v10 }
 0xa01   : > { %20241 = vmatprep.mubr.msk.bf16.mxu1 %vm354_vm1, %v25781_v20 }
 0xa08   : > { %20242 = vmatmul.mubr.msk.bf16.gmra.mrb[92].mxu1 %vm354_vm1, %v14445_v17 }
 0xa09   : > { %20245 = vmatprep.mubr.msk.bf16.mxu1 %vm354_vm1, %v25351_v5  ;;  %v14474_v5 = vrot.slane %v25517_v28, 1 }
 0xa10   : > { %20246 = vmatmul.mubr.msk.bf16.gmra.mrb[96].mxu1 %vm354_vm1, %v25358_v57  ;;  %v14473_v57 = vsel %vm3227_vm2, %v25417_v15, %v14472_v56  ;;  %v25875_v15 = vld [vmem:[#allocation4 + $0xb0] sm:$0xff] }
 0xa11   : > { %20249 = vmatprep.mubr.msk.bf16.mxu1 %vm354_vm1, %v25363_v60  ;;  %v14475_v60 = vsel %vm3227_vm2, %v14472_v56, %v14474_v5  ;;  %v15467_v53 = vshll.u32 %v25875_v15, 16 }
 0xa18   : > { %20250 = vmatmul.mubr.msk.bf16.gmra.mrb[100].mxu1 %vm354_vm1, %v25370_v2  ;;  %v14476_v2 = vrot.slane %v25677_v26, 1 }
 0xa19   : > { %20253 = vmatprep.mubr.msk.bf16.mxu1 %vm354_vm1, %v25375_v14 }
 0xa1a   : > { %v14477_v14 = vsel %vm3227_vm2, %v14474_v5, %v14476_v2  ;;  %v15469_v5 = vrot.slane %v15467_v53, 1 }
 0xa20   : > { %20254 = vmatmul.mubr.msk.bf16.gmra.mrb[104].mxu1 %vm354_vm1, %v25382_v4  ;;  %v15680_v4 = vsel %vm1015_vm0, %v25701_v36, 0 }
 0xa21   : > { %20257 = vmatprep.mubr.msk.bf16.mxu1 %vm354_vm1, %v25387_v23  ;;  %v17698_v23 = vld [vmem:[%s26268_s6 + $0x10] sm:$0x3] }
 0xa28   : > { %20258 = vmatmul.mubr.msk.bf16.gmra.mrb[108].mxu1 %vm354_vm1, %v25394_v42  ;;  %v25859_v42 = vld [vmem:[#allocation4 + $0x90] sm:$0xff] }
 0xa29   : > { %20261 = vmatprep.mubr.msk.bf16.mxu1 %vm354_vm1, %v25399_v40  ;;  %v25863_v40 = vld [vmem:[#allocation4 + $0x98] sm:$0xff]  ;;  %v15439_v26 = vshrl.u32 %v25859_v42, 16 }
 0xa2a   : > { %v15443_v36 = vshll.u32 %v25863_v40, 16  ;;  %v15447_v18 = vshrl.u32 %v25863_v40, 16 }
 0xa30   : > { %20262 = vmatmul.mubr.msk.bf16.gmra.mrb[112].mxu1 %vm354_vm1, %v25406_v43  ;;  %v25867_v43 = vld [vmem:[#allocation4 + $0xa0] sm:$0xff] }
 0xa31   : > { %20265 = vmatprep.mubr.msk.bf16.mxu1 %vm354_vm1, %v25411_v54  ;;  %v25871_v54 = vld [vmem:[#allocation4 + $0xa8] sm:$0xff]  ;;  %v15451_v58 = vshll.u32 %v25867_v43, 16 }
 0xa32   : > { %v15459_v24 = vshll.u32 %v25871_v54, 16  ;;  %v15463_v2 = vshrl.u32 %v25871_v54, 16 }
 0xa34   : > { %v15461_v17 = vrot.slane %v15459_v24, 1 }
 0xa38   : > { %20266 = vmatmul.mubr.msk.bf16.gmra.mrb[116].mxu1 %vm354_vm1, %v25420_v33  ;;  %v25879_v33 = vld [vmem:[#allocation4 + $0xb8] sm:$0xff] }
 0xa39   : > { %20269 = vmatprep.mubr.msk.bf16.mxu1 %vm354_vm1, %v25426_v34  ;;  %v25883_v34 = vld [vmem:[#allocation4 + $0xc0] sm:$0xff] }
 0xa40   : > { %20270 = vmatmul.mubr.msk.bf16.gmra.mrb[120].mxu1 %vm354_vm1, %v14473_v57  ;;  %v15471_v57 = vshrl.u32 %v25875_v15, 16 }
 0xa41   : > { %20273 = vmatprep.mubr.msk.bf16.mxu1 %vm354_vm1, %v14475_v60  ;;  %v15475_v60 = vshll.u32 %v25879_v33, 16 }
 0xa48   : > { %20274 = vmatmul.mubr.msk.bf16.gmra.mrb[124].mxu1 %vm354_vm1, %v14477_v14  ;;  %v15473_v14 = vor.u32 %v15471_v57, %v15469_v5 }
 0xa49   : > { %20279 = vmatprep.mubr.msk.bf16.mxu1 %vm354_vm1, %v25444_v22  ;;  %v25887_v22 = vld [vmem:[#allocation4 + $0xc8] sm:$0xff] }
 0xa50   : > { %20280 = vmatmul.mubr.msk.bf16.vlgmr.msra.gmra.mrb[64].mxu1 %vm354_vm1, %v25449_v38  ;;  %v25891_v38 = vld [vmem:[#allocation4 + $0xd0] sm:$0xff] }
 0xa51   : > { %20344 = vmatpush3.bf16.msra.mxu1 %v15680_v4  ;;  %20283 = vmatprep.mubr.msk.bf16.mxu1 %vm354_vm1, %v25453_v16  ;;  %v25895_v16 = vld [vmem:[#allocation4 + $0xd8] sm:$0xff]  ;;  %v15483_v4 = vshll.u32 %v25883_v34, 16 }
 0xa52   : > { %22088 = vmatprep.subr.msk.bf16.mxu1 %vm1015_vm0, %v17698_v23 }
 0xa58   : > { %20284 = vmatmul.mubr.msk.bf16.gmra.mrb[68].mxu1 %vm354_vm1, %v25457_v25  ;;  %v25899_v25 = vld [vmem:[#allocation4 + $0xe0] sm:$0xff] }
 0xa59   : > { %20287 = vmatprep.mubr.msk.bf16.mxu1 %vm354_vm1, %v25461_v21  ;;  %v25903_v21 = vld [vmem:[#allocation4 + $0xe8] sm:$0xff] }
 0xa60   : > { %20288 = vmatmul.mubr.msk.bf16.gmra.mrb[72].mxu1 %vm354_vm1, %v25465_v0  ;;  %v25907_v0 = vld [vmem:[#allocation4 + $0xf0] sm:$0xff] }
 0xa61   : > { %20291 = vmatprep.mubr.msk.bf16.mxu1 %vm354_vm1, %v25556_v37  ;;  %v25911_v37 = vld [vmem:[#allocation4 + $0xf8] sm:$0xff]  ;;  %v15531_v57 = vshll.u32 %v25907_v0, 16 }
 0xa68   : > { %20292 = vmatmul.mubr.msk.bf16.gmra.mrb[76].mxu1 %vm354_vm1, %v25565_v62  ;;  %v25919_v62 = vld [vmem:[#allocation4 + $0x110] sm:$0xff] }
 0xa69   : > { %20295 = vmatprep.mubr.msk.bf16.mxu1 %vm354_vm1, %v25574_v27  ;;  %v25923_v27 = vld [vmem:[#allocation4 + $0x118] sm:$0xff] }
 0xa70   : > { %20296 = vmatmul.mubr.msk.bf16.gmra.mrb[80].mxu1 %vm354_vm1, %v25583_v50  ;;  %v16169_v50 = vsel %vm1015_vm0, %v17698_v23, 0  ;;  %v15465_v23 = vor.u32 %v15463_v2, %v15461_v17 }
 0xa71   : > { %20299 = vmatprep.mubr.msk.bf16.mxu1 %vm354_vm1, %v25592_v13  ;;  %v26471_v13 = vld [vmem:[#allocation58_spill] sm:$0xff] }
 0xa78   : > { %20300 = vmatmul.mubr.msk.bf16.gmra.mrb[84].mxu1 %vm354_vm1, %v25601_v45  ;;  %v26472_v45 = vld [vmem:[#allocation59_spill] sm:$0xff] }
 0xa79   : > { %20303 = vmatprep.mubr.msk.bf16.mxu1 %vm354_vm1, %v25610_v47  ;;  %v15435_v47 = vshll.u32 %v25859_v42, 16 }
 0xa80   : > { %20304 = vmatmul.mubr.msk.bf16.gmra.mrb[88].mxu1 %vm354_vm1, %v25619_v55  ;;  %v15437_v55 = vrot.slane %v15435_v47, 1  ;;  %v15499_v47 = vshll.u32 %v25891_v38, 16 }
 0xa81   : > { %20307 = vmatprep.mubr.msk.bf16.mxu1 %vm354_vm1, %v25859_v42 }
 0xa82   : > { %v15441_v59 = vor.u32 %v15439_v26, %v15437_v55  ;;  %v15438_v31 = vsel %vm1731_vm4, %v25642_v11, %v15437_v55 }
 0xa88   : > { %20308 = vmatmul.mubr.msk.bf16.gmra.mrb[92].mxu1 %vm354_vm1, %v25863_v40 }
 0xa89   : > { %20311 = vmatprep.mubr.msk.bf16.mxu1 %vm354_vm1, %v25867_v43 }
 0xa90   : > { %20312 = vmatmul.mubr.msk.bf16.gmra.mrb[96].mxu1 %vm354_vm1, %v25871_v54 }
 0xa91   : > { %20315 = vmatprep.mubr.msk.bf16.mxu1 %vm354_vm1, %v25875_v15 }
 0xa98   : > { %20316 = vmatmul.mubr.msk.bf16.gmra.mrb[100].mxu1 %vm354_vm1, %v25879_v33 }
 0xa99   : > { %20319 = vmatprep.mubr.msk.bf16.mxu1 %vm354_vm1, %v25883_v34 }
 0xaa0   : > { %20320 = vmatmul.mubr.msk.bf16.gmra.mrb[104].mxu1 %vm354_vm1, %v25887_v22 }
 0xaa1   : > { %20323 = vmatprep.mubr.msk.bf16.mxu1 %vm354_vm1, %v25891_v38 }
 0xaa8   : > { %20324 = vmatmul.mubr.msk.bf16.gmra.mrb[108].mxu1 %vm354_vm1, %v25895_v16 }
 0xaa9   : > { %20327 = vmatprep.mubr.msk.bf16.mxu1 %vm354_vm1, %v25899_v25 }
 0xab0   : > { %20328 = vmatmul.mubr.msk.bf16.gmra.mrb[112].mxu1 %vm354_vm1, %v25903_v21 }
 0xab1   : > { %20331 = vmatprep.mubr.msk.bf16.mxu1 %vm354_vm1, %v25907_v0 }
 0xab8   : > { %20332 = vmatmul.mubr.msk.bf16.gmra.mrb[116].mxu1 %vm354_vm1, %v25911_v37 }
 0xab9   : > { %20335 = vmatprep.mubr.msk.bf16.mxu1 %vm354_vm1, %v25511_v32  ;;  %v26469_v32 = vld [vmem:[#allocation56_spill] sm:$0xff] }
 0xac0   : > { %20336 = vmatmul.mubr.msk.bf16.gmra.mrb[120].mxu1 %vm354_vm1, %v25517_v28  ;;  %v26470_v28 = vld [vmem:[#allocation57_spill] sm:$0xff] }
 0xac1   : > { %20339 = vmatprep.mubr.msk.bf16.mxu1 %vm354_vm1, %v25919_v62 }
 0xac8   : > { %20340 = vmatmul.mubr.msk.bf16.gmra.mrb[124].mxu1 %vm354_vm1, %v25923_v27 }
 0xac9   : > { %20345 = vmatprep.mubr.msk.bf16.mxu1 %vm354_vm1, %v25536_v29  ;;  %v26473_v29 = vld [vmem:[#allocation60_spill] sm:$0xff] }
 0xad0   : > { %20346 = vmatmul.mubr.msk.bf16.vlgmr.msra.gmra.mrb[64].mxu1 %vm354_vm1, %v25547_v51  ;;  %v26474_v51 = vld [vmem:[#allocation61_spill] sm:$0xff] }
 0xad1   : > { %20410 = vmatpush3.bf16.msra.mxu1 %v16169_v50  ;;  %20349 = vmatprep.mubr.msk.bf16.mxu1 %vm354_vm1, %v25552_v9  ;;  %v26475_v9 = vld [vmem:[#allocation62_spill] sm:$0xff]  ;;  %v15477_v50 = vrot.slane %v15475_v60, 1 }
 0xad8   : > { %20350 = vmatmul.mubr.msk.bf16.gmra.mrb[68].mxu1 %vm354_vm1, %v26469_v32  ;;  %v15470_v32 = vsel %vm1731_vm4, %v15465_v23, %v15469_v5  ;;  %v15533_v23 = vrot.slane %v15531_v57, 1 }
 0xad9   : > { %20353 = vmatprep.mubr.msk.bf16.mxu1 %vm354_vm1, %v26470_v28  ;;  %v15478_v28 = vsel %vm1731_vm4, %v15473_v14, %v15477_v50 }
 0xae0   : > { %20354 = vmatmul.mubr.msk.bf16.gmra.mrb[72].mxu1 %vm354_vm1, %v26471_v13  ;;  %v15485_v13 = vrot.slane %v15483_v4, 1 }
 0xae1   : > { %20357 = vmatprep.mubr.msk.bf16.mxu1 %vm354_vm1, %v26472_v45  ;;  %v15487_v45 = vshrl.u32 %v25883_v34, 16 }
 0xae8   : > { %20358 = vmatmul.mubr.msk.bf16.gmra.mrb[76].mxu1 %vm354_vm1, %v26473_v29  ;;  %v15491_v29 = vshll.u32 %v25887_v22, 16 }
 0xae9   : > { %20361 = vmatprep.mubr.msk.bf16.mxu1 %vm354_vm1, %v26474_v51  ;;  %v15479_v51 = vshrl.u32 %v25879_v33, 16 }
 0xaea   : > { %v15493_v26 = vrot.slane %v15491_v29, 1 }
 0xaeb   : > { %v15481_v55 = vor.u32 %v15479_v51, %v15477_v50  ;;  %v15535_v50 = vshrl.u32 %v25907_v0, 16 }
 0xaf0   : > { %20362 = vmatmul.mubr.msk.bf16.gmra.mrb[80].mxu1 %vm354_vm1, %v25617_v1  ;;  %v15445_v1 = vrot.slane %v15443_v36, 1  ;;  %v15486_v36 = vsel %vm1731_vm4, %v15481_v55, %v15485_v13 }
 0xaf1   : > { %20365 = vmatprep.mubr.msk.bf16.mxu1 %vm354_vm1, %v26475_v9  ;;  %v15489_v9 = vor.u32 %v15487_v45, %v15485_v13  ;;  %v15537_v13 = vor.u32 %v15535_v50, %v15533_v23  ;;  %v22229_v45 = vld [vmem:[#allocation4 + $0x100] sm:$0xff] }
 0xaf2   : > { %v15446_v6 = vsel %vm1731_vm4, %v15441_v59, %v15445_v1  ;;  %v15449_v52 = vor.u32 %v15447_v18, %v15445_v1  ;;  %v15503_v1 = vshrl.u32 %v25891_v38, 16  ;;  %v15547_v29 = vshll.u32 %v22229_v45, 16 }
 0xaf3   : > { %v15494_v59 = vsel %vm1731_vm4, %v15489_v9, %v15493_v26 }
 0xaf8   : > { %20366 = vmatmul.mubr.msk.bf16.gmra.mrb[84].mxu1 %vm354_vm1, %v25632_v39  ;;  %v15453_v39 = vrot.slane %v15451_v58, 1  ;;  %v15501_v58 = vrot.slane %v15499_v47, 1 }
 0xaf9   : > { %20369 = vmatprep.mubr.msk.bf16.mxu1 %vm354_vm1, %v25637_v12  ;;  %v15455_v12 = vshrl.u32 %v25867_v43, 16 }
 0xafa   : > { %v15454_v11 = vsel %vm1731_vm4, %v15449_v52, %v15453_v39 }
 0xafb   : > { %v15457_v46 = vor.u32 %v15455_v12, %v15453_v39  ;;  %v15505_v39 = vor.u32 %v15503_v1, %v15501_v58  ;;  %v15515_v12 = vshll.u32 %v25899_v25, 16  ;;  %v15543_v1 = vshrl.u32 %v25911_v37, 16 }
 0xafd   : > { %v15462_v56 = vsel %vm1731_vm4, %v15457_v46, %v15461_v17  ;;  %v15517_v52 = vrot.slane %v15515_v12, 1  ;;  %v15519_v17 = vshrl.u32 %v25899_v25, 16 }
 0xaff   : > { %v15521_v5 = vor.u32 %v15519_v17, %v15517_v52 }
 0xb00   : > { %20370 = vmatmul.mubr.msk.bf16.gmra.mrb[88].mxu1 %vm354_vm1, %v15438_v31  ;;  %v15507_v31 = vshll.u32 %v25895_v16, 16 }
 0xb01   : > { %20373 = vmatprep.mubr.msk.bf16.mxu1 %vm354_vm1, %v15446_v6  ;;  %v15495_v6 = vshrl.u32 %v25887_v22, 16 }
 0xb02   : > { %v15509_v18 = vrot.slane %v15507_v31, 1 }
 0xb03   : > { %v15497_v24 = vor.u32 %v15495_v6, %v15493_v26  ;;  %v15549_v26 = vrot.slane %v15547_v29, 1  ;;  %v15563_v6 = vshll.u32 %v25919_v62, 16 }
 0xb04   : > { %v15510_v53 = vsel %vm1731_vm4, %v15505_v39, %v15509_v18 }
 0xb05   : > { %v15502_v46 = vsel %vm1731_vm4, %v15497_v24, %v15501_v58  ;;  %v15567_v24 = vshrl.u32 %v25919_v62, 16 }
 0xb08   : > { %20374 = vmatmul.mubr.msk.bf16.gmra.mrb[92].mxu1 %vm354_vm1, %v15454_v11  ;;  %v15523_v11 = vshll.u32 %v25903_v21, 16 }
 0xb09   : > { %20377 = vmatprep.mubr.msk.bf16.mxu1 %vm354_vm1, %v15462_v56  ;;  %v15511_v56 = vshrl.u32 %v25895_v16, 16 }
 0xb0a   : > { %v15525_v2 = vrot.slane %v15523_v11, 1 }
 0xb0b   : > { %v15513_v60 = vor.u32 %v15511_v56, %v15509_v18  ;;  %v15571_v18 = vshll.u32 %v25923_v27, 16 }
 0xb0c   : > { %v15526_v4 = vsel %vm1731_vm4, %v15521_v5, %v15525_v2  ;;  %v26018_v5 = vld [vmem:[#allocation4 + $0x120] sm:$0x1] }
 0xb0d   : > { %v15518_v14 = vsel %vm1731_vm4, %v15513_v60, %v15517_v52  ;;  %v15565_v52 = vrot.slane %v15563_v6, 1  ;;  %v15573_v56 = vrot.slane %v15571_v18, 1  ;;  %v15575_v60 = vshrl.u32 %v25923_v27, 16 }
 0xb0f   : > { %v15569_v11 = vor.u32 %v15567_v24, %v15565_v52 }
 0xb10   : > { %20378 = vmatmul.mubr.msk.bf16.gmra.mrb[96].mxu1 %vm354_vm1, %v15470_v32  ;;  %v15539_v32 = vshll.u32 %v25911_v37, 16 }
 0xb11   : > { %20381 = vmatprep.mubr.msk.bf16.mxu1 %vm354_vm1, %v15478_v28  ;;  %v15527_v28 = vshrl.u32 %v25903_v21, 16 }
 0xb12   : > { %v15541_v9 = vrot.slane %v15539_v32, 1  ;;  %v15971_v32 = vld [vmem:[#allocation4 + $0x20] sm:$0xfe] }
 0xb13   : > { %v15529_v51 = vor.u32 %v15527_v28, %v15525_v2  ;;  %v15579_v2 = vshll.u32 %v26018_v5, 16  ;;  %v16007_v28 = vrot.slane %v15971_v32, 1 }
 0xb14   : > { %v15542_v55 = vsel %vm1731_vm4, %v15537_v13, %v15541_v9  ;;  %v15545_v39 = vor.u32 %v15543_v1, %v15541_v9 }
 0xb15   : > { %v15534_v47 = vsel %vm1731_vm4, %v15529_v51, %v15533_v23  ;;  %v15577_v23 = vor.u32 %v15575_v60, %v15573_v56  ;;  %v15581_v50 = vrot.slane %v15579_v2, 1  ;;  %v16060_v51 = vrot.slane %v25911_v37, 1 }
 0xb16   : > { %v16066_v37 = vrot.slane %v25919_v62, 1  ;;  %v26118_v62 = vld [vmem:[%s26269_s7] ss:$0 sm:$0xff] }
 0xb17   : > { %v15582_v13 = vsel %vm1731_vm4, %v15577_v23, %v15581_v50 }
 0xb18   : > { %20382 = vmatmul.mubr.msk.bf16.gmra.mrb[100].mxu1 %vm354_vm1, %v15486_v36  ;;  %v15551_v36 = vshrl.u32 %v22229_v45, 16  ;;  %v16009_v45 = vsel %vm3227_vm2, %v16007_v28, %v25695_v49  ;;  %v16034_v49 = vrot.slane %v25859_v42, 1 }
 0xb19   : > { %20385 = vmatprep.mubr.msk.bf16.mxu1 %vm354_vm1, %v15494_v59  ;;  %v22230_v59 = vld [vmem:[#allocation4 + $0x108] sm:$0xff] }
 0xb1a   : > { %v15555_v58 = vshll.u32 %v22230_v59, 16  ;;  %v15553_v31 = vor.u32 %v15551_v36, %v15549_v26  ;;  %v15559_v17 = vshrl.u32 %v22230_v59, 16  ;;  %v26479_v59 = vld [vmem:[#allocation54_spill] sm:$0xff] }
 0xb1c   : > { %v15557_v12 = vrot.slane %v15555_v58, 1  ;;  %v26480_v58 = vrot.slane %v26479_v59, 1 }
 0xb1e   : > { %v15561_v57 = vor.u32 %v15559_v17, %v15557_v12  ;;  %v16067_v1 = vsel %vm3227_vm2, %v26480_v58, %v16066_v37 }
 0xb20   : > { %20386 = vmatmul.mubr.msk.bf16.gmra.mrb[104].mxu1 %vm354_vm1, %v15502_v46  ;;  %v15550_v46 = vsel %vm1731_vm4, %v15545_v39, %v15549_v26  ;;  %v26478_v26 = vld [vmem:[#allocation55_spill] sm:$0xff] }
 0xb21   : > { %20389 = vmatprep.mubr.msk.bf16.mxu1 %vm354_vm1, %v15510_v53  ;;  %v15558_v53 = vsel %vm1731_vm4, %v15553_v31, %v15557_v12  ;;  %v16070_v31 = vrot.slane %v26018_v5, 1  ;;  %v26123_v12 = vld [vmem:[%s26270_s8] ss:$0 sm:$0xff] }
 0xb28   : > { %20390 = vmatmul.mubr.msk.bf16.gmra.mrb[108].mxu1 %vm354_vm1, %v15518_v14  ;;  %v15574_v14 = vsel %vm1731_vm4, %v15569_v11, %v15573_v56 }
 0xb29   : > { %20393 = vmatprep.mubr.msk.bf16.mxu1 %vm354_vm1, %v15526_v4  ;;  %v15566_v4 = vsel %vm1731_vm4, %v15561_v57, %v15565_v52 }
 0xb30   : > { %20394 = vmatmul.mubr.msk.bf16.gmra.mrb[112].mxu1 %vm354_vm1, %v15534_v47 }
 0xb31   : > { %20397 = vmatprep.mubr.msk.bf16.mxu1 %vm354_vm1, %v15542_v55 }
 0xb38   : > { %20398 = vmatmul.mubr.msk.bf16.gmra.mrb[116].mxu1 %vm354_vm1, %v15550_v46 }
 0xb39   : > { %20401 = vmatprep.mubr.msk.bf16.mxu1 %vm354_vm1, %v15558_v53 }
 0xb40   : > { %20402 = vmatmul.mubr.msk.bf16.gmra.mrb[120].mxu1 %vm354_vm1, %v15566_v4 }
 0xb41   : > { %20405 = vmatprep.mubr.msk.bf16.mxu1 %vm354_vm1, %v15574_v14 }
 0xb48   : > { %20406 = vmatmul.mubr.msk.bf16.gmra.mrb[124].mxu1 %vm354_vm1, %v15582_v13 }
 0xb49   : > { %20411 = vmatprep.mubr.msk.bf16.mxu1 %vm354_vm1, %v16009_v45 }
 0xb50   : > { %20412 = vmatmul.mubr.msk.bf16.vlgmr.msra.gmra.mrb[64].mxu1 %vm354_vm1, %v25713_v61  ;;  %v16036_v61 = vrot.slane %v25863_v40, 1 }
 0xb51   : > { %20415 = vmatprep.mubr.msk.bf16.mxu1 %vm354_vm1, %v25718_v19  ;;  %v16035_v19 = vsel %vm3227_vm2, %v25772_v30, %v16034_v49 }
 0xb58   : > { %20416 = vmatmul.mubr.msk.bf16.gmra.mrb[68].mxu1 %vm354_vm1, %v25725_v48  ;;  %v16037_v48 = vsel %vm3227_vm2, %v16034_v49, %v16036_v61 }
 0xb59   : > { %20419 = vmatprep.mubr.msk.bf16.mxu1 %vm354_vm1, %v25730_v63  ;;  %v16038_v63 = vrot.slane %v25867_v43, 1  ;;  %v16050_v43 = vrot.slane %v25891_v38, 1 }
 0xb60   : > { %20420 = vmatmul.mubr.msk.bf16.gmra.mrb[72].mxu1 %vm354_vm1, %v25737_v44  ;;  %v16040_v44 = vrot.slane %v25871_v54, 1  ;;  %v16052_v54 = vrot.slane %v25895_v16, 1  ;;  %v16058_v16 = vrot.slane %v25907_v0, 1  ;;  %v16068_v0 = vrot.slane %v25923_v27, 1 }
 0xb61   : > { %20423 = vmatprep.mubr.msk.bf16.mxu1 %vm354_vm1, %v25742_v35  ;;  %v16039_v35 = vsel %vm3227_vm2, %v16036_v61, %v16038_v63 }
 0xb62   : > { %v16069_v36 = vsel %vm3227_vm2, %v16066_v37, %v16068_v0  ;;  %v16071_v6 = vsel %vm3227_vm2, %v16068_v0, %v16070_v31 }
 0xb68   : > { %20424 = vmatmul.mubr.msk.bf16.gmra.mrb[76].mxu1 %vm354_vm1, %v25749_v8  ;;  %v16041_v8 = vsel %vm3227_vm2, %v16038_v63, %v16040_v44 }
 0xb69   : > { %20427 = vmatprep.mubr.msk.bf16.mxu1 %vm354_vm1, %v25754_v3  ;;  %v16042_v3 = vrot.slane %v25875_v15, 1 }
 0xb70   : > { %20428 = vmatmul.mubr.msk.bf16.gmra.mrb[80].mxu1 %vm354_vm1, %v25761_v41  ;;  %v16044_v41 = vrot.slane %v25879_v33, 1  ;;  %v16053_v33 = vsel %vm3227_vm2, %v16050_v43, %v16052_v54 }
 0xb71   : > { %20431 = vmatprep.mubr.msk.bf16.mxu1 %vm354_vm1, %v25766_v7  ;;  %v16043_v7 = vsel %vm3227_vm2, %v16040_v44, %v16042_v3 }
 0xb72   : > { %v16045_v30 = vsel %vm3227_vm2, %v16042_v3, %v16044_v41 }
 0xb78   : > { %20432 = vmatmul.mubr.msk.bf16.gmra.mrb[84].mxu1 %vm354_vm1, %v25775_v10  ;;  %v16046_v10 = vrot.slane %v25883_v34, 1  ;;  %v16054_v34 = vrot.slane %v25899_v25, 1  ;;  %v16061_v25 = vsel %vm3227_vm2, %v16058_v16, %v16060_v51 }
 0xb79   : > { %20435 = vmatprep.mubr.msk.bf16.mxu1 %vm354_vm1, %v25781_v20  ;;  %v16048_v20 = vrot.slane %v25887_v22, 1  ;;  %v16056_v22 = vrot.slane %v25903_v21, 1  ;;  %v26476_v21 = vld [vmem:[#allocation53_spill] sm:$0xff] }
 0xb7a   : > { %v16047_v42 = vsel %vm3227_vm2, %v16044_v41, %v16046_v10  ;;  %v16055_v29 = vsel %vm3227_vm2, %v16052_v54, %v16054_v34  ;;  %v26477_v47 = vrot.slane %v26476_v21, 1 }
 0xb7b   : > { %v16049_v40 = vsel %vm3227_vm2, %v16046_v10, %v16048_v20  ;;  %v16051_v15 = vsel %vm3227_vm2, %v16048_v20, %v16050_v43  ;;  %v16057_v38 = vsel %vm3227_vm2, %v16054_v34, %v16056_v22  ;;  %v16059_v9 = vsel %vm3227_vm2, %v16056_v22, %v16058_v16 }
 0xb7c   : > { %v16063_v55 = vsel %vm3227_vm2, %v16060_v51, %v26477_v47 }
 0xb80   : > { %20436 = vmatmul.mubr.msk.bf16.gmra.mrb[88].mxu1 %vm354_vm1, %v16035_v19 }
 0xb81   : > { %20439 = vmatprep.mubr.msk.bf16.mxu1 %vm354_vm1, %v16037_v48 }
 0xb88   : > { %20440 = vmatmul.mubr.msk.bf16.gmra.mrb[92].mxu1 %vm354_vm1, %v16039_v35 }
 0xb89   : > { %20443 = vmatprep.mubr.msk.bf16.mxu1 %vm354_vm1, %v16041_v8 }
 0xb90   : > { %20444 = vmatmul.mubr.msk.bf16.gmra.mrb[96].mxu1 %vm354_vm1, %v16043_v7 }
 0xb91   : > { %20447 = vmatprep.mubr.msk.bf16.mxu1 %vm354_vm1, %v16045_v30 }
 0xb98   : > { %20448 = vmatmul.mubr.msk.bf16.gmra.mrb[100].mxu1 %vm354_vm1, %v16047_v42 }
 0xb99   : > { %20451 = vmatprep.mubr.msk.bf16.mxu1 %vm354_vm1, %v16049_v40 }
 0xba0   : > { %20452 = vmatmul.mubr.msk.bf16.gmra.mrb[104].mxu1 %vm354_vm1, %v16051_v15 }
 0xba1   : > { %20455 = vmatprep.mubr.msk.bf16.mxu1 %vm354_vm1, %v16053_v33 }
 0xba8   : > { %20456 = vmatmul.mubr.msk.bf16.gmra.mrb[108].mxu1 %vm354_vm1, %v16055_v29 }
 0xba9   : > { %20459 = vmatprep.mubr.msk.bf16.mxu1 %vm354_vm1, %v16057_v38 }
 0xbb0   : > { %20460 = vmatmul.mubr.msk.bf16.gmra.mrb[112].mxu1 %vm354_vm1, %v16059_v9 }
 0xbb1   : > { %20463 = vmatprep.mubr.msk.bf16.mxu1 %vm354_vm1, %v16061_v25 }
 0xbb8   : > { %20464 = vmatmul.mubr.msk.bf16.gmra.mrb[116].mxu1 %vm354_vm1, %v16063_v55 }
 0xbb9   : > { %20467 = vmatprep.mubr.msk.bf16.mxu1 %vm354_vm1, %v26478_v26 }
 0xbc0   : > { %20468 = vmatmul.mubr.msk.bf16.gmra.mrb[120].mxu1 %vm354_vm1, %v16067_v1 }
 0xbc1   : > { %20471 = vmatprep.mubr.msk.bf16.mxu1 %vm354_vm1, %v16069_v36 }
 0xbc8   : > { %20472 = vmatmul.mubr.msk.bf16.gmra.mrb[124].mxu1 %vm354_vm1, %v16071_v6 }
 0xc23   : > { %v20413_v27 = vpop.f32.mrb[64].mxu1 }
 0xc24   : > { %v16205_v39 = vpop.f32.mrb[65].mxu1 }
 0xc25   : > { %v16467_v24 = vmul.f32 %v26118_v62, %v16205_v39  ;;  %v20414_v18 = vpop.f32.mrb[66].mxu1 }
 0xc26   : > { %v16208_v46 = vpop.f32.mrb[67].mxu1 }
 0xc27   : > { %v16506_v53 = vadd.f32 %v26123_v12, %v16467_v24  ;;  %v16468_v52 = vmul.f32 %v26118_v62, %v16208_v46 }
 0xc29   : > { %v16538_v17 = vmax.f32 %v16506_v53, 0.0  ;;  %v16507_v11 = vadd.f32 %v26123_v12, %v16468_v52 }
 0xc2b   : > { %v17770_v56 = vpack.c.bf16 %v16538_v17, %v16538_v17  ;;  %v16539_v5 = vmax.f32 %v16507_v11, 0.0  ;;  %v20417_v57 = vpop.f32.mrb[68].mxu1 }
 0xc2c   : > { %v16219_v60 = vpop.f32.mrb[69].mxu1 }
 0xc2d   : > { %16699 = vst.msk [vmem:[%s26133_s11] sm:$0xf] %vm16698_vm7, %v17770_v56  ;;  %v17771_v2 = vpack.c.bf16 %v16539_v5, %v16539_v5  ;;  %v16469_v14 = vmul.f32 %v26118_v62, %v16219_v60  ;;  %v20418_v4 = vpop.f32.mrb[70].mxu1 }
 0xc2e   : > { %v16222_v23 = vpop.f32.mrb[71].mxu1 }
 0xc2f   : > { %16700 = vst.msk [vmem:[%s26133_s11 + $0x4] sm:$0xf] %vm16698_vm7, %v17771_v2  ;;  %v16508_v50 = vadd.f32 %v26123_v12, %v16469_v14  ;;  %v16470_v32 = vmul.f32 %v26118_v62, %v16222_v23 }
 0xc31   : > { %v16540_v28 = vmax.f32 %v16508_v50, 0.0  ;;  %v16509_v13 = vadd.f32 %v26123_v12, %v16470_v32 }
 0xc33   : > { %v17772_v45 = vpack.c.bf16 %v16540_v28, %v16540_v28  ;;  %v16541_v49 = vmax.f32 %v16509_v13, 0.0  ;;  %v20421_v61 = vpop.f32.mrb[72].mxu1 }
 0xc34   : > { %v16233_v19 = vpop.f32.mrb[73].mxu1 }
 0xc35   : > { %16701 = vst.msk [vmem:[%s26133_s11 + $0x8] sm:$0xf] %vm16698_vm7, %v17772_v45  ;;  %v17773_v48 = vpack.c.bf16 %v16541_v49, %v16541_v49  ;;  %v16471_v63 = vmul.f32 %v26118_v62, %v16233_v19  ;;  %v20422_v44 = vpop.f32.mrb[74].mxu1 }
 0xc36   : > { %v16236_v35 = vpop.f32.mrb[75].mxu1 }
 0xc37   : > { %16702 = vst.msk [vmem:[%s26133_s11 + $0xc] sm:$0xf] %vm16698_vm7, %v17773_v48  ;;  %v16510_v8 = vadd.f32 %v26123_v12, %v16471_v63  ;;  %v16472_v3 = vmul.f32 %v26118_v62, %v16236_v35 }
 0xc39   : > { %v16542_v41 = vmax.f32 %v16510_v8, 0.0  ;;  %v16511_v7 = vadd.f32 %v26123_v12, %v16472_v3 }
 0xc3b   : > { %v17774_v30 = vpack.c.bf16 %v16542_v41, %v16542_v41  ;;  %v16543_v10 = vmax.f32 %v16511_v7, 0.0  ;;  %v20425_v20 = vpop.f32.mrb[76].mxu1 }
 0xc3c   : > { %v16247_v42 = vpop.f32.mrb[77].mxu1 }
 0xc3d   : > { %16703 = vst.msk [vmem:[%s26133_s11 + $0x10] sm:$0xf] %vm16698_vm7, %v17774_v30  ;;  %v17775_v40 = vpack.c.bf16 %v16543_v10, %v16543_v10  ;;  %v16473_v43 = vmul.f32 %v26118_v62, %v16247_v42  ;;  %v20426_v54 = vpop.f32.mrb[78].mxu1 }
 0xc3e   : > { %v16250_v15 = vpop.f32.mrb[79].mxu1 }
 0xc3f   : > { %16704 = vst.msk [vmem:[%s26133_s11 + $0x14] sm:$0xf] %vm16698_vm7, %v17775_v40  ;;  %v16512_v33 = vadd.f32 %v26123_v12, %v16473_v43  ;;  %v16474_v34 = vmul.f32 %v26118_v62, %v16250_v15 }
 0xc41   : > { %v16544_v22 = vmax.f32 %v16512_v33, 0.0  ;;  %v16513_v29 = vadd.f32 %v26123_v12, %v16474_v34 }
 0xc43   : > { %v17776_v38 = vpack.c.bf16 %v16544_v22, %v16544_v22  ;;  %v16545_v16 = vmax.f32 %v16513_v29, 0.0  ;;  %v20429_v51 = vpop.f32.mrb[80].mxu1 }
 0xc44   : > { %v16261_v9 = vpop.f32.mrb[81].mxu1 }
 0xc45   : > { %16705 = vst.msk [vmem:[%s26133_s11 + $0x18] sm:$0xf] %vm16698_vm7, %v17776_v38  ;;  %v17777_v25 = vpack.c.bf16 %v16545_v16, %v16545_v16  ;;  %v16475_v21 = vmul.f32 %v26118_v62, %v16261_v9  ;;  %v20430_v47 = vpop.f32.mrb[82].mxu1 }
 0xc46   : > { %v16264_v55 = vpop.f32.mrb[83].mxu1 }
 0xc47   : > { %16706 = vst.msk [vmem:[%s26133_s11 + $0x1c] sm:$0xf] %vm16698_vm7, %v17777_v25  ;;  %v16514_v26 = vadd.f32 %v26123_v12, %v16475_v21  ;;  %v16476_v0 = vmul.f32 %v26118_v62, %v16264_v55 }
 0xc49   : > { %v16546_v37 = vmax.f32 %v16514_v26, 0.0  ;;  %v16515_v36 = vadd.f32 %v26123_v12, %v16476_v0 }
 0xc4b   : > { %v17778_v59 = vpack.c.bf16 %v16546_v37, %v16546_v37  ;;  %v16547_v58 = vmax.f32 %v16515_v36, 0.0  ;;  %v20433_v1 = vpop.f32.mrb[84].mxu1 }
 0xc4c   : > { %v16275_v31 = vpop.f32.mrb[85].mxu1 }
 0xc4d   : > { %16707 = vst.msk [vmem:[%s26133_s11 + $0x20] sm:$0xf] %vm16698_vm7, %v17778_v59  ;;  %v17779_v6 = vpack.c.bf16 %v16547_v58, %v16547_v58  ;;  %v16477_v27 = vmul.f32 %v26118_v62, %v16275_v31  ;;  %v20434_v39 = vpop.f32.mrb[86].mxu1 }
 0xc4e   : > { %v16278_v24 = vpop.f32.mrb[87].mxu1 }
 0xc4f   : > { %16708 = vst.msk [vmem:[%s26133_s11 + $0x24] sm:$0xf] %vm16698_vm7, %v17779_v6  ;;  %v16516_v18 = vadd.f32 %v26123_v12, %v16477_v27  ;;  %v16478_v46 = vmul.f32 %v26118_v62, %v16278_v24 }
 0xc51   : > { %v16548_v53 = vmax.f32 %v16516_v18, 0.0  ;;  %v16517_v52 = vadd.f32 %v26123_v12, %v16478_v46 }
 0xc53   : > { %v17780_v17 = vpack.c.bf16 %v16548_v53, %v16548_v53  ;;  %v16549_v11 = vmax.f32 %v16517_v52, 0.0  ;;  %v20437_v56 = vpop.f32.mrb[88].mxu1 }
 0xc54   : > { %v16289_v5 = vpop.f32.mrb[89].mxu1 }
 0xc55   : > { %16709 = vst.msk [vmem:[%s26133_s11 + $0x28] sm:$0xf] %vm16698_vm7, %v17780_v17  ;;  %v17781_v57 = vpack.c.bf16 %v16549_v11, %v16549_v11  ;;  %v16479_v60 = vmul.f32 %v26118_v62, %v16289_v5  ;;  %v20438_v2 = vpop.f32.mrb[90].mxu1 }
 0xc56   : > { %v16292_v14 = vpop.f32.mrb[91].mxu1 }
 0xc57   : > { %16710 = vst.msk [vmem:[%s26133_s11 + $0x2c] sm:$0xf] %vm16698_vm7, %v17781_v57  ;;  %v16518_v4 = vadd.f32 %v26123_v12, %v16479_v60  ;;  %v16480_v23 = vmul.f32 %v26118_v62, %v16292_v14 }
 0xc59   : > { %v16550_v50 = vmax.f32 %v16518_v4, 0.0  ;;  %v16519_v32 = vadd.f32 %v26123_v12, %v16480_v23 }
 0xc5b   : > { %v17782_v28 = vpack.c.bf16 %v16550_v50, %v16550_v50  ;;  %v16551_v13 = vmax.f32 %v16519_v32, 0.0  ;;  %v20441_v45 = vpop.f32.mrb[92].mxu1 }
 0xc5c   : > { %v16303_v49 = vpop.f32.mrb[93].mxu1 }
 0xc5d   : > { %16711 = vst.msk [vmem:[%s26133_s11 + $0x30] sm:$0xf] %vm16698_vm7, %v17782_v28  ;;  %v17783_v61 = vpack.c.bf16 %v16551_v13, %v16551_v13  ;;  %v16481_v19 = vmul.f32 %v26118_v62, %v16303_v49  ;;  %v20442_v48 = vpop.f32.mrb[94].mxu1 }
 0xc5e   : > { %v16306_v63 = vpop.f32.mrb[95].mxu1 }
 0xc5f   : > { %16712 = vst.msk [vmem:[%s26133_s11 + $0x34] sm:$0xf] %vm16698_vm7, %v17783_v61  ;;  %v16520_v44 = vadd.f32 %v26123_v12, %v16481_v19  ;;  %v16482_v35 = vmul.f32 %v26118_v62, %v16306_v63 }
 0xc61   : > { %v16552_v8 = vmax.f32 %v16520_v44, 0.0  ;;  %v16521_v3 = vadd.f32 %v26123_v12, %v16482_v35 }
 0xc63   : > { %v17784_v41 = vpack.c.bf16 %v16552_v8, %v16552_v8  ;;  %v16553_v7 = vmax.f32 %v16521_v3, 0.0  ;;  %v20445_v30 = vpop.f32.mrb[96].mxu1 }
 0xc64   : > { %v16317_v10 = vpop.f32.mrb[97].mxu1 }
 0xc65   : > { %16713 = vst.msk [vmem:[%s26133_s11 + $0x38] sm:$0xf] %vm16698_vm7, %v17784_v41  ;;  %v17785_v20 = vpack.c.bf16 %v16553_v7, %v16553_v7  ;;  %v16483_v42 = vmul.f32 %v26118_v62, %v16317_v10  ;;  %v20446_v40 = vpop.f32.mrb[98].mxu1 }
 0xc66   : > { %v16320_v43 = vpop.f32.mrb[99].mxu1 }
 0xc67   : > { %16714 = vst.msk [vmem:[%s26133_s11 + $0x3c] sm:$0xf] %vm16698_vm7, %v17785_v20  ;;  %v16522_v54 = vadd.f32 %v26123_v12, %v16483_v42  ;;  %v16484_v15 = vmul.f32 %v26118_v62, %v16320_v43 }
 0xc69   : > { %v16554_v33 = vmax.f32 %v16522_v54, 0.0  ;;  %v16523_v34 = vadd.f32 %v26123_v12, %v16484_v15 }
 0xc6b   : > { %v17786_v22 = vpack.c.bf16 %v16554_v33, %v16554_v33  ;;  %v16555_v29 = vmax.f32 %v16523_v34, 0.0  ;;  %v20449_v38 = vpop.f32.mrb[100].mxu1 }
 0xc6c   : > { %v16331_v16 = vpop.f32.mrb[101].mxu1 }
 0xc6d   : > { %16715 = vst.msk [vmem:[%s26133_s11 + $0x40] sm:$0xf] %vm16698_vm7, %v17786_v22  ;;  %v17787_v51 = vpack.c.bf16 %v16555_v29, %v16555_v29  ;;  %v16485_v9 = vmul.f32 %v26118_v62, %v16331_v16  ;;  %v20450_v25 = vpop.f32.mrb[102].mxu1 }
 0xc6e   : > { %v16334_v21 = vpop.f32.mrb[103].mxu1 }
 0xc6f   : > { %16716 = vst.msk [vmem:[%s26133_s11 + $0x44] sm:$0xf] %vm16698_vm7, %v17787_v51  ;;  %v16524_v47 = vadd.f32 %v26123_v12, %v16485_v9  ;;  %v16486_v55 = vmul.f32 %v26118_v62, %v16334_v21 }
 0xc71   : > { %v16556_v26 = vmax.f32 %v16524_v47, 0.0  ;;  %v16525_v0 = vadd.f32 %v26123_v12, %v16486_v55 }
 0xc73   : > { %v17788_v37 = vpack.c.bf16 %v16556_v26, %v16556_v26  ;;  %v16557_v36 = vmax.f32 %v16525_v0, 0.0  ;;  %v20453_v59 = vpop.f32.mrb[104].mxu1 }
 0xc74   : > { %v16345_v58 = vpop.f32.mrb[105].mxu1 }
 0xc75   : > { %16717 = vst.msk [vmem:[%s26133_s11 + $0x48] sm:$0xf] %vm16698_vm7, %v17788_v37  ;;  %v17789_v1 = vpack.c.bf16 %v16557_v36, %v16557_v36  ;;  %v16487_v31 = vmul.f32 %v26118_v62, %v16345_v58  ;;  %v20454_v6 = vpop.f32.mrb[106].mxu1 }
 0xc76   : > { %v16348_v27 = vpop.f32.mrb[107].mxu1 }
 0xc77   : > { %16718 = vst.msk [vmem:[%s26133_s11 + $0x4c] sm:$0xf] %vm16698_vm7, %v17789_v1  ;;  %v16526_v39 = vadd.f32 %v26123_v12, %v16487_v31  ;;  %v16488_v24 = vmul.f32 %v26118_v62, %v16348_v27 }
 0xc79   : > { %v16558_v18 = vmax.f32 %v16526_v39, 0.0  ;;  %v16527_v46 = vadd.f32 %v26123_v12, %v16488_v24 }
 0xc7b   : > { %v17790_v53 = vpack.c.bf16 %v16558_v18, %v16558_v18  ;;  %v16559_v52 = vmax.f32 %v16527_v46, 0.0  ;;  %v20457_v17 = vpop.f32.mrb[108].mxu1 }
 0xc7c   : > { %v16359_v11 = vpop.f32.mrb[109].mxu1 }
 0xc7d   : > { %16719 = vst.msk [vmem:[%s26133_s11 + $0x50] sm:$0xf] %vm16698_vm7, %v17790_v53  ;;  %v17791_v56 = vpack.c.bf16 %v16559_v52, %v16559_v52  ;;  %v16489_v5 = vmul.f32 %v26118_v62, %v16359_v11  ;;  %v20458_v57 = vpop.f32.mrb[110].mxu1 }
 0xc7e   : > { %v16362_v60 = vpop.f32.mrb[111].mxu1 }
 0xc7f   : > { %16720 = vst.msk [vmem:[%s26133_s11 + $0x54] sm:$0xf] %vm16698_vm7, %v17791_v56  ;;  %v16528_v2 = vadd.f32 %v26123_v12, %v16489_v5  ;;  %v16490_v14 = vmul.f32 %v26118_v62, %v16362_v60 }
 0xc81   : > { %v16560_v4 = vmax.f32 %v16528_v2, 0.0  ;;  %v16529_v23 = vadd.f32 %v26123_v12, %v16490_v14 }
 0xc83   : > { %v17792_v50 = vpack.c.bf16 %v16560_v4, %v16560_v4  ;;  %v16561_v32 = vmax.f32 %v16529_v23, 0.0  ;;  %v20461_v28 = vpop.f32.mrb[112].mxu1 }
 0xc84   : > { %v16373_v13 = vpop.f32.mrb[113].mxu1 }
 0xc85   : > { %16721 = vst.msk [vmem:[%s26133_s11 + $0x58] sm:$0xf] %vm16698_vm7, %v17792_v50  ;;  %v17793_v45 = vpack.c.bf16 %v16561_v32, %v16561_v32  ;;  %v16491_v49 = vmul.f32 %v26118_v62, %v16373_v13  ;;  %v20462_v61 = vpop.f32.mrb[114].mxu1 }
 0xc86   : > { %v16376_v19 = vpop.f32.mrb[115].mxu1 }
 0xc87   : > { %16722 = vst.msk [vmem:[%s26133_s11 + $0x5c] sm:$0xf] %vm16698_vm7, %v17793_v45  ;;  %v16530_v48 = vadd.f32 %v26123_v12, %v16491_v49  ;;  %v16492_v63 = vmul.f32 %v26118_v62, %v16376_v19 }
 0xc89   : > { %v16562_v44 = vmax.f32 %v16530_v48, 0.0  ;;  %v16531_v35 = vadd.f32 %v26123_v12, %v16492_v63 }
 0xc8b   : > { %v17794_v8 = vpack.c.bf16 %v16562_v44, %v16562_v44  ;;  %v16563_v3 = vmax.f32 %v16531_v35, 0.0  ;;  %v20465_v41 = vpop.f32.mrb[116].mxu1 }
 0xc8c   : > { %v16387_v7 = vpop.f32.mrb[117].mxu1 }
 0xc8d   : > { %16723 = vst.msk [vmem:[%s26133_s11 + $0x60] sm:$0xf] %vm16698_vm7, %v17794_v8  ;;  %v17795_v30 = vpack.c.bf16 %v16563_v3, %v16563_v3  ;;  %v16493_v10 = vmul.f32 %v26118_v62, %v16387_v7  ;;  %v20466_v20 = vpop.f32.mrb[118].mxu1 }
 0xc8e   : > { %v16390_v42 = vpop.f32.mrb[119].mxu1 }
 0xc8f   : > { %16724 = vst.msk [vmem:[%s26133_s11 + $0x64] sm:$0xf] %vm16698_vm7, %v17795_v30  ;;  %v16532_v40 = vadd.f32 %v26123_v12, %v16493_v10  ;;  %v16494_v43 = vmul.f32 %v26118_v62, %v16390_v42 }
 0xc91   : > { %v16564_v54 = vmax.f32 %v16532_v40, 0.0  ;;  %v16533_v15 = vadd.f32 %v26123_v12, %v16494_v43 }
 0xc93   : > { %v17796_v33 = vpack.c.bf16 %v16564_v54, %v16564_v54  ;;  %v16565_v34 = vmax.f32 %v16533_v15, 0.0  ;;  %v20469_v22 = vpop.f32.mrb[120].mxu1 }
 0xc94   : > { %v16401_v29 = vpop.f32.mrb[121].mxu1 }
 0xc95   : > { %16725 = vst.msk [vmem:[%s26133_s11 + $0x68] sm:$0xf] %vm16698_vm7, %v17796_v33  ;;  %v17797_v38 = vpack.c.bf16 %v16565_v34, %v16565_v34  ;;  %v16495_v16 = vmul.f32 %v26118_v62, %v16401_v29  ;;  %v20470_v51 = vpop.f32.mrb[122].mxu1 }
 0xc96   : > { %v16404_v9 = vpop.f32.mrb[123].mxu1 }
 0xc97   : > { %16726 = vst.msk [vmem:[%s26133_s11 + $0x6c] sm:$0xf] %vm16698_vm7, %v17797_v38  ;;  %v16534_v25 = vadd.f32 %v26123_v12, %v16495_v16  ;;  %v16496_v21 = vmul.f32 %v26118_v62, %v16404_v9 }
 0xc99   : > { %v16566_v47 = vmax.f32 %v16534_v25, 0.0  ;;  %v16535_v55 = vadd.f32 %v26123_v12, %v16496_v21 }
 0xc9b   : > { %v17798_v26 = vpack.c.bf16 %v16566_v47, %v16566_v47  ;;  %v16567_v0 = vmax.f32 %v16535_v55, 0.0  ;;  %v20473_v37 = vpop.f32.mrb[124].mxu1 }
 0xc9c   : > { %v16415_v36 = vpop.f32.mrb[125].mxu1 }
 0xc9d   : > { %16727 = vst.msk [vmem:[%s26133_s11 + $0x70] sm:$0xf] %vm16698_vm7, %v17798_v26  ;;  %v17799_v59 = vpack.c.bf16 %v16567_v0, %v16567_v0  ;;  %v16497_v58 = vmul.f32 %v26118_v62, %v16415_v36  ;;  %v20474_v1 = vpop.f32.mrb[126].mxu1 }
 0xc9e   : > { %v16418_v31 = vpop.f32.mrb[127].mxu1 }
 0xc9f   : > { %16728 = vst.msk [vmem:[%s26133_s11 + $0x74] sm:$0xf] %vm16698_vm7, %v17799_v59  ;;  %v16536_v6 = vadd.f32 %v26123_v12, %v16497_v58  ;;  %v16498_v27 = vmul.f32 %v26118_v62, %v16418_v31 }
 0xca1   : > { %v16568_v39 = vmax.f32 %v16536_v6, 0.0  ;;  %v16537_v24 = vadd.f32 %v26123_v12, %v16498_v27 }
 0xca3   : > { %v17800_v18 = vpack.c.bf16 %v16568_v39, %v16568_v39  ;;  %v16569_v46 = vmax.f32 %v16537_v24, 0.0 }
 0xca5   : > { %16729 = vst.msk [vmem:[%s26133_s11 + $0x78] sm:$0xf] %vm16698_vm7, %v17800_v18  ;;  %v17801_v53 = vpack.c.bf16 %v16569_v46, %v16569_v46 }
 0xca7   : > { %16730 = vst.msk [vmem:[%s26133_s11 + $0x7c] sm:$0xf] %vm16698_vm7, %v17801_v53 }
 0xca8 PF: > { %s19_s30 = sadd.s32 1, %s22237_s30  }
 0xca9   : > { %p16_p4 = scmp.ge.s32.totalorder %s19_s30, 4  }
 0xcab   :  { %18 = sbr.rel (!%p16_p4) target bundleno = 1 (0x1), region = 113 }

</bundles_post_ra>
